<compile_context>
chip_gen: v7x
topology: tpu7x:2x2x1
jax: 0.10.0
libtpu: 0.0.40
codegen_flags: <defaults>
</compile_context>

<pallas_src>
import numpy as np
import jax
import jax.numpy as jnp
from jax import lax
from jax.experimental import pallas as pl
from jax.experimental.pallas import tpu as pltpu

# ----------------------- configuration (small shapes) -----------------------
IMAGE_WIDTH = 16          # SIREN output image width/height
HIDDEN = 32               # hidden_size
NUM_LAYERS = 8            # num_layers (SIREN layers before the final linear)
DIM_IN = 2
DIM_OUT = 3
INPUT_RES = 8             # clip input resolution (cutouts resized to this)
BATCH_SIZE = 2            # number of cutouts per forward
EMBED_DIM = 32            # synthetic CLIP embedding dim
W0 = 30.0                 # theta_hidden default
W0_INITIAL = 30.0         # theta_initial default
LOSS_COEF = 100.0
AVERAGING_WEIGHT = 0.3
LOWER_BOUND_CUTOUT = 0.1
UPPER_BOUND_CUTOUT = 1.0

CLIP_MEAN = np.array([0.48145466, 0.4578275, 0.40821073], np.float32)
CLIP_STD = np.array([0.26862954, 0.26130258, 0.27577711], np.float32)

IMAGE_N = IMAGE_WIDTH * IMAGE_WIDTH       # 256 pixels -> lane axis (2 x 128)
CUT_PIX = INPUT_RES * INPUT_RES           # 64 pixels per cutout
FEAT = DIM_OUT * CUT_PIX                  # 192 flattened CLIP input features
SEL_COLS = BATCH_SIZE * CUT_PIX           # 128 (lane-full selection output)
EMB_COLS = BATCH_SIZE * EMBED_DIM         # 64 (both cutout embeddings packed)


# ------------------------------ fused Pallas kernel --------------------------
def deep_daze_kernel(coords_ref, w_first_ref, w_hid_ref, b_hid_ref,
                     w_last_ref, sel_ref, enc_blk_ref, enc_b_ref, text_ref,
                     out_ref):
    # -------- SIREN MLP, transposed layout: activations (HIDDEN, N). --------
    # First layer + bias as one tiny-K MXU matmul against [gy; gx; 1] coords.
    # W0_INITIAL / W0 are already folded into the weights & biases host-side.
    h = jnp.sin(jnp.dot(w_first_ref[...], coords_ref[...],
                        preferred_element_type=jnp.float32))       # (H, N)

    def layer(l, h):
        z = (jnp.dot(w_hid_ref[l], h, preferred_element_type=jnp.float32)
             + b_hid_ref[l])                                        # (H, N)
        return jnp.sin(z)

    # Visible (bounded-liveness) loop, fully unrolled for LLO scheduling.
    h = lax.fori_loop(0, NUM_LAYERS - 1, layer, h, unroll=True)

    # Final linear with norm_siren_output affine pre-folded (0.5*W, 0.5*(b+1)).
    rgb = (jnp.dot(w_last_ref[:, :HIDDEN], h,
                   preferred_element_type=jnp.float32)
           + w_last_ref[:, HIDDEN:HIDDEN + 1])                      # (3, N)
    img = jnp.clip(rgb, 0.0, 1.0)
    out_ref[0:DIM_OUT, :] = img                                     # lane-dense

    # -------- cutouts + (folded) CLIP normalize + encode + cosine loss ------
    # One lane-full selection matmul gathers both cutouts: (3, B*CUT_PIX).
    piece_all = jnp.dot(img, sel_ref[...],
                        preferred_element_type=jnp.float32)         # (3, 128)
    # Per-channel block-diagonal encoder (CLIP mean/std already folded in):
    # both cutout embeddings come out packed on lanes as (1, B*EMBED).
    emb_all = enc_b_ref[...]                                        # (1, 64)
    for c in range(DIM_OUT):                                        # 3 dots
        emb_all = emb_all + jnp.dot(piece_all[c:c + 1, :], enc_blk_ref[c],
                                    preferred_element_type=jnp.float32)

    eps = 1e-8
    text = text_ref[...]                                            # (1, E)
    t_norm = jnp.sqrt(jnp.sum(text * text, axis=-1, keepdims=True))

    def cosine(e):
        e_norm = jnp.sqrt(jnp.sum(e * e, axis=-1, keepdims=True))
        return (jnp.sum(text * e, axis=-1, keepdims=True)
                / jnp.maximum(t_norm * e_norm, eps))

    embs = [emb_all[:, b * EMBED_DIM:(b + 1) * EMBED_DIM]
            for b in range(BATCH_SIZE)]
    cos_sum = embs[0] * 0.0
    avg = embs[0] * 0.0
    for e in embs:
        cos_sum = cos_sum + cosine(e)
        avg = avg + e
    avg = avg * (1.0 / BATCH_SIZE)
    cos_sum = jnp.sum(cos_sum[:, 0:1], axis=-1, keepdims=True)      # (1, 1)
    cos_avg = cosine(avg)

    averaged_loss = -LOSS_COEF * cos_avg                            # (1, 1)
    general_loss = -LOSS_COEF * (cos_sum * (1.0 / BATCH_SIZE))
    total = (averaged_loss * AVERAGING_WEIGHT
             + general_loss * (1.0 - AVERAGING_WEIGHT))             # (1, 1)
    # Pack the scalar loss into the spare sublane row of the image output so
    # there is a single writeback and no masked (1,1) store/extra DMA.
    out_ref[DIM_OUT:DIM_OUT + 1, :] = jnp.broadcast_to(total, (1, IMAGE_N))


# ------------------------------ pallas_call glue -----------------------------
def fused_forward_call(inputs):
    vmem = pltpu.MemorySpace.VMEM
    return pl.pallas_call(
        deep_daze_kernel,
        out_shape=jax.ShapeDtypeStruct((DIM_OUT + 1, IMAGE_N), jnp.float32),
        in_specs=[pl.BlockSpec(memory_space=vmem) for _ in inputs],
        out_specs=pl.BlockSpec(memory_space=vmem),
    )(*inputs)


# ------------------------------- parameter init ------------------------------
def siren_uniform(key, shape, dim_in, w0, is_first):
    bound = (1.0 / dim_in) if is_first else (np.sqrt(6.0 / dim_in) / w0)
    return jax.random.uniform(key, shape, jnp.float32, -bound, bound)


def init_params(key):
    (k_fw, k_fb, k_hid, k_lw, k_lb, k_ew, k_eb) = jax.random.split(key, 7)
    w_first = siren_uniform(k_fw, (DIM_IN, HIDDEN), DIM_IN, W0_INITIAL, True)
    b_first = siren_uniform(k_fb, (1, HIDDEN), DIM_IN, W0_INITIAL, True)
    hid_keys = jax.random.split(k_hid, 2 * (NUM_LAYERS - 1))
    w_hid = jnp.stack([siren_uniform(hid_keys[2 * l], (HIDDEN, HIDDEN),
                                     HIDDEN, W0, False)
                       for l in range(NUM_LAYERS - 1)])
    b_hid = jnp.stack([siren_uniform(hid_keys[2 * l + 1], (1, HIDDEN),
                                     HIDDEN, W0, False)
                       for l in range(NUM_LAYERS - 1)])
    w_last = siren_uniform(k_lw, (HIDDEN, DIM_OUT), HIDDEN, W0, False)
    b_last = siren_uniform(k_lb, (1, DIM_OUT), HIDDEN, W0, False)
    # synthetic CLIP image encoder (stand-in for perceptor.encode_image)
    enc_w = 0.02 * jax.random.normal(k_ew, (FEAT, EMBED_DIM), jnp.float32)
    enc_b = 0.02 * jax.random.normal(k_eb, (1, EMBED_DIM), jnp.float32)
    return dict(w_first=w_first, b_first=b_first, w_hid=w_hid, b_hid=b_hid,
                w_last=w_last, b_last=b_last, enc_w=enc_w, enc_b=enc_b)


def to_kernel_layout(params):
    """One-time fold of w0 / norm / CLIP affines into the kernel-layout weights.

    NOTE: in a training loop these folded copies must be regenerated after
    every parameter update (they are derived, not the canonical params).
    """
    inv_std = jnp.asarray(1.0 / CLIP_STD)                        # (3,)
    mean = jnp.asarray(CLIP_MEAN)                                # (3,)
    # first layer packed (HIDDEN, 3): cols = [w_y, w_x, bias], *W0_INITIAL
    w_first = W0_INITIAL * jnp.concatenate(
        [params["w_first"].T, params["b_first"].T], axis=1)      # (H, 3)
    # hidden chain, transposed and pre-scaled by W0
    w_hid = W0 * jnp.swapaxes(params["w_hid"], 1, 2)             # (L-1, H, H)
    b_hid = W0 * jnp.swapaxes(params["b_hid"], 1, 2)             # (L-1, H, 1)
    # last layer with norm_siren_output folded: [0.5*W^T | 0.5*(b^T + 1)]
    w_last_aug = jnp.concatenate(
        [0.5 * params["w_last"].T, 0.5 * (params["b_last"].T + 1.0)],
        axis=1)                                                  # (3, H+1)
    # encoder with CLIP normalize folded, block-diagonal over the B cutouts
    enc_w_r = params["enc_w"].reshape(DIM_OUT, CUT_PIX, EMBED_DIM)
    enc_w_fold = enc_w_r * inv_std[:, None, None]
    enc_blk = jnp.einsum("bd,cpe->cbpde",
                         jnp.eye(BATCH_SIZE, dtype=jnp.float32),
                         enc_w_fold).reshape(DIM_OUT, SEL_COLS, EMB_COLS)
    enc_b_fold = (params["enc_b"]
                  - jnp.einsum("c,cpe->e", mean * inv_std, enc_w_r)[None, :])
    enc_b_tiled = jnp.tile(enc_b_fold, (1, BATCH_SIZE))          # (1, B*E)
    return dict(w_first=w_first, w_hid=w_hid, b_hid=b_hid,
                w_last_aug=w_last_aug, enc_blk=enc_blk, enc_b_tiled=enc_b_tiled)


# ------------------------------ forward wrapper -------------------------------
def build_selection(sizes, off_y, off_x):
    """Shape-static one-hot selection matrix for cutout + nearest resize.

    Columns are [cutout0 pixels | cutout1 pixels] so one matmul gathers both.
    """
    r = jnp.arange(INPUT_RES, dtype=jnp.int32)
    # PyTorch nearest: src = floor(dst * size / res)
    row_idx = off_y[:, None] + (r[None, :] * sizes[:, None]) // INPUT_RES
    col_idx = off_x[:, None] + (r[None, :] * sizes[:, None]) // INPUT_RES
    flat_idx = (row_idx[:, :, None] * IMAGE_WIDTH
                + col_idx[:, None, :]).reshape(BATCH_SIZE * CUT_PIX)  # (128,)
    pix = jnp.arange(IMAGE_N, dtype=jnp.int32)
    return (pix[:, None] == flat_idx[None, :]).astype(jnp.float32)    # (256,128)


@jax.jit
def deep_daze_forward(text_embed, kparams, coords, sizes, off_y, off_x):
    sel2d = build_selection(sizes, off_y, off_x)
    inputs = [coords, kparams["w_first"], kparams["w_hid"], kparams["b_hid"],
              kparams["w_last_aug"], sel2d, kparams["enc_blk"],
              kparams["enc_b_tiled"], text_embed]
    packed = fused_forward_call(inputs)                  # (4, H*W)
    # rows 0..2: (3, H*W) row-major -> (1, 3, H, W); row 3 lane 0: scalar loss
    out = packed[:DIM_OUT].reshape(1, DIM_OUT, IMAGE_WIDTH, IMAGE_WIDTH)
    loss = packed[DIM_OUT, 0]
    return out, loss


# ------------------------------------ main -----------------------------------
if __name__ == "__main__":
    key = jax.random.PRNGKey(0)
    k_params, k_text = jax.random.split(key, 2)

    params = init_params(k_params)
    kparams = to_kernel_layout(params)
    text_embed = jax.random.normal(k_text, (1, EMBED_DIM), jnp.float32)

    # coordinate grid, torch.meshgrid(indexing='ij') convention, flattened to
    # lanes, with a ones row so the first-layer bias rides the same matmul.
    lin = np.linspace(-1.0, 1.0, IMAGE_WIDTH, dtype=np.float32)
    gyy, gxx = np.meshgrid(lin, lin, indexing="ij")
    coords = jnp.asarray(np.stack([gyy.reshape(-1), gxx.reshape(-1),
                                   np.ones(IMAGE_N, np.float32)],
                                  axis=0))                       # (3, H*W)

    # sample_sizes (gauss_sampling=False): randint(lower*width, upper*width)
    host_rng = np.random.default_rng(0)
    lo = int(LOWER_BOUND_CUTOUT * IMAGE_WIDTH)
    hi = int(UPPER_BOUND_CUTOUT * IMAGE_WIDTH)
    sizes_np = host_rng.integers(lo, hi, size=(BATCH_SIZE,))
    # rand_cutout offsets (center_bias=False): uniform over the valid range
    off_y_np = np.array([host_rng.integers(0, IMAGE_WIDTH - int(s) + 1)
                         for s in sizes_np], dtype=np.int32)
    off_x_np = np.array([host_rng.integers(0, IMAGE_WIDTH - int(s) + 1)
                         for s in sizes_np], dtype=np.int32)
    # TODO(synk): gauss_sampling / center_bias / saturate_bound branches are
    # disabled by module defaults; the host RNG sampling itself has no Pallas path.

    out_img, loss = deep_daze_forward(
        text_embed, kparams, coords,
        jnp.asarray(sizes_np, jnp.int32),
        jnp.asarray(off_y_np, jnp.int32),
        jnp.asarray(off_x_np, jnp.int32))
    jax.block_until_ready((out_img, loss))

    assert out_img.shape == (1, DIM_OUT, IMAGE_WIDTH, IMAGE_WIDTH)
    assert loss.shape == ()
    print("KERNEL_OK")
</pallas_src>

<mosaic_0001>
module attributes {stable_mosaic.version = 11 : i64} {
  func.func @deep_daze_kernel(%arg0: memref<3x256xf32, #tpu.memory_space<vmem>>, %arg1: memref<32x3xf32, #tpu.memory_space<vmem>>, %arg2: memref<7x32x32xf32, #tpu.memory_space<vmem>>, %arg3: memref<7x32x1xf32, #tpu.memory_space<vmem>>, %arg4: memref<3x33xf32, #tpu.memory_space<vmem>>, %arg5: memref<256x128xf32, #tpu.memory_space<vmem>>, %arg6: memref<3x128x64xf32, #tpu.memory_space<vmem>>, %arg7: memref<1x64xf32, #tpu.memory_space<vmem>>, %arg8: memref<1x32xf32, #tpu.memory_space<vmem>>, %arg9: memref<4x256xf32, #tpu.memory_space<vmem>>) attributes {dimension_semantics = [], scalar_prefetch = 0 : i64, scratch_operands = 0 : i64, tpu.core_type = #tpu.core_type<tc>} {
    %c0 = arith.constant 0 : index
    %c0_0 = arith.constant 0 : index
    %0 = vector.load %arg1[%c0, %c0_0] : memref<32x3xf32, #tpu.memory_space<vmem>>, vector<32x3xf32>
    %c0_1 = arith.constant 0 : index
    %c0_2 = arith.constant 0 : index
    %1 = vector.load %arg0[%c0_1, %c0_2] : memref<3x256xf32, #tpu.memory_space<vmem>>, vector<3x256xf32>
    %cst = arith.constant dense<0.000000e+00> : vector<32x256xf32>
    %2 = tpu.matmul %0, %1, %cst {dimension_numbers = #tpu.dot_dimension_numbers<[1], [0], [0], [1], [0, 0, 1, 1], [], []>} : vector<32x3xf32>, vector<3x256xf32>, vector<32x256xf32> -> vector<32x256xf32>
    %3 = math.sin %2 : vector<32x256xf32>
    %c0_i32 = arith.constant 0 : i32
    %4 = arith.index_cast %c0_i32 : i32 to index
    %c0_3 = arith.constant 0 : index
    %c0_4 = arith.constant 0 : index
    %5 = vector.load %arg2[%4, %c0_3, %c0_4] : memref<7x32x32xf32, #tpu.memory_space<vmem>>, vector<1x32x32xf32>
    %6 = vector.shape_cast %5 : vector<1x32x32xf32> to vector<32x32xf32>
    %cst_5 = arith.constant dense<0.000000e+00> : vector<32x256xf32>
    %7 = tpu.matmul %6, %3, %cst_5 {dimension_numbers = #tpu.dot_dimension_numbers<[1], [0], [0], [1], [0, 0, 1, 1], [], []>} : vector<32x32xf32>, vector<32x256xf32>, vector<32x256xf32> -> vector<32x256xf32>
    %8 = arith.index_cast %c0_i32 : i32 to index
    %c0_6 = arith.constant 0 : index
    %c0_7 = arith.constant 0 : index
    %9 = vector.load %arg3[%8, %c0_6, %c0_7] : memref<7x32x1xf32, #tpu.memory_space<vmem>>, vector<1x32x1xf32>
    %10 = vector.shape_cast %9 : vector<1x32x1xf32> to vector<32x1xf32>
    %11 = vector.broadcast %10 : vector<32x1xf32> to vector<32x256xf32>
    %12 = arith.addf %7, %11 : vector<32x256xf32>
    %13 = math.sin %12 : vector<32x256xf32>
    %c1_i32 = arith.constant 1 : i32
    %14 = arith.index_cast %c1_i32 : i32 to index
    %c0_8 = arith.constant 0 : index
    %c0_9 = arith.constant 0 : index
    %15 = vector.load %arg2[%14, %c0_8, %c0_9] : memref<7x32x32xf32, #tpu.memory_space<vmem>>, vector<1x32x32xf32>
    %16 = vector.shape_cast %15 : vector<1x32x32xf32> to vector<32x32xf32>
    %cst_10 = arith.constant dense<0.000000e+00> : vector<32x256xf32>
    %17 = tpu.matmul %16, %13, %cst_10 {dimension_numbers = #tpu.dot_dimension_numbers<[1], [0], [0], [1], [0, 0, 1, 1], [], []>} : vector<32x32xf32>, vector<32x256xf32>, vector<32x256xf32> -> vector<32x256xf32>
    %18 = arith.index_cast %c1_i32 : i32 to index
    %c0_11 = arith.constant 0 : index
    %c0_12 = arith.constant 0 : index
    %19 = vector.load %arg3[%18, %c0_11, %c0_12] : memref<7x32x1xf32, #tpu.memory_space<vmem>>, vector<1x32x1xf32>
    %20 = vector.shape_cast %19 : vector<1x32x1xf32> to vector<32x1xf32>
    %21 = vector.broadcast %20 : vector<32x1xf32> to vector<32x256xf32>
    %22 = arith.addf %17, %21 : vector<32x256xf32>
    %23 = math.sin %22 : vector<32x256xf32>
    %c2_i32 = arith.constant 2 : i32
    %24 = arith.index_cast %c2_i32 : i32 to index
    %c0_13 = arith.constant 0 : index
    %c0_14 = arith.constant 0 : index
    %25 = vector.load %arg2[%24, %c0_13, %c0_14] : memref<7x32x32xf32, #tpu.memory_space<vmem>>, vector<1x32x32xf32>
    %26 = vector.shape_cast %25 : vector<1x32x32xf32> to vector<32x32xf32>
    %cst_15 = arith.constant dense<0.000000e+00> : vector<32x256xf32>
    %27 = tpu.matmul %26, %23, %cst_15 {dimension_numbers = #tpu.dot_dimension_numbers<[1], [0], [0], [1], [0, 0, 1, 1], [], []>} : vector<32x32xf32>, vector<32x256xf32>, vector<32x256xf32> -> vector<32x256xf32>
    %28 = arith.index_cast %c2_i32 : i32 to index
    %c0_16 = arith.constant 0 : index
    %c0_17 = arith.constant 0 : index
    %29 = vector.load %arg3[%28, %c0_16, %c0_17] : memref<7x32x1xf32, #tpu.memory_space<vmem>>, vector<1x32x1xf32>
    %30 = vector.shape_cast %29 : vector<1x32x1xf32> to vector<32x1xf32>
    %31 = vector.broadcast %30 : vector<32x1xf32> to vector<32x256xf32>
    %32 = arith.addf %27, %31 : vector<32x256xf32>
    %33 = math.sin %32 : vector<32x256xf32>
    %c3_i32 = arith.constant 3 : i32
    %34 = arith.index_cast %c3_i32 : i32 to index
    %c0_18 = arith.constant 0 : index
    %c0_19 = arith.constant 0 : index
    %35 = vector.load %arg2[%34, %c0_18, %c0_19] : memref<7x32x32xf32, #tpu.memory_space<vmem>>, vector<1x32x32xf32>
    %36 = vector.shape_cast %35 : vector<1x32x32xf32> to vector<32x32xf32>
    %cst_20 = arith.constant dense<0.000000e+00> : vector<32x256xf32>
    %37 = tpu.matmul %36, %33, %cst_20 {dimension_numbers = #tpu.dot_dimension_numbers<[1], [0], [0], [1], [0, 0, 1, 1], [], []>} : vector<32x32xf32>, vector<32x256xf32>, vector<32x256xf32> -> vector<32x256xf32>
    %38 = arith.index_cast %c3_i32 : i32 to index
    %c0_21 = arith.constant 0 : index
    %c0_22 = arith.constant 0 : index
    %39 = vector.load %arg3[%38, %c0_21, %c0_22] : memref<7x32x1xf32, #tpu.memory_space<vmem>>, vector<1x32x1xf32>
    %40 = vector.shape_cast %39 : vector<1x32x1xf32> to vector<32x1xf32>
    %41 = vector.broadcast %40 : vector<32x1xf32> to vector<32x256xf32>
    %42 = arith.addf %37, %41 : vector<32x256xf32>
    %43 = math.sin %42 : vector<32x256xf32>
    %c4_i32 = arith.constant 4 : i32
    %44 = arith.index_cast %c4_i32 : i32 to index
    %c0_23 = arith.constant 0 : index
    %c0_24 = arith.constant 0 : index
    %45 = vector.load %arg2[%44, %c0_23, %c0_24] : memref<7x32x32xf32, #tpu.memory_space<vmem>>, vector<1x32x32xf32>
    %46 = vector.shape_cast %45 : vector<1x32x32xf32> to vector<32x32xf32>
    %cst_25 = arith.constant dense<0.000000e+00> : vector<32x256xf32>
    %47 = tpu.matmul %46, %43, %cst_25 {dimension_numbers = #tpu.dot_dimension_numbers<[1], [0], [0], [1], [0, 0, 1, 1], [], []>} : vector<32x32xf32>, vector<32x256xf32>, vector<32x256xf32> -> vector<32x256xf32>
    %48 = arith.index_cast %c4_i32 : i32 to index
    %c0_26 = arith.constant 0 : index
    %c0_27 = arith.constant 0 : index
    %49 = vector.load %arg3[%48, %c0_26, %c0_27] : memref<7x32x1xf32, #tpu.memory_space<vmem>>, vector<1x32x1xf32>
    %50 = vector.shape_cast %49 : vector<1x32x1xf32> to vector<32x1xf32>
    %51 = vector.broadcast %50 : vector<32x1xf32> to vector<32x256xf32>
    %52 = arith.addf %47, %51 : vector<32x256xf32>
    %53 = math.sin %52 : vector<32x256xf32>
    %c5_i32 = arith.constant 5 : i32
    %54 = arith.index_cast %c5_i32 : i32 to index
    %c0_28 = arith.constant 0 : index
    %c0_29 = arith.constant 0 : index
    %55 = vector.load %arg2[%54, %c0_28, %c0_29] : memref<7x32x32xf32, #tpu.memory_space<vmem>>, vector<1x32x32xf32>
    %56 = vector.shape_cast %55 : vector<1x32x32xf32> to vector<32x32xf32>
    %cst_30 = arith.constant dense<0.000000e+00> : vector<32x256xf32>
    %57 = tpu.matmul %56, %53, %cst_30 {dimension_numbers = #tpu.dot_dimension_numbers<[1], [0], [0], [1], [0, 0, 1, 1], [], []>} : vector<32x32xf32>, vector<32x256xf32>, vector<32x256xf32> -> vector<32x256xf32>
    %58 = arith.index_cast %c5_i32 : i32 to index
    %c0_31 = arith.constant 0 : index
    %c0_32 = arith.constant 0 : index
    %59 = vector.load %arg3[%58, %c0_31, %c0_32] : memref<7x32x1xf32, #tpu.memory_space<vmem>>, vector<1x32x1xf32>
    %60 = vector.shape_cast %59 : vector<1x32x1xf32> to vector<32x1xf32>
    %61 = vector.broadcast %60 : vector<32x1xf32> to vector<32x256xf32>
    %62 = arith.addf %57, %61 : vector<32x256xf32>
    %63 = math.sin %62 : vector<32x256xf32>
    %c6_i32 = arith.constant 6 : i32
    %64 = arith.index_cast %c6_i32 : i32 to index
    %c0_33 = arith.constant 0 : index
    %c0_34 = arith.constant 0 : index
    %65 = vector.load %arg2[%64, %c0_33, %c0_34] : memref<7x32x32xf32, #tpu.memory_space<vmem>>, vector<1x32x32xf32>
    %66 = vector.shape_cast %65 : vector<1x32x32xf32> to vector<32x32xf32>
    %cst_35 = arith.constant dense<0.000000e+00> : vector<32x256xf32>
    %67 = tpu.matmul %66, %63, %cst_35 {dimension_numbers = #tpu.dot_dimension_numbers<[1], [0], [0], [1], [0, 0, 1, 1], [], []>} : vector<32x32xf32>, vector<32x256xf32>, vector<32x256xf32> -> vector<32x256xf32>
    %68 = arith.index_cast %c6_i32 : i32 to index
    %c0_36 = arith.constant 0 : index
    %c0_37 = arith.constant 0 : index
    %69 = vector.load %arg3[%68, %c0_36, %c0_37] : memref<7x32x1xf32, #tpu.memory_space<vmem>>, vector<1x32x1xf32>
    %70 = vector.shape_cast %69 : vector<1x32x1xf32> to vector<32x1xf32>
    %71 = vector.broadcast %70 : vector<32x1xf32> to vector<32x256xf32>
    %72 = arith.addf %67, %71 : vector<32x256xf32>
    %73 = math.sin %72 : vector<32x256xf32>
    %c7_i32 = arith.constant 7 : i32
    %c0_38 = arith.constant 0 : index
    %c0_39 = arith.constant 0 : index
    %74 = vector.load %arg4[%c0_38, %c0_39] : memref<3x33xf32, #tpu.memory_space<vmem>>, vector<3x32xf32>
    %cst_40 = arith.constant dense<0.000000e+00> : vector<3x256xf32>
    %75 = tpu.matmul %74, %73, %cst_40 {dimension_numbers = #tpu.dot_dimension_numbers<[1], [0], [0], [1], [0, 0, 1, 1], [], []>} : vector<3x32xf32>, vector<32x256xf32>, vector<3x256xf32> -> vector<3x256xf32>
    %c0_41 = arith.constant 0 : index
    %c32 = arith.constant 32 : index
    %76 = vector.load %arg4[%c0_41, %c32] : memref<3x33xf32, #tpu.memory_space<vmem>>, vector<3x1xf32>
    %77 = vector.broadcast %76 : vector<3x1xf32> to vector<3x256xf32>
    %78 = arith.addf %75, %77 : vector<3x256xf32>
    %cst_42 = arith.constant 0.000000e+00 : f32
    %cst_43 = arith.constant 1.000000e+00 : f32
    %79 = vector.broadcast %cst_42 : f32 to vector<3x256xf32>
    %80 = arith.maximumf %79, %78 : vector<3x256xf32>
    %81 = vector.broadcast %cst_43 : f32 to vector<3x256xf32>
    %82 = arith.minimumf %81, %80 : vector<3x256xf32>
    %c0_44 = arith.constant 0 : index
    %c0_45 = arith.constant 0 : index
    %83 = vector.load %arg9[%c0_44, %c0_45] : memref<4x256xf32, #tpu.memory_space<vmem>>, vector<3x256xf32>
    tpu.vector_store %arg9[%c0_44, %c0_45], %82 {strides = array<i32>} : memref<4x256xf32, #tpu.memory_space<vmem>>, vector<3x256xf32>,
    %c0_46 = arith.constant 0 : index
    %c0_47 = arith.constant 0 : index
    %84 = vector.load %arg5[%c0_46, %c0_47] : memref<256x128xf32, #tpu.memory_space<vmem>>, vector<256x128xf32>
    %cst_48 = arith.constant dense<0.000000e+00> : vector<3x128xf32>
    %85 = tpu.matmul %82, %84, %cst_48 {dimension_numbers = #tpu.dot_dimension_numbers<[1], [0], [0], [1], [0, 0, 1, 1], [], []>} : vector<3x256xf32>, vector<256x128xf32>, vector<3x128xf32> -> vector<3x128xf32>
    %c0_49 = arith.constant 0 : index
    %c0_50 = arith.constant 0 : index
    %86 = vector.load %arg7[%c0_49, %c0_50] : memref<1x64xf32, #tpu.memory_space<vmem>>, vector<1x64xf32>
    %87 = vector.extract_strided_slice %85 {offsets = [0, 0], sizes = [1, 128], strides = [1, 1]} : vector<3x128xf32> to vector<1x128xf32>
    %c0_51 = arith.constant 0 : index
    %c0_52 = arith.constant 0 : index
    %c0_53 = arith.constant 0 : index
    %88 = vector.load %arg6[%c0_51, %c0_52, %c0_53] : memref<3x128x64xf32, #tpu.memory_space<vmem>>, vector<1x128x64xf32>
    %89 = vector.shape_cast %88 : vector<1x128x64xf32> to vector<128x64xf32>
    %cst_54 = arith.constant dense<0.000000e+00> : vector<1x64xf32>
    %90 = tpu.matmul %87, %89, %cst_54 {dimension_numbers = #tpu.dot_dimension_numbers<[1], [0], [0], [1], [0, 0, 1, 1], [], []>} : vector<1x128xf32>, vector<128x64xf32>, vector<1x64xf32> -> vector<1x64xf32>
    %91 = arith.addf %86, %90 : vector<1x64xf32>
    %92 = vector.extract_strided_slice %85 {offsets = [1, 0], sizes = [1, 128], strides = [1, 1]} : vector<3x128xf32> to vector<1x128xf32>
    %c1 = arith.constant 1 : index
    %c0_55 = arith.constant 0 : index
    %c0_56 = arith.constant 0 : index
    %93 = vector.load %arg6[%c1, %c0_55, %c0_56] : memref<3x128x64xf32, #tpu.memory_space<vmem>>, vector<1x128x64xf32>
    %94 = vector.shape_cast %93 : vector<1x128x64xf32> to vector<128x64xf32>
    %cst_57 = arith.constant dense<0.000000e+00> : vector<1x64xf32>
    %95 = tpu.matmul %92, %94, %cst_57 {dimension_numbers = #tpu.dot_dimension_numbers<[1], [0], [0], [1], [0, 0, 1, 1], [], []>} : vector<1x128xf32>, vector<128x64xf32>, vector<1x64xf32> -> vector<1x64xf32>
    %96 = arith.addf %91, %95 : vector<1x64xf32>
    %97 = vector.extract_strided_slice %85 {offsets = [2, 0], sizes = [1, 128], strides = [1, 1]} : vector<3x128xf32> to vector<1x128xf32>
    %c2 = arith.constant 2 : index
    %c0_58 = arith.constant 0 : index
    %c0_59 = arith.constant 0 : index
    %98 = vector.load %arg6[%c2, %c0_58, %c0_59] : memref<3x128x64xf32, #tpu.memory_space<vmem>>, vector<1x128x64xf32>
    %99 = vector.shape_cast %98 : vector<1x128x64xf32> to vector<128x64xf32>
    %cst_60 = arith.constant dense<0.000000e+00> : vector<1x64xf32>
    %100 = tpu.matmul %97, %99, %cst_60 {dimension_numbers = #tpu.dot_dimension_numbers<[1], [0], [0], [1], [0, 0, 1, 1], [], []>} : vector<1x128xf32>, vector<128x64xf32>, vector<1x64xf32> -> vector<1x64xf32>
    %101 = arith.addf %96, %100 : vector<1x64xf32>
    %c0_61 = arith.constant 0 : index
    %c0_62 = arith.constant 0 : index
    %102 = vector.load %arg8[%c0_61, %c0_62] : memref<1x32xf32, #tpu.memory_space<vmem>>, vector<1x32xf32>
    %103 = arith.mulf %102, %102 : vector<1x32xf32>
    %cst_63 = arith.constant dense<0.000000e+00> : vector<1xf32>
    %104 = vector.multi_reduction <add>, %103, %cst_63 [1] : vector<1x32xf32> to vector<1xf32>
    %105 = vector.shape_cast %104 : vector<1xf32> to vector<1x1xf32>
    %106 = math.sqrt %105 : vector<1x1xf32>
    %107 = vector.extract_strided_slice %101 {offsets = [0, 0], sizes = [1, 32], strides = [1, 1]} : vector<1x64xf32> to vector<1x32xf32>
    %108 = vector.extract_strided_slice %101 {offsets = [0, 32], sizes = [1, 32], strides = [1, 1]} : vector<1x64xf32> to vector<1x32xf32>
    %cst_64 = arith.constant 0.000000e+00 : f32
    %109 = vector.broadcast %cst_64 : f32 to vector<1x32xf32>
    %110 = arith.mulf %107, %109 : vector<1x32xf32>
    %cst_65 = arith.constant 0.000000e+00 : f32
    %111 = vector.broadcast %cst_65 : f32 to vector<1x32xf32>
    %112 = arith.mulf %107, %111 : vector<1x32xf32>
    %113 = arith.mulf %107, %107 : vector<1x32xf32>
    %cst_66 = arith.constant dense<0.000000e+00> : vector<1xf32>
    %114 = vector.multi_reduction <add>, %113, %cst_66 [1] : vector<1x32xf32> to vector<1xf32>
    %115 = vector.shape_cast %114 : vector<1xf32> to vector<1x1xf32>
    %116 = math.sqrt %115 : vector<1x1xf32>
    %117 = arith.mulf %102, %107 : vector<1x32xf32>
    %cst_67 = arith.constant dense<0.000000e+00> : vector<1xf32>
    %118 = vector.multi_reduction <add>, %117, %cst_67 [1] : vector<1x32xf32> to vector<1xf32>
    %119 = vector.shape_cast %118 : vector<1xf32> to vector<1x1xf32>
    %120 = arith.mulf %106, %116 : vector<1x1xf32>
    %cst_68 = arith.constant 9.99999993E-9 : f32
    %121 = vector.broadcast %cst_68 : f32 to vector<1x1xf32>
    %122 = arith.maximumf %120, %121 : vector<1x1xf32>
    %123 = arith.divf %119, %122 : vector<1x1xf32>
    %124 = vector.broadcast %123 : vector<1x1xf32> to vector<1x32xf32>
    %125 = arith.addf %110, %124 : vector<1x32xf32>
    %126 = arith.addf %112, %107 : vector<1x32xf32>
    %127 = arith.mulf %108, %108 : vector<1x32xf32>
    %cst_69 = arith.constant dense<0.000000e+00> : vector<1xf32>
    %128 = vector.multi_reduction <add>, %127, %cst_69 [1] : vector<1x32xf32> to vector<1xf32>
    %129 = vector.shape_cast %128 : vector<1xf32> to vector<1x1xf32>
    %130 = math.sqrt %129 : vector<1x1xf32>
    %131 = arith.mulf %102, %108 : vector<1x32xf32>
    %cst_70 = arith.constant dense<0.000000e+00> : vector<1xf32>
    %132 = vector.multi_reduction <add>, %131, %cst_70 [1] : vector<1x32xf32> to vector<1xf32>
    %133 = vector.shape_cast %132 : vector<1xf32> to vector<1x1xf32>
    %134 = arith.mulf %106, %130 : vector<1x1xf32>
    %cst_71 = arith.constant 9.99999993E-9 : f32
    %135 = vector.broadcast %cst_71 : f32 to vector<1x1xf32>
    %136 = arith.maximumf %134, %135 : vector<1x1xf32>
    %137 = arith.divf %133, %136 : vector<1x1xf32>
    %138 = vector.broadcast %137 : vector<1x1xf32> to vector<1x32xf32>
    %139 = arith.addf %125, %138 : vector<1x32xf32>
    %140 = arith.addf %126, %108 : vector<1x32xf32>
    %cst_72 = arith.constant 5.000000e-01 : f32
    %141 = vector.broadcast %cst_72 : f32 to vector<1x32xf32>
    %142 = arith.mulf %140, %141 : vector<1x32xf32>
    %143 = vector.extract_strided_slice %139 {offsets = [0, 0], sizes = [1, 1], strides = [1, 1]} : vector<1x32xf32> to vector<1x1xf32>
    %cst_73 = arith.constant dense<0.000000e+00> : vector<1xf32>
    %144 = vector.multi_reduction <add>, %143, %cst_73 [1] : vector<1x1xf32> to vector<1xf32>
    %145 = vector.shape_cast %144 : vector<1xf32> to vector<1x1xf32>
    %146 = arith.mulf %142, %142 : vector<1x32xf32>
    %cst_74 = arith.constant dense<0.000000e+00> : vector<1xf32>
    %147 = vector.multi_reduction <add>, %146, %cst_74 [1] : vector<1x32xf32> to vector<1xf32>
    %148 = vector.shape_cast %147 : vector<1xf32> to vector<1x1xf32>
    %149 = math.sqrt %148 : vector<1x1xf32>
    %150 = arith.mulf %102, %142 : vector<1x32xf32>
    %cst_75 = arith.constant dense<0.000000e+00> : vector<1xf32>
    %151 = vector.multi_reduction <add>, %150, %cst_75 [1] : vector<1x32xf32> to vector<1xf32>
    %152 = vector.shape_cast %151 : vector<1xf32> to vector<1x1xf32>
    %153 = arith.mulf %106, %149 : vector<1x1xf32>
    %cst_76 = arith.constant 9.99999993E-9 : f32
    %154 = vector.broadcast %cst_76 : f32 to vector<1x1xf32>
    %155 = arith.maximumf %153, %154 : vector<1x1xf32>
    %156 = arith.divf %152, %155 : vector<1x1xf32>
    %cst_77 = arith.constant -1.000000e+02 : f32
    %157 = vector.broadcast %cst_77 : f32 to vector<1x1xf32>
    %158 = arith.mulf %157, %156 : vector<1x1xf32>
    %cst_78 = arith.constant 5.000000e-01 : f32
    %159 = vector.broadcast %cst_78 : f32 to vector<1x1xf32>
    %160 = arith.mulf %145, %159 : vector<1x1xf32>
    %cst_79 = arith.constant -1.000000e+02 : f32
    %161 = vector.broadcast %cst_79 : f32 to vector<1x1xf32>
    %162 = arith.mulf %161, %160 : vector<1x1xf32>
    %cst_80 = arith.constant 3.000000e-01 : f32
    %163 = vector.broadcast %cst_80 : f32 to vector<1x1xf32>
    %164 = arith.mulf %158, %163 : vector<1x1xf32>
    %cst_81 = arith.constant 0.699999988 : f32
    %165 = vector.broadcast %cst_81 : f32 to vector<1x1xf32>
    %166 = arith.mulf %162, %165 : vector<1x1xf32>
    %167 = arith.addf %164, %166 : vector<1x1xf32>
    %168 = vector.shape_cast %167 : vector<1x1xf32> to vector<1x1xf32>
    %169 = vector.broadcast %168 : vector<1x1xf32> to vector<1x256xf32>
    %c3 = arith.constant 3 : index
    %c0_82 = arith.constant 0 : index
    %170 = vector.load %arg9[%c3, %c0_82] : memref<4x256xf32, #tpu.memory_space<vmem>>, vector<1x256xf32>
    tpu.vector_store %arg9[%c3, %c0_82], %169 {strides = array<i32>} : memref<4x256xf32, #tpu.memory_space<vmem>>, vector<1x256xf32>,
    return
  }
}

</mosaic_0001>

<bundles_post_ra>
// kernel: deep_daze_forward.1
= control target key start
LH: loop header
LB: loop body
LE: loop exit
PB: predicated region body
PF: predicated region fallthrough
CT: control target
= control target key end

     0   :  { %vm52_vm0 = vcmask 1042432   ;;  %v15389_v1 = vmov 0.0   ;;  %vm39_vm1 = vcmask 23552   ;;  %v15417_v41 = vmov 683565275   ;;  %s15379_s0 = inlined_call_operand.vmem [shape: f32[3,256], index: 0, kind: input, shape index: {}]   ;;  %s15380_s1 = inlined_call_operand.vmem [shape: f32[32,3], index: 1, kind: input, shape index: {}]   ;;  %s15381_s3 = inlined_call_operand.vmem [shape: f32[7,32,1], index: 3, kind: input, shape index: {}]   ;;  %s15382_s2 = inlined_call_operand.vmem [shape: f32[7,32,32], index: 2, kind: input, shape index: {}]   ;;  %s15383_s5 = inlined_call_operand.vmem [shape: f32[256,128], index: 5, kind: input, shape index: {}]   ;;  %s15384_s4 = inlined_call_operand.vmem [shape: f32[3,33], index: 4, kind: input, shape index: {}]   ;;  %s15385_s6 = inlined_call_operand.vmem [shape: f32[3,128,64], index: 6, kind: input, shape index: {}]   ;;  %s15386_s9 = inlined_call_operand.vmem [shape: f32[4,256], index: 9, kind: output, shape index: {}]   ;;  %s15387_s8 = inlined_call_operand.vmem [shape: f32[1,32], index: 8, kind: input, shape index: {}]   ;;  %s15388_s7 = inlined_call_operand.vmem [shape: f32[1,64], index: 7, kind: input, shape index: {}]  }
   0x1   :  { %v36_v0 = vld [vmem:[%s15379_s0] sm:$0x77]  ;;  %121 = vmatprep.mubr.f32.mxu0 %v15389_v1  ;;  %133 = vmatprep.mubr.f32.mxu1 %v15389_v1  ;;  %v34_v4 = vld [vmem:[%s15380_s1 + $0x10] sm:$0xff]  ;;  %v33_v5 = vld [vmem:[%s15380_s1 + $0x8] sm:$0xff]  ;;  %v15404_v45 = vmov 2475754826  }
   0x2   :  { %v38_v2 = vcombine.high %v36_v0, %v36_v0  ;;  %v32_v3 = vld [vmem:[%s15380_s1] sm:$0xff]  ;;  %v35_v6 = vld [vmem:[%s15380_s1 + $0x18] sm:$0xff]  ;;  %v15406_v47 = vmov 2131351028   ;;  %v15402_v49 = vmov 2102212464  }
   0x3   :  { %v15409_v51 = vmov 920167782   ;;  %v15395_v58 = vmov 1326507024  }
   0x4   :  { %8290 = vmatprep.subr.msk.mxu0 %vm52_vm0, %v38_v2  ;;  %9021 = vmatprep.subr.msk.mxu1 %vm52_vm0, %v38_v2 }
   0x5   :  { %8291 = vmatpush1.msk.msra.mxu0 %vm52_vm0, %v36_v0  ;;  %9022 = vmatpush1.msk.msra.mxu1 %vm52_vm0, %v36_v0 }
   0x6   :  { %8292 = vmatmul.mubr.msk.f32.vlgmr.msra.gmra.mrb[0].mxu0 %vm39_vm1, %v32_v3  ;;  %8294 = vmatmul.mubr.msk.f32.vlgmr.msra.gmra.mrb[0].mxu1 %vm39_vm1, %v34_v4 }
   0x7   :  { %127 = vmatprep.mubr.f32.mxu0 %v15389_v1  ;;  %139 = vmatprep.mubr.f32.mxu1 %v15389_v1 }
   0xa   :  { %8293 = vmatmul.mubr.msk.f32.gmra.mrb[2].mxu0 %vm39_vm1, %v33_v5  ;;  %8295 = vmatmul.mubr.msk.f32.gmra.mrb[2].mxu1 %vm39_vm1, %v35_v6 }
   0xb   :  { %1083 = vmatprep.mubr.f32.mxu1 %v15389_v1  ;;  %2046 = vmatprep.mubr.f32.mxu0 %v15389_v1 }
  0xd9   :  { %v9653_v7 = vpop.f32.mrb[0].mxu0  ;;  %v9655_v8 = vpop.f32.mrb[0].mxu1 }
  0xda   :  { %v146_v9 = vand.u32 2147483647, %v9653_v7  ;;  %v149_v10 = vand.u32 2139095040, %v9653_v7  ;;  %v9659_v11 = vpop.f32.mrb[1].mxu0  ;;  %v9661_v12 = vpop.f32.mrb[1].mxu1  ;;  %v565_v14 = vand.u32 2139095040, %v9655_v8 }
  0xdb   :  { %v562_v13 = vand.u32 2147483647, %v9655_v8  ;;  %v253_v19 = vand.u32 2139095040, %v9659_v11  ;;  %v250_v38 = vand.u32 2147483647, %v9659_v11 }
  0xdc   :  { %v150_v15 = vshrl.u32 %v149_v10, 23  ;;  %v153_v16 = vand.u32 8388607, %v146_v9  ;;  %v566_v17 = vshrl.u32 %v565_v14, 23 }
  0xdd   :  { %v569_v18 = vand.u32 8388607, %v562_v13  ;;  %v254_v22 = vshrl.u32 %v253_v19, 23  ;;  %v9670_v23 = vpop.f32.mrb[2].mxu0  ;;  %v9672_v24 = vpop.f32.mrb[2].mxu1 }
  0xde   :  { %v8296_v20 = vadd.s32 4294967169, %v150_v15  ;;  %v8312_v21 = vadd.s32 4294967169, %v566_v17  ;;  %v154_v26 = vor.u32 8388608, %v153_v16  ;;  %v9674_v30 = vpop.f32.mrb[3].mxu0  ;;  %v9676_v31 = vpop.f32.mrb[3].mxu1 }
  0xdf   :  { %v570_v27 = vor.u32 8388608, %v569_v18  ;;  %v8300_v29 = vadd.s32 4294967169, %v254_v22 }
  0xe0   :  { %v156_v25 = vadd.s32 1, %v8296_v20  ;;  %v572_v28 = vadd.s32 1, %v8312_v21  ;;  %v9678_v36 = vshll.u32 %v154_v26, 8 }
  0xe1   :  { %v9680_v37 = vshll.u32 %v570_v27, 8  ;;  %v9683_v39 = vadd.s32 1, %v8300_v29 }
  0xe2   :  { %vm157_vm2 = vcmp.gt.s32.totalorder %v156_v25, 0  ;;  %vm573_vm3 = vcmp.gt.s32.totalorder %v572_v28, 0 }
  0xe3   :  { %v158_v32 = vsel %vm157_vm2, %v156_v25, 0  ;;  %v574_v35 = vsel %vm573_vm3, %v572_v28, 0  ;;  %vm261_vm7 = vcmp.gt.s32.totalorder %v9683_v39, 0 }
  0xe4   :  { %v159_v33 = vshrl.u32 %v158_v32, 5  ;;  %v160_v34 = vand.u32 31, %v158_v32  ;;  %v9686_v43 = vshrl.u32 %v574_v35, 5  ;;  %v576_v44 = vand.u32 31, %v574_v35 }
  0xe6   :  { %v161_v40 = vsub.s32 32, %v160_v34  ;;  %v163_v42 = vshll.u32 %v15417_v41, %v160_v34  ;;  %v166_v46 = vshll.u32 %v15404_v45, %v160_v34  ;;  %v169_v48 = vshll.u32 %v15406_v47, %v160_v34 }
  0xe7   :  { %v172_v50 = vshll.u32 %v15402_v49, %v160_v34  ;;  %v175_v52 = vshll.u32 %v15409_v51, %v160_v34  ;;  %vm178_vm4 = vcmp.lt.s32.totalorder %v159_v33, 1  ;;  %vm180_vm5 = vcmp.lt.s32.totalorder %v159_v33, 3 }
  0xe8   :  { %v164_v53 = vshrl.u32 %v15404_v45, %v161_v40  ;;  %v167_v54 = vshrl.u32 %v15406_v47, %v161_v40  ;;  %v170_v55 = vshrl.u32 %v15402_v49, %v161_v40  ;;  %v162_v56 = vshrl.u32 %v15417_v41, %v161_v40 }
  0xe9   :  { %v173_v57 = vshrl.u32 %v15409_v51, %v161_v40  ;;  %v176_v59 = vshrl.u32 %v15395_v58, %v161_v40  ;;  %v577_v63 = vsub.s32 32, %v576_v44  ;;  %vm181_vm6 = vcmp.lt.s32.totalorder %v159_v33, 4 }
  0xea   :  { %v165_v60 = vor.u32 %v164_v53, %v163_v42  ;;  %v168_v61 = vor.u32 %v167_v54, %v166_v46  ;;  %v171_v62 = vor.u32 %v170_v55, %v169_v48  ;;  %v579_v3 = vshll.u32 %v15417_v41, %v576_v44 }
  0xeb   :  { %v174_v0 = vor.u32 %v173_v57, %v172_v50  ;;  %v177_v2 = vor.u32 %v176_v59, %v175_v52  ;;  %v582_v17 = vshll.u32 %v15404_v45, %v576_v44  ;;  %vm179_vm8 = vcmp.lt.s32.totalorder %v159_v33, 2 }
  0xec   :  { %v182_v4 = vsel %vm178_vm4, %v162_v56, %v165_v60  ;;  %v183_v5 = vsel %vm181_vm6, %v171_v62, 2102212464  ;;  %v186_v6 = vsel %vm178_vm4, %v165_v60, %v168_v61  ;;  %v190_v10 = vsel %vm178_vm4, %v168_v61, %v171_v62 }
  0xed   :  { %v184_v14 = vsel %vm180_vm5, %v168_v61, %v183_v5  ;;  %v187_v15 = vsel %vm181_vm6, %v174_v0, 920167782  ;;  %v191_v16 = vsel %vm181_vm6, %v177_v2, 1326507024  ;;  %v580_v20 = vshrl.u32 %v15404_v45, %v577_v63 }
  0xee   :  { %v188_v18 = vsel %vm180_vm5, %v171_v62, %v187_v15  ;;  %v192_v19 = vsel %vm180_vm5, %v174_v0, %v191_v16  ;;  %v185_v21 = vsel %vm179_vm8, %v182_v4, %v184_v14  ;;  %v583_v26 = vshrl.u32 %v15406_v47, %v577_v63 }
  0xef   :  { %v189_v22 = vsel %vm179_vm8, %v186_v6, %v188_v18  ;;  %v193_v25 = vsel %vm179_vm8, %v190_v10, %v192_v19  ;;  %v581_v34 = vor.u32 %v580_v20, %v579_v3  ;;  %v585_v33 = vshll.u32 %v15406_v47, %v576_v44 }
  0xf0   :  { %v9710_v27 = vmul.u32.u64.low %v9678_v36, %v193_v25  ;;  %v9711_v28 = vmul.u32.u64.high %v9678_v36, %v193_v25, %v9710_v27  ;;  %v9714_v29 = vmul.u32.u64.low %v9678_v36, %v189_v22  ;;  %v9715_v32 = vmul.u32.u64.high %v9678_v36, %v189_v22, %v9714_v29 }
  0xf1   :  { %v584_v35 = vor.u32 %v583_v26, %v582_v17  ;;  %v586_v40 = vshrl.u32 %v15402_v49, %v577_v63  ;;  %v588_v42 = vshll.u32 %v15402_v49, %v576_v44  ;;  %v589_v46 = vshrl.u32 %v15409_v51, %v577_v63 }
  0xf2   :  { %v591_v48 = vshll.u32 %v15409_v51, %v576_v44  ;;  %v592_v50 = vshrl.u32 %v15395_v58, %v577_v63  ;;  %v201_v52 = vmul.u32 %v9678_v36, %v185_v21  ;;  %v578_v53 = vshrl.u32 %v15417_v41, %v577_v63 }
  0xf3   :  { %v587_v54 = vor.u32 %v586_v40, %v585_v33  ;;  %vm594_vm9 = vcmp.lt.s32.totalorder %v9686_v43, 1  ;;  %vm203_vm10 = vc.u32 %v9711_v28, %v9714_v29  ;;  %v204_v55 = vadd.s32 1, %v9715_v32 }
  0xf4   :  { %v590_v56 = vor.u32 %v589_v46, %v588_v42  ;;  %vm595_vm11 = vcmp.lt.s32.totalorder %v9686_v43, 2  ;;  %v593_v57 = vor.u32 %v592_v50, %v591_v48  ;;  %vm596_vm12 = vcmp.lt.s32.totalorder %v9686_v43, 3 }
  0xf5   :  { %vm597_vm13 = vcmp.lt.s32.totalorder %v9686_v43, 4  ;;  %v602_v44 = vsel %vm594_vm9, %v581_v34, %v584_v35  ;;  %v205_v36 = vsel %vm203_vm10, %v204_v55, %v9715_v32  ;;  %v606_v61 = vsel %vm594_vm9, %v584_v35, %v587_v54 }
  0xf6   :  { %v599_v59 = vsel %vm597_vm13, %v587_v54, 2102212464  ;;  %v603_v60 = vsel %vm597_vm13, %v590_v56, 920167782  ;;  %v206_v62 = vadd.s32 %v205_v36, %v201_v52  ;;  %v598_v63 = vsel %vm594_vm9, %v578_v53, %v581_v34 }
  0xf7   :  { %v604_v0 = vsel %vm596_vm12, %v587_v54, %v603_v60  ;;  %v607_v2 = vsel %vm597_vm13, %v593_v57, 1326507024  ;;  %v600_v3 = vsel %vm596_vm12, %v584_v35, %v599_v59  ;;  %v262_v6 = vsel %vm261_vm7, %v9683_v39, 0 }
  0xf8   :  { %v605_v4 = vsel %vm595_vm11, %v602_v44, %v604_v0  ;;  %v608_v5 = vsel %vm596_vm12, %v590_v56, %v607_v2  ;;  %v207_v10 = vadd.s32 536870912, %v206_v62  ;;  %v601_v20 = vsel %vm595_vm11, %v598_v63, %v600_v3 }
  0xf9   :  { %v609_v14 = vsel %vm595_vm11, %v606_v61, %v608_v5  ;;  %v9742_v15 = vmul.u32.u64.low %v9680_v37, %v605_v4  ;;  %v9743_v16 = vmul.u32.u64.high %v9680_v37, %v605_v4, %v9742_v15  ;;  %v257_v39 = vand.u32 8388607, %v250_v38 }
  0xfa   :  { %v9747_v17 = vmul.u32.u64.low %v9680_v37, %v609_v14  ;;  %v9748_v18 = vmul.u32.u64.high %v9680_v37, %v609_v14, %v9747_v17  ;;  %v9750_v19 = vshrl.u32 %v207_v10, 30  ;;  %v264_v21 = vand.u32 31, %v262_v6 }
  0xfb   :  { %v620_v25 = vadd.s32 1, %v9743_v16  ;;  %v617_v27 = vmul.u32 %v9680_v37, %v601_v20  ;;  %v258_v43 = vor.u32 8388608, %v257_v39  ;;  %v669_v52 = vand.u32 2139095040, %v9661_v12 }
  0xfc   :  { %v209_v22 = vshll.u32 %v9750_v19, 30  ;;  %v265_v26 = vsub.s32 32, %v264_v21  ;;  %vm619_vm14 = vc.u32 %v9748_v18, %v9742_v15  ;;  %v267_v35 = vshll.u32 %v15417_v41, %v264_v21 }
  0xfd   :  { %v621_v34 = vsel %vm619_vm14, %v620_v25, %v9743_v16  ;;  %v270_v42 = vshll.u32 %v15404_v45, %v264_v21  ;;  %v273_v37 = vshll.u32 %v15406_v47, %v264_v21  ;;  %v263_v54 = vshrl.u32 %v262_v6, 5 }
  0xfe   :  { %v9761_v32 = vsub.s32 %v206_v62, %v209_v22  ;;  %v622_v33 = vadd.s32 %v621_v34, %v617_v27  ;;  %v268_v40 = vshrl.u32 %v15404_v45, %v265_v26  ;;  %v271_v46 = vshrl.u32 %v15406_v47, %v265_v26 }
  0xff   :  { %v274_v50 = vshrl.u32 %v15402_v49, %v265_v26  ;;  %v276_v36 = vshll.u32 %v15402_v49, %v264_v21  ;;  %v277_v59 = vshrl.u32 %v15409_v51, %v265_v26  ;;  %v279_v61 = vshll.u32 %v15409_v51, %v264_v21 }
 0x100   :  { %v212_v48 = vsub.s32 0, %v9761_v32  ;;  %v623_v53 = vadd.s32 536870912, %v622_v33  ;;  %v269_v55 = vor.u32 %v268_v40, %v267_v35  ;;  %v272_v56 = vor.u32 %v271_v46, %v270_v42 }
 0x101   :  { %v275_v44 = vor.u32 %v274_v50, %v273_v37  ;;  %v280_v62 = vshrl.u32 %v15395_v58, %v265_v26  ;;  %v278_v0 = vor.u32 %v277_v59, %v276_v36  ;;  %v298_v2 = vshll.u32 %v258_v43, 8 }
 0x102   :  { %v8297_v57 = vmin.u32 %v212_v48, %v9761_v32  ;;  %v9775_v60 = vshrl.u32 %v623_v53, 30  ;;  %v670_v3 = vshrl.u32 %v669_v52, 23  ;;  %vm282_vm15 = vcmp.lt.s32.totalorder %v263_v54, 1 }
 0x103   :  { %v281_v5 = vor.u32 %v280_v62, %v279_v61  ;;  %vm285_vm0 = vcmp.lt.s32.totalorder %v263_v54, 4  ;;  %vm284_vm1 = vcmp.lt.s32.totalorder %v263_v54, 3  ;;  %v290_v6 = vsel %vm282_vm15, %v269_v55, %v272_v56 }
 0x104   :  { %v214_v63 = vclz %v8297_v57  ;;  %v625_v4 = vshll.u32 %v9775_v60, 30  ;;  %v291_v10 = vsel %vm285_vm0, %v278_v0, 920167782  ;;  %v294_v14 = vsel %vm282_vm15, %v272_v56, %v275_v44 }
 0x105   :  { %vm283_vm2 = vcmp.lt.s32.totalorder %v263_v54, 2  ;;  %v292_v17 = vsel %vm284_vm1, %v275_v44, %v291_v10  ;;  %v295_v20 = vsel %vm285_vm0, %v281_v5, 1326507024  ;;  %v266_v21 = vshrl.u32 %v15417_v41, %v265_v26 }
 0x106   :  { %v9782_v16 = vsub.s32 %v622_v33, %v625_v4  ;;  %v8298_v39 = vadd.s32 4294967294, %v214_v63  ;;  %v287_v22 = vsel %vm285_vm0, %v275_v44, 2102212464  ;;  %v296_v25 = vsel %vm284_vm1, %v278_v0, %v295_v20 }
 0x107   :  { %v293_v34 = vsel %vm283_vm2, %v290_v6, %v292_v17  ;;  %v297_v43 = vsel %vm283_vm2, %v294_v14, %v296_v25  ;;  %v8316_v35 = vadd.s32 4294967169, %v670_v3  ;;  %v286_v33 = vsel %vm282_vm15, %v266_v21, %v269_v55 }
 0x108   :  { %v628_v27 = vsub.s32 0, %v9782_v16  ;;  %v288_v42 = vsel %vm284_vm1, %v272_v56, %v287_v22  ;;  %v9793_v46 = vmul.u32.u64.low %v298_v2, %v297_v43  ;;  %v9794_v48 = vmul.u32.u64.high %v298_v2, %v297_v43, %v9793_v46 }
 0x109   :  { %vm8299_vm3 = vcmp.lt.s32.totalorder %v8298_v39, 0  ;;  %v9796_v26 = vmul.u32.u64.low %v298_v2, %v293_v34  ;;  %v9797_v37 = vmul.u32.u64.high %v298_v2, %v293_v34, %v9796_v26  ;;  %v676_v50 = vadd.s32 1, %v8316_v35 }
 0x10a   :  { %v8313_v40 = vmin.u32 %v628_v27, %v9782_v16  ;;  %v289_v53 = vsel %vm283_vm2, %v286_v33, %v288_v42  ;;  %v9801_v57 = vsel %vm8299_vm3, 0, %v8298_v39  ;;  %v15391_v36 = vand.u32 2147483647, %v9661_v12 }
 0x10b   :  { %vm307_vm4 = vc.u32 %v9794_v48, %v9796_v26  ;;  %vm677_vm5 = vcmp.gt.s32.totalorder %v676_v50, 0  ;;  %v308_v55 = vadd.s32 1, %v9797_v37  ;;  %v305_v44 = vmul.u32 %v298_v2, %v289_v53 }
 0x10c   :  { %v630_v52 = vclz %v8313_v40  ;;  %v678_v56 = vsel %vm677_vm5, %v676_v50, 0  ;;  %v222_v61 = vsub.s32 4294967266, %v9801_v57  ;;  %v673_v4 = vand.u32 8388607, %v15391_v36 }
 0x10d   :  { %v680_v59 = vand.u32 31, %v678_v56  ;;  %v309_v63 = vsel %vm307_vm4, %v308_v55, %v9797_v37  ;;  %v202_v5 = vadd.s32 %v9714_v29, %v9711_v28  ;;  %v218_v28 = vsub.s32 32, %v9801_v57 }
 0x10e   :  { %v8314_v62 = vadd.s32 4294967294, %v630_v52  ;;  %v310_v54 = vadd.s32 %v309_v63, %v305_v44  ;;  %v223_v6 = vadd.s32 127, %v222_v61  ;;  %v232_v29 = vsub.s32 4, %v9750_v19 }
 0x10f   :  { %v681_v0 = vsub.s32 32, %v680_v59  ;;  %v683_v10 = vshll.u32 %v15417_v41, %v680_v59  ;;  %v686_v17 = vshll.u32 %v15404_v45, %v680_v59  ;;  %v689_v39 = vshll.u32 %v15406_v47, %v680_v59 }
 0x110   :  { %v311_v3 = vadd.s32 536870912, %v310_v54  ;;  %vm8315_vm6 = vcmp.lt.s32.totalorder %v8314_v62, 0  ;;  %v692_v22 = vshll.u32 %v15402_v49, %v680_v59  ;;  %v674_v27 = vor.u32 8388608, %v673_v4 }
 0x111   :  { %v684_v14 = vshrl.u32 %v15404_v45, %v681_v0  ;;  %v687_v20 = vshrl.u32 %v15406_v47, %v681_v0  ;;  %v690_v21 = vshrl.u32 %v15402_v49, %v681_v0  ;;  %v224_v34 = vshll.u32 %v223_v6, 23 }
 0x112   :  { %v9813_v2 = vshrl.u32 %v311_v3, 30  ;;  %v618_v43 = vadd.s32 %v9742_v15, %v9748_v18  ;;  %v679_v35 = vshrl.u32 %v678_v56, 5  ;;  %v693_v33 = vshrl.u32 %v15409_v51, %v681_v0 }
 0x113   :  { %v633_v40 = vsel %vm8315_vm6, 0, %v8314_v62  ;;  %v685_v46 = vor.u32 %v684_v14, %v683_v10  ;;  %v695_v37 = vshll.u32 %v15409_v51, %v680_v59  ;;  %v688_v50 = vor.u32 %v687_v20, %v686_v17 }
 0x114   :  { %v313_v25 = vshll.u32 %v9813_v2, 30  ;;  %v691_v52 = vor.u32 %v690_v21, %v689_v39  ;;  %v694_v53 = vor.u32 %v693_v33, %v692_v22  ;;  %v696_v55 = vshrl.u32 %v15395_v58, %v681_v0 }
 0x115   :  { %v219_v44 = vshll.u32 %v9761_v32, %v9801_v57  ;;  %v220_v61 = vshrl.u32 %v202_v5, %v218_v28  ;;  %v357_v18 = vand.u32 2139095040, %v9670_v23  ;;  %v225_v56 = vor.u32 4788187, %v224_v34 }
 0x116   :  { %v9829_v42 = vsub.s32 %v310_v54, %v313_v25  ;;  %v638_v62 = vsub.s32 4294967266, %v633_v40  ;;  %v697_v63 = vor.u32 %v696_v55, %v695_v37  ;;  %v714_v54 = vshll.u32 %v674_v27, 8 }
 0x117   :  { %v682_v59 = vshrl.u32 %v15417_v41, %v681_v0  ;;  %vm698_vm7 = vcmp.lt.s32.totalorder %v679_v35, 1  ;;  %vm701_vm8 = vcmp.lt.s32.totalorder %v679_v35, 4  ;;  %vm700_vm9 = vcmp.lt.s32.totalorder %v679_v35, 3 }
 0x118   :  { %v316_v15 = vsub.s32 0, %v9829_v42  ;;  %v703_v4 = vsel %vm701_vm8, %v691_v52, 2102212464  ;;  %v706_v6 = vsel %vm698_vm7, %v685_v46, %v688_v50  ;;  %v707_v10 = vsel %vm701_vm8, %v694_v53, 920167782 }
 0x119   :  { %vm699_vm10 = vcmp.lt.s32.totalorder %v679_v35, 2  ;;  %v708_v57 = vsel %vm700_vm9, %v691_v52, %v707_v10  ;;  %v358_v5 = vshrl.u32 %v357_v18, 23  ;;  %v634_v14 = vsub.s32 32, %v633_v40 }
 0x11a   :  { %v8301_v3 = vmin.u32 %v316_v15, %v9829_v42  ;;  %v709_v17 = vsel %vm699_vm10, %v706_v6, %v708_v57  ;;  %v710_v20 = vsel %vm698_vm7, %v688_v50, %v691_v52  ;;  %v711_v39 = vsel %vm701_vm8, %v697_v63, 1326507024 }
 0x11b   :  { %v639_v21 = vadd.s32 127, %v638_v62  ;;  %v702_v22 = vsel %vm698_vm7, %v682_v59, %v685_v46  ;;  %v704_v28 = vsel %vm700_vm9, %v688_v50, %v703_v4  ;;  %v712_v25 = vsel %vm700_vm9, %v694_v53, %v711_v39 }
 0x11c   :  { %v318_v32 = vclz %v8301_v3  ;;  %v221_v0 = vor.u32 %v220_v61, %v219_v44  ;;  %v713_v27 = vsel %vm699_vm10, %v710_v20, %v712_v25  ;;  %v8304_v18 = vadd.s32 4294967169, %v358_v5 }
 0x11d   :  { %v9841_v34 = vmul.u32.u64.low %v714_v54, %v709_v17  ;;  %v9842_v33 = vmul.u32.u64.high %v714_v54, %v709_v17, %v9841_v34  ;;  %v9845_v55 = vmul.u32.u64.low %v714_v54, %v713_v27  ;;  %v9846_v15 = vmul.u32.u64.high %v714_v54, %v713_v27, %v9845_v55 }
 0x11e   :  { %v8302_v37 = vadd.s32 4294967294, %v318_v32  ;;  %v226_v3 = vand.u32 2147483647, %v225_v56  ;;  %v636_v6 = vshrl.u32 %v618_v43, %v634_v14  ;;  %v705_v52 = vsel %vm699_vm10, %v702_v22, %v704_v28 }
 0x11f   :  { %vm148_vm11 = vcmp.lt.s32.totalorder %v9653_v7, 0  ;;  %v640_v46 = vshll.u32 %v639_v21, 23  ;;  %v354_v50 = vand.u32 2147483647, %v9670_v23  ;;  %v364_v53 = vadd.s32 1, %v8304_v18 }
 0x120   :  { %v228_v44 = vcvt.s32.f32 %v221_v0  ;;  %v9854_v61 = vsel %vm148_vm11, %v232_v29, %v9750_v19  ;;  %v635_v62 = vshll.u32 %v9782_v16, %v633_v40  ;;  %v724_v63 = vadd.s32 1, %v9842_v33 }
 0x121   :  { %v648_v43 = vsub.s32 4, %v9775_v60  ;;  %vm8303_vm12 = vcmp.lt.s32.totalorder %v8302_v37, 0  ;;  %v721_v35 = vmul.u32 %v714_v54, %v705_v52  ;;  %vm723_vm13 = vc.u32 %v9846_v15, %v9841_v34 }
 0x122   :  { %v229_v56 = vmul.f32 %v228_v44, %v226_v3  ;;  %v637_v59 = vor.u32 %v636_v6, %v635_v62  ;;  %v725_v4 = vsel %vm723_vm13, %v724_v63, %v9842_v33  ;;  %vm365_vm14 = vcmp.gt.s32.totalorder %v364_v53, 0 }
 0x123   :  { %v641_v10 = vor.u32 4788187, %v640_v46  ;;  %v726_v32 = vadd.s32 %v725_v4, %v721_v35  ;;  %v361_v19 = vand.u32 8388607, %v354_v50  ;;  %v366_v16 = vsel %vm365_vm14, %v364_v53, 0 }
 0x124   :  { %vm9866_vm15 = vcmp.le.f32.partialorder %v146_v9, 0.7853982  ;;  %v9870_v40 = vsel %vm8303_vm12, 0, %v8302_v37  ;;  %v368_v54 = vand.u32 31, %v366_v16  ;;  %vm9877_vm0 = vcmp.le.f32.partialorder %v562_v13, 0.7853982 }
 0x125   :  { %v235_v57 = vsel %vm9866_vm15, 0, %v9854_v61  ;;  %vm564_vm1 = vcmp.lt.s32.totalorder %v9655_v8, 0  ;;  %v727_v14 = vadd.s32 536870912, %v726_v32  ;;  %v230_v9 = vxor.u32 2147483648, %v229_v56 }
 0x126   :  { %v644_v17 = vcvt.s32.f32 %v637_v59  ;;  %v649_v20 = vsel %vm564_vm1, %v648_v43, %v9775_v60  ;;  %v369_v39 = vsub.s32 32, %v368_v54  ;;  %v642_v21 = vand.u32 2147483647, %v641_v10 }
 0x127   :  { %v326_v22 = vsub.s32 4294967266, %v9870_v40  ;;  %v9886_v28 = vshrl.u32 %v727_v14, 30  ;;  %v362_v25 = vor.u32 8388608, %v361_v19  ;;  %v773_v33 = vand.u32 2139095040, %v9672_v24 }
 0x128   :  { %v372_v13 = vshrl.u32 %v15404_v45, %v369_v39  ;;  %v375_v0 = vshrl.u32 %v15406_v47, %v369_v39  ;;  %v378_v27 = vshrl.u32 %v15402_v49, %v369_v39  ;;  %v371_v37 = vshll.u32 %v15417_v41, %v368_v54 }
 0x129   :  { %v374_v55 = vshll.u32 %v15404_v45, %v368_v54  ;;  %v377_v60 = vshll.u32 %v15406_v47, %v368_v54  ;;  %v381_v18 = vshrl.u32 %v15409_v51, %v369_v39  ;;  %v367_v3 = vshrl.u32 %v366_v16, 5 }
 0x12a   :  { %v380_v6 = vshll.u32 %v15402_v49, %v368_v54  ;;  %v383_v52 = vshll.u32 %v15409_v51, %v368_v54  ;;  %v384_v46 = vshrl.u32 %v15395_v58, %v369_v39  ;;  %v729_v53 = vshll.u32 %v9886_v28, 30 }
 0x12b   :  { %v373_v44 = vor.u32 %v372_v13, %v371_v37  ;;  %v376_v61 = vor.u32 %v375_v0, %v374_v55  ;;  %v379_v62 = vor.u32 %v378_v27, %v377_v60  ;;  %v651_v63 = vsel %vm9877_vm0, 0, %v649_v20 }
 0x12c   :  { %v306_v43 = vadd.s32 %v9796_v26, %v9794_v48  ;;  %v327_v35 = vadd.s32 127, %v326_v22  ;;  %v382_v59 = vor.u32 %v381_v18, %v380_v6  ;;  %v231_v4 = vsel %vm148_vm11, %v230_v9, %v229_v56 }
 0x12d   :  { %v645_v10 = vmul.f32 %v644_v17, %v642_v21  ;;  %v322_v19 = vsub.s32 32, %v9870_v40  ;;  %v385_v16 = vor.u32 %v384_v46, %v383_v52  ;;  %vm386_vm2 = vcmp.lt.s32.totalorder %v367_v3, 1 }
 0x12e   :  { %vm389_vm3 = vcmp.lt.s32.totalorder %v367_v3, 4  ;;  %v402_v54 = vshll.u32 %v362_v25, 8  ;;  %v774_v14 = vshrl.u32 %v773_v33, 23  ;;  %v9907_v13 = vsub.s32 %v726_v32, %v729_v53 }
 0x12f   :  { %v370_v20 = vshrl.u32 %v15417_v41, %v369_v39  ;;  %v391_v0 = vsel %vm389_vm3, %v379_v62, 2102212464  ;;  %v394_v27 = vsel %vm386_vm2, %v373_v44, %v376_v61  ;;  %v328_v48 = vshll.u32 %v327_v35, 23 }
 0x130   :  { %vm388_vm4 = vcmp.lt.s32.totalorder %v367_v3, 3  ;;  %v395_v26 = vsel %vm389_vm3, %v382_v59, 920167782  ;;  %v398_v22 = vsel %vm386_vm2, %v376_v61, %v379_v62  ;;  %vm387_vm5 = vcmp.lt.s32.totalorder %v367_v3, 2 }
 0x131   :  { %v390_v56 = vsel %vm386_vm2, %v370_v20, %v373_v44  ;;  %v396_v9 = vsel %vm388_vm4, %v379_v62, %v395_v26  ;;  %v399_v17 = vsel %vm389_vm3, %v385_v16, 1326507024  ;;  %v392_v21 = vsel %vm388_vm4, %v376_v61, %v391_v0 }
 0x132   :  { %v397_v37 = vsel %vm387_vm5, %v394_v27, %v396_v9  ;;  %v400_v55 = vsel %vm388_vm4, %v382_v59, %v399_v17  ;;  %v8320_v60 = vadd.s32 4294967169, %v774_v14  ;;  %v732_v25 = vsub.s32 0, %v9907_v13 }
 0x133   :  { %v401_v32 = vsel %vm387_vm5, %v398_v22, %v400_v55  ;;  %v9911_v33 = vmul.u32.u64.low %v402_v54, %v397_v37  ;;  %v9912_v18 = vmul.u32.u64.high %v402_v54, %v397_v37, %v9911_v33  ;;  %v324_v39 = vshrl.u32 %v306_v43, %v322_v19 }
 0x134   :  { %v9915_v6 = vmul.u32.u64.low %v402_v54, %v401_v32  ;;  %v9916_v52 = vmul.u32.u64.high %v402_v54, %v401_v32, %v9915_v6  ;;  %v780_v46 = vadd.s32 1, %v8320_v60  ;;  %v239_v3 = vadd.s32 3, %v235_v57 }
 0x135   :  { %v393_v53 = vsel %vm387_vm5, %v390_v56, %v392_v21  ;;  %v15394_v44 = vand.u32 2147483647, %v9672_v24  ;;  %v655_v61 = vadd.s32 3, %v651_v63  ;;  %v323_v62 = vshll.u32 %v9829_v42, %v9870_v40 }
 0x136   :  { %v329_v35 = vor.u32 4788187, %v328_v48  ;;  %vm781_vm6 = vcmp.gt.s32.totalorder %v780_v46, 0  ;;  %v234_v59 = vsel %vm9866_vm15, %v9653_v7, %v231_v4  ;;  %v646_v16 = vxor.u32 2147483648, %v645_v10 }
 0x137   :  { %v8317_v43 = vmin.u32 %v732_v25, %v9907_v13  ;;  %v412_v19 = vadd.s32 1, %v9912_v18  ;;  %v325_v14 = vor.u32 %v324_v39, %v323_v62  ;;  %v409_v57 = vmul.u32 %v402_v54, %v393_v53 }
 0x138   :  { %vm411_vm7 = vc.u32 %v9916_v52, %v9911_v33  ;;  %v782_v63 = vsel %vm781_vm6, %v780_v46, 0  ;;  %v9928_v20 = vand.u32 3, %v239_v3  ;;  %vm252_vm8 = vcmp.lt.s32.totalorder %v9659_v11, 0 }
 0x139   :  { %v413_v42 = vsel %vm411_vm7, %v412_v19, %v9912_v18  ;;  %v777_v29 = vand.u32 8388607, %v15394_v44  ;;  %v9934_v40 = vand.u32 3, %v655_v61  ;;  %v330_v4 = vand.u32 2147483647, %v329_v35 }
 0x13a   :  { %v414_v0 = vadd.s32 %v413_v42, %v409_v57  ;;  %v784_v27 = vand.u32 31, %v782_v63  ;;  %9300 = vcosq.f32 %v234_v59  ;;  %v647_v54 = vsel %vm564_vm1, %v646_v16, %v645_v10 }
 0x13b   :  { %v336_v48 = vsub.s32 4, %v9813_v2  ;;  %v734_v26 = vclz %v8317_v43  ;;  %v332_v22 = vcvt.s32.f32 %v325_v14  ;;  %v778_v21 = vor.u32 8388608, %v777_v29 }
 0x13c   :  { %v415_v56 = vadd.s32 536870912, %v414_v0  ;;  %v785_v9 = vsub.s32 32, %v784_v27  ;;  %v787_v17 = vshll.u32 %v15417_v41, %v784_v27  ;;  %v790_v37 = vshll.u32 %v15404_v45, %v784_v27 }
 0x13d   :  { %v793_v55 = vshll.u32 %v15406_v47, %v784_v27  ;;  %v796_v60 = vshll.u32 %v15402_v49, %v784_v27  ;;  %v333_v25 = vmul.f32 %v332_v22, %v330_v4  ;;  %v8318_v39 = vadd.s32 4294967294, %v734_v26 }
 0x13e   :  { %v9943_v32 = vshrl.u32 %v415_v56, 30  ;;  %v788_v10 = vshrl.u32 %v15404_v45, %v785_v9  ;;  %v791_v18 = vshrl.u32 %v15406_v47, %v785_v9  ;;  %v794_v6 = vshrl.u32 %v15402_v49, %v785_v9 }
 0x13f   :  { %v797_v46 = vshrl.u32 %v15409_v51, %v785_v9  ;;  %v799_v3 = vshll.u32 %v15409_v51, %v784_v27  ;;  %v783_v61 = vshrl.u32 %v782_v63, 5  ;;  %v461_v35 = vand.u32 2139095040, %v9674_v30 }
 0x140   :  { %v417_v53 = vshll.u32 %v9943_v32, 30  ;;  %v789_v62 = vor.u32 %v788_v10, %v787_v17  ;;  %v792_v16 = vor.u32 %v791_v18, %v790_v37  ;;  %v795_v43 = vor.u32 %v794_v6, %v793_v55 }
 0x141   :  { %v798_v19 = vor.u32 %v797_v46, %v796_v60  ;;  %v800_v14 = vshrl.u32 %v15395_v58, %v785_v9  ;;  %9302 = vsinq.f32 %v234_v59  ;;  %v9956_v57 = vsel %vm9877_vm0, %v9655_v8, %v647_v54 }
 0x142   :  { %vm9960_vm9 = vcmp.le.f32.partialorder %v250_v38, 0.7853982  ;;  %v9967_v63 = vsel %vm252_vm8, %v336_v48, %v9813_v2  ;;  %v9969_v29 = vsub.s32 %v414_v0, %v417_v53  ;;  %v334_v4 = vxor.u32 2147483648, %v333_v25 }
 0x143   :  { %v786_v59 = vshrl.u32 %v15417_v41, %v785_v9  ;;  %v801_v27 = vor.u32 %v800_v14, %v799_v3  ;;  %v818_v5 = vshll.u32 %v778_v21, 8  ;;  %vm8319_vm10 = vcmp.lt.s32.totalorder %v8318_v39, 0 }
 0x144   :  { %v420_v54 = vsub.s32 0, %v9969_v29  ;;  %vm802_vm11 = vcmp.lt.s32.totalorder %v783_v61, 1  ;;  %vm805_vm12 = vcmp.lt.s32.totalorder %v783_v61, 4  ;;  %v9973_v38 = vpop.eup %9300  ;;  %v462_v17 = vshrl.u32 %v461_v35, 23 }
 0x145   :  { %v807_v26 = vsel %vm805_vm12, %v795_v43, 2102212464  ;;  %v810_v22 = vsel %vm802_vm11, %v789_v62, %v792_v16  ;;  %v811_v56 = vsel %vm805_vm12, %v798_v19, 920167782  ;;  %vm804_vm13 = vcmp.lt.s32.totalorder %v783_v61, 3 }
 0x146   :  { %v8305_v2 = vmin.u32 %v420_v54, %v9969_v29  ;;  %v814_v0 = vsel %vm802_vm11, %v792_v16, %v795_v43  ;;  %v15392_v48 = vand.u32 2147483647, %v9674_v30  ;;  %vm803_vm14 = vcmp.lt.s32.totalorder %v783_v61, 2 }
 0x147   :  { %v806_v9 = vsel %vm802_vm11, %v786_v59, %v789_v62  ;;  %v812_v21 = vsel %vm804_vm13, %v795_v43, %v811_v56  ;;  %v815_v37 = vsel %vm805_vm12, %v801_v27, 1326507024  ;;  %v808_v60 = vsel %vm804_vm13, %v792_v16, %v807_v26 }
 0x148   :  { %v422_v55 = vclz %v8305_v2  ;;  %v813_v10 = vsel %vm803_vm14, %v810_v22, %v812_v21  ;;  %v816_v18 = vsel %vm804_vm13, %v798_v19, %v815_v37  ;;  %v8308_v53 = vadd.s32 4294967169, %v462_v17 }
 0x149   :  { %v817_v6 = vsel %vm803_vm14, %v814_v0, %v816_v18  ;;  %v9979_v46 = vmul.u32.u64.low %v818_v5, %v813_v10  ;;  %v9980_v3 = vmul.u32.u64.high %v818_v5, %v813_v10, %v9979_v46  ;;  %v9984_v35 = vsel %vm8319_vm10, 0, %v8318_v39 }
 0x14a   :  { %v8306_v14 = vadd.s32 4294967294, %v422_v55  ;;  %v9986_v54 = vmul.u32.u64.low %v818_v5, %v817_v6  ;;  %v9987_v62 = vmul.u32.u64.high %v818_v5, %v817_v6, %v9986_v54  ;;  %9304 = vcosq.f32 %v9956_v57 }
 0x14b   :  { %v468_v43 = vadd.s32 1, %v8308_v53  ;;  %v877_v19 = vand.u32 2139095040, %v9676_v31  ;;  %v9994_v59 = vpop.eup %9302  ;;  %v9998_v27 = vsel %vm252_vm8, %v334_v4, %v333_v25  ;;  %v10002_v39 = vadd.s32 %v9841_v34, %v9846_v15 }
 0x14c   :  { %vm8307_vm15 = vcmp.lt.s32.totalorder %v8306_v14, 0  ;;  %v809_v26 = vsel %vm803_vm14, %v806_v9, %v808_v60  ;;  %v742_v22 = vsub.s32 4294967266, %v9984_v35  ;;  %v828_v17 = vadd.s32 1, %v9980_v3 }
 0x14d   :  { %v425_v56 = vsel %vm8307_vm15, 0, %v8306_v14  ;;  %vm469_vm0 = vcmp.gt.s32.totalorder %v468_v43, 0  ;;  %v410_v2 = vadd.s32 %v9911_v33, %v9916_v52  ;;  %v465_v25 = vand.u32 8388607, %v15392_v48 }
 0x14e   :  { %v426_v0 = vsub.s32 32, %v425_v56  ;;  %v430_v21 = vsub.s32 4294967266, %v425_v56  ;;  %v825_v4 = vmul.u32 %v818_v5, %v809_v26  ;;  %vm827_vm1 = vc.u32 %v9987_v62, %v9979_v46 }
 0x14f   :  { %v470_v34 = vsel %vm469_vm0, %v468_v43, 0  ;;  %v878_v15 = vshrl.u32 %v877_v19, 23  ;;  %vm356_vm2 = vcmp.lt.s32.totalorder %v9670_v23, 0  ;;  %v427_v61 = vshll.u32 %v9969_v29, %v425_v56 }
 0x150   :  { %v428_v9 = vshrl.u32 %v410_v2, %v426_v0  ;;  %v431_v37 = vadd.s32 127, %v430_v21  ;;  %v829_v55 = vsel %vm827_vm1, %v828_v17, %v9980_v3  ;;  %v10016_v33 = vadd.s32 127, %v742_v22 }
 0x151   :  { %v830_v52 = vadd.s32 %v829_v55, %v825_v4  ;;  %v472_v60 = vand.u32 31, %v470_v34  ;;  %v15393_v10 = vand.u32 2147483647, %v9676_v31  ;;  %v440_v6 = vsub.s32 4, %v9943_v32 }
 0x152   :  { %v429_v5 = vor.u32 %v428_v9, %v427_v61  ;;  %v432_v18 = vshll.u32 %v431_v37, 23  ;;  %v466_v53 = vor.u32 8388608, %v465_v25  ;;  %v10020_v54 = vshrl.u32 %v470_v34, 5 }
 0x153   :  { %v831_v14 = vadd.s32 536870912, %v830_v52  ;;  %v473_v43 = vsub.s32 32, %v472_v60  ;;  %v8324_v29 = vadd.s32 4294967169, %v878_v15  ;;  %v475_v3 = vshll.u32 %v15417_v41, %v472_v60 }
 0x154   :  { %v433_v19 = vor.u32 4788187, %v432_v18  ;;  %v436_v26 = vcvt.s32.f32 %v429_v5  ;;  %v478_v22 = vshll.u32 %v15404_v45, %v472_v60  ;;  %v10024_v56 = vpop.eup %9304  ;;  %v481_v21 = vshll.u32 %v15406_v47, %v472_v60 }
 0x155   :  { %v10026_v17 = vshrl.u32 %v831_v14, 30  ;;  %v476_v2 = vshrl.u32 %v15404_v45, %v473_v43  ;;  %v479_v0 = vshrl.u32 %v15406_v47, %v473_v43  ;;  %v482_v4 = vshrl.u32 %v15402_v49, %v473_v43 }
 0x156   :  { %v434_v25 = vand.u32 2147483647, %v433_v19  ;;  %v484_v34 = vshll.u32 %v15402_v49, %v472_v60  ;;  %v485_v15 = vshrl.u32 %v15409_v51, %v473_v43  ;;  %v487_v55 = vshll.u32 %v15409_v51, %v472_v60 }
 0x157   :  { %v833_v61 = vshll.u32 %v10026_v17, 30  ;;  %v477_v9 = vor.u32 %v476_v2, %v475_v3  ;;  %v480_v37 = vor.u32 %v479_v0, %v478_v22  ;;  %v483_v18 = vor.u32 %v482_v4, %v481_v21 }
 0x158   :  { %v437_v5 = vmul.f32 %v436_v26, %v434_v25  ;;  %v486_v14 = vor.u32 %v485_v15, %v484_v34  ;;  %v488_v1 = vshrl.u32 %v15395_v58, %v473_v43  ;;  %v738_v36 = vsub.s32 32, %v9984_v35 }
 0x159   :  { %v744_v19 = vshll.u32 %v10016_v33, 23  ;;  %v10042_v48 = vsel %vm356_vm2, %v440_v6, %v9943_v32  ;;  %v10044_v16 = vsub.s32 %v830_v52, %v833_v61  ;;  %vm10048_vm3 = vcmp.le.f32.partialorder %v354_v50, 0.7853982 }
 0x15a   :  { %v438_v26 = vxor.u32 2147483648, %v437_v5  ;;  %v489_v3 = vor.u32 %v488_v1, %v487_v55  ;;  %v506_v22 = vshll.u32 %v466_v53, 8  ;;  %v10054_v2 = vand.u32 8388607, %v15393_v10 }
 0x15b   :  { %v836_v33 = vsub.s32 0, %v10044_v16  ;;  %vm490_vm4 = vcmp.lt.s32.totalorder %v10020_v54, 1  ;;  %vm493_vm5 = vcmp.lt.s32.totalorder %v10020_v54, 4  ;;  %v884_v32 = vadd.s32 1, %v8324_v29 }
 0x15c   :  { %v474_v52 = vshrl.u32 %v15417_v41, %v473_v43  ;;  %v495_v50 = vsel %vm493_vm5, %v483_v18, 2102212464  ;;  %v498_v6 = vsel %vm490_vm4, %v477_v9, %v480_v37  ;;  %v499_v0 = vsel %vm493_vm5, %v486_v14, 920167782 }
 0x15d   :  { %v8321_v21 = vmin.u32 %v836_v33, %v10044_v16  ;;  %vm491_vm6 = vcmp.lt.s32.totalorder %v10020_v54, 2  ;;  %vm492_vm7 = vcmp.lt.s32.totalorder %v10020_v54, 3  ;;  %v502_v1 = vsel %vm490_vm4, %v480_v37, %v483_v18 }
 0x15e   :  { %v439_v53 = vsel %vm356_vm2, %v438_v26, %v437_v5  ;;  %v494_v25 = vsel %vm490_vm4, %v474_v52, %v477_v9  ;;  %v500_v4 = vsel %vm492_vm7, %v483_v18, %v499_v0  ;;  %v503_v34 = vsel %vm493_vm5, %v489_v3, 1326507024 }
 0x15f   :  { %v838_v15 = vclz %v8321_v21  ;;  %v496_v29 = vsel %vm492_vm7, %v480_v37, %v495_v50  ;;  %v501_v43 = vsel %vm491_vm6, %v498_v6, %v500_v4  ;;  %v504_v61 = vsel %vm492_vm7, %v486_v14, %v503_v34 }
 0x160   :  { %v505_v55 = vsel %vm491_vm6, %v502_v1, %v504_v61  ;;  %v10069_v33 = vmul.u32.u64.low %v506_v22, %v501_v43  ;;  %v10070_v10 = vmul.u32.u64.high %v506_v22, %v501_v43, %v10069_v33  ;;  %vm885_vm8 = vcmp.gt.s32.totalorder %v884_v32, 0 }
 0x161   :  { %v8322_v44 = vadd.s32 4294967294, %v838_v15  ;;  %v10073_v58 = vmul.u32.u64.low %v506_v22, %v505_v55  ;;  %v10074_v5 = vmul.u32.u64.high %v506_v22, %v505_v55, %v10073_v58  ;;  %v886_v9 = vsel %vm885_vm8, %v884_v32, 0 }
 0x162   :  { %v10077_v18 = vshrl.u32 %v10002_v39, %v738_v36  ;;  %v10079_v37 = vor.u32 4788187, %v744_v19  ;;  %v497_v14 = vsel %vm491_vm6, %v494_v25, %v496_v29  ;;  %v888_v26 = vand.u32 31, %v886_v9 }
 0x163   :  { %v443_v3 = vsel %vm10048_vm3, 0, %v10042_v48  ;;  %v826_v52 = vadd.s32 %v9979_v46, %v9987_v62  ;;  %vm8323_vm10 = vcmp.lt.s32.totalorder %v8322_v44, 0  ;;  %v882_v58 = vor.u32 8388608, %v10054_v2 }
 0x164   :  { %v442_v36 = vsel %vm10048_vm3, %v9670_v23, %v439_v53  ;;  %v841_v39 = vsel %vm8323_vm10, 0, %v8322_v44  ;;  %v516_v19 = vadd.s32 1, %v10070_v10  ;;  %v889_v54 = vsub.s32 32, %v888_v26 }
 0x165   :  { %v842_v32 = vsub.s32 32, %v841_v39  ;;  %v846_v50 = vsub.s32 4294967266, %v841_v39  ;;  %v513_v6 = vmul.u32 %v506_v22, %v497_v14  ;;  %v891_v0 = vshll.u32 %v15417_v41, %v888_v26 }
 0x166   :  { %v843_v21 = vshll.u32 %v10044_v16, %v841_v39  ;;  %vm515_vm11 = vc.u32 %v10074_v5, %v10069_v33  ;;  %v892_v46 = vshrl.u32 %v15404_v45, %v889_v54  ;;  %v894_v62 = vshll.u32 %v15404_v45, %v888_v26 }
 0x167   :  { %v844_v2 = vshrl.u32 %v826_v52, %v842_v32  ;;  %v847_v1 = vadd.s32 127, %v846_v50  ;;  %v517_v44 = vsel %vm515_vm11, %v516_v19, %v10070_v10  ;;  %v895_v53 = vshrl.u32 %v15406_v47, %v889_v54 }
 0x168   :  { %v518_v25 = vadd.s32 %v517_v44, %v513_v6  ;;  %v887_v4 = vshrl.u32 %v886_v9, 5  ;;  %v897_v22 = vshll.u32 %v15406_v47, %v888_v26  ;;  %v898_v34 = vshrl.u32 %v15402_v49, %v889_v54 }
 0x169   :  { %v845_v16 = vor.u32 %v844_v2, %v843_v21  ;;  %v848_v15 = vshll.u32 %v847_v1, 23  ;;  %v893_v29 = vor.u32 %v892_v46, %v891_v0  ;;  %v900_v43 = vshll.u32 %v15402_v49, %v888_v26 }
 0x16a   :  { %vm772_vm12 = vcmp.lt.s32.totalorder %v9672_v24, 0  ;;  %v519_v61 = vadd.s32 536870912, %v518_v25  ;;  %v896_v55 = vor.u32 %v895_v53, %v894_v62  ;;  %v901_v14 = vshrl.u32 %v15409_v51, %v889_v54 }
 0x16b   :  { %v903_v10 = vshll.u32 %v15409_v51, %v888_v26  ;;  %v849_v52 = vor.u32 4788187, %v848_v15  ;;  %v899_v39 = vor.u32 %v898_v34, %v897_v22  ;;  %v15458_v9 = vmov 1326507024  }
 0x16c   :  { %v904_v19 = vshrl.u32 %v15458_v9, %v889_v54  ;;  %v10108_v32 = vshll.u32 %v882_v58, 8  ;;  %9306 = vsinq.f32 %v442_v36  ;;  %v856_v50 = vsub.s32 4, %v10026_v17 }
 0x16d   :  { %v10111_v6 = vshrl.u32 %v519_v61, 30  ;;  %v902_v0 = vor.u32 %v901_v14, %v900_v43  ;;  %v850_v21 = vand.u32 2147483647, %v849_v52  ;;  %v852_v46 = vcvt.s32.f32 %v845_v16 }
 0x16e   :  { %v905_v2 = vor.u32 %v904_v19, %v903_v10  ;;  %vm906_vm13 = vcmp.lt.s32.totalorder %v887_v4, 1  ;;  %v890_v26 = vshrl.u32 %v15417_v41, %v889_v54  ;;  %vm909_vm14 = vcmp.lt.s32.totalorder %v887_v4, 4 }
 0x16f   :  { %v521_v62 = vshll.u32 %v10111_v6, 30  ;;  %v914_v1 = vsel %vm906_vm13, %v893_v29, %v896_v55  ;;  %v853_v44 = vmul.f32 %v852_v46, %v850_v21  ;;  %vm908_vm15 = vcmp.lt.s32.totalorder %v887_v4, 3 }
 0x170   :  { %v911_v58 = vsel %vm909_vm14, %v899_v39, 2102212464  ;;  %v915_v53 = vsel %vm909_vm14, %v902_v0, 920167782  ;;  %vm907_vm0 = vcmp.lt.s32.totalorder %v887_v4, 2  ;;  %v918_v15 = vsel %vm906_vm13, %v896_v55, %v899_v39 }
 0x171   :  { %v10116_v22 = vsub.s32 %v518_v25, %v521_v62  ;;  %v916_v34 = vsel %vm908_vm15, %v899_v39, %v915_v53  ;;  %9308 = vcosq.f32 %v442_v36  ;;  %v854_v16 = vxor.u32 2147483648, %v853_v44 }
 0x172   :  { %v917_v43 = vsel %vm907_vm0, %v914_v1, %v916_v34  ;;  %v919_v61 = vsel %vm909_vm14, %v905_v2, 1326507024  ;;  %v910_v14 = vsel %vm906_vm13, %v890_v26, %v893_v29  ;;  %v912_v10 = vsel %vm908_vm15, %v896_v55, %v911_v58 }
 0x173   :  { %v524_v54 = vsub.s32 0, %v10116_v22  ;;  %v920_v52 = vsel %vm908_vm15, %v902_v0, %v919_v61  ;;  %v855_v19 = vsel %vm772_vm12, %v854_v16, %v853_v44  ;;  %v10134_v36 = vsel %vm9960_vm9, %v9659_v11, %v9998_v27 }
 0x174   :  { %v921_v25 = vsel %vm907_vm0, %v918_v15, %v920_v52  ;;  %v10126_v21 = vmul.u32.u64.low %v10108_v32, %v917_v43  ;;  %v10127_v46 = vmul.u32.u64.high %v10108_v32, %v917_v43, %v10126_v21  ;;  %v447_v29 = vadd.s32 3, %v443_v3 }
 0x175   :  { %v15459_v55 = vand.u32 2147483647, %v9672_v24  ;;  %v8309_v0 = vmin.u32 %v524_v54, %v10116_v22  ;;  %v739_v2 = vshll.u32 %v9907_v13, %v9984_v35  ;;  %v857_v27 = vsel %vm772_vm12, %v856_v50, %v10026_v17 }
 0x176   :  { %v10153_v60 = vmul.u32.u64.low %v10108_v32, %v921_v25  ;;  %v10154_v62 = vmul.u32.u64.high %v10108_v32, %v921_v25, %v10153_v60  ;;  %v9307_v48 = vpop.eup %9306  ;;  %9310 = vsinq.f32 %v9956_v57  ;;  %v913_v1 = vsel %vm907_vm0, %v910_v14, %v912_v10 }
 0x177   :  { %vm10142_vm1 = vcmp.le.f32.partialorder %v15459_v55, 0.7853982  ;;  %v526_v26 = vclz %v8309_v0  ;;  %9312 = vcosq.f32 %v10134_v36  ;;  %v741_v13 = vor.u32 %v10077_v18, %v739_v2 }
 0x178   :  { %v858_v3 = vsel %vm10142_vm1, %v9672_v24, %v855_v19  ;;  %v746_v35 = vand.u32 2147483647, %v10079_v37  ;;  %v932_v17 = vadd.s32 1, %v10127_v46  ;;  %v448_v50 = vand.u32 3, %v447_v29 }
 0x179   :  { %v859_v44 = vsel %vm10142_vm1, 0, %v857_v27  ;;  %v8310_v57 = vadd.s32 4294967294, %v526_v26  ;;  %v243_v58 = vxor.u32 2147483648, %v9994_v59  ;;  %vm238_vm2 = vweird.f32 %v9653_v7 }
 0x17a   :  { %vm446_vm3 = vweird.f32 %v9670_v23  ;;  %9314 = vcosq.f32 %v858_v3  ;;  %v929_v4 = vmul.u32 %v10108_v32, %v913_v1  ;;  %vm931_vm4 = vc.u32 %v10154_v62, %v10126_v21 }
 0x17b   :  { %v246_v18 = vxor.u32 2147483648, %v9973_v38  ;;  %9316 = vsinq.f32 %v858_v3  ;;  %v514_v37 = vadd.s32 %v10069_v33, %v10074_v5  ;;  %vm8311_vm5 = vcmp.lt.s32.totalorder %v8310_v57, 0  ;;  %v9309_v34 = vpop.eup %9308 }
 0x17c   :  { %v933_v53 = vsel %vm931_vm4, %v932_v17, %v10127_v46  ;;  %v529_v15 = vsel %vm8311_vm5, 0, %v8310_v57  ;;  %vm242_vm6 = vcmp.eq.s32.totalorder %v9928_v20, 0  ;;  %vm245_vm7 = vcmp.eq.s32.totalorder %v9928_v20, 2 }
 0x17d   :  { %v934_v16 = vadd.s32 %v933_v53, %v929_v4  ;;  %v530_v32 = vsub.s32 32, %v529_v15  ;;  %v534_v43 = vsub.s32 4294967266, %v529_v15  ;;  %v244_v61 = vsel %vm242_vm6, %v9973_v38, %v243_v58 }
 0x17e   :  { %v247_v54 = vsel %vm245_vm7, %v246_v18, %v9994_v59  ;;  %vm241_vm8 = vcmp.lt.s32.totalorder %v9928_v20, 2  ;;  %vm450_vm10 = vcmp.eq.s32.totalorder %v448_v50, 0  ;;  %v451_v33 = vxor.u32 2147483648, %v9307_v48 }
 0x17f   :  { %v935_v14 = vadd.s32 536870912, %v934_v16  ;;  %v531_v5 = vshll.u32 %v10116_v22, %v529_v15  ;;  %v532_v10 = vshrl.u32 %v514_v37, %v530_v32  ;;  %v535_v52 = vadd.s32 127, %v534_v43 }
 0x180   :  { %v454_v19 = vxor.u32 2147483648, %v9309_v34  ;;  %v248_v46 = vsel %vm241_vm8, %v244_v61, %v247_v54  ;;  %v452_v29 = vsel %vm450_vm10, %v9309_v34, %v451_v33  ;;  %vm453_vm11 = vcmp.eq.s32.totalorder %v448_v50, 2  ;;  %v9311_v55 = vpop.eup %9310 }
 0x181   :  { %v10183_v25 = vshrl.u32 %v935_v14, 30  ;;  %v533_v39 = vor.u32 %v532_v10, %v531_v5  ;;  %v536_v38 = vshll.u32 %v535_v52, 23  ;;  %vm449_vm12 = vcmp.lt.s32.totalorder %v448_v50, 2  ;;  %v10185_v0 = vpop.eup %9312 }
 0x182   :  { %v455_v59 = vsel %vm453_vm11, %v454_v19, %v9307_v48  ;;  %v748_v20 = vcvt.s32.f32 %v741_v13  ;;  %v544_v2 = vsub.s32 4, %v10111_v6  ;;  %v863_v60 = vadd.s32 3, %v859_v44 }
 0x183   :  { %v937_v22 = vshll.u32 %v10183_v25, 30  ;;  %v456_v27 = vsel %vm449_vm12, %v452_v29, %v455_v59  ;;  %v537_v3 = vor.u32 4788187, %v536_v38  ;;  %v10191_v26 = vsel %vm238_vm2, nan, %v248_v46 }
 0x184   :  { %v10195_v1 = vsel %vm446_vm3, nan, %v456_v27  ;;  %v9315_v17 = vpop.eup %9314  ;;  %9318 = vsinq.f32 %v10134_v36  ;;  %v15462_v48 = vsel %vm9960_vm9, 0, %v9967_v63  ;;  %v749_v57 = vmul.f32 %v748_v20, %v746_v35 }
 0x185   :  { %v343_v13 = vadd.s32 3, %v15462_v48  ;;  %v10202_v50 = vsub.s32 %v934_v16, %v937_v22  ;;  %v8855_v44 = vpack.c.bf16 %v10195_v1, %v10191_v26  ;;  %v9317_v7 = vpop.eup %9316  ;;  %vm460_vm13 = vcmp.lt.s32.totalorder %v9674_v30, 0 }
 0x186   :  { %v538_v23 = vand.u32 2147483647, %v537_v3  ;;  %v540_v58 = vcvt.s32.f32 %v533_v39  ;;  %v545_v36 = vsel %vm460_vm13, %v544_v2, %v10111_v6  ;;  %vm654_vm9 = vweird.f32 %v9655_v8  ;;  %v985_v8 = vld [vmem:[%s15381_s3 + $0x18] sm:$0xff] }
 0x187   :  { %v940_v42 = vsub.s32 0, %v10202_v50  ;;  %v864_v63 = vand.u32 3, %v863_v60  ;;  %v659_v18 = vxor.u32 2147483648, %v9311_v55  ;;  %v10212_v37 = vand.u32 3, %v343_v13 }
 0x188   :  { %v541_v4 = vmul.f32 %v540_v58, %v538_v23  ;;  %vm668_vm14 = vcmp.lt.s32.totalorder %v9661_v12, 0  ;;  %v15463_v35 = vand.u32 2147483647, %v9674_v30  ;;  %v662_v6 = vxor.u32 2147483648, %v10024_v56 }
 0x189   :  { %v8325_v34 = vmin.u32 %v940_v42, %v10202_v50  ;;  %v750_v15 = vxor.u32 2147483648, %v749_v57  ;;  %vm658_vm0 = vcmp.eq.s32.totalorder %v9934_v40, 0  ;;  %vm657_vm1 = vcmp.lt.s32.totalorder %v9934_v40, 2 }
 0x18a   :  { %vm10217_vm15 = vcmp.le.f32.partialorder %v15463_v35, 0.7853982  ;;  %v542_v16 = vxor.u32 2147483648, %v541_v4  ;;  %v660_v61 = vsel %vm658_vm0, %v10024_v56, %v659_v18  ;;  %vm661_vm2 = vcmp.eq.s32.totalorder %v9934_v40, 2  ;;  %v982_v40 = vld [vmem:[%s15381_s3] sm:$0xff]  ;;  %v984_v56 = vld [vmem:[%s15381_s3 + $0x10] sm:$0xff] }
 0x18b   :  { %v547_v32 = vsel %vm10217_vm15, 0, %v545_v36  ;;  %v942_v43 = vclz %v8325_v34  ;;  %v663_v14 = vsel %vm661_vm2, %v662_v6, %v9311_v55  ;;  %vm865_vm3 = vcmp.lt.s32.totalorder %v864_v63, 2  ;;  %v8368_v18 = vld [vmem:[%s15381_s3 + $0x20] sm:$0xff]  ;;  %v8369_v35 = vld [vmem:[%s15381_s3 + $0x28] sm:$0xff] }
 0x18c   :  { %v543_v54 = vsel %vm460_vm13, %v542_v16, %v541_v4  ;;  %v867_v33 = vxor.u32 2147483648, %v9317_v7  ;;  %vm866_vm4 = vcmp.eq.s32.totalorder %v864_v63, 0  ;;  %v870_v52 = vxor.u32 2147483648, %v9315_v17 }
 0x18d   :  { %v546_v5 = vsel %vm10217_vm15, %v9674_v30, %v543_v54  ;;  %v8326_v10 = vadd.s32 4294967294, %v942_v43  ;;  %v664_v19 = vsel %vm657_vm1, %v660_v61, %v663_v14  ;;  %vm869_vm5 = vcmp.eq.s32.totalorder %v864_v63, 2 }
 0x18e   :  { %9320 = vcosq.f32 %v546_v5  ;;  %v868_v46 = vsel %vm866_vm4, %v9315_v17, %v867_v33  ;;  %v9319_v29 = vpop.eup %9318  ;;  %v871_v55 = vsel %vm869_vm5, %v870_v52, %v9317_v7  ;;  %vm862_vm7 = vweird.f32 %v9672_v24  ;;  %v983_v17 = vld [vmem:[%s15381_s3 + $0x8] sm:$0xff] }
 0x18f   :  { %9322 = vsinq.f32 %v546_v5  ;;  %vm8327_vm6 = vcmp.lt.s32.totalorder %v8326_v10, 0  ;;  %v930_v39 = vadd.s32 %v10126_v21, %v10154_v62  ;;  %v872_v59 = vsel %vm865_vm3, %v868_v46, %v871_v55  ;;  %v8412_v55 = vld [vmem:[%s15381_s3 + $0x40] sm:$0xff] }
 0x190   :  { %v945_v38 = vsel %vm8327_vm6, 0, %v8326_v10  ;;  %v15397_v20 = vmov 0   ;;  %v10248_v27 = vsel %vm654_vm9, nan, %v664_v19  ;;  %v10250_v60 = vsel %vm862_vm7, nan, %v872_v59 }
 0x191   :  { %9295 = vset.pattern.permute.xlu0 %v15397_v20  ;;  %9296 = vset.pattern.permute.xlu1 %v15397_v20  ;;  %v946_v2 = vsub.s32 32, %v945_v38  ;;  %v950_v22 = vsub.s32 4294967266, %v945_v38  ;;  %v751_v24 = vsel %vm668_vm14, %v750_v15, %v749_v57  ;;  %v551_v21 = vadd.s32 3, %v547_v32 }
 0x192   :  { %988 = vperm.xlu0 %9295, %v982_v40   ;;  %998 = vperm.xlu1 %9296, %v984_v56   ;;  %v347_v62 = vxor.u32 2147483648, %v9319_v29  ;;  %v8859_v3 = vpack.c.bf16 %v10250_v60, %v10248_v27  ;;  %v947_v48 = vshll.u32 %v10202_v50, %v945_v38  ;;  %v350_v23 = vxor.u32 2147483648, %v10185_v0  ;;  %v979_v27 = vld [vmem:[%s15382_s2 + $0x8] sm:$0xff]  ;;  %v8546_v60 = vld [vmem:[%s15381_s3 + $0xb0] sm:$0xff] }
 0x193   :  { %v948_v13 = vshrl.u32 %v930_v39, %v946_v2  ;;  %v951_v7 = vadd.s32 127, %v950_v22  ;;  %v15466_v57 = vand.u32 2147483647, %v9661_v12  ;;  %v752_v36 = vsub.s32 4, %v9886_v28  ;;  %v8413_v2 = vld [vmem:[%s15381_s3 + $0x48] sm:$0xff] }
 0x194   :  { %v552_v50 = vand.u32 3, %v551_v21  ;;  %vm346_vm10 = vcmp.eq.s32.totalorder %v10212_v37, 0  ;;  %vm349_vm11 = vcmp.eq.s32.totalorder %v10212_v37, 2  ;;  %vm345_vm12 = vcmp.lt.s32.totalorder %v10212_v37, 2 }
 0x195   :  { %vm10266_vm8 = vcmp.le.f32.partialorder %v15466_v57, 0.7853982  ;;  %v949_v63 = vor.u32 %v948_v13, %v947_v48  ;;  %v952_v4 = vshll.u32 %v951_v7, 23  ;;  %v348_v34 = vsel %vm346_vm10, %v10185_v0, %v347_v62  ;;  %v8370_v0 = vld [vmem:[%s15381_s3 + $0x30] sm:$0xff]  ;;  %v8456_v7 = vld [vmem:[%s15381_s3 + $0x60] sm:$0xff] }
 0x196   :  { %v754_v42 = vsel %vm10266_vm8, %v9661_v12, %v751_v24  ;;  %993 = vperm.xlu0 %9295, %v983_v17   ;;  %1003 = vperm.xlu1 %9296, %v985_v8   ;;  %v351_v6 = vsel %vm349_vm11, %v350_v23, %v9319_v29  ;;  %v753_v16 = vsel %vm668_vm14, %v752_v36, %v9886_v28  ;;  %vm557_vm13 = vcmp.eq.s32.totalorder %v552_v50, 2  ;;  %v8371_v28 = vld [vmem:[%s15381_s3 + $0x38] sm:$0xff]  ;;  %v8458_v57 = vld [vmem:[%s15381_s3 + $0x70] sm:$0xff] }
 0x197   :  { %v953_v53 = vor.u32 4788187, %v952_v4  ;;  %9324 = vcosq.f32 %v754_v42  ;;  %v956_v61 = vcvt.s32.f32 %v949_v63  ;;  %v352_v14 = vsel %vm345_vm12, %v348_v34, %v351_v6  ;;  %v8415_v17 = vld [vmem:[%s15381_s3 + $0x58] sm:$0xff]  ;;  %v8500_v34 = vld [vmem:[%s15381_s3 + $0x80] sm:$0xff] }
 0x198   :  { %v9321_v15 = vpop.eup %9320  ;;  %9326 = vsinq.f32 %v754_v42  ;;  %v960_v10 = vsub.s32 4, %v10183_v25  ;;  %vm554_vm9 = vcmp.eq.s32.totalorder %v552_v50, 0  ;;  %vm553_vm14 = vcmp.lt.s32.totalorder %v552_v50, 2  ;;  %v8459_v63 = vld [vmem:[%s15381_s3 + $0x78] sm:$0xff] }
 0x199   :  { %v9323_v32 = vpop.eup %9322  ;;  %v954_v43 = vand.u32 2147483647, %v953_v53  ;;  %v558_v54 = vxor.u32 2147483648, %v9321_v15  ;;  %vm342_vm15 = vweird.f32 %v9659_v11  ;;  %vm550_vm0 = vweird.f32 %v9674_v30 }
 0x19a   :  { %1952 = vperm.xlu0 %9295, %v8368_v18   ;;  %1957 = vperm.xlu1 %9296, %v8369_v35   ;;  %v555_v33 = vxor.u32 2147483648, %v9323_v32  ;;  %v755_v40 = vsel %vm10266_vm8, 0, %v753_v16  ;;  %vm876_vm1 = vcmp.lt.s32.totalorder %v9676_v31, 0  ;;  %v353_v56 = vsel %vm342_vm15, nan, %v352_v14  ;;  %v8503_v14 = vld [vmem:[%s15381_s3 + $0x98] sm:$0xff] }
 0x19b   :  { %v957_v5 = vmul.f32 %v956_v61, %v954_v43  ;;  %v559_v37 = vsel %vm557_vm13, %v558_v54, %v9323_v32  ;;  %v15469_v39 = vand.u32 2147483647, %v9676_v31  ;;  %v961_v38 = vsel %vm876_vm1, %v960_v10, %v10183_v25  ;;  %v8414_v25 = vld [vmem:[%s15381_s3 + $0x50] sm:$0xff]  ;;  %v8589_v10 = vld [vmem:[%s15381_s3 + $0xc8] sm:$0xff] }
 0x19c   :  { %v556_v52 = vsel %vm554_vm9, %v9321_v15, %v555_v33  ;;  %v759_v21 = vadd.s32 3, %v755_v40  ;;  %v8501_v15 = vld [vmem:[%s15381_s3 + $0x88] sm:$0xff]  ;;  %vm758_vm10 = vweird.f32 %v9661_v12  ;;  %vm966_vm11 = vweird.f32 %v9676_v31  ;;  %v8502_v54 = vld [vmem:[%s15381_s3 + $0x90] sm:$0xff]  ;;  %v978_v12 = vld [vmem:[%s15382_s2] sm:$0xff] }
 0x19d   :  { %v958_v19 = vxor.u32 2147483648, %v957_v5  ;;  %v560_v46 = vsel %vm553_vm14, %v556_v52, %v559_v37  ;;  %vm10304_vm2 = vcmp.le.f32.partialorder %v15469_v39, 0.7853982  ;;  %vm1006_vm12 = vcmask 261120   ;;  %v8545_v33 = vld [vmem:[%s15381_s3 + $0xa8] sm:$0xff]  ;;  %v981_v37 = vld [vmem:[%s15382_s2 + $0x18] sm:$0xff] }
 0x19e   :  { %1962 = vperm.xlu0 %9295, %v8370_v0   ;;  %1967 = vperm.xlu1 %9296, %v8371_v28   ;;  %v561_v29 = vsel %vm550_vm0, nan, %v560_v46  ;;  %v963_v62 = vsel %vm10304_vm2, 0, %v961_v38  ;;  %v760_v13 = vand.u32 3, %v759_v21  ;;  %v15472_v0 = vmov 0.0   ;;  %v980_v28 = vld [vmem:[%s15382_s2 + $0x10] sm:$0xff] }
 0x19f   :  { %v959_v30 = vsel %vm876_vm1, %v958_v19, %v957_v5  ;;  %v8853_v59 = vpack.c.bf16 %v561_v29, %v353_v56  ;;  %v967_v48 = vadd.s32 3, %v963_v62  ;;  %v8588_v5 = vld [vmem:[%s15381_s3 + $0xc0] sm:$0xff]  ;;  %v8590_v52 = vld [vmem:[%s15381_s3 + $0xd0] sm:$0xff]  ;;  %v8591_v19 = vld [vmem:[%s15381_s3 + $0xd8] sm:$0xff] }
 0x1a0   :  { %v962_v22 = vsel %vm10304_vm2, %v9676_v31, %v959_v30  ;;  %vm762_vm3 = vcmp.eq.s32.totalorder %v760_v13, 0  ;;  %vm765_vm4 = vcmp.eq.s32.totalorder %v760_v13, 2  ;;  %vm761_vm5 = vcmp.lt.s32.totalorder %v760_v13, 2  ;;  %v8544_v31 = vld [vmem:[%s15381_s3 + $0xa0] sm:$0xff] }
 0x1a1   :  { %9328 = vcosq.f32 %v962_v22  ;;  %8854 = vmatprep.subr.bf16.mxu1 %v8853_v59  ;;  %v9325_v24 = vpop.eup %9324  ;;  %v968_v23 = vand.u32 3, %v967_v48 }
 0x1a2   :  { %2915 = vperm.xlu0 %9295, %v8412_v55   ;;  %9330 = vsinq.f32 %v962_v22  ;;  %8856 = vmatpush1.bf16.msra.mxu1 %v8855_v44  ;;  %v9327_v8 = vpop.eup %9326  ;;  %v766_v1 = vxor.u32 2147483648, %v9325_v24  ;;  %v8457_v44 = vld [vmem:[%s15381_s3 + $0x68] sm:$0xff] }
 0x1a3   :  { %2920 = vperm.xlu1 %9296, %v8413_v2   ;;  %v763_v26 = vxor.u32 2147483648, %v9327_v8  ;;  %vm973_vm6 = vcmp.eq.s32.totalorder %v968_v23, 2  ;;  %vm970_vm7 = vcmp.eq.s32.totalorder %v968_v23, 0  ;;  %vm969_vm8 = vcmp.lt.s32.totalorder %v968_v23, 2 }
 0x1a4   :  { %v767_v42 = vsel %vm765_vm4, %v766_v1, %v9327_v8 }
 0x1a5   :  { %v764_v36 = vsel %vm762_vm3, %v9325_v24, %v763_v26 }
 0x1a6   :  { %2925 = vperm.xlu0 %9295, %v8414_v25   ;;  %v768_v35 = vsel %vm761_vm5, %v764_v36, %v767_v42 }
 0x1a7   :  { %2930 = vperm.xlu1 %9296, %v8415_v17   ;;  %v769_v32 = vsel %vm758_vm10, nan, %v768_v35 }
 0x1aa   :  { %3878 = vperm.xlu0 %9295, %v8456_v7  }
 0x1ab   :  { %3883 = vperm.xlu1 %9296, %v8457_v44   ;;  %v9329_v58 = vpop.eup %9328 }
 0x1ac   :  { %v9331_v4 = vpop.eup %9330  ;;  %v974_v50 = vxor.u32 2147483648, %v9329_v58 }
 0x1ad   :  { %v971_v18 = vxor.u32 2147483648, %v9331_v4 }
 0x1ae   :  { %3888 = vperm.xlu0 %9295, %v8458_v57   ;;  %v975_v53 = vsel %vm973_vm6, %v974_v50, %v9331_v4 }
 0x1af   :  { %3893 = vperm.xlu1 %9296, %v8459_v63   ;;  %v972_v6 = vsel %vm970_vm7, %v9329_v58, %v971_v18 }
 0x1b0   :  { %v976_v16 = vsel %vm969_vm8, %v972_v6, %v975_v53 }
 0x1b1   :  { %v977_v43 = vsel %vm966_vm11, nan, %v976_v16 }
 0x1b2   :  { %4841 = vperm.xlu0 %9295, %v8500_v34   ;;  %v8857_v61 = vpack.c.bf16 %v977_v43, %v769_v32 }
 0x1b3   :  { %4846 = vperm.xlu1 %9296, %v8501_v15  }
 0x1b4   :  { %8858 = vmatprep.subr.bf16.mxu1 %v8857_v61 }
 0x1b5   :  { %8860 = vmatpush1.bf16.msra.mxu1 %v8859_v3  ;;  %v8547_v3 = vld [vmem:[%s15381_s3 + $0xb8] sm:$0xff] }
 0x1b6   :  { %4851 = vperm.xlu0 %9295, %v8502_v54  }
 0x1b7   :  { %4856 = vperm.xlu1 %9296, %v8503_v14  }
 0x1b8   :  { %8328 = vmatmul.mubr.msk.f32.vlgmr.msra.gmra.mrb[4].mxu1 %vm1006_vm12, %v978_v12 }
 0x1b9   :  { %1089 = vmatprep.mubr.f32.mxu1 %v15472_v0 }
 0x1ba   :  { %5804 = vperm.xlu0 %9295, %v8544_v31  }
 0x1bb   :  { %5809 = vperm.xlu1 %9296, %v8545_v33  }
 0x1bc   :  { %8329 = vmatmul.mubr.msk.f32.gmra.mrb[6].mxu1 %vm1006_vm12, %v979_v27 }
 0x1bd   :  { %1095 = vmatprep.mubr.f32.mxu1 %v15472_v0 }
 0x1be   :  { %5814 = vperm.xlu0 %9295, %v8546_v60  }
 0x1bf   :  { %5819 = vperm.xlu1 %9296, %v8547_v3  }
 0x1c0   :  { %8330 = vmatmul.mubr.msk.f32.gmra.mrb[8].mxu1 %vm1006_vm12, %v980_v28 }
 0x1c1   :  { %1101 = vmatprep.mubr.f32.mxu1 %v15472_v0 }
 0x1c2   :  { %6767 = vperm.xlu0 %9295, %v8588_v5  }
 0x1c3   :  { %6772 = vperm.xlu1 %9296, %v8589_v10  }
 0x1c4   :  { %8331 = vmatmul.mubr.msk.f32.gmra.mrb[10].mxu1 %vm1006_vm12, %v981_v37 }
 0x1c5   :  { %3009 = vmatprep.mubr.f32.mxu1 %v15472_v0 }
 0x1c6   :  { %6777 = vperm.xlu0 %9295, %v8590_v52  }
 0x1c7   :  { %6782 = vperm.xlu1 %9296, %v8591_v19  }
 0x211   :  { %v989_v46 = vpop.permute.xlu0 %988 }
 0x215   :  { %v994_v30 = vpop.permute.xlu0 %993 }
 0x28b   :  { %v1085_v40 = vpop.f32.mrb[4].mxu1 }
 0x28c   :  { %v10399_v56 = vadd.f32 %v1085_v40, %v989_v46  ;;  %v1087_v29 = vpop.f32.mrb[5].mxu1 }
 0x28d   :  { %v10401_v55 = vadd.f32 %v1087_v29, %v989_v46 }
 0x28e   :  { %v1108_v39 = vand.u32 2147483647, %v10399_v56  ;;  %v1111_v11 = vand.u32 2139095040, %v10399_v56 }
 0x28f   :  { %v1212_v38 = vand.u32 2147483647, %v10401_v55  ;;  %v1215_v59 = vand.u32 2139095040, %v10401_v55  ;;  %v1091_v2 = vpop.f32.mrb[6].mxu1 }
 0x290   :  { %v1112_v22 = vshrl.u32 %v1111_v11, 23  ;;  %v10407_v24 = vadd.f32 %v1091_v2, %v994_v30  ;;  %v1093_v21 = vpop.f32.mrb[7].mxu1  ;;  %v1115_v62 = vand.u32 8388607, %v1108_v39 }
 0x291   :  { %v1216_v25 = vshrl.u32 %v1215_v59, 23  ;;  %v1219_v17 = vand.u32 8388607, %v1212_v38  ;;  %v10420_v35 = vadd.f32 %v1093_v21, %v994_v30 }
 0x292   :  { %v8332_v8 = vadd.s32 4294967169, %v1112_v22  ;;  %v1319_v13 = vand.u32 2139095040, %v10407_v24  ;;  %v1116_v1 = vor.u32 8388608, %v1115_v62  ;;  %v15401_v16 = vand.u32 2147483647, %v10407_v24 }
 0x293   :  { %v8336_v48 = vadd.s32 4294967169, %v1216_v25  ;;  %v10414_v7 = vpop.f32.mrb[8].mxu1  ;;  %v1220_v44 = vor.u32 8388608, %v1219_v17 }
 0x294   :  { %v1118_v26 = vadd.s32 1, %v8332_v8  ;;  %v1320_v57 = vshrl.u32 %v1319_v13, 23  ;;  %v10416_v58 = vpop.f32.mrb[9].mxu1  ;;  %v10424_v34 = vshll.u32 %v1116_v1, 8 }
 0x295   :  { %v1222_v23 = vadd.s32 1, %v8336_v48  ;;  %v10428_v15 = vshll.u32 %v1220_v44, 8 }
 0x296   :  { %vm1119_vm13 = vcmp.gt.s32.totalorder %v1118_v26, 0  ;;  %v8340_v42 = vadd.s32 4294967169, %v1320_v57 }
 0x297   :  { %v1120_v36 = vsel %vm1119_vm13, %v1118_v26, 0  ;;  %vm1223_vm9 = vcmp.gt.s32.totalorder %v1222_v23, 0  ;;  %v10418_v63 = vpop.f32.mrb[10].mxu1 }
 0x298   :  { %v1121_v4 = vshrl.u32 %v1120_v36, 5  ;;  %v1122_v50 = vand.u32 31, %v1120_v36  ;;  %v1224_v18 = vsel %vm1223_vm9, %v1222_v23, 0  ;;  %v10422_v53 = vpop.f32.mrb[11].mxu1  ;;  %v10432_v54 = vadd.s32 1, %v8340_v42 }
 0x299   :  { %v10426_v6 = vshrl.u32 %v1224_v18, 5  ;;  %v1226_v61 = vand.u32 31, %v1224_v18 }
 0x29a   :  { %v1123_v32 = vsub.s32 32, %v1122_v50  ;;  %v1125_v43 = vshll.u32 %v15417_v41, %v1122_v50  ;;  %v1128_v14 = vshll.u32 %v15404_v45, %v1122_v50  ;;  %v1131_v12 = vshll.u32 %v15406_v47, %v1122_v50 }
 0x29b   :  { %v1134_v31 = vshll.u32 %v15402_v49, %v1122_v50  ;;  %v1137_v33 = vshll.u32 %v15409_v51, %v1122_v50  ;;  %vm1140_vm14 = vcmp.lt.s32.totalorder %v1121_v4, 1  ;;  %vm1141_vm15 = vcmp.lt.s32.totalorder %v1121_v4, 2 }
 0x29c   :  { %v1126_v27 = vshrl.u32 %v15404_v45, %v1123_v32  ;;  %v1129_v60 = vshrl.u32 %v15406_v47, %v1123_v32  ;;  %v1132_v3 = vshrl.u32 %v15402_v49, %v1123_v32  ;;  %v1124_v28 = vshrl.u32 %v15417_v41, %v1123_v32 }
 0x29d   :  { %v1135_v5 = vshrl.u32 %v15409_v51, %v1123_v32  ;;  %v1138_v10 = vshrl.u32 %v15458_v9, %v1123_v32  ;;  %v1227_v46 = vsub.s32 32, %v1226_v61  ;;  %vm1142_vm0 = vcmp.lt.s32.totalorder %v1121_v4, 3 }
 0x29e   :  { %v1127_v37 = vor.u32 %v1126_v27, %v1125_v43  ;;  %v1130_v52 = vor.u32 %v1129_v60, %v1128_v14  ;;  %v1133_v19 = vor.u32 %v1132_v3, %v1131_v12  ;;  %vm1143_vm1 = vcmp.lt.s32.totalorder %v1121_v4, 4 }
 0x29f   :  { %v1136_v40 = vor.u32 %v1135_v5, %v1134_v31  ;;  %v1139_v29 = vor.u32 %v1138_v10, %v1137_v33  ;;  %v1229_v25 = vshll.u32 %v15417_v41, %v1226_v61  ;;  %v1230_v48 = vshrl.u32 %v15404_v45, %v1227_v46 }
 0x2a0   :  { %v1144_v11 = vsel %vm1140_vm14, %v1124_v28, %v1127_v37  ;;  %v1145_v30 = vsel %vm1143_vm1, %v1133_v19, 2102212464  ;;  %v1148_v59 = vsel %vm1140_vm14, %v1127_v37, %v1130_v52  ;;  %v1152_v2 = vsel %vm1140_vm14, %v1130_v52, %v1133_v19 }
 0x2a1   :  { %v1146_v22 = vsel %vm1142_vm0, %v1130_v52, %v1145_v30  ;;  %v1149_v21 = vsel %vm1143_vm1, %v1136_v40, 920167782  ;;  %v1153_v62 = vsel %vm1143_vm1, %v1139_v29, 1326507024  ;;  %v1232_v13 = vshll.u32 %v15404_v45, %v1226_v61 }
 0x2a2   :  { %v1150_v17 = vsel %vm1142_vm0, %v1133_v19, %v1149_v21  ;;  %v1154_v8 = vsel %vm1142_vm0, %v1136_v40, %v1153_v62  ;;  %v1147_v26 = vsel %vm1141_vm15, %v1144_v11, %v1146_v22  ;;  %v1233_v23 = vshrl.u32 %v15406_v47, %v1227_v46 }
 0x2a3   :  { %v1151_v1 = vsel %vm1141_vm15, %v1148_v59, %v1150_v17  ;;  %v1155_v44 = vsel %vm1141_vm15, %v1152_v2, %v1154_v8  ;;  %v1231_v18 = vor.u32 %v1230_v48, %v1229_v25  ;;  %v1235_v43 = vshll.u32 %v15406_v47, %v1226_v61 }
 0x2a4   :  { %v10455_v57 = vmul.u32.u64.low %v10424_v34, %v1155_v44  ;;  %v10456_v36 = vmul.u32.u64.high %v10424_v34, %v1155_v44, %v10455_v57  ;;  %v10459_v42 = vmul.u32.u64.low %v10424_v34, %v1151_v1  ;;  %v10460_v50 = vmul.u32.u64.high %v10424_v34, %v1151_v1, %v10459_v42 }
 0x2a5   :  { %v1234_v32 = vor.u32 %v1233_v23, %v1232_v13  ;;  %v1236_v14 = vshrl.u32 %v15402_v49, %v1227_v46  ;;  %v1228_v4 = vshrl.u32 %v15417_v41, %v1227_v46  ;;  %v1238_v12 = vshll.u32 %v15402_v49, %v1226_v61 }
 0x2a6   :  { %v1239_v31 = vshrl.u32 %v15409_v51, %v1227_v46  ;;  %v1242_v33 = vshrl.u32 %v15458_v9, %v1227_v46  ;;  %v1163_v27 = vmul.u32 %v10424_v34, %v1147_v26  ;;  %v1241_v3 = vshll.u32 %v15409_v51, %v1226_v61 }
 0x2a7   :  { %v1237_v60 = vor.u32 %v1236_v14, %v1235_v43  ;;  %vm1244_vm2 = vcmp.lt.s32.totalorder %v10426_v6, 1  ;;  %vm1165_vm3 = vc.u32 %v10456_v36, %v10459_v42  ;;  %v1166_v28 = vadd.s32 1, %v10460_v50 }
 0x2a8   :  { %v1240_v5 = vor.u32 %v1239_v31, %v1238_v12  ;;  %vm1245_vm4 = vcmp.lt.s32.totalorder %v10426_v6, 2  ;;  %v1243_v10 = vor.u32 %v1242_v33, %v1241_v3  ;;  %vm1246_vm5 = vcmp.lt.s32.totalorder %v10426_v6, 3 }
 0x2a9   :  { %vm1247_vm6 = vcmp.lt.s32.totalorder %v10426_v6, 4  ;;  %v1252_v37 = vsel %vm1244_vm2, %v1231_v18, %v1234_v32  ;;  %v1167_v34 = vsel %vm1165_vm3, %v1166_v28, %v10460_v50  ;;  %v1256_v19 = vsel %vm1244_vm2, %v1234_v32, %v1237_v60 }
 0x2aa   :  { %v1249_v52 = vsel %vm1247_vm6, %v1237_v60, 2102212464  ;;  %v1253_v61 = vsel %vm1247_vm6, %v1240_v5, 920167782  ;;  %v1168_v46 = vadd.s32 %v1167_v34, %v1163_v27  ;;  %v1248_v40 = vsel %vm1244_vm2, %v1228_v4, %v1231_v18 }
 0x2ab   :  { %v1254_v29 = vsel %vm1246_vm5, %v1237_v60, %v1253_v61  ;;  %v1257_v11 = vsel %vm1247_vm6, %v1243_v10, 1326507024  ;;  %v1250_v30 = vsel %vm1246_vm5, %v1234_v32, %v1249_v52  ;;  %vm1327_vm7 = vcmp.gt.s32.totalorder %v10432_v54, 0 }
 0x2ac   :  { %v1255_v59 = vsel %vm1245_vm4, %v1252_v37, %v1254_v29  ;;  %v1258_v2 = vsel %vm1246_vm5, %v1240_v5, %v1257_v11  ;;  %v1169_v22 = vadd.s32 536870912, %v1168_v46  ;;  %v1323_v48 = vand.u32 8388607, %v15401_v16 }
 0x2ad   :  { %v1259_v21 = vsel %vm1245_vm4, %v1256_v19, %v1258_v2  ;;  %v10485_v62 = vmul.u32.u64.low %v10428_v15, %v1255_v59  ;;  %v10486_v25 = vmul.u32.u64.high %v10428_v15, %v1255_v59, %v10485_v62  ;;  %v1328_v13 = vsel %vm1327_vm7, %v10432_v54, 0 }
 0x2ae   :  { %v10490_v17 = vmul.u32.u64.low %v10428_v15, %v1259_v21  ;;  %v10491_v8 = vmul.u32.u64.high %v10428_v15, %v1259_v21, %v10490_v17  ;;  %v10496_v26 = vshrl.u32 %v1169_v22, 30  ;;  %v1251_v1 = vsel %vm1245_vm4, %v1248_v40, %v1250_v30 }
 0x2af   :  { %v1330_v44 = vand.u32 31, %v1328_v13  ;;  %v1423_v23 = vand.u32 2139095040, %v10420_v35  ;;  %v1270_v50 = vadd.s32 1, %v10486_v25  ;;  %v1267_v32 = vmul.u32 %v10428_v15, %v1251_v1 }
 0x2b0   :  { %v1171_v57 = vshll.u32 %v10496_v26, 30  ;;  %vm1269_vm8 = vc.u32 %v10491_v8, %v10485_v62  ;;  %v1324_v43 = vor.u32 8388608, %v1323_v48  ;;  %v1329_v60 = vshrl.u32 %v1328_v13, 5 }
 0x2b1   :  { %v1331_v18 = vsub.s32 32, %v1330_v44  ;;  %v1271_v14 = vsel %vm1269_vm8, %v1270_v50, %v10486_v25  ;;  %v1424_v6 = vshrl.u32 %v1423_v23, 23  ;;  %v1333_v12 = vshll.u32 %v15417_v41, %v1330_v44 }
 0x2b2   :  { %v10506_v54 = vsub.s32 %v1168_v46, %v1171_v57  ;;  %v1272_v4 = vadd.s32 %v1271_v14, %v1267_v32  ;;  %v1336_v15 = vshll.u32 %v15404_v45, %v1330_v44  ;;  %v1339_v10 = vshll.u32 %v15406_v47, %v1330_v44 }
 0x2b3   :  { %v1334_v31 = vshrl.u32 %v15404_v45, %v1331_v18  ;;  %v1337_v33 = vshrl.u32 %v15406_v47, %v1331_v18  ;;  %v1340_v3 = vshrl.u32 %v15402_v49, %v1331_v18  ;;  %v1364_v37 = vshll.u32 %v1324_v43, 8 }
 0x2b4   :  { %v1174_v27 = vsub.s32 0, %v10506_v54  ;;  %v1273_v28 = vadd.s32 536870912, %v1272_v4  ;;  %v1342_v61 = vshll.u32 %v15402_v49, %v1330_v44  ;;  %v1343_v19 = vshrl.u32 %v15409_v51, %v1331_v18 }
 0x2b5   :  { %v1335_v5 = vor.u32 %v1334_v31, %v1333_v12  ;;  %v1338_v52 = vor.u32 %v1337_v33, %v1336_v15  ;;  %v1341_v40 = vor.u32 %v1340_v3, %v1339_v10  ;;  %v1345_v29 = vshll.u32 %v15409_v51, %v1330_v44 }
 0x2b6   :  { %v8333_v34 = vmin.u32 %v1174_v27, %v10506_v54  ;;  %v10519_v46 = vshrl.u32 %v1273_v28, 30  ;;  %v1346_v11 = vshrl.u32 %v15458_v9, %v1331_v18  ;;  %v1344_v59 = vor.u32 %v1343_v19, %v1342_v61 }
 0x2b7   :  { %vm1348_vm10 = vcmp.lt.s32.totalorder %v1329_v60, 1  ;;  %v8344_v2 = vadd.s32 4294967169, %v1424_v6  ;;  %vm1349_vm11 = vcmp.lt.s32.totalorder %v1329_v60, 2  ;;  %vm1351_vm13 = vcmp.lt.s32.totalorder %v1329_v60, 4 }
 0x2b8   :  { %v1176_v30 = vclz %v8333_v34  ;;  %v1275_v22 = vshll.u32 %v10519_v46, 30  ;;  %v1347_v21 = vor.u32 %v1346_v11, %v1345_v29  ;;  %vm1350_vm9 = vcmp.lt.s32.totalorder %v1329_v60, 3 }
 0x2b9   :  { %v1356_v17 = vsel %vm1348_vm10, %v1335_v5, %v1338_v52  ;;  %v1357_v48 = vsel %vm1351_vm13, %v1344_v59, 920167782  ;;  %v1353_v1 = vsel %vm1351_vm13, %v1341_v40, 2102212464  ;;  %v1360_v23 = vsel %vm1348_vm10, %v1338_v52, %v1341_v40 }
 0x2ba   :  { %v8334_v25 = vadd.s32 4294967294, %v1176_v30  ;;  %v10525_v13 = vsub.s32 %v1272_v4, %v1275_v22  ;;  %v1358_v44 = vsel %vm1350_vm9, %v1341_v40, %v1357_v48  ;;  %v1332_v57 = vshrl.u32 %v15417_v41, %v1331_v18 }
 0x2bb   :  { %v1359_v50 = vsel %vm1349_vm11, %v1356_v17, %v1358_v44  ;;  %v1361_v32 = vsel %vm1351_vm13, %v1347_v21, 1326507024  ;;  %v1430_v12 = vadd.s32 1, %v8344_v2  ;;  %v1354_v33 = vsel %vm1350_vm9, %v1338_v52, %v1353_v1  ;;  %v999_v1 = vpop.permute.xlu1 %998 }
 0x2bc   :  { %vm8335_vm14 = vcmp.lt.s32.totalorder %v8334_v25, 0  ;;  %v1278_v14 = vsub.s32 0, %v10525_v13  ;;  %v1362_v6 = vsel %vm1350_vm9, %v1344_v59, %v1361_v32  ;;  %v1352_v4 = vsel %vm1348_vm10, %v1332_v57, %v1335_v5 }
 0x2bd   :  { %v1179_v43 = vsel %vm8335_vm14, 0, %v8334_v25  ;;  %v1363_v27 = vsel %vm1349_vm11, %v1360_v23, %v1362_v6  ;;  %vm1431_vm15 = vcmp.gt.s32.totalorder %v1430_v12, 0  ;;  %v15400_v61 = vand.u32 2147483647, %v10420_v35 }
 0x2be   :  { %v1184_v31 = vsub.s32 4294967266, %v1179_v43  ;;  %v8337_v15 = vmin.u32 %v1278_v14, %v10525_v13  ;;  %v10537_v3 = vmul.u32.u64.low %v1364_v37, %v1363_v27  ;;  %v10538_v18 = vmul.u32.u64.high %v1364_v37, %v1363_v27, %v10537_v3 }
 0x2bf   :  { %v10540_v28 = vmul.u32.u64.low %v1364_v37, %v1359_v50  ;;  %v10541_v10 = vmul.u32.u64.high %v1364_v37, %v1359_v50, %v10540_v28  ;;  %v1432_v19 = vsel %vm1431_vm15, %v1430_v12, 0  ;;  %v1180_v40 = vsub.s32 32, %v1179_v43 }
 0x2c0   :  { %v1280_v34 = vclz %v8337_v15  ;;  %v1185_v5 = vadd.s32 127, %v1184_v31  ;;  %v1355_v52 = vsel %vm1349_vm11, %v1352_v4, %v1354_v33  ;;  %v1434_v29 = vand.u32 31, %v1432_v19 }
 0x2c1   :  { %vm1373_vm0 = vc.u32 %v10538_v18, %v10540_v28  ;;  %v1164_v30 = vadd.s32 %v10459_v42, %v10456_v36  ;;  %v1374_v59 = vadd.s32 1, %v10541_v10  ;;  %v1371_v2 = vmul.u32 %v1364_v37, %v1355_v52 }
 0x2c2   :  { %v8338_v11 = vadd.s32 4294967294, %v1280_v34  ;;  %v1427_v22 = vand.u32 8388607, %v15400_v61  ;;  %v1186_v25 = vshll.u32 %v1185_v5, 23  ;;  %v1435_v17 = vsub.s32 32, %v1434_v29 }
 0x2c3   :  { %v1182_v21 = vshrl.u32 %v1164_v30, %v1180_v40  ;;  %v1375_v60 = vsel %vm1373_vm0, %v1374_v59, %v10541_v10  ;;  %v1181_v44 = vshll.u32 %v10506_v54, %v1179_v43  ;;  %v10556_v36 = vadd.f32 %v10414_v7, %v999_v1 }
 0x2c4   :  { %vm8339_vm1 = vcmp.lt.s32.totalorder %v8338_v11, 0  ;;  %v1376_v48 = vadd.s32 %v1375_v60, %v1371_v2  ;;  %v1428_v50 = vor.u32 8388608, %v1427_v22  ;;  %v1187_v37 = vor.u32 4788187, %v1186_v25 }
 0x2c5   :  { %v1283_v23 = vsel %vm8339_vm1, 0, %v8338_v11  ;;  %v1183_v42 = vor.u32 %v1182_v21, %v1181_v44  ;;  %v1438_v32 = vshrl.u32 %v15404_v45, %v1435_v17  ;;  %v1441_v14 = vshrl.u32 %v15406_v47, %v1435_v17 }
 0x2c6   :  { %v1377_v57 = vadd.s32 536870912, %v1376_v48  ;;  %v1288_v6 = vsub.s32 4294967266, %v1283_v23  ;;  %v1444_v31 = vshrl.u32 %v15402_v49, %v1435_v17  ;;  %v1447_v4 = vshrl.u32 %v15409_v51, %v1435_v17 }
 0x2c7   :  { %v1437_v54 = vshll.u32 %v15417_v41, %v1434_v29  ;;  %v1440_v43 = vshll.u32 %v15404_v45, %v1434_v29  ;;  %v1446_v7 = vshll.u32 %v15402_v49, %v1434_v29  ;;  %v1450_v33 = vshrl.u32 %v15458_v9, %v1435_v17 }
 0x2c8   :  { %v10560_v12 = vshrl.u32 %v1377_v57, 30  ;;  %v1433_v15 = vshrl.u32 %v1432_v19, 5  ;;  %v1443_v3 = vshll.u32 %v15406_v47, %v1434_v29  ;;  %v10571_v10 = vadd.f32 %v10416_v58, %v999_v1 }
 0x2c9   :  { %v1439_v34 = vor.u32 %v1438_v32, %v1437_v54  ;;  %v1442_v40 = vor.u32 %v1441_v14, %v1440_v43  ;;  %v1448_v5 = vor.u32 %v1447_v4, %v1446_v7  ;;  %v1449_v52 = vshll.u32 %v15409_v51, %v1434_v29 }
 0x2ca   :  { %v1379_v27 = vshll.u32 %v10560_v12, 30  ;;  %v1268_v11 = vadd.s32 %v10485_v62, %v10491_v8  ;;  %v1289_v30 = vadd.s32 127, %v1288_v6  ;;  %v1445_v2 = vor.u32 %v1444_v31, %v1443_v3 }
 0x2cb   :  { %v1188_v22 = vand.u32 2147483647, %v1187_v37  ;;  %v1190_v21 = vcvt.s32.f32 %v1183_v42  ;;  %v1451_v19 = vor.u32 %v1450_v33, %v1449_v52  ;;  %v1468_v25 = vshll.u32 %v1428_v50, 8 }
 0x2cc   :  { %v10576_v59 = vsub.s32 %v1376_v48, %v1379_v27  ;;  %v1284_v60 = vsub.s32 32, %v1283_v23  ;;  %vm1452_vm2 = vcmp.lt.s32.totalorder %v1433_v15, 1  ;;  %vm1455_vm3 = vcmp.lt.s32.totalorder %v1433_v15, 4 }
 0x2cd   :  { %v1436_v1 = vshrl.u32 %v15417_v41, %v1435_v17  ;;  %vm1454_vm4 = vcmp.lt.s32.totalorder %v1433_v15, 3  ;;  %v1460_v29 = vsel %vm1452_vm2, %v1439_v34, %v1442_v40  ;;  %v1461_v44 = vsel %vm1455_vm3, %v1448_v5, 920167782 }
 0x2ce   :  { %v1382_v58 = vsub.s32 0, %v10576_v59  ;;  %v1290_v62 = vshll.u32 %v1289_v30, 23  ;;  %vm1453_vm5 = vcmp.lt.s32.totalorder %v1433_v15, 2  ;;  %v1457_v8 = vsel %vm1455_vm3, %v1445_v2, 2102212464 }
 0x2cf   :  { %v1462_v48 = vsel %vm1454_vm4, %v1445_v2, %v1461_v44  ;;  %v1464_v50 = vsel %vm1452_vm2, %v1442_v40, %v1445_v2  ;;  %v1465_v37 = vsel %vm1455_vm3, %v1451_v19, 1326507024  ;;  %v1285_v32 = vshll.u32 %v10525_v13, %v1283_v23 }
 0x2d0   :  { %v8341_v57 = vmin.u32 %v1382_v58, %v10576_v59  ;;  %v1463_v42 = vsel %vm1453_vm5, %v1460_v29, %v1462_v48  ;;  %v1286_v14 = vshrl.u32 %v1268_v11, %v1284_v60  ;;  %v1456_v17 = vsel %vm1452_vm2, %v1436_v1, %v1439_v34 }
 0x2d1   :  { %v1466_v6 = vsel %vm1454_vm4, %v1448_v5, %v1465_v37  ;;  %v1458_v31 = vsel %vm1454_vm4, %v1442_v40, %v1457_v8  ;;  %v10587_v54 = vmul.u32.u64.low %v1468_v25, %v1463_v42  ;;  %v10588_v43 = vmul.u32.u64.high %v1468_v25, %v1463_v42, %v10587_v54  ;;  %v10611_v42 = vpop.permute.xlu1 %1003 }
 0x2d2   :  { %v1467_v4 = vsel %vm1453_vm5, %v1464_v50, %v1466_v6  ;;  %v1191_v7 = vmul.f32 %v1190_v21, %v1188_v22  ;;  %v1291_v33 = vor.u32 4788187, %v1290_v62  ;;  %v1384_v52 = vclz %v8341_v57 }
 0x2d3   :  { %v10591_v27 = vmul.u32.u64.low %v1468_v25, %v1467_v4  ;;  %v10592_v3 = vmul.u32.u64.high %v1468_v25, %v1467_v4, %v10591_v27  ;;  %v1527_v30 = vand.u32 2139095040, %v10556_v36  ;;  %v1287_v13 = vor.u32 %v1286_v14, %v1285_v32 }
 0x2d4   :  { %v1459_v23 = vsel %vm1453_vm5, %v1456_v17, %v1458_v31  ;;  %v1631_v34 = vand.u32 2139095040, %v10571_v10  ;;  %v1478_v40 = vadd.s32 1, %v10588_v43  ;;  %v1192_v11 = vxor.u32 2147483648, %v1191_v7 }
 0x2d5   :  { %v1528_v5 = vshrl.u32 %v1527_v30, 23  ;;  %v1194_v2 = vsub.s32 4, %v10496_v26  ;;  %v1292_v19 = vand.u32 2147483647, %v1291_v33  ;;  %v15398_v22 = vand.u32 2147483647, %v10556_v36 }
 0x2d6   :  { %v8342_v21 = vadd.s32 4294967294, %v1384_v52  ;;  %v1475_v60 = vmul.u32 %v1468_v25, %v1459_v23  ;;  %vm1477_vm6 = vc.u32 %v10592_v3, %v10587_v54  ;;  %v1294_v1 = vcvt.s32.f32 %v1287_v13 }
 0x2d7   :  { %v8348_v58 = vadd.s32 4294967169, %v1528_v5  ;;  %v1479_v15 = vsel %vm1477_vm6, %v1478_v40, %v10588_v43  ;;  %v1632_v29 = vshrl.u32 %v1631_v34, 23  ;;  %vm1110_vm7 = vcmp.lt.s32.totalorder %v10399_v56, 0 }
 0x2d8   :  { %v1480_v44 = vadd.s32 %v1479_v15, %v1475_v60  ;;  %v1193_v8 = vsel %vm1110_vm7, %v1192_v11, %v1191_v7  ;;  %v10605_v48 = vsel %vm1110_vm7, %v1194_v2, %v10496_v26  ;;  %v10607_v57 = vmul.f32 %v1294_v1, %v1292_v19 }
 0x2d9   :  { %v1534_v62 = vadd.s32 1, %v8348_v58  ;;  %v1531_v25 = vand.u32 8388607, %v15398_v22  ;;  %vm8343_vm8 = vcmp.lt.s32.totalorder %v8342_v21, 0  ;;  %v8352_v37 = vadd.s32 4294967169, %v1632_v29 }
 0x2da   :  { %v1481_v50 = vadd.s32 536870912, %v1480_v44  ;;  %vm10615_vm11 = vcmp.le.f32.partialorder %v1108_v39, 0.7853982  ;;  %v10621_v26 = vadd.f32 %v10418_v63, %v10611_v42  ;;  %v10628_v6 = vadd.s32 %v10540_v28, %v10538_v18 }
 0x2db   :  { %vm1535_vm10 = vcmp.gt.s32.totalorder %v1534_v62, 0  ;;  %v10635_v39 = vsel %vm10615_vm11, %v10399_v56, %v1193_v8  ;;  %v1296_v43 = vxor.u32 2147483648, %v10607_v57  ;;  %v10638_v63 = vsel %vm8343_vm8, 0, %v8342_v21 }
 0x2dc   :  { %v1536_v14 = vsel %vm1535_vm10, %v1534_v62, 0  ;;  %v10630_v31 = vshrl.u32 %v1481_v50, 30  ;;  %v1532_v27 = vor.u32 8388608, %v1531_v25  ;;  %v1638_v18 = vadd.s32 1, %v8352_v37 }
 0x2dd   :  { %v1538_v4 = vand.u32 31, %v1536_v14  ;;  %v1537_v28 = vshrl.u32 %v1536_v14, 5  ;;  %v15399_v29 = vand.u32 2147483647, %v10571_v10  ;;  %vm1214_vm13 = vcmp.lt.s32.totalorder %v10401_v55, 0 }
 0x2de   :  { %v1483_v33 = vshll.u32 %v10630_v31, 30  ;;  %v1572_v37 = vshll.u32 %v1532_v27, 8  ;;  %vm1639_vm14 = vcmp.gt.s32.totalorder %v1638_v18, 0  ;;  %vm10703_vm4 = vcmp.le.f32.partialorder %v1212_v38, 0.7853982 }
 0x2df   :  { %v1539_v52 = vsub.s32 32, %v1538_v4  ;;  %v1541_v30 = vshll.u32 %v15417_v41, %v1538_v4  ;;  %v1544_v13 = vshll.u32 %v15404_v45, %v1538_v4  ;;  %v1547_v23 = vshll.u32 %v15406_v47, %v1538_v4 }
 0x2e0   :  { %v10645_v34 = vsub.s32 %v1480_v44, %v1483_v33  ;;  %v1550_v11 = vshll.u32 %v15402_v49, %v1538_v4  ;;  %v1553_v21 = vshll.u32 %v15409_v51, %v1538_v4  ;;  %v1392_v44 = vsub.s32 4294967266, %v10638_v63 }
 0x2e1   :  { %v1542_v40 = vshrl.u32 %v15404_v45, %v1539_v52  ;;  %v1545_v5 = vshrl.u32 %v15406_v47, %v1539_v52  ;;  %v1548_v2 = vshrl.u32 %v15402_v49, %v1539_v52  ;;  %v1551_v19 = vshrl.u32 %v15409_v51, %v1539_v52 }
 0x2e2   :  { %v1554_v60 = vshrl.u32 %v15458_v9, %v1539_v52  ;;  %v1486_v58 = vsub.s32 0, %v10645_v34  ;;  %vm1556_vm9 = vcmp.lt.s32.totalorder %v1537_v28, 1  ;;  %v1540_v14 = vshrl.u32 %v15417_v41, %v1539_v52 }
 0x2e3   :  { %v1543_v1 = vor.u32 %v1542_v40, %v1541_v30  ;;  %v1546_v15 = vor.u32 %v1545_v5, %v1544_v13  ;;  %v1549_v62 = vor.u32 %v1548_v2, %v1547_v23  ;;  %v1552_v8 = vor.u32 %v1551_v19, %v1550_v11 }
 0x2e4   :  { %v1555_v25 = vor.u32 %v1554_v60, %v1553_v21  ;;  %v8345_v50 = vmin.u32 %v1486_v58, %v10645_v34  ;;  %vm1557_vm15 = vcmp.lt.s32.totalorder %v1537_v28, 2  ;;  %vm1559_vm0 = vcmp.lt.s32.totalorder %v1537_v28, 4 }
 0x2e5   :  { %v1564_v4 = vsel %vm1556_vm9, %v1543_v1, %v1546_v15  ;;  %vm1558_vm1 = vcmp.lt.s32.totalorder %v1537_v28, 3  ;;  %v1561_v30 = vsel %vm1559_vm0, %v1549_v62, 2102212464  ;;  %v1565_v13 = vsel %vm1559_vm0, %v1552_v8, 920167782 }
 0x2e6   :  { %v1488_v33 = vclz %v8345_v50  ;;  %v1560_v40 = vsel %vm1556_vm9, %v1540_v14, %v1543_v1  ;;  %v1566_v5 = vsel %vm1558_vm1, %v1549_v62, %v1565_v13  ;;  %v1568_v20 = vsel %vm1556_vm9, %v1546_v15, %v1549_v62 }
 0x2e7   :  { %v1569_v23 = vsel %vm1559_vm0, %v1555_v25, 1326507024  ;;  %v1562_v2 = vsel %vm1558_vm1, %v1546_v15, %v1561_v30  ;;  %v1567_v19 = vsel %vm1557_vm15, %v1564_v4, %v1566_v5  ;;  %v1393_v27 = vadd.s32 127, %v1392_v44 }
 0x2e8   :  { %v8346_v11 = vadd.s32 4294967294, %v1488_v33  ;;  %v1570_v21 = vsel %vm1558_vm1, %v1552_v8, %v1569_v23  ;;  %v10662_v52 = vmul.u32.u64.low %v1572_v37, %v1567_v19  ;;  %v10663_v58 = vmul.u32.u64.high %v1572_v37, %v1567_v19, %v10662_v52 }
 0x2e9   :  { %v1571_v60 = vsel %vm1557_vm15, %v1568_v20, %v1570_v21  ;;  %v1640_v1 = vsel %vm1639_vm14, %v1638_v18, 0  ;;  %v1563_v15 = vsel %vm1557_vm15, %v1560_v40, %v1562_v2  ;;  %v1635_v8 = vand.u32 8388607, %v15399_v29 }
 0x2ea   :  { %vm8347_vm2 = vcmp.lt.s32.totalorder %v8346_v11, 0  ;;  %v10666_v50 = vmul.u32.u64.low %v1572_v37, %v1571_v60  ;;  %v10667_v22 = vmul.u32.u64.high %v1572_v37, %v1571_v60, %v10666_v50  ;;  %v1642_v44 = vand.u32 31, %v1640_v1 }
 0x2eb   :  { %v10670_v62 = vsel %vm8347_vm2, 0, %v8346_v11  ;;  %v10678_v20 = vsel %vm1214_vm13, %v1296_v43, %v10607_v57  ;;  %v1388_v25 = vsub.s32 32, %v10638_v63  ;;  %v15408_v14 = vand.u32 2147483647, %v10621_v26 }
 0x2ec   :  { %v1735_v4 = vand.u32 2139095040, %v10621_v26  ;;  %v1389_v18 = vshll.u32 %v10576_v59, %v10638_v63  ;;  %v1496_v28 = vsub.s32 4294967266, %v10670_v62  ;;  %v1582_v33 = vadd.s32 1, %v10663_v58 }
 0x2ed   :  { %v1643_v30 = vsub.s32 32, %v1642_v44  ;;  %v1394_v13 = vshll.u32 %v1393_v27, 23  ;;  %v1476_v40 = vadd.s32 %v10587_v54, %v10592_v3  ;;  %v1579_v57 = vmul.u32 %v1572_v37, %v1563_v15 }
 0x2ee   :  { %vm1581_vm3 = vc.u32 %v10667_v22, %v10662_v52  ;;  %v1636_v5 = vor.u32 8388608, %v1635_v8  ;;  %v1492_v2 = vsub.s32 32, %v10670_v62  ;;  %v1641_v21 = vshrl.u32 %v1640_v1, 5 }
 0x2ef   :  { %v1583_v43 = vsel %vm1581_vm3, %v1582_v33, %v10663_v58  ;;  %v1646_v23 = vshrl.u32 %v15404_v45, %v1643_v30  ;;  %v1649_v11 = vshrl.u32 %v15406_v47, %v1643_v30  ;;  %v1736_v60 = vshrl.u32 %v1735_v4, 23 }
 0x2f0   :  { %v1584_v19 = vadd.s32 %v1583_v43, %v1579_v57  ;;  %v1497_v27 = vadd.s32 127, %v1496_v28  ;;  %v1645_v50 = vshll.u32 %v15417_v41, %v1642_v44  ;;  %v1648_v54 = vshll.u32 %v15404_v45, %v1642_v44 }
 0x2f1   :  { %v1652_v3 = vshrl.u32 %v15402_v49, %v1643_v30  ;;  %v1651_v58 = vshll.u32 %v15406_v47, %v1642_v44  ;;  %v1654_v15 = vshll.u32 %v15402_v49, %v1642_v44  ;;  %v1655_v8 = vshrl.u32 %v15409_v51, %v1643_v30 }
 0x2f2   :  { %v1585_v37 = vadd.s32 536870912, %v1584_v19  ;;  %v1647_v1 = vor.u32 %v1646_v23, %v1645_v50  ;;  %v1650_v4 = vor.u32 %v1649_v11, %v1648_v54  ;;  %v1657_v28 = vshll.u32 %v15409_v51, %v1642_v44 }
 0x2f3   :  { %v1658_v57 = vshrl.u32 %v15458_v9, %v1643_v30  ;;  %v1390_v43 = vshrl.u32 %v10628_v6, %v1388_v25  ;;  %v1653_v17 = vor.u32 %v1652_v3, %v1651_v58  ;;  %v1656_v61 = vor.u32 %v1655_v8, %v1654_v15 }
 0x2f4   :  { %v10710_v29 = vshrl.u32 %v1585_v37, 30  ;;  %v1395_v16 = vor.u32 4788187, %v1394_v13  ;;  %v1676_v45 = vshll.u32 %v1636_v5, 8  ;;  %v8356_v47 = vadd.s32 4294967169, %v1736_v60 }
 0x2f5   :  { %v1659_v49 = vor.u32 %v1658_v57, %v1657_v28  ;;  %v1498_v38 = vshll.u32 %v1497_v27, 23  ;;  %vm1660_vm5 = vcmp.lt.s32.totalorder %v1641_v21, 1  ;;  %vm1663_vm6 = vcmp.lt.s32.totalorder %v1641_v21, 4 }
 0x2f6   :  { %v1587_v7 = vshll.u32 %v10710_v29, 30  ;;  %vm1318_vm7 = vcmp.lt.s32.totalorder %v10407_v24, 0  ;;  %v1493_v44 = vshll.u32 %v10645_v34, %v10670_v62  ;;  %v1494_v23 = vshrl.u32 %v1476_v40, %v1492_v2 }
 0x2f7   :  { %v1668_v6 = vsel %vm1660_vm5, %v1647_v1, %v1650_v4  ;;  %v1669_v25 = vsel %vm1663_vm6, %v1656_v61, 920167782  ;;  %v1644_v13 = vshrl.u32 %v15417_v41, %v1643_v30  ;;  %vm1662_vm8 = vcmp.lt.s32.totalorder %v1641_v21, 3 }
 0x2f8   :  { %v10717_v11 = vsub.s32 %v1584_v19, %v1587_v7  ;;  %v1665_v5 = vsel %vm1663_vm6, %v1653_v17, 2102212464  ;;  %vm1661_vm10 = vcmp.lt.s32.totalorder %v1641_v21, 2  ;;  %v1670_v60 = vsel %vm1662_vm8, %v1653_v17, %v1669_v25 }
 0x2f9   :  { %v1672_v27 = vsel %vm1660_vm5, %v1650_v4, %v1653_v17  ;;  %v1673_v50 = vsel %vm1663_vm6, %v1659_v49, 1326507024  ;;  %v1499_v54 = vor.u32 4788187, %v1498_v38  ;;  %v1664_v34 = vsel %vm1660_vm5, %v1644_v13, %v1647_v1 }
 0x2fa   :  { %v1590_v3 = vsub.s32 0, %v10717_v11  ;;  %v1671_v62 = vsel %vm1661_vm10, %v1668_v6, %v1670_v60  ;;  %v1666_v40 = vsel %vm1662_vm8, %v1650_v4, %v1665_v5  ;;  %v1674_v2 = vsel %vm1662_vm8, %v1656_v61, %v1673_v50 }
 0x2fb   :  { %v10724_v7 = vmul.u32.u64.low %v1676_v45, %v1671_v62  ;;  %v10725_v19 = vmul.u32.u64.high %v1676_v45, %v1671_v62, %v10724_v7  ;;  %v1300_v30 = vsel %vm10703_vm4, %v10401_v55, %v10678_v20  ;;  %v1675_v17 = vsel %vm1661_vm10, %v1672_v27, %v1674_v2 }
 0x2fc   :  { %v8349_v49 = vmin.u32 %v1590_v3, %v10717_v11  ;;  %v1742_v37 = vadd.s32 1, %v8356_v47  ;;  %v1391_v58 = vor.u32 %v1390_v43, %v1389_v18  ;;  %v1495_v15 = vor.u32 %v1494_v23, %v1493_v44 }
 0x2fd   :  { %v10737_v61 = vmul.u32.u64.low %v1676_v45, %v1675_v17  ;;  %v10738_v8 = vmul.u32.u64.high %v1676_v45, %v1675_v17, %v10737_v61  ;;  %v1396_v1 = vand.u32 2147483647, %v1395_v16  ;;  %v1667_v28 = vsel %vm1661_vm10, %v1664_v34, %v1666_v40 }
 0x2fe   :  { %v1592_v4 = vclz %v8349_v49  ;;  %vm1743_vm9 = vcmp.gt.s32.totalorder %v1742_v37, 0  ;;  %v1500_v57 = vand.u32 2147483647, %v1499_v54  ;;  %v1686_v20 = vadd.s32 1, %v10725_v19 }
 0x2ff   :  { %v1739_v38 = vand.u32 8388607, %v15408_v14  ;;  %v1744_v47 = vsel %vm1743_vm9, %v1742_v37, 0  ;;  %9332 = vcosq.f32 %v1300_v30  ;;  %v15477_v59 = vsub.s32 4, %v10560_v12 }
 0x300   :  { %v8350_v16 = vadd.s32 4294967294, %v1592_v4  ;;  %v1746_v18 = vand.u32 31, %v1744_v47  ;;  %v1398_v21 = vcvt.s32.f32 %v1391_v58  ;;  %v1502_v43 = vcvt.s32.f32 %v1495_v15 }
 0x301   :  { %v10749_v63 = vsel %vm1318_vm7, %v15477_v59, %v10560_v12  ;;  %v1683_v44 = vmul.u32 %v1676_v45, %v1667_v28  ;;  %vm1685_vm14 = vc.u32 %v10738_v8, %v10724_v7  ;;  %9334 = vsinq.f32 %v1300_v30 }
 0x302   :  { %vm8351_vm15 = vcmp.lt.s32.totalorder %v8350_v16, 0  ;;  %v1687_v23 = vsel %vm1685_vm14, %v1686_v20, %v10725_v19  ;;  %v1747_v6 = vsub.s32 32, %v1746_v18  ;;  %v1399_v25 = vmul.f32 %v1398_v21, %v1396_v1 }
 0x303   :  { %v10754_v13 = vmul.f32 %v1502_v43, %v1500_v57  ;;  %v1688_v5 = vadd.s32 %v1687_v23, %v1683_v44  ;;  %v1740_v60 = vor.u32 8388608, %v1739_v38  ;;  %v10756_v12 = vsel %vm8351_vm15, 0, %v8350_v16 }
 0x304   :  { %v10758_v27 = vshrl.u32 %v1744_v47, 5  ;;  %v15478_v50 = vmov 2131351028   ;;  %v10763_v45 = vadd.f32 %v10422_v53, %v10611_v42  ;;  %v15479_v34 = vmov 2475754826  }
 0x305   :  { %v1755_v54 = vshll.u32 %v15478_v50, %v1746_v18  ;;  %v1689_v3 = vadd.s32 536870912, %v1688_v5  ;;  %v1750_v62 = vshrl.u32 %v15479_v34, %v1747_v6  ;;  %v1753_v40 = vshrl.u32 %v15478_v50, %v1747_v6 }
 0x306   :  { %v15480_v2 = vmov 2102212464   ;;  %v1749_v30 = vshll.u32 %v15417_v41, %v1746_v18  ;;  %v1752_v49 = vshll.u32 %v15479_v34, %v1746_v18  ;;  %v1759_v37 = vshrl.u32 %v15409_v51, %v1747_v6 }
 0x307   :  { %v1756_v19 = vshrl.u32 %v15480_v2, %v1747_v6  ;;  %v1758_v17 = vshll.u32 %v15480_v2, %v1746_v18  ;;  %v1400_v58 = vxor.u32 2147483648, %v1399_v25  ;;  %v1504_v15 = vxor.u32 2147483648, %v10754_v13 }
 0x308   :  { %v10773_v53 = vshrl.u32 %v1689_v3, 30  ;;  %v1600_v61 = vsub.s32 4294967266, %v10756_v12  ;;  %v1751_v1 = vor.u32 %v1750_v62, %v1749_v30  ;;  %v1754_v4 = vor.u32 %v1753_v40, %v1752_v49 }
 0x309   :  { %v1757_v42 = vor.u32 %v1756_v19, %v1755_v54  ;;  %v1760_v28 = vor.u32 %v1759_v37, %v1758_v17  ;;  %v15481_v57 = vand.u32 2147483647, %v10407_v24  ;;  %v1761_v47 = vshll.u32 %v15409_v51, %v1746_v18  ;;  %v10785_v21 = vpop.eup %9332 }
 0x30a   :  { %v1691_v38 = vshll.u32 %v10773_v53, 30  ;;  %v1762_v59 = vshrl.u32 %v15458_v9, %v1747_v6  ;;  %v1780_v16 = vshll.u32 %v1740_v60, 8  ;;  %vm1422_vm1 = vcmp.lt.s32.totalorder %v10420_v35, 0 }
 0x30b   :  { %vm10778_vm0 = vcmp.le.f32.partialorder %v15481_v57, 0.7853982  ;;  %v1596_v43 = vsub.s32 32, %v10756_v12  ;;  %v1748_v44 = vshrl.u32 %v15417_v41, %v1747_v6  ;;  %vm1767_vm2 = vcmp.lt.s32.totalorder %v10758_v27, 4  ;;  %v10797_v60 = vpop.eup %9334 }
 0x30c   :  { %v1839_v23 = vand.u32 2139095040, %v10763_v45  ;;  %v10792_v54 = vsub.s32 %v1688_v5, %v1691_v38  ;;  %v1763_v3 = vor.u32 %v1762_v59, %v1761_v47  ;;  %vm1764_vm3 = vcmp.lt.s32.totalorder %v10758_v27, 1 }
 0x30d   :  { %v1769_v18 = vsel %vm1767_vm2, %v1757_v42, 2102212464  ;;  %v1601_v62 = vadd.s32 127, %v1600_v61  ;;  %vm1766_vm5 = vcmp.lt.s32.totalorder %v10758_v27, 3  ;;  %v1772_v40 = vsel %vm1764_vm3, %v1751_v1, %v1754_v4 }
 0x30e   :  { %v1773_v6 = vsel %vm1767_vm2, %v1760_v28, 920167782  ;;  %v15484_v19 = vand.u32 2147483647, %v10420_v35  ;;  %v1694_v30 = vsub.s32 0, %v10792_v54  ;;  %vm1765_vm8 = vcmp.lt.s32.totalorder %v10758_v27, 2 }
 0x30f   :  { %v1774_v49 = vsel %vm1766_vm5, %v1757_v42, %v1773_v6  ;;  %v1776_v17 = vsel %vm1764_vm3, %v1754_v4, %v1757_v42  ;;  %v1768_v37 = vsel %vm1764_vm3, %v1748_v44, %v1751_v1  ;;  %v1770_v61 = vsel %vm1766_vm5, %v1754_v4, %v1769_v18 }
 0x310   :  { %vm10804_vm6 = vcmp.le.f32.partialorder %v15484_v19, 0.7853982  ;;  %v1775_v57 = vsel %vm1765_vm8, %v1772_v40, %v1774_v49  ;;  %v1777_v38 = vsel %vm1767_vm2, %v1763_v3, 1326507024  ;;  %v8353_v47 = vmin.u32 %v1694_v30, %v10792_v54 }
 0x311   :  { %v1778_v59 = vsel %vm1766_vm5, %v1760_v28, %v1777_v38  ;;  %v10815_v19 = vmul.u32.u64.low %v1780_v16, %v1775_v57  ;;  %v10816_v14 = vmul.u32.u64.high %v1780_v16, %v1775_v57, %v10815_v19  ;;  %v15487_v51 = vsel %vm10615_vm11, 0, %v10605_v48 }
 0x312   :  { %v10822_v6 = vadd.s32 3, %v15487_v51  ;;  %v1401_v42 = vsel %vm1318_vm7, %v1400_v58, %v1399_v25  ;;  %v1779_v1 = vsel %vm1765_vm8, %v1776_v17, %v1778_v59  ;;  %v1840_v4 = vshrl.u32 %v1839_v23, 23 }
 0x313   :  { %v1580_v44 = vadd.s32 %v10662_v52, %v10667_v22  ;;  %v1696_v28 = vclz %v8353_v47  ;;  %v10830_v3 = vmul.u32.u64.low %v1780_v16, %v1779_v1  ;;  %v10831_v18 = vmul.u32.u64.high %v1780_v16, %v1779_v1, %v10830_v3 }
 0x314   :  { %9336 = vcosq.f32 %v10635_v39  ;;  %v1405_v51 = vsel %vm10778_vm0, 0, %v10749_v63  ;;  %v1771_v48 = vsel %vm1765_vm8, %v1768_v37, %v1770_v61  ;;  %v8360_v32 = vadd.s32 4294967169, %v1840_v4 }
 0x315   :  { %v1505_v25 = vsel %vm1422_vm1, %v1504_v15, %v10754_v13  ;;  %v1598_v58 = vshrl.u32 %v1580_v44, %v1596_v43  ;;  %v1602_v22 = vshll.u32 %v1601_v62, 23  ;;  %v1790_v52 = vadd.s32 1, %v10816_v14 }
 0x316   :  { %v1404_v23 = vsel %vm10778_vm0, %v10407_v24, %v1401_v42  ;;  %v15411_v40 = vand.u32 2147483647, %v10763_v45  ;;  %v1846_v30 = vadd.s32 1, %v8360_v32  ;;  %v1298_v63 = vsub.s32 4, %v10519_v46 }
 0x317   :  { %v1597_v27 = vshll.u32 %v10717_v11, %v10756_v12  ;;  %v8354_v49 = vadd.s32 4294967294, %v1696_v28  ;;  %v1787_v17 = vmul.u32 %v1780_v16, %v1771_v48  ;;  %vm1789_vm11 = vc.u32 %v10831_v18, %v10815_v19 }
 0x318   :  { %9338 = vsinq.f32 %v10635_v39  ;;  %v1508_v13 = vsel %vm10804_vm6, %v10420_v35, %v1505_v25  ;;  %v1791_v15 = vsel %vm1789_vm11, %v1790_v52, %v10816_v14  ;;  %vm1847_vm7 = vcmp.gt.s32.totalorder %v1846_v30, 0 }
 0x319   :  { %9340 = vcosq.f32 %v1404_v23  ;;  %v10856_v20 = vor.u32 %v1598_v58, %v1597_v27  ;;  %v10858_v43 = vor.u32 4788187, %v1602_v22  ;;  %v1792_v62 = vadd.s32 %v1791_v15, %v1787_v17 }
 0x31a   :  { %9342 = vsinq.f32 %v1404_v23  ;;  %v10860_v11 = vadd.s32 3, %v1405_v51  ;;  %v1843_v12 = vand.u32 8388607, %v15411_v40  ;;  %v1848_v39 = vsel %vm1847_vm7, %v1846_v30, 0 }
 0x31b   :  { %9344 = vcosq.f32 %v1508_v13  ;;  %vm8355_vm10 = vcmp.lt.s32.totalorder %v8354_v49, 0  ;;  %v1793_v16 = vadd.s32 536870912, %v1792_v62  ;;  %v1299_v14 = vsel %vm1214_vm13, %v1298_v63, %v10519_v46 }
 0x31c   :  { %9346 = vsinq.f32 %v1508_v13  ;;  %v10869_v37 = vadd.s32 %v10724_v7, %v10738_v8  ;;  %v1850_v61 = vand.u32 31, %v1848_v39  ;;  %v10879_v4 = vsel %vm8355_vm10, 0, %v8354_v49 }
 0x31d   :  { %v10874_v59 = vshrl.u32 %v1793_v16, 30  ;;  %v1844_v46 = vor.u32 8388608, %v1843_v12  ;;  %v1301_v7 = vsel %vm10703_vm4, 0, %v1299_v14  ;;  %v10884_v8 = vadd.s32 %v10815_v19, %v10831_v18 }
 0x31e   :  { %v10877_v1 = vpop.eup %9336  ;;  %v1851_v44 = vsub.s32 32, %v1850_v61  ;;  %v1853_v3 = vshll.u32 %v15417_v41, %v1850_v61  ;;  %v1506_v51 = vsub.s32 4, %v10630_v31  ;;  %v1856_v32 = vshll.u32 %v15479_v34, %v1850_v61 }
 0x31f   :  { %v1795_v28 = vshll.u32 %v10874_v59, 30  ;;  %v1704_v33 = vsub.s32 4294967266, %v10879_v4  ;;  %v1849_v19 = vshrl.u32 %v1848_v39, 5  ;;  %v1859_v18 = vshll.u32 %v15478_v50, %v1850_v61 }
 0x320   :  { %v1854_v48 = vshrl.u32 %v15479_v34, %v1851_v44  ;;  %v1857_v25 = vshrl.u32 %v15478_v50, %v1851_v44  ;;  %v1860_v58 = vshrl.u32 %v15480_v2, %v1851_v44  ;;  %v1700_v23 = vsub.s32 32, %v10879_v4 }
 0x321   :  { %v10894_v22 = vsub.s32 %v1792_v62, %v1795_v28  ;;  %v10900_v27 = vshll.u32 %v1844_v46, 8  ;;  %v1862_v15 = vshll.u32 %v15480_v2, %v1850_v61  ;;  %v15488_v62 = vmov 920167782  }
 0x322   :  { %v10897_v52 = vpop.eup %9338  ;;  %v1855_v30 = vor.u32 %v1854_v48, %v1853_v3  ;;  %v1858_v63 = vor.u32 %v1857_v25, %v1856_v32  ;;  %v1861_v13 = vor.u32 %v1860_v58, %v1859_v18  ;;  %v1863_v12 = vshrl.u32 %v15488_v62, %v1851_v44 }
 0x323   :  { %v10902_v49 = vpop.eup %9340  ;;  %v1798_v17 = vsub.s32 0, %v10894_v22  ;;  %v1865_v16 = vshll.u32 %v15488_v62, %v1850_v61  ;;  %v1866_v14 = vshrl.u32 %v15458_v9, %v1851_v44  ;;  %v1305_v28 = vadd.s32 3, %v1301_v7 }
 0x324   :  { %v10907_v39 = vpop.eup %9342  ;;  %v1507_v46 = vsel %vm1422_vm1, %v1506_v51, %v10630_v31  ;;  %v1705_v48 = vadd.s32 127, %v1704_v33  ;;  %v1864_v25 = vor.u32 %v1863_v12, %v1862_v15  ;;  %vm1868_vm13 = vcmp.lt.s32.totalorder %v1849_v19, 1 }
 0x325   :  { %v10914_v3 = vpop.eup %9344  ;;  %v8357_v32 = vmin.u32 %v1798_v17, %v10894_v22  ;;  %v1852_v18 = vshrl.u32 %v15417_v41, %v1851_v44  ;;  %v1867_v40 = vor.u32 %v1866_v14, %v1865_v16  ;;  %vm1871_vm4 = vcmp.lt.s32.totalorder %v1849_v19, 4 }
 0x326   :  { %v9347_v58 = vpop.eup %9346  ;;  %v1876_v61 = vsel %vm1868_vm13, %v1855_v30, %v1858_v63  ;;  %vm1870_vm9 = vcmp.lt.s32.totalorder %v1849_v19, 3  ;;  %v1873_v7 = vsel %vm1871_vm4, %v1861_v13, 2102212464  ;;  %v1877_v38 = vsel %vm1871_vm4, %v1864_v25, 920167782 }
 0x327   :  { %v1800_v47 = vclz %v8357_v32  ;;  %vm1869_vm14 = vcmp.lt.s32.totalorder %v1849_v19, 2  ;;  %v1878_v42 = vsel %vm1870_vm9, %v1861_v13, %v1877_v38  ;;  %v1880_v31 = vsel %vm1868_vm13, %v1858_v63, %v1861_v13 }
 0x328   :  { %v1306_v51 = vand.u32 3, %v1305_v28  ;;  %v1872_v33 = vsel %vm1868_vm13, %v1852_v18, %v1855_v30  ;;  %v1879_v17 = vsel %vm1869_vm14, %v1876_v61, %v1878_v42  ;;  %v1881_v15 = vsel %vm1871_vm4, %v1867_v40, 1326507024 }
 0x329   :  { %v8358_v57 = vadd.s32 4294967294, %v1800_v47  ;;  %v1874_v12 = vsel %vm1870_vm9, %v1858_v63, %v1873_v7  ;;  %v1882_v9 = vsel %vm1870_vm9, %v1864_v25, %v1881_v15  ;;  %v1701_v14 = vshll.u32 %v10792_v54, %v10879_v4 }
 0x32a   :  { %v10920_v44 = vmul.u32.u64.low %v10900_v27, %v1879_v17  ;;  %v10921_v16 = vmul.u32.u64.high %v10900_v27, %v1879_v17, %v10920_v44  ;;  %v1883_v38 = vsel %vm1869_vm14, %v1880_v31, %v1882_v9  ;;  %v1509_v47 = vsel %vm10804_vm6, 0, %v1507_v46 }
 0x32b   :  { %vm8359_vm15 = vcmp.lt.s32.totalorder %v8358_v57, 0  ;;  %v1702_v30 = vshrl.u32 %v10869_v37, %v1700_v23  ;;  %v10931_v40 = vmul.u32.u64.low %v10900_v27, %v1883_v38  ;;  %v10932_v63 = vmul.u32.u64.high %v10900_v27, %v1883_v38, %v10931_v40 }
 0x32c   :  { %v1803_v42 = vsel %vm8359_vm15, 0, %v8358_v57  ;;  %vm1304_vm0 = vweird.f32 %v10401_v55  ;;  %vm1512_vm1 = vweird.f32 %v10420_v35  ;;  %v1706_v13 = vshll.u32 %v1705_v48, 23 }
 0x32d   :  { %v1808_v28 = vsub.s32 4294967266, %v1803_v42  ;;  %v1875_v54 = vsel %vm1869_vm14, %v1872_v33, %v1874_v12  ;;  %v1517_v4 = vxor.u32 2147483648, %v9347_v58  ;;  %v1894_v9 = vadd.s32 1, %v10921_v16 }
 0x32e   :  { %vm1308_vm2 = vcmp.eq.s32.totalorder %v1306_v51, 0  ;;  %vm1311_vm3 = vcmp.eq.s32.totalorder %v1306_v51, 2  ;;  %v1513_v5 = vadd.s32 3, %v1509_v47  ;;  %v15489_v57 = vxor.u32 2147483648, %v10797_v60 }
 0x32f   :  { %v1809_v37 = vadd.s32 127, %v1808_v28  ;;  %v15490_v46 = vxor.u32 2147483648, %v10785_v21  ;;  %v1520_v48 = vxor.u32 2147483648, %v10914_v3  ;;  %v1703_v25 = vor.u32 %v1702_v30, %v1701_v14 }
 0x330   :  { %v1310_v23 = vsel %vm1308_vm2, %v10785_v21, %v15489_v57  ;;  %v1891_v19 = vmul.u32 %v10900_v27, %v1875_v54  ;;  %vm1893_vm5 = vc.u32 %v10932_v63, %v10920_v44  ;;  %v1514_v18 = vand.u32 3, %v1513_v5 }
 0x331   :  { %v1313_v32 = vsel %vm1311_vm3, %v15490_v46, %v10797_v60  ;;  %v1707_v61 = vor.u32 4788187, %v1706_v13  ;;  %v1804_v7 = vsub.s32 32, %v1803_v42  ;;  %v1895_v31 = vsel %vm1893_vm5, %v1894_v9, %v10921_v16 }
 0x332   :  { %vm1307_vm6 = vcmp.lt.s32.totalorder %v1306_v51, 2  ;;  %v1896_v33 = vadd.s32 %v1895_v31, %v1891_v19  ;;  %vm1516_vm8 = vcmp.eq.s32.totalorder %v1514_v18, 0  ;;  %vm1519_vm11 = vcmp.eq.s32.totalorder %v1514_v18, 2 }
 0x333   :  { %v1314_v17 = vsel %vm1307_vm6, %v1310_v23, %v1313_v32  ;;  %v1810_v21 = vshll.u32 %v1809_v37, 23  ;;  %vm1515_vm7 = vcmp.lt.s32.totalorder %v1514_v18, 2  ;;  %v1518_v60 = vsel %vm1516_vm8, %v10914_v3, %v1517_v4 }
 0x334   :  { %v1521_v15 = vsel %vm1519_vm11, %v1520_v48, %v9347_v58  ;;  %v1897_v12 = vadd.s32 536870912, %v1896_v33  ;;  %v1202_v14 = vand.u32 3, %v10822_v6  ;;  %v1205_v38 = vxor.u32 2147483648, %v10897_v52 }
 0x335   :  { %v1522_v27 = vsel %vm1515_vm7, %v1518_v60, %v1521_v15  ;;  %v1806_v47 = vshrl.u32 %v10884_v8, %v1804_v7  ;;  %v1315_v51 = vsel %vm1304_vm0, nan, %v1314_v17  ;;  %v1208_v30 = vxor.u32 2147483648, %v10877_v1 }
 0x336   :  { %v1523_v16 = vsel %vm1512_vm1, nan, %v1522_v27  ;;  %v1805_v40 = vshll.u32 %v10894_v22, %v1803_v42  ;;  %v10959_v3 = vshrl.u32 %v1897_v12, 30  ;;  %vm1204_vm10 = vcmp.eq.s32.totalorder %v1202_v14, 0 }
 0x337   :  { %v8861_v58 = vpack.c.bf16 %v1523_v16, %v1315_v51  ;;  %v1811_v13 = vor.u32 4788187, %v1810_v21  ;;  %v1206_v6 = vsel %vm1204_vm10, %v10877_v1, %v1205_v38  ;;  %vm1207_vm13 = vcmp.eq.s32.totalorder %v1202_v14, 2 }
 0x338   :  { %v1410_v8 = vand.u32 3, %v10860_v11  ;;  %v1899_v55 = vshll.u32 %v10959_v3, 30  ;;  %v1209_v35 = vsel %vm1207_vm13, %v1208_v30, %v10897_v52  ;;  %v1413_v28 = vxor.u32 2147483648, %v10907_v39 }
 0x339   :  { %8862 = vmatprep.subr.bf16.mxu0 %v8861_v58  ;;  %v1416_v54 = vxor.u32 2147483648, %v10902_v49  ;;  %v1708_v22 = vand.u32 2147483647, %v1707_v61  ;;  %v1807_v42 = vor.u32 %v1806_v47, %v1805_v40  ;;  %vm1203_vm4 = vcmp.lt.s32.totalorder %v1202_v14, 2 }
 0x33a   :  { %vm1412_vm9 = vcmp.eq.s32.totalorder %v1410_v8, 0  ;;  %v1900_v4 = vsub.s32 %v1896_v33, %v1899_v55  ;;  %v1210_v9 = vsel %vm1203_vm4, %v1206_v6, %v1209_v35  ;;  %vm1415_vm14 = vcmp.eq.s32.totalorder %v1410_v8, 2 }
 0x33b   :  { %v1414_v1 = vsel %vm1412_vm9, %v10902_v49, %v1413_v28  ;;  %v1710_v5 = vcvt.s32.f32 %v1703_v25  ;;  %v1812_v11 = vand.u32 2147483647, %v1811_v13  ;;  %vm1411_vm15 = vcmp.lt.s32.totalorder %v1410_v8, 2 }
 0x33c   :  { %v1417_v37 = vsel %vm1415_vm14, %v1416_v54, %v10907_v39  ;;  %v1902_v57 = vsub.s32 0, %v1900_v4  ;;  %vm1200_vm0 = vweird.f32 %v10399_v56  ;;  %vm1408_vm1 = vweird.f32 %v10407_v24 }
 0x33d   :  { %v1418_v52 = vsel %vm1411_vm15, %v1414_v1, %v1417_v37  ;;  %v15491_v23 = vand.u32 2147483647, %v10858_v43  ;;  %v15492_v46 = vcvt.s32.f32 %v10856_v20  ;;  %v1814_v48 = vcvt.s32.f32 %v1807_v42 }
 0x33e   :  { %v1211_v19 = vsel %vm1200_vm0, nan, %v1210_v9  ;;  %v1419_v49 = vsel %vm1408_vm1, nan, %v1418_v52  ;;  %v1711_v18 = vmul.f32 %v1710_v5, %v1708_v22  ;;  %v8361_v25 = vmin.u32 %v1902_v57, %v1900_v4 }
 0x33f   :  { %v1607_v32 = vmul.f32 %v15492_v46, %v15491_v23  ;;  %v8863_v61 = vpack.c.bf16 %v1419_v49, %v1211_v19  ;;  %v1815_v7 = vmul.f32 %v1814_v48, %v1812_v11  ;;  %vm1526_vm2 = vcmp.lt.s32.totalorder %v10556_v36, 0 }
 0x340   :  { %v1904_v31 = vclz %v8361_v25  ;;  %v1712_v33 = vxor.u32 2147483648, %v1711_v18  ;;  %vm1630_vm5 = vcmp.lt.s32.totalorder %v10571_v10, 0  ;;  %vm1734_vm6 = vcmp.lt.s32.totalorder %v10621_v26, 0 }
 0x341   :  { %8864 = vmatpush1.bf16.msra.mxu0 %v8863_v61  ;;  %v1608_v39 = vxor.u32 2147483648, %v1607_v32  ;;  %v1816_v17 = vxor.u32 2147483648, %v1815_v7  ;;  %v1892_v21 = vadd.s32 %v10920_v44, %v10932_v63  ;;  %v15493_v12 = vand.u32 2147483647, %v10556_v36 }
 0x342   :  { %v8362_v56 = vadd.s32 4294967294, %v1904_v31  ;;  %v1713_v43 = vsel %vm1630_vm5, %v1712_v33, %v1711_v18  ;;  %v15496_v14 = vand.u32 2147483647, %v10571_v10  ;;  %v15499_v40 = vand.u32 2147483647, %v10621_v26 }
 0x343   :  { %v1609_v24 = vsel %vm1526_vm2, %v1608_v39, %v1607_v32  ;;  %vm10986_vm8 = vcmp.le.f32.partialorder %v15493_v12, 0.7853982  ;;  %v1817_v47 = vsel %vm1734_vm6, %v1816_v17, %v1815_v7  ;;  %v1818_v55 = vsub.s32 4, %v10874_v59 }
 0x344   :  { %vm8363_vm3 = vcmp.lt.s32.totalorder %v8362_v56, 0  ;;  %vm10992_vm11 = vcmp.le.f32.partialorder %v15496_v14, 0.7853982  ;;  %v1612_v44 = vsel %vm10986_vm8, %v10556_v36, %v1609_v24  ;;  %vm11006_vm7 = vcmp.le.f32.partialorder %v15499_v40, 0.7853982 }
 0x345   :  { %v1907_v20 = vsel %vm8363_vm3, 0, %v8362_v56  ;;  %v1716_v30 = vsel %vm10992_vm11, %v10571_v10, %v1713_v43  ;;  %v1820_v13 = vsel %vm11006_vm7, %v10621_v26, %v1817_v47  ;;  %9348 = vcosq.f32 %v1612_v44 }
 0x346   :  { %v1908_v60 = vsub.s32 32, %v1907_v20  ;;  %v1912_v15 = vsub.s32 4294967266, %v1907_v20  ;;  %v1909_v63 = vshll.u32 %v1900_v4, %v1907_v20  ;;  %9350 = vcosq.f32 %v1716_v30 }
 0x347   :  { %9352 = vcosq.f32 %v1820_v13  ;;  %v1714_v28 = vsub.s32 4, %v10773_v53  ;;  %v1610_v54 = vsub.s32 4, %v10710_v29  ;;  %v1819_v4 = vsel %vm1734_vm6, %v1818_v55, %v10874_v59 }
 0x348   :  { %v1910_v51 = vshrl.u32 %v1892_v21, %v1908_v60  ;;  %v1913_v16 = vadd.s32 127, %v1912_v15  ;;  %9354 = vsinq.f32 %v1820_v13  ;;  %v1922_v1 = vsub.s32 4, %v10959_v3 }
 0x349   :  { %9356 = vsinq.f32 %v1716_v30  ;;  %v1715_v5 = vsel %vm1630_vm5, %v1714_v28, %v10773_v53  ;;  %v1611_v11 = vsel %vm1526_vm2, %v1610_v54, %v10710_v29  ;;  %v1821_v57 = vsel %vm11006_vm7, 0, %v1819_v4 }
 0x34a   :  { %v1911_v6 = vor.u32 %v1910_v51, %v1909_v63  ;;  %v1914_v8 = vshll.u32 %v1913_v16, 23  ;;  %9358 = vsinq.f32 %v1612_v44  ;;  %vm1838_vm10 = vcmp.lt.s32.totalorder %v10763_v45, 0 }
 0x34b   :  { %v15502_v52 = vand.u32 2147483647, %v10763_v45  ;;  %v1717_v53 = vsel %vm10992_vm11, 0, %v1715_v5  ;;  %v1923_v46 = vsel %vm1838_vm10, %v1922_v1, %v10959_v3  ;;  %v1613_v29 = vsel %vm10986_vm8, 0, %v1611_v11  ;;  %v8364_v5 = vld [vmem:[%s15382_s2 + $0x20] sm:$0xff] }
 0x34c   :  { %v1915_v35 = vor.u32 4788187, %v1914_v8  ;;  %v1918_v42 = vcvt.s32.f32 %v1911_v6  ;;  %v1825_v49 = vadd.s32 3, %v1821_v57  ;;  %v1721_v25 = vadd.s32 3, %v1717_v53  ;;  %v1958_v53 = vpop.permute.xlu1 %1957 }
 0x34d   :  { %vm11031_vm13 = vcmp.le.f32.partialorder %v15502_v52, 0.7853982  ;;  %v1617_v31 = vadd.s32 3, %v1613_v29  ;;  %vm1824_vm7 = vweird.f32 %v10621_v26  ;;  %v8367_v26 = vld [vmem:[%s15382_s2 + $0x38] sm:$0xff] }
 0x34e   :  { %v1916_v22 = vand.u32 2147483647, %v1915_v35  ;;  %v1925_v61 = vsel %vm11031_vm13, 0, %v1923_v46  ;;  %v1826_v56 = vand.u32 3, %v1825_v49  ;;  %v1722_v17 = vand.u32 3, %v1721_v25 }
 0x34f   :  { %v9349_v32 = vpop.eup %9348  ;;  %v1929_v33 = vadd.s32 3, %v1925_v61  ;;  %v1618_v60 = vand.u32 3, %v1617_v31 }
 0x350   :  { %v1919_v9 = vmul.f32 %v1918_v42, %v1916_v22  ;;  %v9351_v19 = vpop.eup %9350  ;;  %v1624_v12 = vxor.u32 2147483648, %v9349_v32  ;;  %vm1828_vm4 = vcmp.eq.s32.totalorder %v1826_v56, 0  ;;  %vm1831_vm9 = vcmp.eq.s32.totalorder %v1826_v56, 2 }
 0x351   :  { %v9353_v18 = vpop.eup %9352  ;;  %v1728_v21 = vxor.u32 2147483648, %v9351_v19  ;;  %v1930_v27 = vand.u32 3, %v1929_v33  ;;  %vm1724_vm14 = vcmp.eq.s32.totalorder %v1722_v17, 0  ;;  %vm1727_vm15 = vcmp.eq.s32.totalorder %v1722_v17, 2 }
 0x352   :  { %v1920_v37 = vxor.u32 2147483648, %v1919_v9  ;;  %v9355_v7 = vpop.eup %9354  ;;  %v1832_v20 = vxor.u32 2147483648, %v9353_v18  ;;  %vm1620_vm0 = vcmp.eq.s32.totalorder %v1618_v60, 0  ;;  %vm1623_vm1 = vcmp.eq.s32.totalorder %v1618_v60, 2 }
 0x353   :  { %v9357_v3 = vpop.eup %9356  ;;  %v1829_v24 = vxor.u32 2147483648, %v9355_v7  ;;  %vm1827_vm2 = vcmp.lt.s32.totalorder %v1826_v56, 2  ;;  %vm1723_vm3 = vcmp.lt.s32.totalorder %v1722_v17, 2  ;;  %vm1935_vm5 = vcmp.eq.s32.totalorder %v1930_v27, 2 }
 0x354   :  { %v1921_v23 = vsel %vm1838_vm10, %v1920_v37, %v1919_v9  ;;  %v9359_v39 = vpop.eup %9358  ;;  %v1725_v43 = vxor.u32 2147483648, %v9357_v3  ;;  %v1833_v38 = vsel %vm1831_vm9, %v1832_v20, %v9355_v7  ;;  %v1729_v63 = vsel %vm1727_vm15, %v1728_v21, %v9357_v3 }
 0x355   :  { %v1924_v48 = vsel %vm11031_vm13, %v10763_v45, %v1921_v23  ;;  %v1621_v15 = vxor.u32 2147483648, %v9359_v39  ;;  %v1830_v14 = vsel %vm1828_vm4, %v9353_v18, %v1829_v24  ;;  %v1625_v40 = vsel %vm1623_vm1, %v1624_v12, %v9359_v39 }
 0x356   :  { %9360 = vcosq.f32 %v1924_v48  ;;  %v1726_v44 = vsel %vm1724_vm14, %v9351_v19, %v1725_v43  ;;  %v1834_v13 = vsel %vm1827_vm2, %v1830_v14, %v1833_v38  ;;  %vm1932_vm6 = vcmp.eq.s32.totalorder %v1930_v27, 0 }
 0x357   :  { %9362 = vsinq.f32 %v1924_v48  ;;  %v1622_v30 = vsel %vm1620_vm0, %v9349_v32, %v1621_v15  ;;  %v1730_v6 = vsel %vm1723_vm3, %v1726_v44, %v1729_v63  ;;  %vm1619_vm8 = vcmp.lt.s32.totalorder %v1618_v60, 2 }
 0x358   :  { %vm1931_vm11 = vcmp.lt.s32.totalorder %v1930_v27, 2  ;;  %v1626_v35 = vsel %vm1619_vm8, %v1622_v30, %v1625_v40  ;;  %vm1720_vm10 = vweird.f32 %v10571_v10  ;;  %vm1928_vm13 = vweird.f32 %v10763_v45  ;;  %v8365_v10 = vld [vmem:[%s15382_s2 + $0x28] sm:$0xff]  ;;  %v1953_v45 = vpop.permute.xlu0 %1952 }
 0x359   :  { %v1835_v54 = vsel %vm1824_vm7, nan, %v1834_v13  ;;  %v1731_v22 = vsel %vm1720_vm10, nan, %v1730_v6  ;;  %vm1616_vm4 = vweird.f32 %v10556_v36  ;;  %v8366_v36 = vld [vmem:[%s15382_s2 + $0x30] sm:$0xff] }
 0x35a   :  { %v1627_v9 = vsel %vm1616_vm4, nan, %v1626_v35 }
 0x35b   :  { %v8867_v1 = vpack.c.bf16 %v1835_v54, %v1627_v9  ;;  %v15505_v9 = vmov 1326507024  }
 0x360   :  { %v9361_v47 = vpop.eup %9360 }
 0x361   :  { %v9363_v51 = vpop.eup %9362  ;;  %v1936_v16 = vxor.u32 2147483648, %v9361_v47 }
 0x362   :  { %v1933_v58 = vxor.u32 2147483648, %v9363_v51 }
 0x363   :  { %v1937_v8 = vsel %vm1935_vm5, %v1936_v16, %v9363_v51 }
 0x364   :  { %v1934_v55 = vsel %vm1932_vm6, %v9361_v47, %v1933_v58 }
 0x365   :  { %v1938_v28 = vsel %vm1931_vm11, %v1934_v55, %v1937_v8 }
 0x366   :  { %v1939_v42 = vsel %vm1928_vm13, nan, %v1938_v28 }
 0x367   :  { %v8865_v4 = vpack.c.bf16 %v1939_v42, %v1731_v22 }
 0x369   :  { %8866 = vmatprep.subr.bf16.mxu0 %v8865_v4 }
 0x36a   :  { %8868 = vmatpush1.bf16.msra.mxu0 %v8867_v1 }
 0x36d   :  { %8372 = vmatmul.mubr.msk.f32.vlgmr.msra.gmra.mrb[4].mxu0 %vm1006_vm12, %v8364_v5 }
 0x36e   :  { %2052 = vmatprep.mubr.f32.mxu0 %v15472_v0 }
 0x371   :  { %8373 = vmatmul.mubr.msk.f32.gmra.mrb[6].mxu0 %vm1006_vm12, %v8365_v10 }
 0x372   :  { %2058 = vmatprep.mubr.f32.mxu0 %v15472_v0 }
 0x375   :  { %8374 = vmatmul.mubr.msk.f32.gmra.mrb[8].mxu0 %vm1006_vm12, %v8366_v36 }
 0x376   :  { %2064 = vmatprep.mubr.f32.mxu0 %v15472_v0 }
 0x379   :  { %8375 = vmatmul.mubr.msk.f32.gmra.mrb[10].mxu0 %vm1006_vm12, %v8367_v26 }
 0x37a   :  { %3972 = vmatprep.mubr.f32.mxu0 %v15472_v0 }
 0x440   :  { %v2048_v11 = vpop.f32.mrb[4].mxu0 }
 0x441   :  { %v11069_v37 = vadd.f32 %v2048_v11, %v1953_v45  ;;  %v2050_v57 = vpop.f32.mrb[5].mxu0 }
 0x442   :  { %v11071_v52 = vadd.f32 %v2050_v57, %v1953_v45 }
 0x443   :  { %v2071_v59 = vand.u32 2147483647, %v11069_v37  ;;  %v2074_v23 = vand.u32 2139095040, %v11069_v37 }
 0x444   :  { %v2175_v46 = vand.u32 2147483647, %v11071_v52  ;;  %v2178_v32 = vand.u32 2139095040, %v11071_v52  ;;  %v2054_v29 = vpop.f32.mrb[6].mxu0 }
 0x445   :  { %v2075_v48 = vshrl.u32 %v2074_v23, 23  ;;  %v11077_v19 = vadd.f32 %v2054_v29, %v1958_v53  ;;  %v2056_v49 = vpop.f32.mrb[7].mxu0  ;;  %v2078_v18 = vand.u32 8388607, %v2071_v59 }
 0x446   :  { %v2179_v25 = vshrl.u32 %v2178_v32, 23  ;;  %v2182_v61 = vand.u32 8388607, %v2175_v46  ;;  %v11090_v38 = vadd.f32 %v2056_v49, %v1958_v53 }
 0x447   :  { %v8376_v7 = vadd.s32 4294967169, %v2075_v48  ;;  %v2282_v3 = vand.u32 2139095040, %v11077_v19  ;;  %v2079_v56 = vor.u32 8388608, %v2078_v18  ;;  %v15416_v16 = vand.u32 2147483647, %v11077_v19 }
 0x448   :  { %v8380_v31 = vadd.s32 4294967169, %v2179_v25  ;;  %v11084_v39 = vpop.f32.mrb[8].mxu0  ;;  %v2183_v17 = vor.u32 8388608, %v2182_v61 }
 0x449   :  { %v2081_v33 = vadd.s32 1, %v8376_v7  ;;  %v2283_v20 = vshrl.u32 %v2282_v3, 23  ;;  %v11086_v43 = vpop.f32.mrb[9].mxu0  ;;  %v11094_v44 = vshll.u32 %v2079_v56, 8 }
 0x44a   :  { %v2185_v24 = vadd.s32 1, %v8380_v31  ;;  %v11098_v51 = vshll.u32 %v2183_v17, 8 }
 0x44b   :  { %vm2082_vm9 = vcmp.gt.s32.totalorder %v2081_v33, 0  ;;  %v8384_v60 = vadd.s32 4294967169, %v2283_v20 }
 0x44c   :  { %v2083_v21 = vsel %vm2082_vm9, %v2081_v33, 0  ;;  %vm2186_vm14 = vcmp.gt.s32.totalorder %v2185_v24, 0  ;;  %v11088_v15 = vpop.f32.mrb[10].mxu0 }
 0x44d   :  { %v2084_v12 = vshrl.u32 %v2083_v21, 5  ;;  %v2085_v27 = vand.u32 31, %v2083_v21  ;;  %v2187_v14 = vsel %vm2186_vm14, %v2185_v24, 0  ;;  %v11092_v47 = vpop.f32.mrb[11].mxu0  ;;  %v11102_v13 = vadd.s32 1, %v8384_v60 }
 0x44e   :  { %v11096_v63 = vshrl.u32 %v2187_v14, 5  ;;  %v2189_v58 = vand.u32 31, %v2187_v14 }
 0x44f   :  { %v2086_v30 = vsub.s32 32, %v2085_v27  ;;  %v2088_v40 = vshll.u32 %v15417_v41, %v2085_v27  ;;  %v2091_v6 = vshll.u32 %v15479_v34, %v2085_v27  ;;  %v2094_v8 = vshll.u32 %v15478_v50, %v2085_v27 }
 0x450   :  { %v2097_v55 = vshll.u32 %v15480_v2, %v2085_v27  ;;  %v2100_v35 = vshll.u32 %v15488_v62, %v2085_v27  ;;  %vm2103_vm15 = vcmp.lt.s32.totalorder %v2084_v12, 1  ;;  %vm2104_vm0 = vcmp.lt.s32.totalorder %v2084_v12, 2 }
 0x451   :  { %v2089_v28 = vshrl.u32 %v15479_v34, %v2086_v30  ;;  %v2092_v54 = vshrl.u32 %v15478_v50, %v2086_v30  ;;  %v2095_v22 = vshrl.u32 %v15480_v2, %v2086_v30  ;;  %v2087_v42 = vshrl.u32 %v15417_v41, %v2086_v30 }
 0x452   :  { %v2098_v4 = vshrl.u32 %v15488_v62, %v2086_v30  ;;  %v2101_v1 = vshrl.u32 %v15505_v9, %v2086_v30  ;;  %v2190_v26 = vsub.s32 32, %v2189_v58  ;;  %vm2105_vm1 = vcmp.lt.s32.totalorder %v2084_v12, 3 }
 0x453   :  { %v2090_v5 = vor.u32 %v2089_v28, %v2088_v40  ;;  %v2093_v10 = vor.u32 %v2092_v54, %v2091_v6  ;;  %v2096_v36 = vor.u32 %v2095_v22, %v2094_v8  ;;  %vm2106_vm2 = vcmp.lt.s32.totalorder %v2084_v12, 4 }
 0x454   :  { %v2099_v45 = vor.u32 %v2098_v4, %v2097_v55  ;;  %v2102_v11 = vor.u32 %v2101_v1, %v2100_v35  ;;  %v2192_v18 = vshll.u32 %v15417_v41, %v2189_v58  ;;  %v2193_v7 = vshrl.u32 %v15479_v34, %v2190_v26 }
 0x455   :  { %v2107_v57 = vsel %vm2103_vm15, %v2087_v42, %v2090_v5  ;;  %v2108_v23 = vsel %vm2106_vm2, %v2096_v36, 2102212464  ;;  %v2111_v53 = vsel %vm2103_vm15, %v2090_v5, %v2093_v10  ;;  %v2115_v32 = vsel %vm2103_vm15, %v2093_v10, %v2096_v36 }
 0x456   :  { %v2109_v29 = vsel %vm2105_vm1, %v2093_v10, %v2108_v23  ;;  %v2112_v48 = vsel %vm2106_vm2, %v2099_v45, 920167782  ;;  %v2116_v49 = vsel %vm2106_vm2, %v2102_v11, 1326507024  ;;  %v2195_v31 = vshll.u32 %v15479_v34, %v2189_v58 }
 0x457   :  { %v2113_v25 = vsel %vm2105_vm1, %v2096_v36, %v2112_v48  ;;  %v2117_v61 = vsel %vm2105_vm1, %v2099_v45, %v2116_v49  ;;  %v2110_v3 = vsel %vm2104_vm0, %v2107_v57, %v2109_v29  ;;  %v2196_v17 = vshrl.u32 %v15478_v50, %v2190_v26 }
 0x458   :  { %v2114_v33 = vsel %vm2104_vm0, %v2111_v53, %v2113_v25  ;;  %v2118_v56 = vsel %vm2104_vm0, %v2115_v32, %v2117_v61  ;;  %v2194_v27 = vor.u32 %v2193_v7, %v2192_v18  ;;  %v2198_v30 = vshll.u32 %v15478_v50, %v2189_v58 }
 0x459   :  { %v11125_v24 = vmul.u32.u64.low %v11094_v44, %v2118_v56  ;;  %v11126_v20 = vmul.u32.u64.high %v11094_v44, %v2118_v56, %v11125_v24  ;;  %v11129_v21 = vmul.u32.u64.low %v11094_v44, %v2114_v33  ;;  %v11130_v60 = vmul.u32.u64.high %v11094_v44, %v2114_v33, %v11129_v21 }
 0x45a   :  { %v2197_v14 = vor.u32 %v2196_v17, %v2195_v31  ;;  %v2199_v40 = vshrl.u32 %v15480_v2, %v2190_v26  ;;  %v2191_v12 = vshrl.u32 %v15417_v41, %v2190_v26  ;;  %v2201_v6 = vshll.u32 %v15480_v2, %v2189_v58 }
 0x45b   :  { %v2202_v8 = vshrl.u32 %v15488_v62, %v2190_v26  ;;  %v2205_v55 = vshrl.u32 %v15505_v9, %v2190_v26  ;;  %v2126_v35 = vmul.u32 %v11094_v44, %v2110_v3  ;;  %v2204_v54 = vshll.u32 %v15488_v62, %v2189_v58 }
 0x45c   :  { %v2200_v28 = vor.u32 %v2199_v40, %v2198_v30  ;;  %vm2207_vm3 = vcmp.lt.s32.totalorder %v11096_v63, 1  ;;  %vm2128_vm5 = vc.u32 %v11126_v20, %v11129_v21  ;;  %v2129_v22 = vadd.s32 1, %v11130_v60 }
 0x45d   :  { %v2203_v42 = vor.u32 %v2202_v8, %v2201_v6  ;;  %vm2208_vm6 = vcmp.lt.s32.totalorder %v11096_v63, 2  ;;  %v2206_v4 = vor.u32 %v2205_v55, %v2204_v54  ;;  %vm2209_vm8 = vcmp.lt.s32.totalorder %v11096_v63, 3 }
 0x45e   :  { %vm2210_vm11 = vcmp.lt.s32.totalorder %v11096_v63, 4  ;;  %v2215_v1 = vsel %vm2207_vm3, %v2194_v27, %v2197_v14  ;;  %v2130_v44 = vsel %vm2128_vm5, %v2129_v22, %v11130_v60  ;;  %v2219_v10 = vsel %vm2207_vm3, %v2197_v14, %v2200_v28 }
 0x45f   :  { %v2212_v5 = vsel %vm2210_vm11, %v2200_v28, 2102212464  ;;  %v2216_v58 = vsel %vm2210_vm11, %v2203_v42, 920167782  ;;  %v2131_v36 = vadd.s32 %v2130_v44, %v2126_v35  ;;  %v2211_v26 = vsel %vm2207_vm3, %v2191_v12, %v2194_v27 }
 0x460   :  { %v2217_v45 = vsel %vm2209_vm8, %v2200_v28, %v2216_v58  ;;  %v2220_v11 = vsel %vm2210_vm11, %v2206_v4, 1326507024  ;;  %v2213_v57 = vsel %vm2209_vm8, %v2197_v14, %v2212_v5  ;;  %vm2290_vm7 = vcmp.gt.s32.totalorder %v11102_v13, 0 }
 0x461   :  { %v2218_v23 = vsel %vm2208_vm6, %v2215_v1, %v2217_v45  ;;  %v2221_v53 = vsel %vm2209_vm8, %v2203_v42, %v2220_v11  ;;  %v2132_v32 = vadd.s32 536870912, %v2131_v36  ;;  %v2286_v61 = vand.u32 8388607, %v15416_v16 }
 0x462   :  { %v2222_v29 = vsel %vm2208_vm6, %v2219_v10, %v2221_v53  ;;  %v11155_v48 = vmul.u32.u64.low %v11098_v51, %v2218_v23  ;;  %v11156_v49 = vmul.u32.u64.high %v11098_v51, %v2218_v23, %v11155_v48  ;;  %v2291_v7 = vsel %vm2290_vm7, %v11102_v13, 0 }
 0x463   :  { %v11160_v18 = vmul.u32.u64.low %v11098_v51, %v2222_v29  ;;  %v11161_v25 = vmul.u32.u64.high %v11098_v51, %v2222_v29, %v11160_v18  ;;  %v11166_v31 = vshrl.u32 %v2132_v32, 30  ;;  %v2214_v3 = vsel %vm2208_vm6, %v2211_v26, %v2213_v57 }
 0x464   :  { %v2293_v33 = vand.u32 31, %v2291_v7  ;;  %v2386_v56 = vand.u32 2139095040, %v11090_v38  ;;  %v2233_v24 = vadd.s32 1, %v11156_v49  ;;  %v2230_v27 = vmul.u32 %v11098_v51, %v2214_v3 }
 0x465   :  { %v2134_v17 = vshll.u32 %v11166_v31, 30  ;;  %vm2232_vm10 = vc.u32 %v11161_v25, %v11155_v48  ;;  %v2287_v14 = vor.u32 8388608, %v2286_v61  ;;  %v2292_v35 = vshrl.u32 %v2291_v7, 5 }
 0x466   :  { %v2294_v60 = vsub.s32 32, %v2293_v33  ;;  %v2234_v30 = vsel %vm2232_vm10, %v2233_v24, %v11156_v49  ;;  %v2387_v63 = vshrl.u32 %v2386_v56, 23  ;;  %v2296_v12 = vshll.u32 %v15417_v41, %v2293_v33 }
 0x467   :  { %v11176_v13 = vsub.s32 %v2131_v36, %v2134_v17  ;;  %v2235_v40 = vadd.s32 %v2234_v30, %v2230_v27  ;;  %v2299_v51 = vshll.u32 %v15479_v34, %v2293_v33  ;;  %v2302_v42 = vshll.u32 %v15478_v50, %v2293_v33 }
 0x468   :  { %v2297_v6 = vshrl.u32 %v15479_v34, %v2294_v60  ;;  %v2300_v8 = vshrl.u32 %v15478_v50, %v2294_v60  ;;  %v2303_v28 = vshrl.u32 %v15480_v2, %v2294_v60  ;;  %v2327_v4 = vshll.u32 %v2287_v14, 8 }
 0x469   :  { %v2137_v55 = vsub.s32 0, %v11176_v13  ;;  %v2236_v54 = vadd.s32 536870912, %v2235_v40  ;;  %v2305_v5 = vshll.u32 %v15480_v2, %v2293_v33  ;;  %v2306_v58 = vshrl.u32 %v15488_v62, %v2294_v60 }
 0x46a   :  { %v2298_v22 = vor.u32 %v2297_v6, %v2296_v12  ;;  %v2301_v44 = vor.u32 %v2300_v8, %v2299_v51  ;;  %v2304_v36 = vor.u32 %v2303_v28, %v2302_v42  ;;  %v2308_v26 = vshll.u32 %v15488_v62, %v2293_v33 }
 0x46b   :  { %v8377_v1 = vmin.u32 %v2137_v55, %v11176_v13  ;;  %v11189_v10 = vshrl.u32 %v2236_v54, 30  ;;  %v2309_v45 = vshrl.u32 %v15505_v9, %v2294_v60  ;;  %v2307_v57 = vor.u32 %v2306_v58, %v2305_v5 }
 0x46c   :  { %vm2311_vm13 = vcmp.lt.s32.totalorder %v2292_v35, 1  ;;  %v8388_v23 = vadd.s32 4294967169, %v2387_v63  ;;  %vm2312_vm4 = vcmp.lt.s32.totalorder %v2292_v35, 2  ;;  %vm2314_vm9 = vcmp.lt.s32.totalorder %v2292_v35, 4 }
 0x46d   :  { %v2139_v11 = vclz %v8377_v1  ;;  %v2238_v53 = vshll.u32 %v11189_v10, 30  ;;  %v2310_v32 = vor.u32 %v2309_v45, %v2308_v26  ;;  %vm2313_vm14 = vcmp.lt.s32.totalorder %v2292_v35, 3 }
 0x46e   :  { %v2319_v49 = vsel %vm2311_vm13, %v2298_v22, %v2301_v44  ;;  %v2320_v18 = vsel %vm2314_vm9, %v2307_v57, 920167782  ;;  %v2316_v7 = vsel %vm2314_vm9, %v2304_v36, 2102212464  ;;  %v2323_v33 = vsel %vm2311_vm13, %v2301_v44, %v2304_v36 }
 0x46f   :  { %v8378_v29 = vadd.s32 4294967294, %v2139_v11  ;;  %v11195_v61 = vsub.s32 %v2235_v40, %v2238_v53  ;;  %v2321_v3 = vsel %vm2313_vm14, %v2304_v36, %v2320_v18  ;;  %v2295_v56 = vshrl.u32 %v15417_v41, %v2294_v60  ;;  %v1963_v18 = vpop.permute.xlu0 %1962 }
 0x470   :  { %v2322_v17 = vsel %vm2312_vm4, %v2319_v49, %v2321_v3  ;;  %v2324_v24 = vsel %vm2314_vm9, %v2310_v32, 1326507024  ;;  %v2393_v63 = vadd.s32 1, %v8388_v23  ;;  %v2317_v6 = vsel %vm2313_vm14, %v2301_v44, %v2316_v7 }
 0x471   :  { %vm8379_vm15 = vcmp.lt.s32.totalorder %v8378_v29, 0  ;;  %v2241_v14 = vsub.s32 0, %v11195_v61  ;;  %v2325_v30 = vsel %vm2313_vm14, %v2307_v57, %v2324_v24  ;;  %v2315_v40 = vsel %vm2311_vm13, %v2295_v56, %v2298_v22 }
 0x472   :  { %v2142_v27 = vsel %vm8379_vm15, 0, %v8378_v29  ;;  %v2326_v8 = vsel %vm2312_vm4, %v2323_v33, %v2325_v30  ;;  %vm2394_vm0 = vcmp.gt.s32.totalorder %v2393_v63, 0  ;;  %v15415_v1 = vand.u32 2147483647, %v11090_v38 }
 0x473   :  { %v2147_v12 = vsub.s32 4294967266, %v2142_v27  ;;  %v8381_v55 = vmin.u32 %v2241_v14, %v11195_v61  ;;  %v11207_v51 = vmul.u32.u64.low %v2327_v4, %v2326_v8  ;;  %v11208_v60 = vmul.u32.u64.high %v2327_v4, %v2326_v8, %v11207_v51 }
 0x474   :  { %v11210_v28 = vmul.u32.u64.low %v2327_v4, %v2322_v17  ;;  %v11211_v54 = vmul.u32.u64.high %v2327_v4, %v2322_v17, %v11210_v28  ;;  %v2395_v5 = vsel %vm2394_vm0, %v2393_v63, 0  ;;  %v2143_v58 = vsub.s32 32, %v2142_v27 }
 0x475   :  { %v2243_v42 = vclz %v8381_v55  ;;  %v2148_v22 = vadd.s32 127, %v2147_v12  ;;  %v2318_v44 = vsel %vm2312_vm4, %v2315_v40, %v2317_v6  ;;  %v2397_v36 = vand.u32 31, %v2395_v5 }
 0x476   :  { %vm2336_vm1 = vc.u32 %v11208_v60, %v11210_v28  ;;  %v2127_v45 = vadd.s32 %v11129_v21, %v11126_v20  ;;  %v2337_v11 = vadd.s32 1, %v11211_v54  ;;  %v2334_v57 = vmul.u32 %v2327_v4, %v2318_v44 }
 0x477   :  { %v8382_v26 = vadd.s32 4294967294, %v2243_v42  ;;  %v2390_v23 = vand.u32 8388607, %v15415_v1  ;;  %v2149_v32 = vshll.u32 %v2148_v22, 23  ;;  %v2398_v29 = vsub.s32 32, %v2397_v36 }
 0x478   :  { %v2145_v53 = vshrl.u32 %v2127_v45, %v2143_v58  ;;  %v2338_v35 = vsel %vm2336_vm1, %v2337_v11, %v11211_v54  ;;  %v2144_v7 = vshll.u32 %v11176_v13, %v2142_v27  ;;  %v11226_v20 = vadd.f32 %v11084_v39, %v1963_v18 }
 0x479   :  { %vm8383_vm2 = vcmp.lt.s32.totalorder %v8382_v26, 0  ;;  %v2339_v49 = vadd.s32 %v2338_v35, %v2334_v57  ;;  %v2391_v56 = vor.u32 8388608, %v2390_v23  ;;  %v2150_v4 = vor.u32 4788187, %v2149_v32 }
 0x47a   :  { %v2246_v3 = vsel %vm8383_vm2, 0, %v8382_v26  ;;  %v2146_v21 = vor.u32 %v2145_v53, %v2144_v7  ;;  %v2401_v17 = vshrl.u32 %v15479_v34, %v2398_v29  ;;  %v2404_v24 = vshrl.u32 %v15478_v50, %v2398_v29 }
 0x47b   :  { %v2340_v33 = vadd.s32 536870912, %v2339_v49  ;;  %v2251_v14 = vsub.s32 4294967266, %v2246_v3  ;;  %v2407_v63 = vshrl.u32 %v15480_v2, %v2398_v29  ;;  %v2410_v12 = vshrl.u32 %v15488_v62, %v2398_v29 }
 0x47c   :  { %v2400_v13 = vshll.u32 %v15417_v41, %v2397_v36  ;;  %v2403_v27 = vshll.u32 %v15479_v34, %v2397_v36  ;;  %v2409_v39 = vshll.u32 %v15480_v2, %v2397_v36  ;;  %v2413_v40 = vshrl.u32 %v15505_v9, %v2398_v29 }
 0x47d   :  { %v11230_v30 = vshrl.u32 %v2340_v33, 30  ;;  %v2396_v8 = vshrl.u32 %v2395_v5, 5  ;;  %v2406_v55 = vshll.u32 %v15478_v50, %v2397_v36  ;;  %v11241_v51 = vadd.f32 %v11086_v43, %v1963_v18 }
 0x47e   :  { %v2402_v54 = vor.u32 %v2401_v17, %v2400_v13  ;;  %v2405_v42 = vor.u32 %v2404_v24, %v2403_v27  ;;  %v2411_v58 = vor.u32 %v2410_v12, %v2409_v39  ;;  %v2412_v22 = vshll.u32 %v15488_v62, %v2397_v36 }
 0x47f   :  { %v2342_v6 = vshll.u32 %v11230_v30, 30  ;;  %v2231_v44 = vadd.s32 %v11155_v48, %v11161_v25  ;;  %v2252_v26 = vadd.s32 127, %v2251_v14  ;;  %v2408_v11 = vor.u32 %v2407_v63, %v2406_v55 }
 0x480   :  { %v2151_v57 = vand.u32 2147483647, %v2150_v4  ;;  %v2153_v23 = vcvt.s32.f32 %v2146_v21  ;;  %v2414_v5 = vor.u32 %v2413_v40, %v2412_v22  ;;  %v2431_v53 = vshll.u32 %v2391_v56, 8 }
 0x481   :  { %v11246_v45 = vsub.s32 %v2339_v49, %v2342_v6  ;;  %v2247_v32 = vsub.s32 32, %v2246_v3  ;;  %vm2415_vm3 = vcmp.lt.s32.totalorder %v2396_v8, 1  ;;  %vm2418_vm5 = vcmp.lt.s32.totalorder %v2396_v8, 4 }
 0x482   :  { %v2399_v35 = vshrl.u32 %v15417_v41, %v2398_v29  ;;  %vm2417_vm6 = vcmp.lt.s32.totalorder %v2396_v8, 3  ;;  %v2423_v36 = vsel %vm2415_vm3, %v2402_v54, %v2405_v42  ;;  %v2424_v18 = vsel %vm2418_vm5, %v2411_v58, 920167782 }
 0x483   :  { %v2345_v43 = vsub.s32 0, %v11246_v45  ;;  %v2253_v48 = vshll.u32 %v2252_v26, 23  ;;  %vm2416_vm8 = vcmp.lt.s32.totalorder %v2396_v8, 2  ;;  %v2420_v25 = vsel %vm2418_vm5, %v2408_v11, 2102212464 }
 0x484   :  { %v2425_v49 = vsel %vm2417_vm6, %v2408_v11, %v2424_v18  ;;  %v2427_v56 = vsel %vm2415_vm3, %v2405_v42, %v2408_v11  ;;  %v2428_v21 = vsel %vm2418_vm5, %v2414_v5, 1326507024  ;;  %v2248_v4 = vshll.u32 %v11195_v61, %v2246_v3 }
 0x485   :  { %v8385_v7 = vmin.u32 %v2345_v43, %v11246_v45  ;;  %v2426_v33 = vsel %vm2416_vm8, %v2423_v36, %v2425_v49  ;;  %v2249_v17 = vshrl.u32 %v2231_v44, %v2247_v32  ;;  %v2419_v29 = vsel %vm2415_vm3, %v2399_v35, %v2402_v54 }
 0x486   :  { %v2429_v24 = vsel %vm2417_vm6, %v2411_v58, %v2428_v21  ;;  %v2421_v14 = vsel %vm2417_vm6, %v2405_v42, %v2420_v25  ;;  %v11257_v12 = vmul.u32.u64.low %v2431_v53, %v2426_v33  ;;  %v11258_v13 = vmul.u32.u64.high %v2431_v53, %v2426_v33, %v11257_v12 }
 0x487   :  { %v2430_v63 = vsel %vm2416_vm8, %v2427_v56, %v2429_v24  ;;  %v2154_v27 = vmul.f32 %v2153_v23, %v2151_v57  ;;  %v2254_v39 = vor.u32 4788187, %v2253_v48  ;;  %v2347_v55 = vclz %v8385_v7  ;;  %v11281_v7 = vpop.permute.xlu1 %1967 }
 0x488   :  { %v11261_v40 = vmul.u32.u64.low %v2431_v53, %v2430_v63  ;;  %v11262_v6 = vmul.u32.u64.high %v2431_v53, %v2430_v63, %v11261_v40  ;;  %v2490_v22 = vand.u32 2139095040, %v11226_v20  ;;  %v2250_v61 = vor.u32 %v2249_v17, %v2248_v4 }
 0x489   :  { %v2422_v3 = vsel %vm2416_vm8, %v2419_v29, %v2421_v14  ;;  %v2594_v54 = vand.u32 2139095040, %v11241_v51  ;;  %v2441_v42 = vadd.s32 1, %v11258_v13  ;;  %v2155_v44 = vxor.u32 2147483648, %v2154_v27 }
 0x48a   :  { %v2491_v58 = vshrl.u32 %v2490_v22, 23  ;;  %v2157_v26 = vsub.s32 4, %v11166_v31  ;;  %v2255_v11 = vand.u32 2147483647, %v2254_v39  ;;  %v15413_v57 = vand.u32 2147483647, %v11226_v20 }
 0x48b   :  { %v8386_v23 = vadd.s32 4294967294, %v2347_v55  ;;  %v2438_v5 = vmul.u32 %v2431_v53, %v2422_v3  ;;  %vm2440_vm11 = vc.u32 %v11262_v6, %v11257_v12  ;;  %v2257_v43 = vcvt.s32.f32 %v2250_v61 }
 0x48c   :  { %v8392_v32 = vadd.s32 4294967169, %v2491_v58  ;;  %v2442_v8 = vsel %vm2440_vm11, %v2441_v42, %v11258_v13  ;;  %v2595_v35 = vshrl.u32 %v2594_v54, 23  ;;  %vm2073_vm7 = vcmp.lt.s32.totalorder %v11069_v37, 0 }
 0x48d   :  { %v2443_v36 = vadd.s32 %v2442_v8, %v2438_v5  ;;  %v2156_v48 = vsel %vm2073_vm7, %v2155_v44, %v2154_v27  ;;  %v11275_v25 = vsel %vm2073_vm7, %v2157_v26, %v11166_v31  ;;  %v11277_v49 = vmul.f32 %v2257_v43, %v2255_v11 }
 0x48e   :  { %v2497_v18 = vadd.s32 1, %v8392_v32  ;;  %v2494_v53 = vand.u32 8388607, %v15413_v57  ;;  %vm8387_vm10 = vcmp.lt.s32.totalorder %v8386_v23, 0  ;;  %v8396_v56 = vadd.s32 4294967169, %v2595_v35 }
 0x48f   :  { %v2444_v33 = vadd.s32 536870912, %v2443_v36  ;;  %vm11285_vm4 = vcmp.le.f32.partialorder %v2071_v59, 0.7853982  ;;  %v11291_v31 = vadd.f32 %v11088_v15, %v11281_v7  ;;  %v11298_v29 = vadd.s32 %v11210_v28, %v11208_v60 }
 0x490   :  { %vm2498_vm13 = vcmp.gt.s32.totalorder %v2497_v18, 0  ;;  %v11305_v59 = vsel %vm11285_vm4, %v11069_v37, %v2156_v48  ;;  %v2259_v63 = vxor.u32 2147483648, %v11277_v49  ;;  %v11308_v15 = vsel %vm8387_vm10, 0, %v8386_v23 }
 0x491   :  { %v2499_v4 = vsel %vm2498_vm13, %v2497_v18, 0  ;;  %v11300_v24 = vshrl.u32 %v2444_v33, 30  ;;  %v2495_v39 = vor.u32 8388608, %v2494_v53  ;;  %v2601_v60 = vadd.s32 1, %v8396_v56 }
 0x492   :  { %v2501_v14 = vand.u32 31, %v2499_v4  ;;  %v2500_v28 = vshrl.u32 %v2499_v4, 5  ;;  %v15414_v8 = vand.u32 2147483647, %v11241_v51  ;;  %vm2177_vm9 = vcmp.lt.s32.totalorder %v11071_v52, 0 }
 0x493   :  { %v2446_v27 = vshll.u32 %v11300_v24, 30  ;;  %v2355_v35 = vsub.s32 4294967266, %v11308_v15  ;;  %v2535_v33 = vshll.u32 %v2495_v39, 8  ;;  %vm2602_vm15 = vcmp.gt.s32.totalorder %v2601_v60, 0 }
 0x494   :  { %v2502_v40 = vsub.s32 32, %v2501_v14  ;;  %v2504_v55 = vshll.u32 %v15417_v41, %v2501_v14  ;;  %v2507_v22 = vshll.u32 %v15479_v34, %v2501_v14  ;;  %v2510_v61 = vshll.u32 %v15478_v50, %v2501_v14 }
 0x495   :  { %v11315_v3 = vsub.s32 %v2443_v36, %v2446_v27  ;;  %v2513_v58 = vshll.u32 %v15480_v2, %v2501_v14  ;;  %v2516_v11 = vshll.u32 %v15488_v62, %v2501_v14  ;;  %vm2519_vm14 = vcmp.lt.s32.totalorder %v2500_v28, 1 }
 0x496   :  { %v2505_v54 = vshrl.u32 %v15479_v34, %v2502_v40  ;;  %v2508_v42 = vshrl.u32 %v15478_v50, %v2502_v40  ;;  %v2511_v44 = vshrl.u32 %v15480_v2, %v2502_v40  ;;  %v2514_v26 = vshrl.u32 %v15488_v62, %v2502_v40 }
 0x497   :  { %v2517_v23 = vshrl.u32 %v15505_v9, %v2502_v40  ;;  %v2449_v5 = vsub.s32 0, %v11315_v3  ;;  %v2503_v56 = vshrl.u32 %v15417_v41, %v2502_v40  ;;  %vm2520_vm0 = vcmp.lt.s32.totalorder %v2500_v28, 2 }
 0x498   :  { %v2506_v32 = vor.u32 %v2505_v54, %v2504_v55  ;;  %v2509_v43 = vor.u32 %v2508_v42, %v2507_v22  ;;  %v2512_v36 = vor.u32 %v2511_v44, %v2510_v61  ;;  %v2515_v18 = vor.u32 %v2514_v26, %v2513_v58 }
 0x499   :  { %v2518_v48 = vor.u32 %v2517_v23, %v2516_v11  ;;  %v8389_v53 = vmin.u32 %v2449_v5, %v11315_v3  ;;  %vm2522_vm1 = vcmp.lt.s32.totalorder %v2500_v28, 4  ;;  %vm2521_vm2 = vcmp.lt.s32.totalorder %v2500_v28, 3 }
 0x49a   :  { %v2527_v4 = vsel %vm2519_vm14, %v2506_v32, %v2509_v43  ;;  %v2524_v27 = vsel %vm2522_vm1, %v2512_v36, 2102212464  ;;  %v2528_v55 = vsel %vm2522_vm1, %v2515_v18, 920167782  ;;  %v2523_v22 = vsel %vm2519_vm14, %v2503_v56, %v2506_v32 }
 0x49b   :  { %v2451_v14 = vclz %v8389_v53  ;;  %v2529_v54 = vsel %vm2521_vm2, %v2512_v36, %v2528_v55  ;;  %v2531_v42 = vsel %vm2519_vm14, %v2509_v43, %v2512_v36  ;;  %v2532_v61 = vsel %vm2522_vm1, %v2518_v48, 1326507024 }
 0x49c   :  { %v2525_v44 = vsel %vm2521_vm2, %v2509_v43, %v2524_v27  ;;  %v2530_v26 = vsel %vm2520_vm0, %v2527_v4, %v2529_v54  ;;  %v2533_v11 = vsel %vm2521_vm2, %v2515_v18, %v2532_v61  ;;  %v2356_v39 = vadd.s32 127, %v2355_v35 }
 0x49d   :  { %v8390_v58 = vadd.s32 4294967294, %v2451_v14  ;;  %v2534_v23 = vsel %vm2520_vm0, %v2531_v42, %v2533_v11  ;;  %v11332_v40 = vmul.u32.u64.low %v2535_v33, %v2530_v26  ;;  %v11333_v5 = vmul.u32.u64.high %v2535_v33, %v2530_v26, %v11332_v40 }
 0x49e   :  { %v11336_v53 = vmul.u32.u64.low %v2535_v33, %v2534_v23  ;;  %v11337_v57 = vmul.u32.u64.high %v2535_v33, %v2534_v23, %v11336_v53  ;;  %v2603_v32 = vsel %vm2602_vm15, %v2601_v60, 0  ;;  %v2526_v43 = vsel %vm2520_vm0, %v2523_v22, %v2525_v44 }
 0x49f   :  { %vm8391_vm3 = vcmp.lt.s32.totalorder %v8390_v58, 0  ;;  %v2598_v18 = vand.u32 8388607, %v15414_v8  ;;  %v2605_v35 = vand.u32 31, %v2603_v32  ;;  %v11348_v48 = vsel %vm2177_vm9, %v2259_v63, %v11277_v49 }
 0x4a0   :  { %v11340_v36 = vsel %vm8391_vm3, 0, %v8390_v58  ;;  %v2351_v56 = vsub.s32 32, %v11308_v15  ;;  %v2698_v14 = vand.u32 2139095040, %v11291_v31  ;;  %v2545_v27 = vadd.s32 1, %v11333_v5 }
 0x4a1   :  { %v2459_v28 = vsub.s32 4294967266, %v11340_v36  ;;  %v2606_v55 = vsub.s32 32, %v2605_v35  ;;  %v2357_v22 = vshll.u32 %v2356_v39, 23  ;;  %v2439_v54 = vadd.s32 %v11257_v12, %v11262_v6 }
 0x4a2   :  { %v2542_v49 = vmul.u32 %v2535_v33, %v2526_v43  ;;  %vm2544_vm5 = vc.u32 %v11337_v57, %v11332_v40  ;;  %v2599_v42 = vor.u32 8388608, %v2598_v18  ;;  %v2455_v44 = vsub.s32 32, %v11340_v36 }
 0x4a3   :  { %v2546_v63 = vsel %vm2544_vm5, %v2545_v27, %v11333_v5  ;;  %v2609_v61 = vshrl.u32 %v15479_v34, %v2606_v55  ;;  %v2612_v58 = vshrl.u32 %v15478_v50, %v2606_v55  ;;  %v2604_v11 = vshrl.u32 %v2603_v32, 5 }
 0x4a4   :  { %v2547_v26 = vadd.s32 %v2546_v63, %v2542_v49  ;;  %v2699_v23 = vshrl.u32 %v2698_v14, 23  ;;  %v2460_v39 = vadd.s32 127, %v2459_v28  ;;  %v2608_v53 = vshll.u32 %v15417_v41, %v2605_v35 }
 0x4a5   :  { %v2611_v12 = vshll.u32 %v15479_v34, %v2605_v35  ;;  %v2615_v6 = vshrl.u32 %v15480_v2, %v2606_v55  ;;  %v2614_v5 = vshll.u32 %v15478_v50, %v2605_v35  ;;  %v2617_v43 = vshll.u32 %v15480_v2, %v2605_v35 }
 0x4a6   :  { %v2548_v33 = vadd.s32 536870912, %v2547_v26  ;;  %v2618_v18 = vshrl.u32 %v15488_v62, %v2606_v55  ;;  %vm11373_vm6 = vcmp.le.f32.partialorder %v2175_v46, 0.7853982  ;;  %v2610_v32 = vor.u32 %v2609_v61, %v2608_v53 }
 0x4a7   :  { %v2613_v14 = vor.u32 %v2612_v58, %v2611_v12  ;;  %v2620_v28 = vshll.u32 %v15488_v62, %v2605_v35  ;;  %v2621_v49 = vshrl.u32 %v15505_v9, %v2606_v55  ;;  %v2353_v63 = vshrl.u32 %v11298_v29, %v2351_v56 }
 0x4a8   :  { %v11380_v8 = vshrl.u32 %v2548_v33, 30  ;;  %v2616_v17 = vor.u32 %v2615_v6, %v2614_v5  ;;  %v2619_v1 = vor.u32 %v2618_v18, %v2617_v43  ;;  %v2358_v16 = vor.u32 4788187, %v2357_v22 }
 0x4a9   :  { %v2622_v13 = vor.u32 %v2621_v49, %v2620_v28  ;;  %v2639_v4 = vshll.u32 %v2599_v42, 8  ;;  %v8400_v60 = vadd.s32 4294967169, %v2699_v23  ;;  %v2461_v46 = vshll.u32 %v2460_v39, 23 }
 0x4aa   :  { %v2550_v41 = vshll.u32 %v11380_v8, 30  ;;  %vm2623_vm8 = vcmp.lt.s32.totalorder %v2604_v11, 1  ;;  %vm2626_vm11 = vcmp.lt.s32.totalorder %v2604_v11, 4  ;;  %vm2281_vm7 = vcmp.lt.s32.totalorder %v11077_v19, 0 }
 0x4ab   :  { %v2456_v35 = vshll.u32 %v11315_v3, %v11340_v36  ;;  %v2457_v61 = vshrl.u32 %v2439_v54, %v2455_v44  ;;  %v2631_v29 = vsel %vm2623_vm8, %v2610_v32, %v2613_v14  ;;  %v2632_v56 = vsel %vm2626_vm11, %v2619_v1, 920167782 }
 0x4ac   :  { %v11387_v58 = vsub.s32 %v2547_v26, %v2550_v41  ;;  %v15510_v22 = vmov 683565275   ;;  %vm2625_vm10 = vcmp.lt.s32.totalorder %v2604_v11, 3  ;;  %v2628_v42 = vsel %vm2626_vm11, %v2616_v17, 2102212464 }
 0x4ad   :  { %v2607_v53 = vshrl.u32 %v15510_v22, %v2606_v55  ;;  %vm2624_vm13 = vcmp.lt.s32.totalorder %v2604_v11, 2  ;;  %v2633_v23 = vsel %vm2625_vm10, %v2616_v17, %v2632_v56  ;;  %v2635_v39 = vsel %vm2623_vm8, %v2613_v14, %v2616_v17 }
 0x4ae   :  { %v2636_v12 = vsel %vm2626_vm11, %v2622_v13, 1326507024  ;;  %v2462_v6 = vor.u32 4788187, %v2461_v46  ;;  %v2553_v33 = vsub.s32 0, %v11387_v58  ;;  %v2634_v36 = vsel %vm2624_vm13, %v2631_v29, %v2633_v23 }
 0x4af   :  { %v2627_v3 = vsel %vm2623_vm8, %v2607_v53, %v2610_v32  ;;  %v2629_v54 = vsel %vm2625_vm10, %v2613_v14, %v2628_v42  ;;  %v2637_v44 = vsel %vm2625_vm10, %v2619_v1, %v2636_v12  ;;  %v2263_v55 = vsel %vm11373_vm6, %v11071_v52, %v11348_v48 }
 0x4b0   :  { %v11394_v41 = vmul.u32.u64.low %v2639_v4, %v2634_v36  ;;  %v11395_v26 = vmul.u32.u64.high %v2639_v4, %v2634_v36, %v11394_v41  ;;  %v8393_v17 = vmin.u32 %v2553_v33, %v11387_v58  ;;  %v2638_v13 = vsel %vm2624_vm13, %v2635_v39, %v2637_v44 }
 0x4b1   :  { %v2705_v5 = vadd.s32 1, %v8400_v60  ;;  %v15511_v43 = vshll.u32 %v11246_v45, %v11308_v15  ;;  %v2458_v32 = vor.u32 %v2457_v61, %v2456_v35  ;;  %v2359_v28 = vand.u32 2147483647, %v2358_v16 }
 0x4b2   :  { %v11407_v1 = vmul.u32.u64.low %v2639_v4, %v2638_v13  ;;  %v11408_v14 = vmul.u32.u64.high %v2639_v4, %v2638_v13, %v11407_v1  ;;  %v2555_v49 = vclz %v8393_v17  ;;  %v2630_v46 = vsel %vm2624_vm13, %v2627_v3, %v2629_v54 }
 0x4b3   :  { %v2354_v18 = vor.u32 %v2353_v63, %v15511_v43  ;;  %vm2706_vm14 = vcmp.gt.s32.totalorder %v2705_v5, 0  ;;  %v2463_v29 = vand.u32 2147483647, %v2462_v6  ;;  %v2649_v48 = vadd.s32 1, %v11395_v26 }
 0x4b4   :  { %v15512_v56 = vand.u32 2147483647, %v11291_v31  ;;  %v2707_v60 = vsel %vm2706_vm14, %v2705_v5, 0  ;;  %9364 = vcosq.f32 %v2263_v55  ;;  %v15513_v45 = vsub.s32 4, %v11230_v30 }
 0x4b5   :  { %v8394_v16 = vadd.s32 4294967294, %v2555_v49  ;;  %v2709_v63 = vand.u32 31, %v2707_v60  ;;  %v2361_v11 = vcvt.s32.f32 %v2354_v18  ;;  %v2465_v35 = vcvt.s32.f32 %v2458_v32 }
 0x4b6   :  { %v2702_v53 = vand.u32 8388607, %v15512_v56  ;;  %v11419_v15 = vsel %vm2281_vm7, %v15513_v45, %v11230_v30  ;;  %v2646_v61 = vmul.u32 %v2639_v4, %v2630_v46  ;;  %vm2648_vm15 = vc.u32 %v11408_v14, %v11394_v41 }
 0x4b7   :  { %9366 = vsinq.f32 %v2263_v55  ;;  %vm8395_vm0 = vcmp.lt.s32.totalorder %v8394_v16, 0  ;;  %v2650_v42 = vsel %vm2648_vm15, %v2649_v48, %v11395_v26  ;;  %v2710_v23 = vsub.s32 32, %v2709_v63 }
 0x4b8   :  { %v2362_v39 = vmul.f32 %v2361_v11, %v2359_v28  ;;  %v11424_v12 = vmul.f32 %v2465_v35, %v2463_v29  ;;  %v2651_v6 = vadd.s32 %v2650_v42, %v2646_v61  ;;  %v2703_v33 = vor.u32 8388608, %v2702_v53 }
 0x4b9   :  { %v11426_v30 = vsel %vm8395_vm0, 0, %v8394_v16  ;;  %v11428_v3 = vshrl.u32 %v2707_v60, 5  ;;  %v2718_v36 = vshll.u32 %v15478_v50, %v2709_v63  ;;  %v11433_v4 = vadd.f32 %v11092_v47, %v11281_v7 }
 0x4ba   :  { %v2652_v54 = vadd.s32 536870912, %v2651_v6  ;;  %v2713_v44 = vshrl.u32 %v15479_v34, %v2710_v23  ;;  %v2716_v26 = vshrl.u32 %v15478_v50, %v2710_v23  ;;  %v2719_v55 = vshrl.u32 %v15480_v2, %v2710_v23 }
 0x4bb   :  { %v2712_v17 = vshll.u32 %v15510_v22, %v2709_v63  ;;  %v2715_v13 = vshll.u32 %v15479_v34, %v2709_v63  ;;  %v2721_v5 = vshll.u32 %v15480_v2, %v2709_v63  ;;  %v2722_v43 = vshrl.u32 %v15488_v62, %v2710_v23 }
 0x4bc   :  { %v2363_v18 = vxor.u32 2147483648, %v2362_v39  ;;  %v2467_v32 = vxor.u32 2147483648, %v11424_v12  ;;  %v11443_v47 = vshrl.u32 %v2652_v54, 30  ;;  %v2720_v7 = vor.u32 %v2719_v55, %v2718_v36 }
 0x4bd   :  { %v2563_v1 = vsub.s32 4294967266, %v11426_v30  ;;  %v2714_v28 = vor.u32 %v2713_v44, %v2712_v17  ;;  %v2717_v49 = vor.u32 %v2716_v26, %v2715_v13  ;;  %v2723_v46 = vor.u32 %v2722_v43, %v2721_v5 }
 0x4be   :  { %v15514_v29 = vand.u32 2147483647, %v11077_v19  ;;  %v2654_v56 = vshll.u32 %v11443_v47, 30  ;;  %v2724_v53 = vshll.u32 %v15488_v62, %v2709_v63  ;;  %v2725_v60 = vshrl.u32 %v15505_v9, %v2710_v23  ;;  %v11455_v16 = vpop.eup %9364 }
 0x4bf   :  { %v2743_v45 = vshll.u32 %v2703_v33, 8  ;;  %vm2385_vm2 = vcmp.lt.s32.totalorder %v11090_v38, 0  ;;  %v2559_v11 = vsub.s32 32, %v11426_v30  ;;  %v2711_v35 = vshrl.u32 %v15510_v22, %v2710_v23 }
 0x4c0   :  { %vm11448_vm1 = vcmp.le.f32.partialorder %v15514_v29, 0.7853982  ;;  %vm2730_vm3 = vcmp.lt.s32.totalorder %v11428_v3, 4  ;;  %v2802_v61 = vand.u32 2139095040, %v11433_v4  ;;  %v11462_v42 = vsub.s32 %v2651_v6, %v2654_v56 }
 0x4c1   :  { %v2726_v36 = vor.u32 %v2725_v60, %v2724_v53  ;;  %vm2727_vm5 = vcmp.lt.s32.totalorder %v11428_v3, 1  ;;  %v2732_v63 = vsel %vm2730_vm3, %v2720_v7, 2102212464  ;;  %v11467_v33 = vpop.eup %9366  ;;  %v2564_v54 = vadd.s32 127, %v2563_v1 }
 0x4c2   :  { %vm2729_vm8 = vcmp.lt.s32.totalorder %v11428_v3, 3  ;;  %v2735_v44 = vsel %vm2727_vm5, %v2714_v28, %v2717_v49  ;;  %v2736_v23 = vsel %vm2730_vm3, %v2723_v46, 920167782  ;;  %v15517_v26 = vand.u32 2147483647, %v11090_v38 }
 0x4c3   :  { %v2657_v55 = vsub.s32 0, %v11462_v42  ;;  %vm2728_vm10 = vcmp.lt.s32.totalorder %v11428_v3, 2  ;;  %v2737_v17 = vsel %vm2729_vm8, %v2720_v7, %v2736_v23  ;;  %v2739_v13 = vsel %vm2727_vm5, %v2717_v49, %v2720_v7 }
 0x4c4   :  { %vm11474_vm11 = vcmp.le.f32.partialorder %v15517_v26, 0.7853982  ;;  %v2731_v5 = vsel %vm2727_vm5, %v2711_v35, %v2714_v28  ;;  %v2733_v43 = vsel %vm2729_vm8, %v2717_v49, %v2732_v63  ;;  %v2738_v1 = vsel %vm2728_vm10, %v2735_v44, %v2737_v17 }
 0x4c5   :  { %v2740_v29 = vsel %vm2730_vm3, %v2726_v36, 1326507024  ;;  %v8397_v56 = vmin.u32 %v2657_v55, %v11462_v42  ;;  %v11485_v60 = vmul.u32.u64.low %v2743_v45, %v2738_v1  ;;  %v11486_v26 = vmul.u32.u64.high %v2743_v45, %v2738_v1, %v11485_v60 }
 0x4c6   :  { %v2741_v53 = vsel %vm2729_vm8, %v2723_v46, %v2740_v29  ;;  %v15520_v0 = vsel %vm11285_vm4, 0, %v11275_v25  ;;  %v2364_v7 = vsel %vm2281_vm7, %v2363_v18, %v2362_v39  ;;  %v2803_v49 = vshrl.u32 %v2802_v61, 23 }
 0x4c7   :  { %v11492_v23 = vadd.s32 3, %v15520_v0  ;;  %v2742_v28 = vsel %vm2728_vm10, %v2739_v13, %v2741_v53  ;;  %v2543_v35 = vadd.s32 %v11332_v40, %v11337_v57  ;;  %v2659_v46 = vclz %v8397_v56 }
 0x4c8   :  { %v11500_v36 = vmul.u32.u64.low %v2743_v45, %v2742_v28  ;;  %v11501_v63 = vmul.u32.u64.high %v2743_v45, %v2742_v28, %v11500_v36  ;;  %9368 = vcosq.f32 %v11305_v59  ;;  %v2368_v0 = vsel %vm11448_vm1, 0, %v11419_v15 }
 0x4c9   :  { %v2734_v25 = vsel %vm2728_vm10, %v2731_v5, %v2733_v43  ;;  %v8404_v21 = vadd.s32 4294967169, %v2803_v49  ;;  %v2468_v39 = vsel %vm2385_vm2, %v2467_v32, %v11424_v12  ;;  %v2561_v18 = vshrl.u32 %v2543_v35, %v2559_v11 }
 0x4ca   :  { %v2565_v57 = vshll.u32 %v2564_v54, 23  ;;  %v2753_v40 = vadd.s32 1, %v11486_v26  ;;  %v2367_v61 = vsel %vm11448_vm1, %v11077_v19, %v2364_v7  ;;  %v15420_v44 = vand.u32 2147483647, %v11433_v4 }
 0x4cb   :  { %v2809_v55 = vadd.s32 1, %v8404_v21  ;;  %v2261_v15 = vsub.s32 4, %v11189_v10  ;;  %v2560_v3 = vshll.u32 %v11387_v58, %v11426_v30  ;;  %v8398_v17 = vadd.s32 4294967294, %v2659_v46 }
 0x4cc   :  { %v2750_v13 = vmul.u32 %v2743_v45, %v2734_v25  ;;  %vm2752_vm4 = vc.u32 %v11501_v63, %v11485_v60  ;;  %9370 = vsinq.f32 %v11305_v59  ;;  %v2471_v12 = vsel %vm11474_vm11, %v11090_v38, %v2468_v39 }
 0x4cd   :  { %v2754_v32 = vsel %vm2752_vm4, %v2753_v40, %v11486_v26  ;;  %vm2810_vm7 = vcmp.gt.s32.totalorder %v2809_v55, 0  ;;  %9372 = vcosq.f32 %v2367_v61  ;;  %v11526_v48 = vor.u32 %v2561_v18, %v2560_v3 }
 0x4ce   :  { %v11528_v11 = vor.u32 4788187, %v2565_v57  ;;  %v2755_v54 = vadd.s32 %v2754_v32, %v2750_v13  ;;  %9374 = vsinq.f32 %v2367_v61  ;;  %v11530_v58 = vadd.s32 3, %v2368_v0 }
 0x4cf   :  { %v2806_v30 = vand.u32 8388607, %v15420_v44  ;;  %v2811_v59 = vsel %vm2810_vm7, %v2809_v55, 0  ;;  %9376 = vcosq.f32 %v2471_v12  ;;  %vm8399_vm13 = vcmp.lt.s32.totalorder %v8398_v17, 0 }
 0x4d0   :  { %v2756_v45 = vadd.s32 536870912, %v2755_v54  ;;  %v2262_v5 = vsel %vm2177_vm9, %v2261_v15, %v11189_v10  ;;  %9378 = vsinq.f32 %v2471_v12  ;;  %v11539_v43 = vadd.s32 %v11394_v41, %v11408_v14 }
 0x4d1   :  { %v2813_v1 = vand.u32 31, %v2811_v59  ;;  %v11549_v49 = vsel %vm8399_vm13, 0, %v8398_v17  ;;  %v2807_v10 = vor.u32 8388608, %v2806_v30  ;;  %v2264_v41 = vsel %vm11373_vm6, 0, %v2262_v5 }
 0x4d2   :  { %v11544_v26 = vshrl.u32 %v2756_v45, 30  ;;  %v11547_v28 = vpop.eup %9368  ;;  %v11554_v14 = vadd.s32 %v11485_v60, %v11501_v63  ;;  %v2469_v0 = vsub.s32 4, %v11300_v24  ;;  %v2667_v27 = vsub.s32 4294967266, %v11549_v49 }
 0x4d3   :  { %v2814_v35 = vsub.s32 32, %v2813_v1  ;;  %v2816_v36 = vshll.u32 %v15510_v22, %v2813_v1  ;;  %v2819_v21 = vshll.u32 %v15479_v34, %v2813_v1  ;;  %v2812_v60 = vshrl.u32 %v2811_v59, 5 }
 0x4d4   :  { %v2758_v46 = vshll.u32 %v11544_v26, 30  ;;  %v2822_v63 = vshll.u32 %v15478_v50, %v2813_v1  ;;  %v2663_v61 = vsub.s32 32, %v11549_v49  ;;  %v11570_v3 = vshll.u32 %v2807_v10, 8 }
 0x4d5   :  { %v2817_v25 = vshrl.u32 %v15479_v34, %v2814_v35  ;;  %v2820_v39 = vshrl.u32 %v15478_v50, %v2814_v35  ;;  %v2823_v18 = vshrl.u32 %v15480_v2, %v2814_v35  ;;  %v2825_v32 = vshll.u32 %v15480_v2, %v2813_v1 }
 0x4d6   :  { %v11564_v57 = vsub.s32 %v2755_v54, %v2758_v46  ;;  %v11567_v40 = vpop.eup %9370  ;;  %v2826_v54 = vshrl.u32 %v15488_v62, %v2814_v35  ;;  %v2828_v59 = vshll.u32 %v15488_v62, %v2813_v1  ;;  %v2829_v45 = vshrl.u32 %v15505_v9, %v2814_v35 }
 0x4d7   :  { %v2818_v55 = vor.u32 %v2817_v25, %v2816_v36  ;;  %v2821_v15 = vor.u32 %v2820_v39, %v2819_v21  ;;  %v11572_v17 = vpop.eup %9372  ;;  %v2824_v12 = vor.u32 %v2823_v18, %v2822_v63  ;;  %v2268_v5 = vadd.s32 3, %v2264_v41 }
 0x4d8   :  { %v2761_v13 = vsub.s32 0, %v11564_v57  ;;  %v11577_v30 = vpop.eup %9374  ;;  %v2470_v10 = vsel %vm2385_vm2, %v2469_v0, %v11300_v24  ;;  %v2668_v36 = vadd.s32 127, %v2667_v27  ;;  %v2827_v21 = vor.u32 %v2826_v54, %v2825_v32 }
 0x4d9   :  { %v11584_v46 = vpop.eup %9376  ;;  %vm2831_vm9 = vcmp.lt.s32.totalorder %v2812_v60, 1  ;;  %v2815_v18 = vshrl.u32 %v15510_v22, %v2814_v35  ;;  %v2830_v63 = vor.u32 %v2829_v45, %v2828_v59  ;;  %vm2834_vm6 = vcmp.lt.s32.totalorder %v2812_v60, 4 }
 0x4da   :  { %v8401_v25 = vmin.u32 %v2761_v13, %v11564_v57  ;;  %v9379_v39 = vpop.eup %9378  ;;  %v2839_v1 = vsel %vm2831_vm9, %v2818_v55, %v2821_v15  ;;  %vm2833_vm14 = vcmp.lt.s32.totalorder %v2812_v60, 3  ;;  %v2836_v41 = vsel %vm2834_vm6, %v2824_v12, 2102212464 }
 0x4db   :  { %v2840_v53 = vsel %vm2834_vm6, %v2827_v21, 920167782  ;;  %vm2832_vm15 = vcmp.lt.s32.totalorder %v2812_v60, 2  ;;  %v2843_v24 = vsel %vm2831_vm9, %v2821_v15, %v2824_v12  ;;  %v2269_v0 = vand.u32 3, %v2268_v5 }
 0x4dc   :  { %v2763_v44 = vclz %v8401_v25  ;;  %v2841_v56 = vsel %vm2833_vm14, %v2824_v12, %v2840_v53  ;;  %v2835_v27 = vsel %vm2831_vm9, %v2815_v18, %v2818_v55  ;;  %v2844_v32 = vsel %vm2834_vm6, %v2830_v63, 1326507024 }
 0x4dd   :  { %v2842_v13 = vsel %vm2832_vm15, %v2839_v1, %v2841_v56  ;;  %v2837_v54 = vsel %vm2833_vm14, %v2821_v15, %v2836_v41  ;;  %v2845_v29 = vsel %vm2833_vm14, %v2827_v21, %v2844_v32  ;;  %v2664_v45 = vshll.u32 %v11462_v42, %v11549_v49 }
 0x4de   :  { %v8402_v7 = vadd.s32 4294967294, %v2763_v44  ;;  %v11590_v35 = vmul.u32.u64.low %v11570_v3, %v2842_v13  ;;  %v11591_v59 = vmul.u32.u64.high %v11570_v3, %v2842_v13, %v11590_v35  ;;  %v2846_v53 = vsel %vm2832_vm15, %v2843_v24, %v2845_v29 }
 0x4df   :  { %v2472_v44 = vsel %vm11474_vm11, 0, %v2470_v10  ;;  %v2665_v55 = vshrl.u32 %v11539_v43, %v2663_v61  ;;  %v11601_v15 = vmul.u32.u64.low %v11570_v3, %v2846_v53  ;;  %v11602_v12 = vmul.u32.u64.high %v11570_v3, %v2846_v53, %v11601_v15 }
 0x4e0   :  { %vm8403_vm0 = vcmp.lt.s32.totalorder %v8402_v7, 0  ;;  %vm2267_vm1 = vweird.f32 %v11071_v52  ;;  %vm2475_vm2 = vweird.f32 %v11090_v38  ;;  %v2669_v5 = vshll.u32 %v2668_v36, 23 }
 0x4e1   :  { %v2766_v56 = vsel %vm8403_vm0, 0, %v8402_v7  ;;  %v2838_v42 = vsel %vm2832_vm15, %v2835_v27, %v2837_v54  ;;  %v2480_v49 = vxor.u32 2147483648, %v9379_v39  ;;  %v2857_v29 = vadd.s32 1, %v11591_v59 }
 0x4e2   :  { %v2771_v25 = vsub.s32 4294967266, %v2766_v56  ;;  %vm2271_vm3 = vcmp.eq.s32.totalorder %v2269_v0, 0  ;;  %vm2274_vm5 = vcmp.eq.s32.totalorder %v2269_v0, 2  ;;  %v2476_v6 = vadd.s32 3, %v2472_v44 }
 0x4e3   :  { %v15521_v7 = vxor.u32 2147483648, %v11467_v33  ;;  %v15522_v10 = vxor.u32 2147483648, %v11455_v16  ;;  %v2483_v36 = vxor.u32 2147483648, %v11584_v46  ;;  %v2666_v18 = vor.u32 %v2665_v55, %v2664_v45 }
 0x4e4   :  { %v2772_v43 = vadd.s32 127, %v2771_v25  ;;  %v2854_v60 = vmul.u32 %v11570_v3, %v2838_v42  ;;  %vm2856_vm8 = vc.u32 %v11602_v12, %v11590_v35  ;;  %v2477_v63 = vand.u32 3, %v2476_v6 }
 0x4e5   :  { %v2273_v61 = vsel %vm2271_vm3, %v11455_v16, %v15521_v7  ;;  %v2276_v21 = vsel %vm2274_vm5, %v15522_v10, %v11467_v33  ;;  %v2670_v1 = vor.u32 4788187, %v2669_v5  ;;  %v2767_v41 = vsub.s32 32, %v2766_v56 }
 0x4e6   :  { %v2858_v24 = vsel %vm2856_vm8, %v2857_v29, %v11591_v59  ;;  %vm2270_vm11 = vcmp.lt.s32.totalorder %v2269_v0, 2  ;;  %vm2479_vm10 = vcmp.eq.s32.totalorder %v2477_v63, 0  ;;  %vm2482_vm4 = vcmp.eq.s32.totalorder %v2477_v63, 2 }
 0x4e7   :  { %v2859_v27 = vadd.s32 %v2858_v24, %v2854_v60  ;;  %v2277_v13 = vsel %vm2270_vm11, %v2273_v61, %v2276_v21  ;;  %v2773_v16 = vshll.u32 %v2772_v43, 23  ;;  %vm2478_vm7 = vcmp.lt.s32.totalorder %v2477_v63, 2 }
 0x4e8   :  { %v2481_v33 = vsel %vm2479_vm10, %v11584_v46, %v2480_v49  ;;  %v2484_v32 = vsel %vm2482_vm4, %v2483_v36, %v9379_v39  ;;  %v2165_v45 = vand.u32 3, %v11492_v23  ;;  %v2168_v53 = vxor.u32 2147483648, %v11567_v40 }
 0x4e9   :  { %v2860_v54 = vadd.s32 536870912, %v2859_v27  ;;  %v2485_v3 = vsel %vm2478_vm7, %v2481_v33, %v2484_v32  ;;  %v2769_v44 = vshrl.u32 %v11554_v14, %v2767_v41  ;;  %v2278_v0 = vsel %vm2267_vm1, nan, %v2277_v13 }
 0x4ea   :  { %v2486_v59 = vsel %vm2475_vm2, nan, %v2485_v3  ;;  %v2171_v55 = vxor.u32 2147483648, %v11547_v28  ;;  %v2768_v15 = vshll.u32 %v11564_v57, %v2766_v56  ;;  %vm2167_vm13 = vcmp.eq.s32.totalorder %v2165_v45, 0 }
 0x4eb   :  { %v11629_v46 = vshrl.u32 %v2860_v54, 30  ;;  %v8869_v39 = vpack.c.bf16 %v2486_v59, %v2278_v0  ;;  %v2774_v5 = vor.u32 4788187, %v2773_v16  ;;  %v2169_v23 = vsel %vm2167_vm13, %v11547_v28, %v2168_v53 }
 0x4ec   :  { %vm2170_vm9 = vcmp.eq.s32.totalorder %v2165_v45, 2  ;;  %v2373_v14 = vand.u32 3, %v11530_v58  ;;  %v2376_v25 = vxor.u32 2147483648, %v11577_v30  ;;  %v2379_v42 = vxor.u32 2147483648, %v11572_v17 }
 0x4ed   :  { %v2862_v52 = vshll.u32 %v11629_v46, 30  ;;  %8870 = vmatprep.subr.bf16.mxu1 %v8869_v39  ;;  %v2172_v38 = vsel %vm2170_vm9, %v2171_v55, %v11567_v40  ;;  %v2671_v57 = vand.u32 2147483647, %v2670_v1  ;;  %v2770_v56 = vor.u32 %v2769_v44, %v2768_v15 }
 0x4ee   :  { %vm2166_vm6 = vcmp.lt.s32.totalorder %v2165_v45, 2  ;;  %vm2375_vm14 = vcmp.eq.s32.totalorder %v2373_v14, 0  ;;  %vm2378_vm15 = vcmp.eq.s32.totalorder %v2373_v14, 2  ;;  %v2673_v6 = vcvt.s32.f32 %v2666_v18 }
 0x4ef   :  { %v2863_v49 = vsub.s32 %v2859_v27, %v2862_v52  ;;  %v2173_v29 = vsel %vm2166_vm6, %v2169_v23, %v2172_v38  ;;  %v2377_v28 = vsel %vm2375_vm14, %v11572_v17, %v2376_v25  ;;  %v2775_v58 = vand.u32 2147483647, %v2774_v5 }
 0x4f0   :  { %vm2374_vm0 = vcmp.lt.s32.totalorder %v2373_v14, 2  ;;  %v2380_v43 = vsel %vm2378_vm15, %v2379_v42, %v11577_v30  ;;  %vm2163_vm1 = vweird.f32 %v11069_v37  ;;  %vm2371_vm2 = vweird.f32 %v11077_v19 }
 0x4f1   :  { %v2865_v7 = vsub.s32 0, %v2863_v49  ;;  %v2381_v40 = vsel %vm2374_vm0, %v2377_v28, %v2380_v43  ;;  %v15523_v61 = vand.u32 2147483647, %v11528_v11  ;;  %v15524_v10 = vcvt.s32.f32 %v11526_v48 }
 0x4f2   :  { %v2777_v36 = vcvt.s32.f32 %v2770_v56  ;;  %v2174_v60 = vsel %vm2163_vm1, nan, %v2173_v29  ;;  %v2382_v17 = vsel %vm2371_vm2, nan, %v2381_v40  ;;  %v2674_v63 = vmul.f32 %v2673_v6, %v2671_v57 }
 0x4f3   :  { %v2570_v21 = vmul.f32 %v15524_v10, %v15523_v61  ;;  %v8405_v18 = vmin.u32 %v2865_v7, %v2863_v49  ;;  %v8871_v1 = vpack.c.bf16 %v2382_v17, %v2174_v60  ;;  %vm2489_vm3 = vcmp.lt.s32.totalorder %v11226_v20, 0 }
 0x4f4   :  { %v2778_v41 = vmul.f32 %v2777_v36, %v2775_v58  ;;  %v2675_v27 = vxor.u32 2147483648, %v2674_v63  ;;  %vm2593_vm8 = vcmp.lt.s32.totalorder %v11241_v51, 0  ;;  %vm2697_vm11 = vcmp.lt.s32.totalorder %v11291_v31, 0 }
 0x4f5   :  { %v2867_v24 = vclz %v8405_v18  ;;  %8872 = vmatpush1.bf16.msra.mxu1 %v8871_v1  ;;  %v2571_v30 = vxor.u32 2147483648, %v2570_v21  ;;  %v2855_v16 = vadd.s32 %v11590_v35, %v11602_v12  ;;  %v15525_v54 = vand.u32 2147483647, %v11226_v20 }
 0x4f6   :  { %v2779_v13 = vxor.u32 2147483648, %v2778_v41  ;;  %v2676_v11 = vsel %vm2593_vm8, %v2675_v27, %v2674_v63  ;;  %v15528_v45 = vand.u32 2147483647, %v11241_v51  ;;  %v15531_v15 = vand.u32 2147483647, %v11291_v31 }
 0x4f7   :  { %v8406_v37 = vadd.s32 4294967294, %v2867_v24  ;;  %v2572_v19 = vsel %vm2489_vm3, %v2571_v30, %v2570_v21  ;;  %vm11656_vm10 = vcmp.le.f32.partialorder %v15525_v54, 0.7853982  ;;  %v2781_v52 = vsub.s32 4, %v11544_v26 }
 0x4f8   :  { %vm11662_vm4 = vcmp.le.f32.partialorder %v15528_v45, 0.7853982  ;;  %v2780_v44 = vsel %vm2697_vm11, %v2779_v13, %v2778_v41  ;;  %v2575_v35 = vsel %vm11656_vm10, %v11226_v20, %v2572_v19  ;;  %vm11676_vm7 = vcmp.le.f32.partialorder %v15531_v15, 0.7853982 }
 0x4f9   :  { %vm8407_vm5 = vcmp.lt.s32.totalorder %v8406_v37, 0  ;;  %v2679_v55 = vsel %vm11662_vm4, %v11241_v51, %v2676_v11  ;;  %v2783_v5 = vsel %vm11676_vm7, %v11291_v31, %v2780_v44  ;;  %9380 = vcosq.f32 %v2575_v35 }
 0x4fa   :  { %v2870_v48 = vsel %vm8407_vm5, 0, %v8406_v37  ;;  %9382 = vcosq.f32 %v2679_v55  ;;  %v2677_v25 = vsub.s32 4, %v11443_v47  ;;  %v2573_v42 = vsub.s32 4, %v11380_v8 }
 0x4fb   :  { %v2871_v33 = vsub.s32 32, %v2870_v48  ;;  %v2875_v32 = vsub.s32 4294967266, %v2870_v48  ;;  %v2872_v12 = vshll.u32 %v2863_v49, %v2870_v48  ;;  %9384 = vcosq.f32 %v2783_v5 }
 0x4fc   :  { %9386 = vsinq.f32 %v2783_v5  ;;  %v2782_v49 = vsel %vm2697_vm11, %v2781_v52, %v11544_v26  ;;  %v2885_v28 = vsub.s32 4, %v11629_v46  ;;  %v2678_v6 = vsel %vm2593_vm8, %v2677_v25, %v11443_v47 }
 0x4fd   :  { %v2873_v0 = vshrl.u32 %v2855_v16, %v2871_v33  ;;  %v2876_v59 = vadd.s32 127, %v2875_v32  ;;  %9388 = vsinq.f32 %v2679_v55  ;;  %v2574_v58 = vsel %vm2489_vm3, %v2573_v42, %v11380_v8 }
 0x4fe   :  { %9390 = vsinq.f32 %v2575_v35  ;;  %v2784_v7 = vsel %vm11676_vm7, 0, %v2782_v49  ;;  %vm2801_vm13 = vcmp.lt.s32.totalorder %v11433_v4, 0  ;;  %v15534_v40 = vand.u32 2147483647, %v11433_v4 }
 0x4ff   :  { %v2874_v23 = vor.u32 %v2873_v0, %v2872_v12  ;;  %v2877_v14 = vshll.u32 %v2876_v59, 23  ;;  %v2680_v47 = vsel %vm11662_vm4, 0, %v2678_v6  ;;  %v2886_v10 = vsel %vm2801_vm13, %v2885_v28, %v11629_v46  ;;  %v8408_v6 = vld [vmem:[%s15382_s2 + $0x40] sm:$0xff] }
 0x500   :  { %vm11701_vm9 = vcmp.le.f32.partialorder %v15534_v40, 0.7853982  ;;  %v2576_v8 = vsel %vm11656_vm10, 0, %v2574_v58  ;;  %v2788_v17 = vadd.s32 3, %v2784_v7  ;;  %v2684_v18 = vadd.s32 3, %v2680_v47  ;;  %v2916_v58 = vpop.permute.xlu0 %2915 }
 0x501   :  { %v2878_v38 = vor.u32 4788187, %v2877_v14  ;;  %v2881_v56 = vcvt.s32.f32 %v2874_v23  ;;  %v2888_v1 = vsel %vm11701_vm9, 0, %v2886_v10  ;;  %v2580_v24 = vadd.s32 3, %v2576_v8  ;;  %v2921_v10 = vpop.permute.xlu1 %2920 }
 0x502   :  { %v2892_v27 = vadd.s32 3, %v2888_v1  ;;  %v2789_v37 = vand.u32 3, %v2788_v17  ;;  %v2685_v13 = vand.u32 3, %v2684_v18  ;;  %vm2787_vm7 = vweird.f32 %v11291_v31  ;;  %v8409_v31 = vld [vmem:[%s15382_s2 + $0x48] sm:$0xff] }
 0x503   :  { %v2879_v57 = vand.u32 2147483647, %v2878_v38  ;;  %v9381_v21 = vpop.eup %9380  ;;  %v2581_v33 = vand.u32 3, %v2580_v24 }
 0x504   :  { %v9383_v60 = vpop.eup %9382  ;;  %v2587_v54 = vxor.u32 2147483648, %v9381_v21  ;;  %v2893_v3 = vand.u32 3, %v2892_v27  ;;  %vm2791_vm6 = vcmp.eq.s32.totalorder %v2789_v37, 0  ;;  %vm2794_vm14 = vcmp.eq.s32.totalorder %v2789_v37, 2 }
 0x505   :  { %v2882_v29 = vmul.f32 %v2881_v56, %v2879_v57  ;;  %v9385_v63 = vpop.eup %9384  ;;  %v2691_v16 = vxor.u32 2147483648, %v9383_v60  ;;  %vm2687_vm15 = vcmp.eq.s32.totalorder %v2685_v13, 0  ;;  %vm2690_vm0 = vcmp.eq.s32.totalorder %v2685_v13, 2 }
 0x506   :  { %v9387_v41 = vpop.eup %9386  ;;  %v2795_v48 = vxor.u32 2147483648, %v9385_v63  ;;  %vm2583_vm1 = vcmp.eq.s32.totalorder %v2581_v33, 0  ;;  %vm2586_vm2 = vcmp.eq.s32.totalorder %v2581_v33, 2  ;;  %vm2790_vm3 = vcmp.lt.s32.totalorder %v2789_v37, 2 }
 0x507   :  { %v2883_v43 = vxor.u32 2147483648, %v2882_v29  ;;  %v9389_v46 = vpop.eup %9388  ;;  %v2792_v19 = vxor.u32 2147483648, %v9387_v41  ;;  %vm2686_vm5 = vcmp.lt.s32.totalorder %v2685_v13, 2  ;;  %vm2898_vm8 = vcmp.eq.s32.totalorder %v2893_v3, 2 }
 0x508   :  { %v9391_v30 = vpop.eup %9390  ;;  %v2688_v11 = vxor.u32 2147483648, %v9389_v46  ;;  %v2796_v53 = vsel %vm2794_vm14, %v2795_v48, %v9387_v41  ;;  %v2692_v12 = vsel %vm2690_vm0, %v2691_v16, %v9389_v46  ;;  %vm2895_vm11 = vcmp.eq.s32.totalorder %v2893_v3, 0 }
 0x509   :  { %v2884_v61 = vsel %vm2801_vm13, %v2883_v43, %v2882_v29  ;;  %v2584_v32 = vxor.u32 2147483648, %v9391_v30  ;;  %v2793_v45 = vsel %vm2791_vm6, %v9385_v63, %v2792_v19  ;;  %v2588_v15 = vsel %vm2586_vm2, %v2587_v54, %v9391_v30 }
 0x50a   :  { %v2887_v36 = vsel %vm11701_vm9, %v11433_v4, %v2884_v61  ;;  %v2689_v35 = vsel %vm2687_vm15, %v9383_v60, %v2688_v11  ;;  %v2797_v5 = vsel %vm2790_vm3, %v2793_v45, %v2796_v53  ;;  %vm2582_vm10 = vcmp.lt.s32.totalorder %v2581_v33, 2 }
 0x50b   :  { %9392 = vcosq.f32 %v2887_v36  ;;  %v2585_v55 = vsel %vm2583_vm1, %v9381_v21, %v2584_v32  ;;  %v2693_v23 = vsel %vm2686_vm5, %v2689_v35, %v2692_v12  ;;  %vm2894_vm4 = vcmp.lt.s32.totalorder %v2893_v3, 2 }
 0x50c   :  { %9394 = vsinq.f32 %v2887_v36  ;;  %v2589_v38 = vsel %vm2582_vm10, %v2585_v55, %v2588_v15  ;;  %vm2683_vm13 = vweird.f32 %v11241_v51  ;;  %vm2891_vm9 = vweird.f32 %v11433_v4  ;;  %v8411_v4 = vld [vmem:[%s15382_s2 + $0x58] sm:$0xff] }
 0x50d   :  { %v2798_v42 = vsel %vm2787_vm7, nan, %v2797_v5  ;;  %v2694_v57 = vsel %vm2683_vm13, nan, %v2693_v23  ;;  %vm2579_vm6 = vweird.f32 %v11226_v20  ;;  %v15537_v51 = vmov 0.0   ;;  %v8410_v20 = vld [vmem:[%s15382_s2 + $0x50] sm:$0xff] }
 0x50e   :  { %v2590_v29 = vsel %vm2579_vm6, nan, %v2589_v38 }
 0x50f   :  { %v8875_v28 = vpack.c.bf16 %v2798_v42, %v2590_v29 }
 0x515   :  { %v9393_v44 = vpop.eup %9392 }
 0x516   :  { %v9395_v0 = vpop.eup %9394  ;;  %v2899_v59 = vxor.u32 2147483648, %v9393_v44 }
 0x517   :  { %v2896_v39 = vxor.u32 2147483648, %v9395_v0 }
 0x518   :  { %v2900_v14 = vsel %vm2898_vm8, %v2899_v59, %v9395_v0 }
 0x519   :  { %v2897_v52 = vsel %vm2895_vm11, %v9393_v44, %v2896_v39 }
 0x51a   :  { %v2901_v25 = vsel %vm2894_vm4, %v2897_v52, %v2900_v14 }
 0x51b   :  { %v2902_v56 = vsel %vm2891_vm9, nan, %v2901_v25 }
 0x51c   :  { %v8873_v49 = vpack.c.bf16 %v2902_v56, %v2694_v57 }
 0x51e   :  { %8874 = vmatprep.subr.bf16.mxu1 %v8873_v49 }
 0x51f   :  { %8876 = vmatpush1.bf16.msra.mxu1 %v8875_v28 }
 0x522   :  { %8416 = vmatmul.mubr.msk.f32.vlgmr.msra.gmra.mrb[12].mxu1 %vm1006_vm12, %v8408_v6 }
 0x523   :  { %3015 = vmatprep.mubr.f32.mxu1 %v15537_v51 }
 0x526   :  { %8417 = vmatmul.mubr.msk.f32.gmra.mrb[14].mxu1 %vm1006_vm12, %v8409_v31 }
 0x527   :  { %3021 = vmatprep.mubr.f32.mxu1 %v15537_v51 }
 0x52a   :  { %8418 = vmatmul.mubr.msk.f32.gmra.mrb[16].mxu1 %vm1006_vm12, %v8410_v20 }
 0x52b   :  { %3027 = vmatprep.mubr.f32.mxu1 %v15537_v51 }
 0x52e   :  { %8419 = vmatmul.mubr.msk.f32.gmra.mrb[18].mxu1 %vm1006_vm12, %v8411_v4 }
 0x52f   :  { %4935 = vmatprep.mubr.f32.mxu1 %v15537_v51 }
 0x5f5   :  { %v3011_v43 = vpop.f32.mrb[12].mxu1 }
 0x5f6   :  { %v11739_v7 = vadd.f32 %v3011_v43, %v2916_v58  ;;  %v3013_v40 = vpop.f32.mrb[13].mxu1 }
 0x5f7   :  { %v11741_v26 = vadd.f32 %v3013_v40, %v2916_v58 }
 0x5f8   :  { %v3034_v61 = vand.u32 2147483647, %v11739_v7  ;;  %v3037_v47 = vand.u32 2139095040, %v11739_v7 }
 0x5f9   :  { %v3138_v21 = vand.u32 2147483647, %v11741_v26  ;;  %v3141_v8 = vand.u32 2139095040, %v11741_v26  ;;  %v3017_v36 = vpop.f32.mrb[14].mxu1 }
 0x5fa   :  { %v3038_v60 = vshrl.u32 %v3037_v47, 23  ;;  %v11747_v17 = vadd.f32 %v3017_v36, %v2921_v10  ;;  %v3019_v63 = vpop.f32.mrb[15].mxu1  ;;  %v3041_v18 = vand.u32 8388607, %v3034_v61 }
 0x5fb   :  { %v3142_v1 = vshrl.u32 %v3141_v8, 23  ;;  %v3145_v41 = vand.u32 8388607, %v3138_v21  ;;  %v11760_v44 = vadd.f32 %v3019_v63, %v2921_v10 }
 0x5fc   :  { %v8420_v24 = vadd.s32 4294967169, %v3038_v60  ;;  %v3245_v30 = vand.u32 2139095040, %v11747_v17  ;;  %v3042_v13 = vor.u32 8388608, %v3041_v18  ;;  %v15424_v55 = vand.u32 2147483647, %v11747_v17 }
 0x5fd   :  { %v8424_v46 = vadd.s32 4294967169, %v3142_v1  ;;  %v11754_v27 = vpop.f32.mrb[16].mxu1  ;;  %v3146_v19 = vor.u32 8388608, %v3145_v41 }
 0x5fe   :  { %v3044_v37 = vadd.s32 1, %v8420_v24  ;;  %v3246_v11 = vshrl.u32 %v3245_v30, 23  ;;  %v11756_v16 = vpop.f32.mrb[17].mxu1  ;;  %v11764_v12 = vshll.u32 %v3042_v13, 8 }
 0x5ff   :  { %v3148_v48 = vadd.s32 1, %v8424_v46  ;;  %v11768_v59 = vshll.u32 %v3146_v19, 8 }
 0x600   :  { %vm3045_vm14 = vcmp.gt.s32.totalorder %v3044_v37, 0  ;;  %v8428_v32 = vadd.s32 4294967169, %v3246_v11 }
 0x601   :  { %v3046_v33 = vsel %vm3045_vm14, %v3044_v37, 0  ;;  %vm3149_vm15 = vcmp.gt.s32.totalorder %v3148_v48, 0  ;;  %v11758_v54 = vpop.f32.mrb[18].mxu1 }
 0x602   :  { %v3047_v3 = vshrl.u32 %v3046_v33, 5  ;;  %v3048_v45 = vand.u32 31, %v3046_v33  ;;  %v3150_v53 = vsel %vm3149_vm15, %v3148_v48, 0  ;;  %v11762_v35 = vpop.f32.mrb[19].mxu1  ;;  %v11772_v23 = vadd.s32 1, %v8428_v32 }
 0x603   :  { %v11766_v0 = vshrl.u32 %v3150_v53, 5  ;;  %v3152_v5 = vand.u32 31, %v3150_v53 }
 0x604   :  { %v3049_v15 = vsub.s32 32, %v3048_v45  ;;  %v3051_v39 = vshll.u32 %v15510_v22, %v3048_v45  ;;  %v3054_v14 = vshll.u32 %v15479_v34, %v3048_v45  ;;  %v3057_v52 = vshll.u32 %v15478_v50, %v3048_v45 }
 0x605   :  { %v3060_v38 = vshll.u32 %v15480_v2, %v3048_v45  ;;  %v3063_v25 = vshll.u32 %v15488_v62, %v3048_v45  ;;  %vm3066_vm0 = vcmp.lt.s32.totalorder %v3047_v3, 1  ;;  %vm3067_vm1 = vcmp.lt.s32.totalorder %v3047_v3, 2 }
 0x606   :  { %v3052_v42 = vshrl.u32 %v15479_v34, %v3049_v15  ;;  %v3055_v57 = vshrl.u32 %v15478_v50, %v3049_v15  ;;  %v3058_v56 = vshrl.u32 %v15480_v2, %v3049_v15  ;;  %v3050_v49 = vshrl.u32 %v15510_v22, %v3049_v15 }
 0x607   :  { %v3061_v29 = vshrl.u32 %v15488_v62, %v3049_v15  ;;  %v3064_v28 = vshrl.u32 %v15505_v9, %v3049_v15  ;;  %v3153_v4 = vsub.s32 32, %v3152_v5  ;;  %vm3068_vm2 = vcmp.lt.s32.totalorder %v3047_v3, 3 }
 0x608   :  { %v3053_v6 = vor.u32 %v3052_v42, %v3051_v39  ;;  %v3056_v31 = vor.u32 %v3055_v57, %v3054_v14  ;;  %v3059_v20 = vor.u32 %v3058_v56, %v3057_v52  ;;  %vm3069_vm3 = vcmp.lt.s32.totalorder %v3047_v3, 4 }
 0x609   :  { %v3062_v58 = vor.u32 %v3061_v29, %v3060_v38  ;;  %v3065_v43 = vor.u32 %v3064_v28, %v3063_v25  ;;  %v3155_v18 = vshll.u32 %v15510_v22, %v3152_v5  ;;  %v3156_v24 = vshrl.u32 %v15479_v34, %v3153_v4 }
 0x60a   :  { %v3070_v40 = vsel %vm3066_vm0, %v3050_v49, %v3053_v6  ;;  %v3071_v47 = vsel %vm3069_vm3, %v3059_v20, 2102212464  ;;  %v3074_v10 = vsel %vm3066_vm0, %v3053_v6, %v3056_v31  ;;  %v3078_v8 = vsel %vm3066_vm0, %v3056_v31, %v3059_v20 }
 0x60b   :  { %v3072_v36 = vsel %vm3068_vm2, %v3056_v31, %v3071_v47  ;;  %v3075_v60 = vsel %vm3069_vm3, %v3062_v58, 920167782  ;;  %v3079_v63 = vsel %vm3069_vm3, %v3065_v43, 1326507024  ;;  %v3158_v46 = vshll.u32 %v15479_v34, %v3152_v5 }
 0x60c   :  { %v3076_v1 = vsel %vm3068_vm2, %v3059_v20, %v3075_v60  ;;  %v3080_v41 = vsel %vm3068_vm2, %v3062_v58, %v3079_v63  ;;  %v3073_v30 = vsel %vm3067_vm1, %v3070_v40, %v3072_v36  ;;  %v3159_v19 = vshrl.u32 %v15478_v50, %v3153_v4 }
 0x60d   :  { %v3077_v37 = vsel %vm3067_vm1, %v3074_v10, %v3076_v1  ;;  %v3081_v13 = vsel %vm3067_vm1, %v3078_v8, %v3080_v41  ;;  %v3157_v45 = vor.u32 %v3156_v24, %v3155_v18  ;;  %v3161_v15 = vshll.u32 %v15478_v50, %v3152_v5 }
 0x60e   :  { %v11795_v48 = vmul.u32.u64.low %v11764_v12, %v3081_v13  ;;  %v11796_v11 = vmul.u32.u64.high %v11764_v12, %v3081_v13, %v11795_v48  ;;  %v11799_v33 = vmul.u32.u64.low %v11764_v12, %v3077_v37  ;;  %v11800_v32 = vmul.u32.u64.high %v11764_v12, %v3077_v37, %v11799_v33 }
 0x60f   :  { %v3160_v53 = vor.u32 %v3159_v19, %v3158_v46  ;;  %v3162_v39 = vshrl.u32 %v15480_v2, %v3153_v4  ;;  %v3154_v3 = vshrl.u32 %v15510_v22, %v3153_v4  ;;  %v3164_v14 = vshll.u32 %v15480_v2, %v3152_v5 }
 0x610   :  { %v3165_v52 = vshrl.u32 %v15488_v62, %v3153_v4  ;;  %v3168_v38 = vshrl.u32 %v15505_v9, %v3153_v4  ;;  %v3089_v25 = vmul.u32 %v11764_v12, %v3073_v30  ;;  %v3167_v57 = vshll.u32 %v15488_v62, %v3152_v5 }
 0x611   :  { %v3163_v42 = vor.u32 %v3162_v39, %v3161_v15  ;;  %vm3170_vm5 = vcmp.lt.s32.totalorder %v11766_v0, 1  ;;  %vm3091_vm8 = vc.u32 %v11796_v11, %v11799_v33  ;;  %v3092_v56 = vadd.s32 1, %v11800_v32 }
 0x612   :  { %v3166_v49 = vor.u32 %v3165_v52, %v3164_v14  ;;  %vm3171_vm11 = vcmp.lt.s32.totalorder %v11766_v0, 2  ;;  %v3169_v29 = vor.u32 %v3168_v38, %v3167_v57  ;;  %vm3172_vm10 = vcmp.lt.s32.totalorder %v11766_v0, 3 }
 0x613   :  { %vm3173_vm4 = vcmp.lt.s32.totalorder %v11766_v0, 4  ;;  %v3178_v28 = vsel %vm3170_vm5, %v3157_v45, %v3160_v53  ;;  %v3093_v12 = vsel %vm3091_vm8, %v3092_v56, %v11800_v32  ;;  %v3182_v31 = vsel %vm3170_vm5, %v3160_v53, %v3163_v42 }
 0x614   :  { %v3175_v6 = vsel %vm3173_vm4, %v3163_v42, 2102212464  ;;  %v3179_v5 = vsel %vm3173_vm4, %v3166_v49, 920167782  ;;  %v3094_v20 = vadd.s32 %v3093_v12, %v3089_v25  ;;  %v3174_v4 = vsel %vm3170_vm5, %v3154_v3, %v3157_v45 }
 0x615   :  { %v3180_v58 = vsel %vm3172_vm10, %v3163_v42, %v3179_v5  ;;  %v3183_v43 = vsel %vm3173_vm4, %v3169_v29, 1326507024  ;;  %v3176_v40 = vsel %vm3172_vm10, %v3160_v53, %v3175_v6  ;;  %vm3253_vm7 = vcmp.gt.s32.totalorder %v11772_v23, 0 }
 0x616   :  { %v3181_v47 = vsel %vm3171_vm11, %v3178_v28, %v3180_v58  ;;  %v3184_v10 = vsel %vm3172_vm10, %v3166_v49, %v3183_v43  ;;  %v3095_v8 = vadd.s32 536870912, %v3094_v20  ;;  %v3249_v41 = vand.u32 8388607, %v15424_v55 }
 0x617   :  { %v3185_v36 = vsel %vm3171_vm11, %v3182_v31, %v3184_v10  ;;  %v11825_v60 = vmul.u32.u64.low %v11768_v59, %v3181_v47  ;;  %v11826_v63 = vmul.u32.u64.high %v11768_v59, %v3181_v47, %v11825_v60  ;;  %v3254_v24 = vsel %vm3253_vm7, %v11772_v23, 0 }
 0x618   :  { %v11830_v18 = vmul.u32.u64.low %v11768_v59, %v3185_v36  ;;  %v11831_v1 = vmul.u32.u64.high %v11768_v59, %v3185_v36, %v11830_v18  ;;  %v11836_v46 = vshrl.u32 %v3095_v8, 30  ;;  %v3177_v30 = vsel %vm3171_vm11, %v3174_v4, %v3176_v40 }
 0x619   :  { %v3256_v37 = vand.u32 31, %v3254_v24  ;;  %v3349_v13 = vand.u32 2139095040, %v11760_v44  ;;  %v3196_v48 = vadd.s32 1, %v11826_v63  ;;  %v3193_v45 = vmul.u32 %v11768_v59, %v3177_v30 }
 0x61a   :  { %v3097_v19 = vshll.u32 %v11836_v46, 30  ;;  %vm3195_vm13 = vc.u32 %v11831_v1, %v11825_v60  ;;  %v3250_v53 = vor.u32 8388608, %v3249_v41  ;;  %v3255_v25 = vshrl.u32 %v3254_v24, 5 }
 0x61b   :  { %v3257_v32 = vsub.s32 32, %v3256_v37  ;;  %v3197_v15 = vsel %vm3195_vm13, %v3196_v48, %v11826_v63  ;;  %v3350_v0 = vshrl.u32 %v3349_v13, 23  ;;  %v3259_v3 = vshll.u32 %v15510_v22, %v3256_v37 }
 0x61c   :  { %v11846_v23 = vsub.s32 %v3094_v20, %v3097_v19  ;;  %v3198_v39 = vadd.s32 %v3197_v15, %v3193_v45  ;;  %v3262_v59 = vshll.u32 %v15479_v34, %v3256_v37  ;;  %v3265_v49 = vshll.u32 %v15478_v50, %v3256_v37 }
 0x61d   :  { %v3260_v14 = vshrl.u32 %v15479_v34, %v3257_v32  ;;  %v3263_v52 = vshrl.u32 %v15478_v50, %v3257_v32  ;;  %v3266_v42 = vshrl.u32 %v15480_v2, %v3257_v32  ;;  %v3290_v29 = vshll.u32 %v3250_v53, 8 }
 0x61e   :  { %v3100_v38 = vsub.s32 0, %v11846_v23  ;;  %v3199_v57 = vadd.s32 536870912, %v3198_v39  ;;  %v3268_v6 = vshll.u32 %v15480_v2, %v3256_v37  ;;  %v3269_v5 = vshrl.u32 %v15488_v62, %v3257_v32 }
 0x61f   :  { %v3261_v56 = vor.u32 %v3260_v14, %v3259_v3  ;;  %v3264_v12 = vor.u32 %v3263_v52, %v3262_v59  ;;  %v3267_v20 = vor.u32 %v3266_v42, %v3265_v49  ;;  %v3271_v4 = vshll.u32 %v15488_v62, %v3256_v37 }
 0x620   :  { %v8421_v28 = vmin.u32 %v3100_v38, %v11846_v23  ;;  %v11859_v31 = vshrl.u32 %v3199_v57, 30  ;;  %v3272_v58 = vshrl.u32 %v15505_v9, %v3257_v32  ;;  %v3270_v40 = vor.u32 %v3269_v5, %v3268_v6 }
 0x621   :  { %vm3274_vm9 = vcmp.lt.s32.totalorder %v3255_v25, 1  ;;  %v8432_v47 = vadd.s32 4294967169, %v3350_v0  ;;  %vm3275_vm6 = vcmp.lt.s32.totalorder %v3255_v25, 2  ;;  %vm3277_vm14 = vcmp.lt.s32.totalorder %v3255_v25, 4 }
 0x622   :  { %v3102_v43 = vclz %v8421_v28  ;;  %v3201_v10 = vshll.u32 %v11859_v31, 30  ;;  %v3273_v8 = vor.u32 %v3272_v58, %v3271_v4  ;;  %vm3276_vm15 = vcmp.lt.s32.totalorder %v3255_v25, 3 }
 0x623   :  { %v3282_v63 = vsel %vm3274_vm9, %v3261_v56, %v3264_v12  ;;  %v3283_v18 = vsel %vm3277_vm14, %v3270_v40, 920167782  ;;  %v3279_v24 = vsel %vm3277_vm14, %v3267_v20, 2102212464  ;;  %v3286_v37 = vsel %vm3274_vm9, %v3264_v12, %v3267_v20 }
 0x624   :  { %v8422_v36 = vadd.s32 4294967294, %v3102_v43  ;;  %v11865_v41 = vsub.s32 %v3198_v39, %v3201_v10  ;;  %v3284_v30 = vsel %vm3276_vm15, %v3267_v20, %v3283_v18  ;;  %v3258_v13 = vshrl.u32 %v15510_v22, %v3257_v32  ;;  %v2926_v18 = vpop.permute.xlu0 %2925 }
 0x625   :  { %v3285_v19 = vsel %vm3275_vm6, %v3282_v63, %v3284_v30  ;;  %v3287_v48 = vsel %vm3277_vm14, %v3273_v8, 1326507024  ;;  %v3356_v0 = vadd.s32 1, %v8432_v47  ;;  %v3280_v14 = vsel %vm3276_vm15, %v3264_v12, %v3279_v24 }
 0x626   :  { %vm8423_vm0 = vcmp.lt.s32.totalorder %v8422_v36, 0  ;;  %v3204_v53 = vsub.s32 0, %v11865_v41  ;;  %v3288_v15 = vsel %vm3276_vm15, %v3270_v40, %v3287_v48  ;;  %v3278_v39 = vsel %vm3274_vm9, %v3258_v13, %v3261_v56 }
 0x627   :  { %v3105_v45 = vsel %vm8423_vm0, 0, %v8422_v36  ;;  %v3289_v52 = vsel %vm3275_vm6, %v3286_v37, %v3288_v15  ;;  %vm3357_vm1 = vcmp.gt.s32.totalorder %v3356_v0, 0  ;;  %v15423_v28 = vand.u32 2147483647, %v11760_v44 }
 0x628   :  { %v3110_v3 = vsub.s32 4294967266, %v3105_v45  ;;  %v8425_v38 = vmin.u32 %v3204_v53, %v11865_v41  ;;  %v11877_v59 = vmul.u32.u64.low %v3290_v29, %v3289_v52  ;;  %v11878_v32 = vmul.u32.u64.high %v3290_v29, %v3289_v52, %v11877_v59 }
 0x629   :  { %v11880_v42 = vmul.u32.u64.low %v3290_v29, %v3285_v19  ;;  %v11881_v57 = vmul.u32.u64.high %v3290_v29, %v3285_v19, %v11880_v42  ;;  %v3358_v6 = vsel %vm3357_vm1, %v3356_v0, 0  ;;  %v3106_v5 = vsub.s32 32, %v3105_v45 }
 0x62a   :  { %v3206_v49 = vclz %v8425_v38  ;;  %v3111_v56 = vadd.s32 127, %v3110_v3  ;;  %v3281_v12 = vsel %vm3275_vm6, %v3278_v39, %v3280_v14  ;;  %v3360_v20 = vand.u32 31, %v3358_v6 }
 0x62b   :  { %vm3299_vm2 = vc.u32 %v11878_v32, %v11880_v42  ;;  %v3090_v58 = vadd.s32 %v11799_v33, %v11796_v11  ;;  %v3300_v43 = vadd.s32 1, %v11881_v57  ;;  %v3297_v40 = vmul.u32 %v3290_v29, %v3281_v12 }
 0x62c   :  { %v8426_v4 = vadd.s32 4294967294, %v3206_v49  ;;  %v3353_v47 = vand.u32 8388607, %v15423_v28  ;;  %v3112_v8 = vshll.u32 %v3111_v56, 23  ;;  %v3361_v36 = vsub.s32 32, %v3360_v20 }
 0x62d   :  { %v3108_v10 = vshrl.u32 %v3090_v58, %v3106_v5  ;;  %v3301_v25 = vsel %vm3299_vm2, %v3300_v43, %v11881_v57  ;;  %v3107_v24 = vshll.u32 %v11846_v23, %v3105_v45  ;;  %v11896_v11 = vadd.f32 %v11754_v27, %v2926_v18 }
 0x62e   :  { %vm8427_vm3 = vcmp.lt.s32.totalorder %v8426_v4, 0  ;;  %v3302_v63 = vadd.s32 %v3301_v25, %v3297_v40  ;;  %v3354_v13 = vor.u32 8388608, %v3353_v47  ;;  %v3113_v29 = vor.u32 4788187, %v3112_v8 }
 0x62f   :  { %v3209_v30 = vsel %vm8427_vm3, 0, %v8426_v4  ;;  %v3109_v33 = vor.u32 %v3108_v10, %v3107_v24  ;;  %v3364_v19 = vshrl.u32 %v15479_v34, %v3361_v36  ;;  %v3367_v48 = vshrl.u32 %v15478_v50, %v3361_v36 }
 0x630   :  { %v3303_v37 = vadd.s32 536870912, %v3302_v63  ;;  %v3214_v53 = vsub.s32 4294967266, %v3209_v30  ;;  %v3370_v0 = vshrl.u32 %v15480_v2, %v3361_v36  ;;  %v3373_v3 = vshrl.u32 %v15488_v62, %v3361_v36 }
 0x631   :  { %v3363_v23 = vshll.u32 %v15510_v22, %v3360_v20  ;;  %v3366_v45 = vshll.u32 %v15479_v34, %v3360_v20  ;;  %v3372_v27 = vshll.u32 %v15480_v2, %v3360_v20  ;;  %v3376_v39 = vshrl.u32 %v15505_v9, %v3361_v36 }
 0x632   :  { %v11900_v15 = vshrl.u32 %v3303_v37, 30  ;;  %v3359_v52 = vshrl.u32 %v3358_v6, 5  ;;  %v3369_v38 = vshll.u32 %v15478_v50, %v3360_v20  ;;  %v11911_v59 = vadd.f32 %v11756_v16, %v2926_v18 }
 0x633   :  { %v3365_v57 = vor.u32 %v3364_v19, %v3363_v23  ;;  %v3368_v49 = vor.u32 %v3367_v48, %v3366_v45  ;;  %v3374_v5 = vor.u32 %v3373_v3, %v3372_v27  ;;  %v3375_v56 = vshll.u32 %v15488_v62, %v3360_v20 }
 0x634   :  { %v3305_v14 = vshll.u32 %v11900_v15, 30  ;;  %v3194_v12 = vadd.s32 %v11825_v60, %v11831_v1  ;;  %v3215_v4 = vadd.s32 127, %v3214_v53  ;;  %v3371_v43 = vor.u32 %v3370_v0, %v3369_v38 }
 0x635   :  { %v3114_v40 = vand.u32 2147483647, %v3113_v29  ;;  %v3116_v47 = vcvt.s32.f32 %v3109_v33  ;;  %v3377_v6 = vor.u32 %v3376_v39, %v3375_v56  ;;  %v3394_v10 = vshll.u32 %v3354_v13, 8 }
 0x636   :  { %v11916_v58 = vsub.s32 %v3302_v63, %v3305_v14  ;;  %v3210_v8 = vsub.s32 32, %v3209_v30  ;;  %vm3378_vm5 = vcmp.lt.s32.totalorder %v3359_v52, 1  ;;  %vm3381_vm8 = vcmp.lt.s32.totalorder %v3359_v52, 4 }
 0x637   :  { %v3362_v25 = vshrl.u32 %v15510_v22, %v3361_v36  ;;  %vm3380_vm11 = vcmp.lt.s32.totalorder %v3359_v52, 3  ;;  %v3386_v20 = vsel %vm3378_vm5, %v3365_v57, %v3368_v49  ;;  %v3387_v18 = vsel %vm3381_vm8, %v3374_v5, 920167782 }
 0x638   :  { %v3308_v16 = vsub.s32 0, %v11916_v58  ;;  %v3216_v60 = vshll.u32 %v3215_v4, 23  ;;  %vm3379_vm10 = vcmp.lt.s32.totalorder %v3359_v52, 2  ;;  %v3383_v1 = vsel %vm3381_vm8, %v3371_v43, 2102212464 }
 0x639   :  { %v3388_v63 = vsel %vm3380_vm11, %v3371_v43, %v3387_v18  ;;  %v3390_v13 = vsel %vm3378_vm5, %v3368_v49, %v3371_v43  ;;  %v3391_v33 = vsel %vm3381_vm8, %v3377_v6, 1326507024  ;;  %v3211_v29 = vshll.u32 %v11865_v41, %v3209_v30 }
 0x63a   :  { %v8429_v24 = vmin.u32 %v3308_v16, %v11916_v58  ;;  %v3389_v37 = vsel %vm3379_vm10, %v3386_v20, %v3388_v63  ;;  %v3212_v19 = vshrl.u32 %v3194_v12, %v3210_v8  ;;  %v3382_v36 = vsel %vm3378_vm5, %v3362_v25, %v3365_v57 }
 0x63b   :  { %v3392_v48 = vsel %vm3380_vm11, %v3374_v5, %v3391_v33  ;;  %v3384_v53 = vsel %vm3380_vm11, %v3368_v49, %v3383_v1  ;;  %v11927_v3 = vmul.u32.u64.low %v3394_v10, %v3389_v37  ;;  %v11928_v23 = vmul.u32.u64.high %v3394_v10, %v3389_v37, %v11927_v3 }
 0x63c   :  { %v3393_v0 = vsel %vm3379_vm10, %v3390_v13, %v3392_v48  ;;  %v3117_v45 = vmul.f32 %v3116_v47, %v3114_v40  ;;  %v3217_v27 = vor.u32 4788187, %v3216_v60  ;;  %v3310_v38 = vclz %v8429_v24  ;;  %v11951_v24 = vpop.permute.xlu1 %2930 }
 0x63d   :  { %v11931_v39 = vmul.u32.u64.low %v3394_v10, %v3393_v0  ;;  %v11932_v14 = vmul.u32.u64.high %v3394_v10, %v3393_v0, %v11931_v39  ;;  %v3453_v56 = vand.u32 2139095040, %v11896_v11  ;;  %v3213_v41 = vor.u32 %v3212_v19, %v3211_v29 }
 0x63e   :  { %v3385_v30 = vsel %vm3379_vm10, %v3382_v36, %v3384_v53  ;;  %v3557_v57 = vand.u32 2139095040, %v11911_v59  ;;  %v3404_v49 = vadd.s32 1, %v11928_v23  ;;  %v3118_v12 = vxor.u32 2147483648, %v3117_v45 }
 0x63f   :  { %v3454_v5 = vshrl.u32 %v3453_v56, 23  ;;  %v3120_v4 = vsub.s32 4, %v11836_v46  ;;  %v3218_v43 = vand.u32 2147483647, %v3217_v27  ;;  %v15421_v40 = vand.u32 2147483647, %v11896_v11 }
 0x640   :  { %v8430_v47 = vadd.s32 4294967294, %v3310_v38  ;;  %v3401_v6 = vmul.u32 %v3394_v10, %v3385_v30  ;;  %vm3403_vm4 = vc.u32 %v11932_v14, %v11927_v3  ;;  %v3220_v16 = vcvt.s32.f32 %v3213_v41 }
 0x641   :  { %v8436_v8 = vadd.s32 4294967169, %v3454_v5  ;;  %v3405_v52 = vsel %vm3403_vm4, %v3404_v49, %v11928_v23  ;;  %v3558_v25 = vshrl.u32 %v3557_v57, 23  ;;  %vm3036_vm7 = vcmp.lt.s32.totalorder %v11739_v7, 0 }
 0x642   :  { %v3406_v20 = vadd.s32 %v3405_v52, %v3401_v6  ;;  %v3119_v60 = vsel %vm3036_vm7, %v3118_v12, %v3117_v45  ;;  %v11945_v1 = vsel %vm3036_vm7, %v3120_v4, %v11836_v46  ;;  %v11947_v63 = vmul.f32 %v3220_v16, %v3218_v43 }
 0x643   :  { %v3460_v18 = vadd.s32 1, %v8436_v8  ;;  %v3457_v10 = vand.u32 8388607, %v15421_v40  ;;  %vm8431_vm13 = vcmp.lt.s32.totalorder %v8430_v47, 0  ;;  %v8440_v13 = vadd.s32 4294967169, %v3558_v25 }
 0x644   :  { %v3407_v37 = vadd.s32 536870912, %v3406_v20  ;;  %vm11955_vm6 = vcmp.le.f32.partialorder %v3034_v61, 0.7853982  ;;  %v11961_v46 = vadd.f32 %v11758_v54, %v11951_v24  ;;  %v11968_v36 = vadd.s32 %v11880_v42, %v11878_v32 }
 0x645   :  { %vm3461_vm9 = vcmp.gt.s32.totalorder %v3460_v18, 0  ;;  %v11975_v61 = vsel %vm11955_vm6, %v11739_v7, %v3119_v60  ;;  %v3222_v0 = vxor.u32 2147483648, %v11947_v63  ;;  %v11978_v54 = vsel %vm8431_vm13, 0, %v8430_v47 }
 0x646   :  { %v3462_v29 = vsel %vm3461_vm9, %v3460_v18, 0  ;;  %v11970_v48 = vshrl.u32 %v3407_v37, 30  ;;  %v3458_v27 = vor.u32 8388608, %v3457_v10  ;;  %v3564_v32 = vadd.s32 1, %v8440_v13 }
 0x647   :  { %v3464_v53 = vand.u32 31, %v3462_v29  ;;  %v3463_v42 = vshrl.u32 %v3462_v29, 5  ;;  %v15422_v52 = vand.u32 2147483647, %v11911_v59  ;;  %vm3140_vm14 = vcmp.lt.s32.totalorder %v11741_v26, 0 }
 0x648   :  { %v3409_v45 = vshll.u32 %v11970_v48, 30  ;;  %v3318_v25 = vsub.s32 4294967266, %v11978_v54  ;;  %v3498_v37 = vshll.u32 %v3458_v27, 8  ;;  %vm3565_vm0 = vcmp.gt.s32.totalorder %v3564_v32, 0 }
 0x649   :  { %v3465_v39 = vsub.s32 32, %v3464_v53  ;;  %v3467_v38 = vshll.u32 %v15510_v22, %v3464_v53  ;;  %v3470_v56 = vshll.u32 %v15479_v34, %v3464_v53  ;;  %v3473_v41 = vshll.u32 %v15478_v50, %v3464_v53 }
 0x64a   :  { %v11985_v30 = vsub.s32 %v3406_v20, %v3409_v45  ;;  %v3476_v5 = vshll.u32 %v15480_v2, %v3464_v53  ;;  %v3479_v43 = vshll.u32 %v15488_v62, %v3464_v53  ;;  %vm3482_vm15 = vcmp.lt.s32.totalorder %v3463_v42, 1 }
 0x64b   :  { %v3468_v57 = vshrl.u32 %v15479_v34, %v3465_v39  ;;  %v3471_v49 = vshrl.u32 %v15478_v50, %v3465_v39  ;;  %v3474_v12 = vshrl.u32 %v15480_v2, %v3465_v39  ;;  %v3477_v4 = vshrl.u32 %v15488_v62, %v3465_v39 }
 0x64c   :  { %v3480_v47 = vshrl.u32 %v15505_v9, %v3465_v39  ;;  %v3412_v6 = vsub.s32 0, %v11985_v30  ;;  %v3466_v13 = vshrl.u32 %v15510_v22, %v3465_v39  ;;  %vm3483_vm1 = vcmp.lt.s32.totalorder %v3463_v42, 2 }
 0x64d   :  { %v3469_v8 = vor.u32 %v3468_v57, %v3467_v38  ;;  %v3472_v16 = vor.u32 %v3471_v49, %v3470_v56  ;;  %v3475_v20 = vor.u32 %v3474_v12, %v3473_v41  ;;  %v3478_v18 = vor.u32 %v3477_v4, %v3476_v5 }
 0x64e   :  { %v3481_v60 = vor.u32 %v3480_v47, %v3479_v43  ;;  %v8433_v10 = vmin.u32 %v3412_v6, %v11985_v30  ;;  %vm3485_vm2 = vcmp.lt.s32.totalorder %v3463_v42, 4  ;;  %vm3484_vm3 = vcmp.lt.s32.totalorder %v3463_v42, 3 }
 0x64f   :  { %v3490_v29 = vsel %vm3482_vm15, %v3469_v8, %v3472_v16  ;;  %v3487_v45 = vsel %vm3485_vm2, %v3475_v20, 2102212464  ;;  %v3491_v38 = vsel %vm3485_vm2, %v3478_v18, 920167782  ;;  %v3486_v56 = vsel %vm3482_vm15, %v3466_v13, %v3469_v8 }
 0x650   :  { %v3414_v53 = vclz %v8433_v10  ;;  %v3492_v57 = vsel %vm3484_vm3, %v3475_v20, %v3491_v38  ;;  %v3494_v49 = vsel %vm3482_vm15, %v3472_v16, %v3475_v20  ;;  %v3495_v41 = vsel %vm3485_vm2, %v3481_v60, 1326507024 }
 0x651   :  { %v3488_v12 = vsel %vm3484_vm3, %v3472_v16, %v3487_v45  ;;  %v3493_v4 = vsel %vm3483_vm1, %v3490_v29, %v3492_v57  ;;  %v3496_v43 = vsel %vm3484_vm3, %v3478_v18, %v3495_v41  ;;  %v3319_v27 = vadd.s32 127, %v3318_v25 }
 0x652   :  { %v8434_v5 = vadd.s32 4294967294, %v3414_v53  ;;  %v3497_v47 = vsel %vm3483_vm1, %v3494_v49, %v3496_v43  ;;  %v12002_v39 = vmul.u32.u64.low %v3498_v37, %v3493_v4  ;;  %v12003_v6 = vmul.u32.u64.high %v3498_v37, %v3493_v4, %v12002_v39 }
 0x653   :  { %v12006_v10 = vmul.u32.u64.low %v3498_v37, %v3497_v47  ;;  %v12007_v40 = vmul.u32.u64.high %v3498_v37, %v3497_v47, %v12006_v10  ;;  %v3566_v8 = vsel %vm3565_vm0, %v3564_v32, 0  ;;  %v3489_v16 = vsel %vm3483_vm1, %v3486_v56, %v3488_v12 }
 0x654   :  { %vm8435_vm5 = vcmp.lt.s32.totalorder %v8434_v5, 0  ;;  %v3561_v18 = vand.u32 8388607, %v15422_v52  ;;  %v3568_v25 = vand.u32 31, %v3566_v8  ;;  %v12018_v60 = vsel %vm3140_vm14, %v3222_v0, %v11947_v63 }
 0x655   :  { %v12010_v20 = vsel %vm8435_vm5, 0, %v8434_v5  ;;  %v3314_v13 = vsub.s32 32, %v11978_v54  ;;  %v3661_v53 = vand.u32 2139095040, %v11961_v46  ;;  %v3508_v45 = vadd.s32 1, %v12003_v6 }
 0x656   :  { %v3422_v42 = vsub.s32 4294967266, %v12010_v20  ;;  %v3569_v38 = vsub.s32 32, %v3568_v25  ;;  %v3320_v56 = vshll.u32 %v3319_v27, 23  ;;  %v3402_v57 = vadd.s32 %v11927_v3, %v11932_v14 }
 0x657   :  { %v3505_v63 = vmul.u32 %v3498_v37, %v3489_v16  ;;  %vm3507_vm8 = vc.u32 %v12007_v40, %v12002_v39  ;;  %v3562_v49 = vor.u32 8388608, %v3561_v18  ;;  %v3418_v12 = vsub.s32 32, %v12010_v20 }
 0x658   :  { %v3509_v0 = vsel %vm3507_vm8, %v3508_v45, %v12003_v6  ;;  %v3572_v41 = vshrl.u32 %v15479_v34, %v3569_v38  ;;  %v3575_v5 = vshrl.u32 %v15478_v50, %v3569_v38  ;;  %v3567_v43 = vshrl.u32 %v3566_v8, 5 }
 0x659   :  { %v3510_v4 = vadd.s32 %v3509_v0, %v3505_v63  ;;  %v3662_v47 = vshrl.u32 %v3661_v53, 23  ;;  %v3423_v27 = vadd.s32 127, %v3422_v42  ;;  %v3571_v10 = vshll.u32 %v15510_v22, %v3568_v25 }
 0x65a   :  { %v3574_v3 = vshll.u32 %v15479_v34, %v3568_v25  ;;  %v3578_v14 = vshrl.u32 %v15480_v2, %v3569_v38  ;;  %v3577_v6 = vshll.u32 %v15478_v50, %v3568_v25  ;;  %v3580_v16 = vshll.u32 %v15480_v2, %v3568_v25 }
 0x65b   :  { %v3511_v37 = vadd.s32 536870912, %v3510_v4  ;;  %v3581_v18 = vshrl.u32 %v15488_v62, %v3569_v38  ;;  %vm12043_vm11 = vcmp.le.f32.partialorder %v3138_v21, 0.7853982  ;;  %v3573_v8 = vor.u32 %v3572_v41, %v3571_v10 }
 0x65c   :  { %v3576_v53 = vor.u32 %v3575_v5, %v3574_v3  ;;  %v3583_v42 = vshll.u32 %v15488_v62, %v3568_v25  ;;  %v3584_v63 = vshrl.u32 %v15505_v9, %v3569_v38  ;;  %v3316_v0 = vshrl.u32 %v11968_v36, %v3314_v13 }
 0x65d   :  { %v12050_v52 = vshrl.u32 %v3511_v37, 30  ;;  %v3579_v19 = vor.u32 %v3578_v14, %v3577_v6  ;;  %v3582_v28 = vor.u32 %v3581_v18, %v3580_v16  ;;  %v3321_v55 = vor.u32 4788187, %v3320_v56 }
 0x65e   :  { %v3585_v23 = vor.u32 %v3584_v63, %v3583_v42  ;;  %v3602_v29 = vshll.u32 %v3562_v49, 8  ;;  %v8444_v32 = vadd.s32 4294967169, %v3662_v47  ;;  %v3424_v21 = vshll.u32 %v3423_v27, 23 }
 0x65f   :  { %v3513_v51 = vshll.u32 %v12050_v52, 30  ;;  %vm3586_vm10 = vcmp.lt.s32.totalorder %v3567_v43, 1  ;;  %vm3589_vm4 = vcmp.lt.s32.totalorder %v3567_v43, 4  ;;  %vm3244_vm7 = vcmp.lt.s32.totalorder %v11747_v17, 0 }
 0x660   :  { %v3419_v25 = vshll.u32 %v11985_v30, %v12010_v20  ;;  %v3420_v41 = vshrl.u32 %v3402_v57, %v3418_v12  ;;  %v3594_v36 = vsel %vm3586_vm10, %v3573_v8, %v3576_v53  ;;  %v3595_v13 = vsel %vm3589_vm4, %v3582_v28, 920167782 }
 0x661   :  { %v12057_v5 = vsub.s32 %v3510_v4, %v3513_v51  ;;  %v3570_v56 = vshrl.u32 %v15510_v22, %v3569_v38  ;;  %vm3588_vm13 = vcmp.lt.s32.totalorder %v3567_v43, 3  ;;  %v3591_v49 = vsel %vm3589_vm4, %v3579_v19, 2102212464 }
 0x662   :  { %vm3587_vm9 = vcmp.lt.s32.totalorder %v3567_v43, 2  ;;  %v3596_v47 = vsel %vm3588_vm13, %v3579_v19, %v3595_v13  ;;  %v3598_v27 = vsel %vm3586_vm10, %v3576_v53, %v3579_v19  ;;  %v3599_v10 = vsel %vm3589_vm4, %v3585_v23, 1326507024 }
 0x663   :  { %v3425_v3 = vor.u32 4788187, %v3424_v21  ;;  %v3516_v14 = vsub.s32 0, %v12057_v5  ;;  %v3590_v30 = vsel %vm3586_vm10, %v3570_v56, %v3573_v8  ;;  %v3597_v20 = vsel %vm3587_vm9, %v3594_v36, %v3596_v47 }
 0x664   :  { %v3592_v57 = vsel %vm3588_vm13, %v3576_v53, %v3591_v49  ;;  %v3600_v12 = vsel %vm3588_vm13, %v3582_v28, %v3599_v10  ;;  %v12064_v51 = vmul.u32.u64.low %v3602_v29, %v3597_v20  ;;  %v12065_v4 = vmul.u32.u64.high %v3602_v29, %v3597_v20, %v12064_v51 }
 0x665   :  { %v3226_v38 = vsel %vm12043_vm11, %v11741_v26, %v12018_v60  ;;  %v8437_v19 = vmin.u32 %v3516_v14, %v12057_v5  ;;  %v3601_v23 = vsel %vm3587_vm9, %v3598_v27, %v3600_v12  ;;  %v3668_v37 = vadd.s32 1, %v8444_v32 }
 0x666   :  { %v15542_v6 = vshll.u32 %v11916_v58, %v11978_v54  ;;  %v3421_v18 = vor.u32 %v3420_v41, %v3419_v25  ;;  %v12077_v28 = vmul.u32.u64.low %v3602_v29, %v3601_v23  ;;  %v12078_v8 = vmul.u32.u64.high %v3602_v29, %v3601_v23, %v12077_v28 }
 0x667   :  { %v3322_v53 = vand.u32 2147483647, %v3321_v55  ;;  %v3518_v42 = vclz %v8437_v19  ;;  %v3593_v63 = vsel %vm3587_vm9, %v3590_v30, %v3592_v57  ;;  %vm3669_vm15 = vcmp.gt.s32.totalorder %v3668_v37, 0 }
 0x668   :  { %v3317_v16 = vor.u32 %v3316_v0, %v15542_v6  ;;  %v3426_v21 = vand.u32 2147483647, %v3425_v3  ;;  %v3612_v60 = vadd.s32 1, %v12065_v4  ;;  %v15543_v36 = vand.u32 2147483647, %v11961_v46 }
 0x669   :  { %v3670_v32 = vsel %vm3669_vm15, %v3668_v37, 0  ;;  %9396 = vcosq.f32 %v3226_v38  ;;  %v15544_v58 = vsub.s32 4, %v11900_v15  ;;  %v8438_v55 = vadd.s32 4294967294, %v3518_v42 }
 0x66a   :  { %v3665_v13 = vand.u32 8388607, %v15543_v36  ;;  %v3672_v0 = vand.u32 31, %v3670_v32  ;;  %v3324_v43 = vcvt.s32.f32 %v3317_v16  ;;  %v3428_v25 = vcvt.s32.f32 %v3421_v18 }
 0x66b   :  { %v12089_v54 = vsel %vm3244_vm7, %v15544_v58, %v11900_v15  ;;  %v3609_v41 = vmul.u32 %v3602_v29, %v3593_v63  ;;  %vm3611_vm0 = vc.u32 %v12078_v8, %v12064_v51  ;;  %9398 = vsinq.f32 %v3226_v38 }
 0x66c   :  { %vm8439_vm1 = vcmp.lt.s32.totalorder %v8438_v55, 0  ;;  %v3613_v56 = vsel %vm3611_vm0, %v3612_v60, %v12065_v4  ;;  %v3673_v49 = vsub.s32 32, %v3672_v0  ;;  %v3325_v47 = vmul.f32 %v3324_v43, %v3322_v53 }
 0x66d   :  { %v12094_v27 = vmul.f32 %v3428_v25, %v3426_v21  ;;  %v3614_v10 = vadd.s32 %v3613_v56, %v3609_v41  ;;  %v3666_v3 = vor.u32 8388608, %v3665_v13  ;;  %v12096_v15 = vsel %vm8439_vm1, 0, %v8438_v55 }
 0x66e   :  { %v12098_v14 = vshrl.u32 %v3670_v32, 5  ;;  %v3681_v30 = vshll.u32 %v15478_v50, %v3672_v0  ;;  %v12103_v29 = vadd.f32 %v11762_v35, %v11951_v24  ;;  %v3676_v57 = vshrl.u32 %v15479_v34, %v3673_v49 }
 0x66f   :  { %v3615_v20 = vadd.s32 536870912, %v3614_v10  ;;  %v3679_v12 = vshrl.u32 %v15478_v50, %v3673_v49  ;;  %v3682_v4 = vshrl.u32 %v15480_v2, %v3673_v49  ;;  %v3675_v38 = vshll.u32 %v15510_v22, %v3672_v0 }
 0x670   :  { %v3678_v19 = vshll.u32 %v15479_v34, %v3672_v0  ;;  %v3684_v23 = vshll.u32 %v15480_v2, %v3672_v0  ;;  %v3685_v37 = vshrl.u32 %v15488_v62, %v3673_v49  ;;  %v3326_v6 = vxor.u32 2147483648, %v3325_v47 }
 0x671   :  { %v3430_v16 = vxor.u32 2147483648, %v12094_v27  ;;  %v12113_v35 = vshrl.u32 %v3615_v20, 30  ;;  %v3683_v24 = vor.u32 %v3682_v4, %v3681_v30  ;;  %v3526_v18 = vsub.s32 4294967266, %v12096_v15 }
 0x672   :  { %v3677_v28 = vor.u32 %v3676_v57, %v3675_v38  ;;  %v3680_v53 = vor.u32 %v3679_v12, %v3678_v19  ;;  %v3686_v42 = vor.u32 %v3685_v37, %v3684_v23  ;;  %v15545_v63 = vand.u32 2147483647, %v11747_v17 }
 0x673   :  { %v3617_v60 = vshll.u32 %v12113_v35, 30  ;;  %v3687_v36 = vshll.u32 %v15488_v62, %v3672_v0  ;;  %v3688_v13 = vshrl.u32 %v15505_v9, %v3673_v49  ;;  %v3706_v32 = vshll.u32 %v3666_v3, 8  ;;  %v12125_v58 = vpop.eup %9396 }
 0x674   :  { %vm12118_vm2 = vcmp.le.f32.partialorder %v15545_v63, 0.7853982  ;;  %vm3348_vm3 = vcmp.lt.s32.totalorder %v11760_v44, 0  ;;  %v3522_v55 = vsub.s32 32, %v12096_v15  ;;  %v3674_v43 = vshrl.u32 %v15510_v22, %v3673_v49 }
 0x675   :  { %vm3693_vm5 = vcmp.lt.s32.totalorder %v12098_v14, 4  ;;  %v3765_v25 = vand.u32 2139095040, %v12103_v29  ;;  %v12132_v41 = vsub.s32 %v3614_v10, %v3617_v60  ;;  %v3689_v56 = vor.u32 %v3688_v13, %v3687_v36  ;;  %v12137_v3 = vpop.eup %9398 }
 0x676   :  { %vm3690_vm8 = vcmp.lt.s32.totalorder %v12098_v14, 1  ;;  %v3695_v0 = vsel %vm3693_vm5, %v3683_v24, 2102212464  ;;  %v3527_v30 = vadd.s32 127, %v3526_v18  ;;  %vm3692_vm10 = vcmp.lt.s32.totalorder %v12098_v14, 3 }
 0x677   :  { %v3698_v20 = vsel %vm3690_vm8, %v3677_v28, %v3680_v53  ;;  %v3699_v49 = vsel %vm3693_vm5, %v3686_v42, 920167782  ;;  %v15548_v57 = vand.u32 2147483647, %v11760_v44  ;;  %v3620_v12 = vsub.s32 0, %v12132_v41 }
 0x678   :  { %vm3691_vm13 = vcmp.lt.s32.totalorder %v12098_v14, 2  ;;  %v3700_v4 = vsel %vm3692_vm10, %v3683_v24, %v3699_v49  ;;  %v3702_v38 = vsel %vm3690_vm8, %v3680_v53, %v3683_v24  ;;  %v3694_v19 = vsel %vm3690_vm8, %v3674_v43, %v3677_v28 }
 0x679   :  { %vm12144_vm4 = vcmp.le.f32.partialorder %v15548_v57, 0.7853982  ;;  %v3696_v23 = vsel %vm3692_vm10, %v3680_v53, %v3695_v0  ;;  %v3701_v37 = vsel %vm3691_vm13, %v3698_v20, %v3700_v4  ;;  %v3703_v18 = vsel %vm3693_vm5, %v3689_v56, 1326507024 }
 0x67a   :  { %v8441_v63 = vmin.u32 %v3620_v12, %v12132_v41  ;;  %v3704_v60 = vsel %vm3692_vm10, %v3686_v42, %v3703_v18  ;;  %v12155_v36 = vmul.u32.u64.low %v3706_v32, %v3701_v37  ;;  %v12156_v13 = vmul.u32.u64.high %v3706_v32, %v3701_v37, %v12155_v36 }
 0x67b   :  { %v15551_v57 = vsel %vm11955_vm6, 0, %v11945_v1  ;;  %v3327_v24 = vsel %vm3244_vm7, %v3326_v6, %v3325_v47  ;;  %v3705_v28 = vsel %vm3691_vm13, %v3702_v38, %v3704_v60  ;;  %v3766_v53 = vshrl.u32 %v3765_v25, 23 }
 0x67c   :  { %v12162_v49 = vadd.s32 3, %v15551_v57  ;;  %v3506_v43 = vadd.s32 %v12002_v39, %v12007_v40  ;;  %v3622_v42 = vclz %v8441_v63  ;;  %9400 = vcosq.f32 %v11975_v61 }
 0x67d   :  { %v12170_v56 = vmul.u32.u64.low %v3706_v32, %v3705_v28  ;;  %v12171_v0 = vmul.u32.u64.high %v3706_v32, %v3705_v28, %v12170_v56  ;;  %v3331_v1 = vsel %vm12118_vm2, 0, %v12089_v54  ;;  %v3697_v33 = vsel %vm3691_vm13, %v3694_v19, %v3696_v23 }
 0x67e   :  { %v8448_v47 = vadd.s32 4294967169, %v3766_v53  ;;  %v3431_v6 = vsel %vm3348_vm3, %v3430_v16, %v12094_v27  ;;  %v3524_v25 = vshrl.u32 %v3506_v43, %v3522_v55  ;;  %v3528_v40 = vshll.u32 %v3527_v30, 23 }
 0x67f   :  { %v3716_v39 = vadd.s32 1, %v12156_v13  ;;  %v3330_v20 = vsel %vm12118_vm2, %v11747_v17, %v3327_v24  ;;  %v15426_v12 = vand.u32 2147483647, %v12103_v29  ;;  %v3224_v54 = vsub.s32 4, %v11859_v31 }
 0x680   :  { %v3772_v4 = vadd.s32 1, %v8448_v47  ;;  %v3523_v14 = vshll.u32 %v12057_v5, %v12096_v15  ;;  %v8442_v38 = vadd.s32 4294967294, %v3622_v42  ;;  %v3713_v19 = vmul.u32 %v3706_v32, %v3697_v33 }
 0x681   :  { %vm3715_vm6 = vc.u32 %v12171_v0, %v12155_v36  ;;  %9402 = vsinq.f32 %v11975_v61  ;;  %v3434_v27 = vsel %vm12144_vm4, %v11760_v44, %v3431_v6  ;;  %v12198_v55 = vor.u32 4788187, %v3528_v40 }
 0x682   :  { %v3717_v16 = vsel %vm3715_vm6, %v3716_v39, %v12156_v13  ;;  %vm3773_vm7 = vcmp.gt.s32.totalorder %v3772_v4, 0  ;;  %9404 = vcosq.f32 %v3330_v20  ;;  %v12196_v21 = vor.u32 %v3524_v25, %v3523_v14 }
 0x683   :  { %v3718_v30 = vadd.s32 %v3717_v16, %v3713_v19  ;;  %9406 = vsinq.f32 %v3330_v20  ;;  %v12200_v5 = vadd.s32 3, %v3331_v1  ;;  %v3769_v15 = vand.u32 8388607, %v15426_v12 }
 0x684   :  { %v3774_v61 = vsel %vm3773_vm7, %v3772_v4, 0  ;;  %9408 = vcosq.f32 %v3434_v27  ;;  %vm8443_vm9 = vcmp.lt.s32.totalorder %v8442_v38, 0  ;;  %v3225_v23 = vsel %vm3140_vm14, %v3224_v54, %v11859_v31 }
 0x685   :  { %v3719_v32 = vadd.s32 536870912, %v3718_v30  ;;  %9410 = vsinq.f32 %v3434_v27  ;;  %v12209_v37 = vadd.s32 %v12064_v51, %v12078_v8  ;;  %v3776_v18 = vand.u32 31, %v3774_v61 }
 0x686   :  { %v12217_v28 = vpop.eup %9400  ;;  %v12219_v53 = vsel %vm8443_vm9, 0, %v8442_v38  ;;  %v3770_v31 = vor.u32 8388608, %v3769_v15  ;;  %v3227_v51 = vsel %vm12043_vm11, 0, %v3225_v23  ;;  %v12224_v8 = vadd.s32 %v12155_v36, %v12171_v0 }
 0x687   :  { %v12214_v57 = vshrl.u32 %v3719_v32, 30  ;;  %v3777_v43 = vsub.s32 32, %v3776_v18  ;;  %v3779_v56 = vshll.u32 %v15510_v22, %v3776_v18  ;;  %v3432_v1 = vsub.s32 4, %v11970_v48 }
 0x688   :  { %v3782_v47 = vshll.u32 %v15479_v34, %v3776_v18  ;;  %v3630_v45 = vsub.s32 4294967266, %v12219_v53  ;;  %v3775_v36 = vshrl.u32 %v3774_v61, 5  ;;  %v3785_v0 = vshll.u32 %v15478_v50, %v3776_v18 }
 0x689   :  { %v3721_v42 = vshll.u32 %v12214_v57, 30  ;;  %v3780_v33 = vshrl.u32 %v15479_v34, %v3777_v43  ;;  %v3783_v6 = vshrl.u32 %v15478_v50, %v3777_v43  ;;  %v3786_v25 = vshrl.u32 %v15480_v2, %v3777_v43 }
 0x68a   :  { %v3626_v20 = vsub.s32 32, %v12219_v53  ;;  %v12240_v14 = vshll.u32 %v3770_v31, 8  ;;  %v3788_v16 = vshll.u32 %v15480_v2, %v3776_v18  ;;  %v3791_v61 = vshll.u32 %v15488_v62, %v3776_v18 }
 0x68b   :  { %v12234_v40 = vsub.s32 %v3718_v30, %v3721_v42  ;;  %v12237_v39 = vpop.eup %9402  ;;  %v3781_v4 = vor.u32 %v3780_v33, %v3779_v56  ;;  %v3784_v54 = vor.u32 %v3783_v6, %v3782_v47  ;;  %v3787_v27 = vor.u32 %v3786_v25, %v3785_v0 }
 0x68c   :  { %v12242_v38 = vpop.eup %9404  ;;  %v3789_v30 = vshrl.u32 %v15488_v62, %v3777_v43  ;;  %v3792_v32 = vshrl.u32 %v15505_v9, %v3777_v43  ;;  %v3231_v23 = vadd.s32 3, %v3227_v51  ;;  %v3433_v31 = vsel %vm3348_vm3, %v3432_v1, %v11970_v48 }
 0x68d   :  { %v3724_v19 = vsub.s32 0, %v12234_v40  ;;  %v12247_v15 = vpop.eup %9406  ;;  %v3631_v56 = vadd.s32 127, %v3630_v45  ;;  %vm3794_vm14 = vcmp.lt.s32.totalorder %v3775_v36, 1  ;;  %v3778_v25 = vshrl.u32 %v15510_v22, %v3777_v43 }
 0x68e   :  { %v12254_v42 = vpop.eup %9408  ;;  %v3790_v47 = vor.u32 %v3789_v30, %v3788_v16  ;;  %v3793_v0 = vor.u32 %v3792_v32, %v3791_v61  ;;  %vm3797_vm11 = vcmp.lt.s32.totalorder %v3775_v36, 4  ;;  %v3802_v18 = vsel %vm3794_vm14, %v3781_v4, %v3784_v54 }
 0x68f   :  { %v8445_v33 = vmin.u32 %v3724_v19, %v12234_v40  ;;  %v9411_v6 = vpop.eup %9410  ;;  %vm3796_vm15 = vcmp.lt.s32.totalorder %v3775_v36, 3  ;;  %v3799_v51 = vsel %vm3797_vm11, %v3787_v27, 2102212464  ;;  %vm3795_vm0 = vcmp.lt.s32.totalorder %v3775_v36, 2 }
 0x690   :  { %v3803_v13 = vsel %vm3797_vm11, %v3790_v47, 920167782  ;;  %v3806_v48 = vsel %vm3794_vm14, %v3784_v54, %v3787_v27  ;;  %v3232_v1 = vand.u32 3, %v3231_v23  ;;  %v3798_v45 = vsel %vm3794_vm14, %v3778_v25, %v3781_v4 }
 0x691   :  { %v3726_v12 = vclz %v8445_v33  ;;  %v3804_v60 = vsel %vm3796_vm15, %v3787_v27, %v3803_v13  ;;  %v3807_v16 = vsel %vm3797_vm11, %v3793_v0, 1326507024  ;;  %v3800_v30 = vsel %vm3796_vm15, %v3784_v54, %v3799_v51 }
 0x692   :  { %v3805_v19 = vsel %vm3795_vm0, %v3802_v18, %v3804_v60  ;;  %v3808_v63 = vsel %vm3796_vm15, %v3790_v47, %v3807_v16  ;;  %v3627_v32 = vshll.u32 %v12132_v41, %v12219_v53  ;;  %v3628_v4 = vshrl.u32 %v12209_v37, %v3626_v20 }
 0x693   :  { %v8446_v24 = vadd.s32 4294967294, %v3726_v12  ;;  %v12260_v43 = vmul.u32.u64.low %v12240_v14, %v3805_v19  ;;  %v12261_v61 = vmul.u32.u64.high %v12240_v14, %v3805_v19, %v12260_v43  ;;  %v3809_v13 = vsel %vm3795_vm0, %v3806_v48, %v3808_v63 }
 0x694   :  { %v3435_v12 = vsel %vm12144_vm4, 0, %v3433_v31  ;;  %v12271_v54 = vmul.u32.u64.low %v12240_v14, %v3809_v13  ;;  %v12272_v27 = vmul.u32.u64.high %v12240_v14, %v3809_v13, %v12271_v54  ;;  %vm3230_vm2 = vweird.f32 %v11741_v26 }
 0x695   :  { %vm8447_vm1 = vcmp.lt.s32.totalorder %v8446_v24, 0  ;;  %vm3438_vm3 = vweird.f32 %v11760_v44  ;;  %v3632_v23 = vshll.u32 %v3631_v56, 23  ;;  %v3801_v41 = vsel %vm3795_vm0, %v3798_v45, %v3800_v30 }
 0x696   :  { %v3729_v60 = vsel %vm8447_vm1, 0, %v8446_v24  ;;  %v3443_v53 = vxor.u32 2147483648, %v9411_v6  ;;  %v3820_v63 = vadd.s32 1, %v12261_v61  ;;  %vm3234_vm5 = vcmp.eq.s32.totalorder %v3232_v1, 0 }
 0x697   :  { %v3734_v33 = vsub.s32 4294967266, %v3729_v60  ;;  %vm3237_vm8 = vcmp.eq.s32.totalorder %v3232_v1, 2  ;;  %v3439_v10 = vadd.s32 3, %v3435_v12  ;;  %v15552_v24 = vxor.u32 2147483648, %v12137_v3 }
 0x698   :  { %v15553_v31 = vxor.u32 2147483648, %v12125_v58  ;;  %v3446_v56 = vxor.u32 2147483648, %v12254_v42  ;;  %v3629_v25 = vor.u32 %v3628_v4, %v3627_v32  ;;  %v3817_v36 = vmul.u32 %v12240_v14, %v3801_v41 }
 0x699   :  { %v3735_v37 = vadd.s32 127, %v3734_v33  ;;  %v3236_v20 = vsel %vm3234_vm5, %v12125_v58, %v15552_v24  ;;  %vm3819_vm10 = vc.u32 %v12272_v27, %v12260_v43  ;;  %v3440_v0 = vand.u32 3, %v3439_v10 }
 0x69a   :  { %v3239_v47 = vsel %vm3237_vm8, %v15553_v31, %v12137_v3  ;;  %v3633_v18 = vor.u32 4788187, %v3632_v23  ;;  %v3730_v51 = vsub.s32 32, %v3729_v60  ;;  %v3821_v48 = vsel %vm3819_vm10, %v3820_v63, %v12261_v61 }
 0x69b   :  { %vm3233_vm4 = vcmp.lt.s32.totalorder %v3232_v1, 2  ;;  %v3822_v45 = vadd.s32 %v3821_v48, %v3817_v36  ;;  %vm3442_vm13 = vcmp.eq.s32.totalorder %v3440_v0, 0  ;;  %vm3445_vm6 = vcmp.eq.s32.totalorder %v3440_v0, 2 }
 0x69c   :  { %v3240_v19 = vsel %vm3233_vm4, %v3236_v20, %v3239_v47  ;;  %v3736_v58 = vshll.u32 %v3735_v37, 23  ;;  %vm3441_vm7 = vcmp.lt.s32.totalorder %v3440_v0, 2  ;;  %v3444_v3 = vsel %vm3442_vm13, %v12254_v42, %v3443_v53 }
 0x69d   :  { %v3447_v16 = vsel %vm3445_vm6, %v3446_v56, %v9411_v6  ;;  %v3823_v30 = vadd.s32 536870912, %v3822_v45  ;;  %v3128_v32 = vand.u32 3, %v12162_v49  ;;  %v3131_v13 = vxor.u32 2147483648, %v12237_v39 }
 0x69e   :  { %v3448_v14 = vsel %vm3441_vm7, %v3444_v3, %v3447_v16  ;;  %v3732_v12 = vshrl.u32 %v12224_v8, %v3730_v51  ;;  %v3241_v1 = vsel %vm3230_vm2, nan, %v3240_v19  ;;  %v3134_v4 = vxor.u32 2147483648, %v12217_v28 }
 0x69f   :  { %v3449_v61 = vsel %vm3438_vm3, nan, %v3448_v14  ;;  %v3731_v54 = vshll.u32 %v12234_v40, %v3729_v60  ;;  %v12299_v42 = vshrl.u32 %v3823_v30, 30  ;;  %vm3130_vm9 = vcmp.eq.s32.totalorder %v3128_v32, 0 }
 0x6a0   :  { %v8877_v6 = vpack.c.bf16 %v3449_v61, %v3241_v1  ;;  %v3737_v23 = vor.u32 4788187, %v3736_v58  ;;  %v3132_v49 = vsel %vm3130_vm9, %v12217_v28, %v3131_v13  ;;  %vm3133_vm14 = vcmp.eq.s32.totalorder %v3128_v32, 2 }
 0x6a1   :  { %v3336_v8 = vand.u32 3, %v12200_v5  ;;  %v3825_v26 = vshll.u32 %v12299_v42, 30  ;;  %v3135_v44 = vsel %vm3133_vm14, %v3134_v4, %v12237_v39  ;;  %v3339_v33 = vxor.u32 2147483648, %v12247_v15 }
 0x6a2   :  { %8878 = vmatprep.subr.bf16.mxu0 %v8877_v6  ;;  %v3342_v41 = vxor.u32 2147483648, %v12242_v38  ;;  %v3634_v40 = vand.u32 2147483647, %v3633_v18  ;;  %v3733_v60 = vor.u32 %v3732_v12, %v3731_v54  ;;  %vm3129_vm11 = vcmp.lt.s32.totalorder %v3128_v32, 2 }
 0x6a3   :  { %vm3338_vm15 = vcmp.eq.s32.totalorder %v3336_v8, 0  ;;  %v3826_v53 = vsub.s32 %v3822_v45, %v3825_v26  ;;  %v3136_v63 = vsel %vm3129_vm11, %v3132_v49, %v3135_v44  ;;  %vm3341_vm0 = vcmp.eq.s32.totalorder %v3336_v8, 2 }
 0x6a4   :  { %v3340_v28 = vsel %vm3338_vm15, %v12242_v38, %v3339_v33  ;;  %v3636_v10 = vcvt.s32.f32 %v3629_v25  ;;  %v3738_v5 = vand.u32 2147483647, %v3737_v23  ;;  %vm3337_vm1 = vcmp.lt.s32.totalorder %v3336_v8, 2 }
 0x6a5   :  { %v3343_v37 = vsel %vm3341_vm0, %v3342_v41, %v12247_v15  ;;  %v3828_v24 = vsub.s32 0, %v3826_v53  ;;  %vm3126_vm2 = vweird.f32 %v11739_v7  ;;  %vm3334_vm3 = vweird.f32 %v11747_v17 }
 0x6a6   :  { %v3344_v39 = vsel %vm3337_vm1, %v3340_v28, %v3343_v37  ;;  %v15554_v20 = vand.u32 2147483647, %v12198_v55  ;;  %v15555_v31 = vcvt.s32.f32 %v12196_v21  ;;  %v3740_v56 = vcvt.s32.f32 %v3733_v60 }
 0x6a7   :  { %v3137_v36 = vsel %vm3126_vm2, nan, %v3136_v63  ;;  %v3345_v38 = vsel %vm3334_vm3, nan, %v3344_v39  ;;  %v3637_v0 = vmul.f32 %v3636_v10, %v3634_v40  ;;  %v8449_v25 = vmin.u32 %v3828_v24, %v3826_v53 }
 0x6a8   :  { %v3533_v47 = vmul.f32 %v15555_v31, %v15554_v20  ;;  %v8879_v18 = vpack.c.bf16 %v3345_v38, %v3137_v36  ;;  %v3741_v51 = vmul.f32 %v3740_v56, %v3738_v5  ;;  %vm3452_vm5 = vcmp.lt.s32.totalorder %v11896_v11, 0 }
 0x6a9   :  { %v3830_v48 = vclz %v8449_v25  ;;  %v3638_v45 = vxor.u32 2147483648, %v3637_v0  ;;  %vm3556_vm10 = vcmp.lt.s32.totalorder %v11911_v59, 0  ;;  %vm3660_vm4 = vcmp.lt.s32.totalorder %v11961_v46, 0 }
 0x6aa   :  { %8880 = vmatpush1.bf16.msra.mxu0 %v8879_v18  ;;  %v3534_v15 = vxor.u32 2147483648, %v3533_v47  ;;  %v3742_v19 = vxor.u32 2147483648, %v3741_v51  ;;  %v3818_v58 = vadd.s32 %v12260_v43, %v12272_v27  ;;  %v15556_v30 = vand.u32 2147483647, %v11896_v11 }
 0x6ab   :  { %v8450_v7 = vadd.s32 4294967294, %v3830_v48  ;;  %v3639_v55 = vsel %vm3556_vm10, %v3638_v45, %v3637_v0  ;;  %v15559_v32 = vand.u32 2147483647, %v11911_v59  ;;  %v15562_v54 = vand.u32 2147483647, %v11961_v46 }
 0x6ac   :  { %v3535_v17 = vsel %vm3452_vm5, %v3534_v15, %v3533_v47  ;;  %vm12326_vm13 = vcmp.le.f32.partialorder %v15556_v30, 0.7853982  ;;  %v3743_v12 = vsel %vm3660_vm4, %v3742_v19, %v3741_v51  ;;  %v3744_v26 = vsub.s32 4, %v12214_v57 }
 0x6ad   :  { %vm8451_vm8 = vcmp.lt.s32.totalorder %v8450_v7, 0  ;;  %vm12332_vm6 = vcmp.le.f32.partialorder %v15559_v32, 0.7853982  ;;  %v3538_v43 = vsel %vm12326_vm13, %v11896_v11, %v3535_v17  ;;  %vm12346_vm7 = vcmp.le.f32.partialorder %v15562_v54, 0.7853982 }
 0x6ae   :  { %v3833_v21 = vsel %vm8451_vm8, 0, %v8450_v7  ;;  %v3642_v4 = vsel %vm12332_vm6, %v11911_v59, %v3639_v55  ;;  %v3746_v23 = vsel %vm12346_vm7, %v11961_v46, %v3743_v12  ;;  %9412 = vcosq.f32 %v3538_v43 }
 0x6af   :  { %v3834_v3 = vsub.s32 32, %v3833_v21  ;;  %v3838_v16 = vsub.s32 4294967266, %v3833_v21  ;;  %v3835_v27 = vshll.u32 %v3826_v53, %v3833_v21  ;;  %9414 = vcosq.f32 %v3642_v4 }
 0x6b0   :  { %9416 = vcosq.f32 %v3746_v23  ;;  %v3640_v33 = vsub.s32 4, %v12113_v35  ;;  %v3536_v41 = vsub.s32 4, %v12050_v52  ;;  %v3745_v53 = vsel %vm3660_vm4, %v3744_v26, %v12214_v57 }
 0x6b1   :  { %v3836_v1 = vshrl.u32 %v3818_v58, %v3834_v3  ;;  %v3839_v61 = vadd.s32 127, %v3838_v16  ;;  %9418 = vsinq.f32 %v3746_v23  ;;  %v3848_v28 = vsub.s32 4, %v12299_v42 }
 0x6b2   :  { %9420 = vsinq.f32 %v3642_v4  ;;  %v3641_v10 = vsel %vm3556_vm10, %v3640_v33, %v12113_v35  ;;  %v3537_v5 = vsel %vm3452_vm5, %v3536_v41, %v12050_v52  ;;  %v3747_v24 = vsel %vm12346_vm7, 0, %v3745_v53 }
 0x6b3   :  { %v3837_v49 = vor.u32 %v3836_v1, %v3835_v27  ;;  %v3840_v8 = vshll.u32 %v3839_v61, 23  ;;  %9422 = vsinq.f32 %v3538_v43  ;;  %vm3764_vm9 = vcmp.lt.s32.totalorder %v12103_v29, 0 }
 0x6b4   :  { %v15565_v39 = vand.u32 2147483647, %v12103_v29  ;;  %v3643_v35 = vsel %vm12332_vm6, 0, %v3641_v10  ;;  %v3849_v31 = vsel %vm3764_vm9, %v3848_v28, %v12299_v42  ;;  %v3539_v52 = vsel %vm12326_vm13, 0, %v3537_v5  ;;  %v8452_v10 = vld [vmem:[%s15382_s2 + $0x60] sm:$0xff]  ;;  %v3879_v5 = vpop.permute.xlu0 %3878 }
 0x6b5   :  { %v3841_v44 = vor.u32 4788187, %v3840_v8  ;;  %v3844_v60 = vcvt.s32.f32 %v3837_v49  ;;  %v3751_v38 = vadd.s32 3, %v3747_v24  ;;  %v3647_v25 = vadd.s32 3, %v3643_v35 }
 0x6b6   :  { %vm12371_vm14 = vcmp.le.f32.partialorder %v15565_v39, 0.7853982  ;;  %v3543_v48 = vadd.s32 3, %v3539_v52  ;;  %vm3750_vm7 = vweird.f32 %v11961_v46  ;;  %v8453_v46 = vld [vmem:[%s15382_s2 + $0x68] sm:$0xff] }
 0x6b7   :  { %v3842_v40 = vand.u32 2147483647, %v3841_v44  ;;  %v3851_v18 = vsel %vm12371_vm14, 0, %v3849_v31  ;;  %v3752_v7 = vand.u32 3, %v3751_v38  ;;  %v3648_v19 = vand.u32 3, %v3647_v25  ;;  %v3884_v31 = vpop.permute.xlu1 %3883 }
 0x6b8   :  { %v9413_v47 = vpop.eup %9412  ;;  %v3855_v45 = vadd.s32 3, %v3851_v18  ;;  %v3544_v3 = vand.u32 3, %v3543_v48 }
 0x6b9   :  { %v3845_v63 = vmul.f32 %v3844_v60, %v3842_v40  ;;  %v9415_v36 = vpop.eup %9414  ;;  %v3550_v30 = vxor.u32 2147483648, %v9413_v47  ;;  %vm3754_vm11 = vcmp.eq.s32.totalorder %v3752_v7, 0  ;;  %vm3757_vm15 = vcmp.eq.s32.totalorder %v3752_v7, 2 }
 0x6ba   :  { %v9417_v0 = vpop.eup %9416  ;;  %v3654_v58 = vxor.u32 2147483648, %v9415_v36  ;;  %v3856_v14 = vand.u32 3, %v3855_v45  ;;  %vm3650_vm0 = vcmp.eq.s32.totalorder %v3648_v19, 0  ;;  %vm3653_vm1 = vcmp.eq.s32.totalorder %v3648_v19, 2 }
 0x6bb   :  { %v3846_v37 = vxor.u32 2147483648, %v3845_v63  ;;  %v9419_v51 = vpop.eup %9418  ;;  %v3758_v21 = vxor.u32 2147483648, %v9417_v0  ;;  %vm3546_vm2 = vcmp.eq.s32.totalorder %v3544_v3, 0  ;;  %vm3549_vm3 = vcmp.eq.s32.totalorder %v3544_v3, 2 }
 0x6bc   :  { %v9421_v42 = vpop.eup %9420  ;;  %v3755_v17 = vxor.u32 2147483648, %v9419_v51  ;;  %vm3753_vm5 = vcmp.lt.s32.totalorder %v3752_v7, 2  ;;  %vm3649_vm8 = vcmp.lt.s32.totalorder %v3648_v19, 2  ;;  %vm3861_vm10 = vcmp.eq.s32.totalorder %v3856_v14, 2 }
 0x6bd   :  { %v3847_v20 = vsel %vm3764_vm9, %v3846_v37, %v3845_v63  ;;  %v9423_v15 = vpop.eup %9422  ;;  %v3651_v55 = vxor.u32 2147483648, %v9421_v42  ;;  %v3759_v13 = vsel %vm3757_vm15, %v3758_v21, %v9419_v51  ;;  %v3655_v27 = vsel %vm3653_vm1, %v3654_v58, %v9421_v42 }
 0x6be   :  { %v3850_v56 = vsel %vm12371_vm14, %v12103_v29, %v3847_v20  ;;  %v3547_v16 = vxor.u32 2147483648, %v9423_v15  ;;  %v3756_v32 = vsel %vm3754_vm11, %v9417_v0, %v3755_v17  ;;  %v3551_v54 = vsel %vm3549_vm3, %v3550_v30, %v9423_v15 }
 0x6bf   :  { %9424 = vcosq.f32 %v3850_v56  ;;  %v3652_v43 = vsel %vm3650_vm0, %v9415_v36, %v3651_v55  ;;  %v3760_v23 = vsel %vm3753_vm5, %v3756_v32, %v3759_v13  ;;  %vm3858_vm4 = vcmp.eq.s32.totalorder %v3856_v14, 0 }
 0x6c0   :  { %9426 = vsinq.f32 %v3850_v56  ;;  %v3548_v4 = vsel %vm3546_vm2, %v9413_v47, %v3547_v16  ;;  %v3656_v49 = vsel %vm3649_vm8, %v3652_v43, %v3655_v27  ;;  %vm3545_vm13 = vcmp.lt.s32.totalorder %v3544_v3, 2 }
 0x6c1   :  { %vm3857_vm6 = vcmp.lt.s32.totalorder %v3856_v14, 2  ;;  %v3552_v44 = vsel %vm3545_vm13, %v3548_v4, %v3551_v54  ;;  %vm3646_vm9 = vweird.f32 %v11911_v59  ;;  %vm3854_vm14 = vweird.f32 %v12103_v29  ;;  %v8455_v29 = vld [vmem:[%s15382_s2 + $0x78] sm:$0xff] }
 0x6c2   :  { %v3761_v41 = vsel %vm3750_vm7, nan, %v3760_v23  ;;  %v3657_v40 = vsel %vm3646_vm9, nan, %v3656_v49  ;;  %vm3542_vm11 = vweird.f32 %v11896_v11  ;;  %v15568_v59 = vmov 0.0   ;;  %v8454_v11 = vld [vmem:[%s15382_s2 + $0x70] sm:$0xff] }
 0x6c3   :  { %v3553_v63 = vsel %vm3542_vm11, nan, %v3552_v44 }
 0x6c4   :  { %v8883_v28 = vpack.c.bf16 %v3761_v41, %v3553_v63 }
 0x6c9   :  { %v9425_v12 = vpop.eup %9424 }
 0x6ca   :  { %v9427_v1 = vpop.eup %9426  ;;  %v3862_v61 = vxor.u32 2147483648, %v9425_v12 }
 0x6cb   :  { %v3859_v6 = vxor.u32 2147483648, %v9427_v1 }
 0x6cc   :  { %v3863_v8 = vsel %vm3861_vm10, %v3862_v61, %v9427_v1 }
 0x6cd   :  { %v3860_v26 = vsel %vm3858_vm4, %v9425_v12, %v3859_v6 }
 0x6ce   :  { %v3864_v33 = vsel %vm3857_vm6, %v3860_v26, %v3863_v8 }
 0x6cf   :  { %v3865_v60 = vsel %vm3854_vm14, nan, %v3864_v33 }
 0x6d0   :  { %v8881_v53 = vpack.c.bf16 %v3865_v60, %v3657_v40 }
 0x6d2   :  { %8882 = vmatprep.subr.bf16.mxu0 %v8881_v53 }
 0x6d3   :  { %8884 = vmatpush1.bf16.msra.mxu0 %v8883_v28 }
 0x6d6   :  { %8460 = vmatmul.mubr.msk.f32.vlgmr.msra.gmra.mrb[12].mxu0 %vm1006_vm12, %v8452_v10 }
 0x6d7   :  { %3978 = vmatprep.mubr.f32.mxu0 %v15568_v59 }
 0x6da   :  { %8461 = vmatmul.mubr.msk.f32.gmra.mrb[14].mxu0 %vm1006_vm12, %v8453_v46 }
 0x6db   :  { %3984 = vmatprep.mubr.f32.mxu0 %v15568_v59 }
 0x6de   :  { %8462 = vmatmul.mubr.msk.f32.gmra.mrb[16].mxu0 %vm1006_vm12, %v8454_v11 }
 0x6df   :  { %3990 = vmatprep.mubr.f32.mxu0 %v15568_v59 }
 0x6e2   :  { %8463 = vmatmul.mubr.msk.f32.gmra.mrb[18].mxu0 %vm1006_vm12, %v8455_v29 }
 0x6e3   :  { %5898 = vmatprep.mubr.f32.mxu0 %v15568_v59 }
 0x7a9   :  { %v3974_v37 = vpop.f32.mrb[12].mxu0 }
 0x7aa   :  { %v12409_v24 = vadd.f32 %v3974_v37, %v3879_v5  ;;  %v3976_v39 = vpop.f32.mrb[13].mxu0 }
 0x7ab   :  { %v12411_v57 = vadd.f32 %v3976_v39, %v3879_v5 }
 0x7ac   :  { %v3997_v20 = vand.u32 2147483647, %v12409_v24  ;;  %v4000_v35 = vand.u32 2139095040, %v12409_v24 }
 0x7ad   :  { %v4101_v47 = vand.u32 2147483647, %v12411_v57  ;;  %v4104_v52 = vand.u32 2139095040, %v12411_v57  ;;  %v3980_v56 = vpop.f32.mrb[14].mxu0 }
 0x7ae   :  { %v4001_v36 = vshrl.u32 %v4000_v35, 23  ;;  %v12417_v38 = vadd.f32 %v3980_v56, %v3884_v31  ;;  %v3982_v0 = vpop.f32.mrb[15].mxu0  ;;  %v4004_v25 = vand.u32 8388607, %v3997_v20 }
 0x7af   :  { %v4105_v18 = vshrl.u32 %v4104_v52, 23  ;;  %v4108_v51 = vand.u32 8388607, %v4101_v47  ;;  %v12430_v12 = vadd.f32 %v3982_v0, %v3884_v31 }
 0x7b0   :  { %v8464_v48 = vadd.s32 4294967169, %v4001_v36  ;;  %v4208_v15 = vand.u32 2139095040, %v12417_v38  ;;  %v4005_v19 = vor.u32 8388608, %v4004_v25  ;;  %v15430_v4 = vand.u32 2147483647, %v12417_v38 }
 0x7b1   :  { %v8468_v42 = vadd.s32 4294967169, %v4105_v18  ;;  %v12424_v45 = vpop.f32.mrb[16].mxu0  ;;  %v4109_v17 = vor.u32 8388608, %v4108_v51 }
 0x7b2   :  { %v4007_v7 = vadd.s32 1, %v8464_v48  ;;  %v4209_v55 = vshrl.u32 %v4208_v15, 23  ;;  %v12426_v58 = vpop.f32.mrb[17].mxu0  ;;  %v12434_v27 = vshll.u32 %v4005_v19, 8 }
 0x7b3   :  { %v4111_v21 = vadd.s32 1, %v8468_v42  ;;  %v12438_v61 = vshll.u32 %v4109_v17, 8 }
 0x7b4   :  { %vm4008_vm15 = vcmp.gt.s32.totalorder %v4007_v7, 0  ;;  %v8472_v16 = vadd.s32 4294967169, %v4209_v55 }
 0x7b5   :  { %v4009_v3 = vsel %vm4008_vm15, %v4007_v7, 0  ;;  %vm4112_vm0 = vcmp.gt.s32.totalorder %v4111_v21, 0  ;;  %v12428_v30 = vpop.f32.mrb[18].mxu0 }
 0x7b6   :  { %v4010_v14 = vshrl.u32 %v4009_v3, 5  ;;  %v4011_v32 = vand.u32 31, %v4009_v3  ;;  %v4113_v13 = vsel %vm4112_vm0, %v4111_v21, 0  ;;  %v12432_v43 = vpop.f32.mrb[19].mxu0  ;;  %v12442_v49 = vadd.s32 1, %v8472_v16 }
 0x7b7   :  { %v12436_v1 = vshrl.u32 %v4113_v13, 5  ;;  %v4115_v23 = vand.u32 31, %v4113_v13 }
 0x7b8   :  { %v4012_v54 = vsub.s32 32, %v4011_v32  ;;  %v4014_v6 = vshll.u32 %v15510_v22, %v4011_v32  ;;  %v4017_v8 = vshll.u32 %v15479_v34, %v4011_v32  ;;  %v4020_v26 = vshll.u32 %v15478_v50, %v4011_v32 }
 0x7b9   :  { %v4023_v44 = vshll.u32 %v15480_v2, %v4011_v32  ;;  %v4026_v33 = vshll.u32 %v15488_v62, %v4011_v32  ;;  %vm4029_vm1 = vcmp.lt.s32.totalorder %v4010_v14, 1  ;;  %vm4030_vm2 = vcmp.lt.s32.totalorder %v4010_v14, 2 }
 0x7ba   :  { %v4015_v41 = vshrl.u32 %v15479_v34, %v4012_v54  ;;  %v4018_v40 = vshrl.u32 %v15478_v50, %v4012_v54  ;;  %v4021_v60 = vshrl.u32 %v15480_v2, %v4012_v54  ;;  %v4013_v53 = vshrl.u32 %v15510_v22, %v4012_v54 }
 0x7bb   :  { %v4024_v63 = vshrl.u32 %v15488_v62, %v4012_v54  ;;  %v4027_v28 = vshrl.u32 %v15505_v9, %v4012_v54  ;;  %v4116_v29 = vsub.s32 32, %v4115_v23  ;;  %vm4031_vm3 = vcmp.lt.s32.totalorder %v4010_v14, 3 }
 0x7bc   :  { %v4016_v10 = vor.u32 %v4015_v41, %v4014_v6  ;;  %v4019_v46 = vor.u32 %v4018_v40, %v4017_v8  ;;  %v4022_v11 = vor.u32 %v4021_v60, %v4020_v26  ;;  %vm4032_vm5 = vcmp.lt.s32.totalorder %v4010_v14, 4 }
 0x7bd   :  { %v4025_v5 = vor.u32 %v4024_v63, %v4023_v44  ;;  %v4028_v37 = vor.u32 %v4027_v28, %v4026_v33  ;;  %v4118_v25 = vshll.u32 %v15510_v22, %v4115_v23  ;;  %v4119_v48 = vshrl.u32 %v15479_v34, %v4116_v29 }
 0x7be   :  { %v4033_v39 = vsel %vm4029_vm1, %v4013_v53, %v4016_v10  ;;  %v4034_v35 = vsel %vm4032_vm5, %v4022_v11, 2102212464  ;;  %v4037_v31 = vsel %vm4029_vm1, %v4016_v10, %v4019_v46  ;;  %v4041_v52 = vsel %vm4029_vm1, %v4019_v46, %v4022_v11 }
 0x7bf   :  { %v4035_v56 = vsel %vm4031_vm3, %v4019_v46, %v4034_v35  ;;  %v4038_v36 = vsel %vm4032_vm5, %v4025_v5, 920167782  ;;  %v4042_v0 = vsel %vm4032_vm5, %v4028_v37, 1326507024  ;;  %v4121_v42 = vshll.u32 %v15479_v34, %v4115_v23 }
 0x7c0   :  { %v4039_v18 = vsel %vm4031_vm3, %v4022_v11, %v4038_v36  ;;  %v4043_v51 = vsel %vm4031_vm3, %v4025_v5, %v4042_v0  ;;  %v4036_v15 = vsel %vm4030_vm2, %v4033_v39, %v4035_v56  ;;  %v4122_v17 = vshrl.u32 %v15478_v50, %v4116_v29 }
 0x7c1   :  { %v4040_v7 = vsel %vm4030_vm2, %v4037_v31, %v4039_v18  ;;  %v4044_v19 = vsel %vm4030_vm2, %v4041_v52, %v4043_v51  ;;  %v4120_v32 = vor.u32 %v4119_v48, %v4118_v25  ;;  %v4124_v54 = vshll.u32 %v15478_v50, %v4115_v23 }
 0x7c2   :  { %v12465_v21 = vmul.u32.u64.low %v12434_v27, %v4044_v19  ;;  %v12466_v55 = vmul.u32.u64.high %v12434_v27, %v4044_v19, %v12465_v21  ;;  %v12469_v3 = vmul.u32.u64.low %v12434_v27, %v4040_v7  ;;  %v12470_v16 = vmul.u32.u64.high %v12434_v27, %v4040_v7, %v12469_v3 }
 0x7c3   :  { %v4123_v13 = vor.u32 %v4122_v17, %v4121_v42  ;;  %v4125_v6 = vshrl.u32 %v15480_v2, %v4116_v29  ;;  %v4117_v14 = vshrl.u32 %v15510_v22, %v4116_v29  ;;  %v4127_v8 = vshll.u32 %v15480_v2, %v4115_v23 }
 0x7c4   :  { %v4128_v26 = vshrl.u32 %v15488_v62, %v4116_v29  ;;  %v4131_v44 = vshrl.u32 %v15505_v9, %v4116_v29  ;;  %v4052_v33 = vmul.u32 %v12434_v27, %v4036_v15  ;;  %v4130_v40 = vshll.u32 %v15488_v62, %v4115_v23 }
 0x7c5   :  { %v4126_v41 = vor.u32 %v4125_v6, %v4124_v54  ;;  %vm4133_vm8 = vcmp.lt.s32.totalorder %v12436_v1, 1  ;;  %vm4054_vm10 = vc.u32 %v12466_v55, %v12469_v3  ;;  %v4055_v60 = vadd.s32 1, %v12470_v16 }
 0x7c6   :  { %v4129_v53 = vor.u32 %v4128_v26, %v4127_v8  ;;  %vm4134_vm4 = vcmp.lt.s32.totalorder %v12436_v1, 2  ;;  %v4132_v63 = vor.u32 %v4131_v44, %v4130_v40  ;;  %vm4135_vm13 = vcmp.lt.s32.totalorder %v12436_v1, 3 }
 0x7c7   :  { %vm4136_vm6 = vcmp.lt.s32.totalorder %v12436_v1, 4  ;;  %v4141_v28 = vsel %vm4133_vm8, %v4120_v32, %v4123_v13  ;;  %v4056_v27 = vsel %vm4054_vm10, %v4055_v60, %v12470_v16  ;;  %v4145_v46 = vsel %vm4133_vm8, %v4123_v13, %v4126_v41 }
 0x7c8   :  { %v4138_v10 = vsel %vm4136_vm6, %v4126_v41, 2102212464  ;;  %v4142_v23 = vsel %vm4136_vm6, %v4129_v53, 920167782  ;;  %v4057_v11 = vadd.s32 %v4056_v27, %v4052_v33  ;;  %v4137_v29 = vsel %vm4133_vm8, %v4117_v14, %v4120_v32 }
 0x7c9   :  { %v4143_v5 = vsel %vm4135_vm13, %v4126_v41, %v4142_v23  ;;  %v4146_v37 = vsel %vm4136_vm6, %v4132_v63, 1326507024  ;;  %v4139_v39 = vsel %vm4135_vm13, %v4123_v13, %v4138_v10  ;;  %vm4216_vm7 = vcmp.gt.s32.totalorder %v12442_v49, 0 }
 0x7ca   :  { %v4144_v35 = vsel %vm4134_vm4, %v4141_v28, %v4143_v5  ;;  %v4147_v31 = vsel %vm4135_vm13, %v4129_v53, %v4146_v37  ;;  %v4058_v52 = vadd.s32 536870912, %v4057_v11  ;;  %v4212_v51 = vand.u32 8388607, %v15430_v4 }
 0x7cb   :  { %v4148_v56 = vsel %vm4134_vm4, %v4145_v46, %v4147_v31  ;;  %v12495_v36 = vmul.u32.u64.low %v12438_v61, %v4144_v35  ;;  %v12496_v0 = vmul.u32.u64.high %v12438_v61, %v4144_v35, %v12495_v36  ;;  %v4217_v48 = vsel %vm4216_vm7, %v12442_v49, 0 }
 0x7cc   :  { %v12500_v25 = vmul.u32.u64.low %v12438_v61, %v4148_v56  ;;  %v12501_v18 = vmul.u32.u64.high %v12438_v61, %v4148_v56, %v12500_v25  ;;  %v12506_v42 = vshrl.u32 %v4058_v52, 30  ;;  %v4140_v15 = vsel %vm4134_vm4, %v4137_v29, %v4139_v39 }
 0x7cd   :  { %v4219_v7 = vand.u32 31, %v4217_v48  ;;  %v4312_v19 = vand.u32 2139095040, %v12430_v12  ;;  %v4159_v21 = vadd.s32 1, %v12496_v0  ;;  %v4156_v32 = vmul.u32 %v12438_v61, %v4140_v15 }
 0x7ce   :  { %v4060_v17 = vshll.u32 %v12506_v42, 30  ;;  %vm4158_vm9 = vc.u32 %v12501_v18, %v12495_v36  ;;  %v4213_v13 = vor.u32 8388608, %v4212_v51  ;;  %v4218_v33 = vshrl.u32 %v4217_v48, 5 }
 0x7cf   :  { %v4220_v16 = vsub.s32 32, %v4219_v7  ;;  %v4160_v54 = vsel %vm4158_vm9, %v4159_v21, %v12496_v0  ;;  %v4313_v1 = vshrl.u32 %v4312_v19, 23  ;;  %v4222_v14 = vshll.u32 %v15510_v22, %v4219_v7 }
 0x7d0   :  { %v12516_v49 = vsub.s32 %v4057_v11, %v4060_v17  ;;  %v4161_v6 = vadd.s32 %v4160_v54, %v4156_v32  ;;  %v4225_v61 = vshll.u32 %v15479_v34, %v4219_v7  ;;  %v4228_v53 = vshll.u32 %v15478_v50, %v4219_v7 }
 0x7d1   :  { %v4223_v8 = vshrl.u32 %v15479_v34, %v4220_v16  ;;  %v4226_v26 = vshrl.u32 %v15478_v50, %v4220_v16  ;;  %v4229_v41 = vshrl.u32 %v15480_v2, %v4220_v16  ;;  %v4253_v63 = vshll.u32 %v4213_v13, 8 }
 0x7d2   :  { %v4063_v44 = vsub.s32 0, %v12516_v49  ;;  %v4162_v40 = vadd.s32 536870912, %v4161_v6  ;;  %v4231_v10 = vshll.u32 %v15480_v2, %v4219_v7  ;;  %v4232_v23 = vshrl.u32 %v15488_v62, %v4220_v16 }
 0x7d3   :  { %v4224_v60 = vor.u32 %v4223_v8, %v4222_v14  ;;  %v4227_v27 = vor.u32 %v4226_v26, %v4225_v61  ;;  %v4230_v11 = vor.u32 %v4229_v41, %v4228_v53  ;;  %v4234_v29 = vshll.u32 %v15488_v62, %v4219_v7 }
 0x7d4   :  { %v8465_v28 = vmin.u32 %v4063_v44, %v12516_v49  ;;  %v12529_v46 = vshrl.u32 %v4162_v40, 30  ;;  %v4235_v5 = vshrl.u32 %v15505_v9, %v4220_v16  ;;  %v4233_v39 = vor.u32 %v4232_v23, %v4231_v10 }
 0x7d5   :  { %vm4237_vm14 = vcmp.lt.s32.totalorder %v4218_v33, 1  ;;  %v8476_v35 = vadd.s32 4294967169, %v4313_v1  ;;  %vm4238_vm11 = vcmp.lt.s32.totalorder %v4218_v33, 2  ;;  %vm4240_vm15 = vcmp.lt.s32.totalorder %v4218_v33, 4 }
 0x7d6   :  { %v4065_v37 = vclz %v8465_v28  ;;  %v4164_v31 = vshll.u32 %v12529_v46, 30  ;;  %v4236_v52 = vor.u32 %v4235_v5, %v4234_v29  ;;  %vm4239_vm0 = vcmp.lt.s32.totalorder %v4218_v33, 3 }
 0x7d7   :  { %v4245_v0 = vsel %vm4237_vm14, %v4224_v60, %v4227_v27  ;;  %v4246_v25 = vsel %vm4240_vm15, %v4233_v39, 920167782  ;;  %v4242_v48 = vsel %vm4240_vm15, %v4230_v11, 2102212464  ;;  %v4249_v7 = vsel %vm4237_vm14, %v4227_v27, %v4230_v11 }
 0x7d8   :  { %v8466_v56 = vadd.s32 4294967294, %v4065_v37  ;;  %v12535_v51 = vsub.s32 %v4161_v6, %v4164_v31  ;;  %v4247_v15 = vsel %vm4239_vm0, %v4230_v11, %v4246_v25  ;;  %v4221_v19 = vshrl.u32 %v15510_v22, %v4220_v16  ;;  %v3889_v25 = vpop.permute.xlu0 %3888 }
 0x7d9   :  { %v4248_v17 = vsel %vm4238_vm11, %v4245_v0, %v4247_v15  ;;  %v4250_v21 = vsel %vm4240_vm15, %v4236_v52, 1326507024  ;;  %v4319_v1 = vadd.s32 1, %v8476_v35  ;;  %v4243_v8 = vsel %vm4239_vm0, %v4227_v27, %v4242_v48 }
 0x7da   :  { %vm8467_vm1 = vcmp.lt.s32.totalorder %v8466_v56, 0  ;;  %v4167_v13 = vsub.s32 0, %v12535_v51  ;;  %v4251_v54 = vsel %vm4239_vm0, %v4233_v39, %v4250_v21  ;;  %v4241_v6 = vsel %vm4237_vm14, %v4221_v19, %v4224_v60 }
 0x7db   :  { %v4068_v32 = vsel %vm8467_vm1, 0, %v8466_v56  ;;  %v4252_v26 = vsel %vm4238_vm11, %v4249_v7, %v4251_v54  ;;  %vm4320_vm2 = vcmp.gt.s32.totalorder %v4319_v1, 0  ;;  %v15429_v28 = vand.u32 2147483647, %v12430_v12 }
 0x7dc   :  { %v4073_v14 = vsub.s32 4294967266, %v4068_v32  ;;  %v8469_v44 = vmin.u32 %v4167_v13, %v12535_v51  ;;  %v12547_v61 = vmul.u32.u64.low %v4253_v63, %v4252_v26  ;;  %v12548_v16 = vmul.u32.u64.high %v4253_v63, %v4252_v26, %v12547_v61 }
 0x7dd   :  { %v12550_v41 = vmul.u32.u64.low %v4253_v63, %v4248_v17  ;;  %v12551_v40 = vmul.u32.u64.high %v4253_v63, %v4248_v17, %v12550_v41  ;;  %v4321_v10 = vsel %vm4320_vm2, %v4319_v1, 0  ;;  %v4069_v23 = vsub.s32 32, %v4068_v32 }
 0x7de   :  { %v4169_v53 = vclz %v8469_v44  ;;  %v4074_v60 = vadd.s32 127, %v4073_v14  ;;  %v4244_v27 = vsel %vm4238_vm11, %v4241_v6, %v4243_v8  ;;  %v4323_v11 = vand.u32 31, %v4321_v10 }
 0x7df   :  { %vm4262_vm3 = vc.u32 %v12548_v16, %v12550_v41  ;;  %v4053_v5 = vadd.s32 %v12469_v3, %v12466_v55  ;;  %v4263_v37 = vadd.s32 1, %v12551_v40  ;;  %v4260_v39 = vmul.u32 %v4253_v63, %v4244_v27 }
 0x7e0   :  { %v8470_v29 = vadd.s32 4294967294, %v4169_v53  ;;  %v4316_v35 = vand.u32 8388607, %v15429_v28  ;;  %v4075_v52 = vshll.u32 %v4074_v60, 23  ;;  %v4324_v56 = vsub.s32 32, %v4323_v11 }
 0x7e1   :  { %v4071_v31 = vshrl.u32 %v4053_v5, %v4069_v23  ;;  %v4264_v33 = vsel %vm4262_vm3, %v4263_v37, %v12551_v40  ;;  %v4070_v48 = vshll.u32 %v12516_v49, %v4068_v32  ;;  %v12566_v55 = vadd.f32 %v12424_v45, %v3889_v25 }
 0x7e2   :  { %vm8471_vm5 = vcmp.lt.s32.totalorder %v8470_v29, 0  ;;  %v4265_v0 = vadd.s32 %v4264_v33, %v4260_v39  ;;  %v4317_v19 = vor.u32 8388608, %v4316_v35  ;;  %v4076_v63 = vor.u32 4788187, %v4075_v52 }
 0x7e3   :  { %v4172_v15 = vsel %vm8471_vm5, 0, %v8470_v29  ;;  %v4072_v3 = vor.u32 %v4071_v31, %v4070_v48  ;;  %v4327_v17 = vshrl.u32 %v15479_v34, %v4324_v56  ;;  %v4330_v21 = vshrl.u32 %v15478_v50, %v4324_v56 }
 0x7e4   :  { %v4266_v7 = vadd.s32 536870912, %v4265_v0  ;;  %v4177_v13 = vsub.s32 4294967266, %v4172_v15  ;;  %v4333_v1 = vshrl.u32 %v15480_v2, %v4324_v56  ;;  %v4336_v14 = vshrl.u32 %v15488_v62, %v4324_v56 }
 0x7e5   :  { %v4326_v49 = vshll.u32 %v15510_v22, %v4323_v11  ;;  %v4329_v32 = vshll.u32 %v15479_v34, %v4323_v11  ;;  %v4335_v45 = vshll.u32 %v15480_v2, %v4323_v11  ;;  %v4339_v6 = vshrl.u32 %v15505_v9, %v4324_v56 }
 0x7e6   :  { %v12570_v54 = vshrl.u32 %v4266_v7, 30  ;;  %v4322_v26 = vshrl.u32 %v4321_v10, 5  ;;  %v4332_v44 = vshll.u32 %v15478_v50, %v4323_v11  ;;  %v12581_v61 = vadd.f32 %v12426_v58, %v3889_v25 }
 0x7e7   :  { %v4328_v40 = vor.u32 %v4327_v17, %v4326_v49  ;;  %v4331_v53 = vor.u32 %v4330_v21, %v4329_v32  ;;  %v4337_v23 = vor.u32 %v4336_v14, %v4335_v45  ;;  %v4338_v60 = vshll.u32 %v15488_v62, %v4323_v11 }
 0x7e8   :  { %v4268_v8 = vshll.u32 %v12570_v54, 30  ;;  %v4157_v27 = vadd.s32 %v12495_v36, %v12501_v18  ;;  %v4178_v29 = vadd.s32 127, %v4177_v13  ;;  %v4334_v37 = vor.u32 %v4333_v1, %v4332_v44 }
 0x7e9   :  { %v4077_v39 = vand.u32 2147483647, %v4076_v63  ;;  %v4079_v35 = vcvt.s32.f32 %v4072_v3  ;;  %v4340_v10 = vor.u32 %v4339_v6, %v4338_v60  ;;  %v4357_v31 = vshll.u32 %v4317_v19, 8 }
 0x7ea   :  { %v12586_v5 = vsub.s32 %v4265_v0, %v4268_v8  ;;  %v4173_v52 = vsub.s32 32, %v4172_v15  ;;  %vm4341_vm8 = vcmp.lt.s32.totalorder %v4322_v26, 1  ;;  %vm4344_vm10 = vcmp.lt.s32.totalorder %v4322_v26, 4 }
 0x7eb   :  { %v4325_v33 = vshrl.u32 %v15510_v22, %v4324_v56  ;;  %vm4343_vm4 = vcmp.lt.s32.totalorder %v4322_v26, 3  ;;  %v4349_v11 = vsel %vm4341_vm8, %v4328_v40, %v4331_v53  ;;  %v4350_v25 = vsel %vm4344_vm10, %v4337_v23, 920167782 }
 0x7ec   :  { %v4271_v58 = vsub.s32 0, %v12586_v5  ;;  %v4179_v36 = vshll.u32 %v4178_v29, 23  ;;  %vm4342_vm13 = vcmp.lt.s32.totalorder %v4322_v26, 2  ;;  %v4346_v18 = vsel %vm4344_vm10, %v4334_v37, 2102212464 }
 0x7ed   :  { %v4351_v0 = vsel %vm4343_vm4, %v4334_v37, %v4350_v25  ;;  %v4353_v19 = vsel %vm4341_vm8, %v4331_v53, %v4334_v37  ;;  %v4354_v3 = vsel %vm4344_vm10, %v4340_v10, 1326507024  ;;  %v4174_v63 = vshll.u32 %v12535_v51, %v4172_v15 }
 0x7ee   :  { %v8473_v48 = vmin.u32 %v4271_v58, %v12586_v5  ;;  %v4352_v7 = vsel %vm4342_vm13, %v4349_v11, %v4351_v0  ;;  %v4175_v17 = vshrl.u32 %v4157_v27, %v4173_v52  ;;  %v4345_v56 = vsel %vm4341_vm8, %v4325_v33, %v4328_v40 }
 0x7ef   :  { %v4355_v21 = vsel %vm4343_vm4, %v4337_v23, %v4354_v3  ;;  %v4347_v13 = vsel %vm4343_vm4, %v4331_v53, %v4346_v18  ;;  %v12597_v14 = vmul.u32.u64.low %v4357_v31, %v4352_v7  ;;  %v12598_v49 = vmul.u32.u64.high %v4357_v31, %v4352_v7, %v12597_v14 }
 0x7f0   :  { %v4356_v1 = vsel %vm4342_vm13, %v4353_v19, %v4355_v21  ;;  %v4080_v32 = vmul.f32 %v4079_v35, %v4077_v39  ;;  %v4180_v45 = vor.u32 4788187, %v4179_v36  ;;  %v4273_v44 = vclz %v8473_v48  ;;  %v12621_v48 = vpop.permute.xlu1 %3893 }
 0x7f1   :  { %v12601_v6 = vmul.u32.u64.low %v4357_v31, %v4356_v1  ;;  %v12602_v8 = vmul.u32.u64.high %v4357_v31, %v4356_v1, %v12601_v6  ;;  %v4416_v60 = vand.u32 2139095040, %v12566_v55  ;;  %v4176_v51 = vor.u32 %v4175_v17, %v4174_v63 }
 0x7f2   :  { %v4348_v15 = vsel %vm4342_vm13, %v4345_v56, %v4347_v13  ;;  %v4520_v40 = vand.u32 2139095040, %v12581_v61  ;;  %v4367_v53 = vadd.s32 1, %v12598_v49  ;;  %v4081_v27 = vxor.u32 2147483648, %v4080_v32 }
 0x7f3   :  { %v4417_v23 = vshrl.u32 %v4416_v60, 23  ;;  %v4083_v29 = vsub.s32 4, %v12506_v42  ;;  %v4181_v37 = vand.u32 2147483647, %v4180_v45  ;;  %v15427_v39 = vand.u32 2147483647, %v12566_v55 }
 0x7f4   :  { %v8474_v35 = vadd.s32 4294967294, %v4273_v44  ;;  %v4364_v10 = vmul.u32 %v4357_v31, %v4348_v15  ;;  %vm4366_vm6 = vc.u32 %v12602_v8, %v12597_v14  ;;  %v4183_v58 = vcvt.s32.f32 %v4176_v51 }
 0x7f5   :  { %v8480_v52 = vadd.s32 4294967169, %v4417_v23  ;;  %v4368_v26 = vsel %vm4366_vm6, %v4367_v53, %v12598_v49  ;;  %v4521_v33 = vshrl.u32 %v4520_v40, 23  ;;  %vm3999_vm7 = vcmp.lt.s32.totalorder %v12409_v24, 0 }
 0x7f6   :  { %v4369_v11 = vadd.s32 %v4368_v26, %v4364_v10  ;;  %v4082_v36 = vsel %vm3999_vm7, %v4081_v27, %v4080_v32  ;;  %v12615_v18 = vsel %vm3999_vm7, %v4083_v29, %v12506_v42  ;;  %v12617_v0 = vmul.f32 %v4183_v58, %v4181_v37 }
 0x7f7   :  { %v4423_v25 = vadd.s32 1, %v8480_v52  ;;  %v4420_v31 = vand.u32 8388607, %v15427_v39  ;;  %vm8475_vm9 = vcmp.lt.s32.totalorder %v8474_v35, 0  ;;  %v8484_v19 = vadd.s32 4294967169, %v4521_v33 }
 0x7f8   :  { %v4370_v7 = vadd.s32 536870912, %v4369_v11  ;;  %vm12625_vm11 = vcmp.le.f32.partialorder %v3997_v20, 0.7853982  ;;  %v12631_v42 = vadd.f32 %v12428_v30, %v12621_v48  ;;  %v12638_v56 = vadd.s32 %v12550_v41, %v12548_v16 }
 0x7f9   :  { %vm4424_vm14 = vcmp.gt.s32.totalorder %v4423_v25, 0  ;;  %v12645_v20 = vsel %vm12625_vm11, %v12409_v24, %v4082_v36  ;;  %v4185_v1 = vxor.u32 2147483648, %v12617_v0  ;;  %v12648_v30 = vsel %vm8475_vm9, 0, %v8474_v35 }
 0x7fa   :  { %v4425_v63 = vsel %vm4424_vm14, %v4423_v25, 0  ;;  %v12640_v21 = vshrl.u32 %v4370_v7, 30  ;;  %v4421_v45 = vor.u32 8388608, %v4420_v31  ;;  %v4527_v16 = vadd.s32 1, %v8484_v19 }
 0x7fb   :  { %v4427_v13 = vand.u32 31, %v4425_v63  ;;  %v4426_v41 = vshrl.u32 %v4425_v63, 5  ;;  %v15428_v26 = vand.u32 2147483647, %v12581_v61  ;;  %vm4103_vm15 = vcmp.lt.s32.totalorder %v12411_v57, 0 }
 0x7fc   :  { %v4372_v32 = vshll.u32 %v12640_v21, 30  ;;  %v4281_v33 = vsub.s32 4294967266, %v12648_v30  ;;  %v4461_v7 = vshll.u32 %v4421_v45, 8  ;;  %vm4528_vm1 = vcmp.gt.s32.totalorder %v4527_v16, 0 }
 0x7fd   :  { %v4428_v6 = vsub.s32 32, %v4427_v13  ;;  %v4430_v44 = vshll.u32 %v15510_v22, %v4427_v13  ;;  %v4433_v60 = vshll.u32 %v15479_v34, %v4427_v13  ;;  %v4436_v51 = vshll.u32 %v15478_v50, %v4427_v13 }
 0x7fe   :  { %v12655_v15 = vsub.s32 %v4369_v11, %v4372_v32  ;;  %v4439_v23 = vshll.u32 %v15480_v2, %v4427_v13  ;;  %v4442_v37 = vshll.u32 %v15488_v62, %v4427_v13  ;;  %vm4445_vm0 = vcmp.lt.s32.totalorder %v4426_v41, 1 }
 0x7ff   :  { %v4431_v40 = vshrl.u32 %v15479_v34, %v4428_v6  ;;  %v4434_v53 = vshrl.u32 %v15478_v50, %v4428_v6  ;;  %v4437_v27 = vshrl.u32 %v15480_v2, %v4428_v6  ;;  %v4440_v29 = vshrl.u32 %v15488_v62, %v4428_v6 }
 0x800   :  { %v4443_v35 = vshrl.u32 %v15505_v9, %v4428_v6  ;;  %v4375_v10 = vsub.s32 0, %v12655_v15  ;;  %v4429_v19 = vshrl.u32 %v15510_v22, %v4428_v6  ;;  %vm4446_vm2 = vcmp.lt.s32.totalorder %v4426_v41, 2 }
 0x801   :  { %v4432_v52 = vor.u32 %v4431_v40, %v4430_v44  ;;  %v4435_v58 = vor.u32 %v4434_v53, %v4433_v60  ;;  %v4438_v11 = vor.u32 %v4437_v27, %v4436_v51  ;;  %v4441_v25 = vor.u32 %v4440_v29, %v4439_v23 }
 0x802   :  { %v4444_v36 = vor.u32 %v4443_v35, %v4442_v37  ;;  %v8477_v31 = vmin.u32 %v4375_v10, %v12655_v15  ;;  %vm4448_vm3 = vcmp.lt.s32.totalorder %v4426_v41, 4  ;;  %vm4447_vm5 = vcmp.lt.s32.totalorder %v4426_v41, 3 }
 0x803   :  { %v4453_v63 = vsel %vm4445_vm0, %v4432_v52, %v4435_v58  ;;  %v4450_v32 = vsel %vm4448_vm3, %v4438_v11, 2102212464  ;;  %v4454_v44 = vsel %vm4448_vm3, %v4441_v25, 920167782  ;;  %v4449_v60 = vsel %vm4445_vm0, %v4429_v19, %v4432_v52 }
 0x804   :  { %v4377_v13 = vclz %v8477_v31  ;;  %v4455_v40 = vsel %vm4447_vm5, %v4438_v11, %v4454_v44  ;;  %v4457_v53 = vsel %vm4445_vm0, %v4435_v58, %v4438_v11  ;;  %v4458_v51 = vsel %vm4448_vm3, %v4444_v36, 1326507024 }
 0x805   :  { %v4451_v27 = vsel %vm4447_vm5, %v4435_v58, %v4450_v32  ;;  %v4456_v29 = vsel %vm4446_vm2, %v4453_v63, %v4455_v40  ;;  %v4459_v37 = vsel %vm4447_vm5, %v4441_v25, %v4458_v51  ;;  %v4282_v45 = vadd.s32 127, %v4281_v33 }
 0x806   :  { %v8478_v23 = vadd.s32 4294967294, %v4377_v13  ;;  %v4460_v35 = vsel %vm4446_vm2, %v4457_v53, %v4459_v37  ;;  %v12672_v6 = vmul.u32.u64.low %v4461_v7, %v4456_v29  ;;  %v12673_v10 = vmul.u32.u64.high %v4461_v7, %v4456_v29, %v12672_v6 }
 0x807   :  { %v12676_v31 = vmul.u32.u64.low %v4461_v7, %v4460_v35  ;;  %v12677_v39 = vmul.u32.u64.high %v4461_v7, %v4460_v35, %v12676_v31  ;;  %v4529_v52 = vsel %vm4528_vm1, %v4527_v16, 0  ;;  %v4452_v58 = vsel %vm4446_vm2, %v4449_v60, %v4451_v27 }
 0x808   :  { %vm8479_vm8 = vcmp.lt.s32.totalorder %v8478_v23, 0  ;;  %v4524_v25 = vand.u32 8388607, %v15428_v26  ;;  %v4531_v33 = vand.u32 31, %v4529_v52  ;;  %v12688_v36 = vsel %vm4103_vm15, %v4185_v1, %v12617_v0 }
 0x809   :  { %v12680_v11 = vsel %vm8479_vm8, 0, %v8478_v23  ;;  %v4277_v19 = vsub.s32 32, %v12648_v30  ;;  %v4624_v13 = vand.u32 2139095040, %v12631_v42  ;;  %v4471_v32 = vadd.s32 1, %v12673_v10 }
 0x80a   :  { %v4385_v41 = vsub.s32 4294967266, %v12680_v11  ;;  %v4532_v44 = vsub.s32 32, %v4531_v33  ;;  %v4283_v60 = vshll.u32 %v4282_v45, 23  ;;  %v4365_v40 = vadd.s32 %v12597_v14, %v12602_v8 }
 0x80b   :  { %v4468_v0 = vmul.u32 %v4461_v7, %v4452_v58  ;;  %vm4470_vm10 = vc.u32 %v12677_v39, %v12672_v6  ;;  %v4525_v53 = vor.u32 8388608, %v4524_v25  ;;  %v4381_v27 = vsub.s32 32, %v12680_v11 }
 0x80c   :  { %v4472_v1 = vsel %vm4470_vm10, %v4471_v32, %v12673_v10  ;;  %v4535_v51 = vshrl.u32 %v15479_v34, %v4532_v44  ;;  %v4538_v23 = vshrl.u32 %v15478_v50, %v4532_v44  ;;  %v4530_v37 = vshrl.u32 %v4529_v52, 5 }
 0x80d   :  { %v4473_v29 = vadd.s32 %v4472_v1, %v4468_v0  ;;  %v4625_v35 = vshrl.u32 %v4624_v13, 23  ;;  %v4386_v45 = vadd.s32 127, %v4385_v41  ;;  %v4534_v31 = vshll.u32 %v15510_v22, %v4531_v33 }
 0x80e   :  { %v4537_v14 = vshll.u32 %v15479_v34, %v4531_v33  ;;  %v4541_v8 = vshrl.u32 %v15480_v2, %v4532_v44  ;;  %v4540_v10 = vshll.u32 %v15478_v50, %v4531_v33  ;;  %v4543_v58 = vshll.u32 %v15480_v2, %v4531_v33 }
 0x80f   :  { %v4474_v7 = vadd.s32 536870912, %v4473_v29  ;;  %v4544_v25 = vshrl.u32 %v15488_v62, %v4532_v44  ;;  %vm12713_vm4 = vcmp.le.f32.partialorder %v4101_v47, 0.7853982  ;;  %v4536_v52 = vor.u32 %v4535_v51, %v4534_v31 }
 0x810   :  { %v4539_v13 = vor.u32 %v4538_v23, %v4537_v14  ;;  %v4546_v41 = vshll.u32 %v15488_v62, %v4531_v33  ;;  %v4547_v0 = vshrl.u32 %v15505_v9, %v4532_v44  ;;  %v4279_v1 = vshrl.u32 %v12638_v56, %v4277_v19 }
 0x811   :  { %v12720_v26 = vshrl.u32 %v4474_v7, 30  ;;  %v4542_v17 = vor.u32 %v4541_v8, %v4540_v10  ;;  %v4545_v28 = vor.u32 %v4544_v25, %v4543_v58  ;;  %v4284_v4 = vor.u32 4788187, %v4283_v60 }
 0x812   :  { %v4548_v49 = vor.u32 %v4547_v0, %v4546_v41  ;;  %v4565_v63 = vshll.u32 %v4525_v53, 8  ;;  %v8488_v16 = vadd.s32 4294967169, %v4625_v35  ;;  %v4387_v47 = vshll.u32 %v4386_v45, 23 }
 0x813   :  { %v4476_v59 = vshll.u32 %v12720_v26, 30  ;;  %vm4549_vm13 = vcmp.lt.s32.totalorder %v4530_v37, 1  ;;  %vm4552_vm6 = vcmp.lt.s32.totalorder %v4530_v37, 4  ;;  %vm4207_vm7 = vcmp.lt.s32.totalorder %v12417_v38, 0 }
 0x814   :  { %v4382_v33 = vshll.u32 %v12655_v15, %v12680_v11  ;;  %v4383_v51 = vshrl.u32 %v4365_v40, %v4381_v27  ;;  %v4557_v56 = vsel %vm4549_vm13, %v4536_v52, %v4539_v13  ;;  %v4558_v19 = vsel %vm4552_vm6, %v4545_v28, 920167782 }
 0x815   :  { %v12727_v23 = vsub.s32 %v4473_v29, %v4476_v59  ;;  %v4533_v60 = vshrl.u32 %v15510_v22, %v4532_v44  ;;  %vm4551_vm9 = vcmp.lt.s32.totalorder %v4530_v37, 3  ;;  %v4554_v53 = vsel %vm4552_vm6, %v4542_v17, 2102212464 }
 0x816   :  { %vm4550_vm14 = vcmp.lt.s32.totalorder %v4530_v37, 2  ;;  %v4559_v35 = vsel %vm4551_vm9, %v4542_v17, %v4558_v19  ;;  %v4561_v45 = vsel %vm4549_vm13, %v4539_v13, %v4542_v17  ;;  %v4562_v31 = vsel %vm4552_vm6, %v4548_v49, 1326507024 }
 0x817   :  { %v4388_v14 = vor.u32 4788187, %v4387_v47  ;;  %v4479_v8 = vsub.s32 0, %v12727_v23  ;;  %v4553_v15 = vsel %vm4549_vm13, %v4533_v60, %v4536_v52  ;;  %v4560_v11 = vsel %vm4550_vm14, %v4557_v56, %v4559_v35 }
 0x818   :  { %v4555_v40 = vsel %vm4551_vm9, %v4539_v13, %v4554_v53  ;;  %v4563_v27 = vsel %vm4551_vm9, %v4545_v28, %v4562_v31  ;;  %v12734_v59 = vmul.u32.u64.low %v4565_v63, %v4560_v11  ;;  %v12735_v29 = vmul.u32.u64.high %v4565_v63, %v4560_v11, %v12734_v59 }
 0x819   :  { %v4189_v44 = vsel %vm12713_vm4, %v12411_v57, %v12688_v36  ;;  %v8481_v17 = vmin.u32 %v4479_v8, %v12727_v23  ;;  %v4564_v49 = vsel %vm4550_vm14, %v4561_v45, %v4563_v27  ;;  %v4631_v7 = vadd.s32 1, %v8488_v16 }
 0x81a   :  { %v15573_v10 = vshll.u32 %v12586_v5, %v12648_v30  ;;  %v4384_v25 = vor.u32 %v4383_v51, %v4382_v33  ;;  %v12747_v28 = vmul.u32.u64.low %v4565_v63, %v4564_v49  ;;  %v12748_v52 = vmul.u32.u64.high %v4565_v63, %v4564_v49, %v12747_v28 }
 0x81b   :  { %v4285_v13 = vand.u32 2147483647, %v4284_v4  ;;  %v4481_v41 = vclz %v8481_v17  ;;  %v4556_v0 = vsel %vm4550_vm14, %v4553_v15, %v4555_v40  ;;  %vm4632_vm0 = vcmp.gt.s32.totalorder %v4631_v7, 0 }
 0x81c   :  { %v4280_v58 = vor.u32 %v4279_v1, %v15573_v10  ;;  %v4389_v47 = vand.u32 2147483647, %v4388_v14  ;;  %v4575_v36 = vadd.s32 1, %v12735_v29  ;;  %v15574_v56 = vand.u32 2147483647, %v12631_v42 }
 0x81d   :  { %v4633_v16 = vsel %vm4632_vm0, %v4631_v7, 0  ;;  %9428 = vcosq.f32 %v4189_v44  ;;  %v15575_v5 = vsub.s32 4, %v12570_v54  ;;  %v8482_v4 = vadd.s32 4294967294, %v4481_v41 }
 0x81e   :  { %v4628_v19 = vand.u32 8388607, %v15574_v56  ;;  %v4635_v1 = vand.u32 31, %v4633_v16  ;;  %v4287_v37 = vcvt.s32.f32 %v4280_v58  ;;  %v4391_v33 = vcvt.s32.f32 %v4384_v25 }
 0x81f   :  { %v12759_v30 = vsel %vm4207_vm7, %v15575_v5, %v12570_v54  ;;  %v4572_v51 = vmul.u32 %v4565_v63, %v4556_v0  ;;  %vm4574_vm1 = vc.u32 %v12748_v52, %v12734_v59  ;;  %9430 = vsinq.f32 %v4189_v44 }
 0x820   :  { %vm8483_vm2 = vcmp.lt.s32.totalorder %v8482_v4, 0  ;;  %v4576_v60 = vsel %vm4574_vm1, %v4575_v36, %v12735_v29  ;;  %v4636_v53 = vsub.s32 32, %v4635_v1  ;;  %v4288_v35 = vmul.f32 %v4287_v37, %v4285_v13 }
 0x821   :  { %v12764_v45 = vmul.f32 %v4391_v33, %v4389_v47  ;;  %v4577_v31 = vadd.s32 %v4576_v60, %v4572_v51  ;;  %v4629_v14 = vor.u32 8388608, %v4628_v19  ;;  %v12766_v54 = vsel %vm8483_vm2, 0, %v8482_v4 }
 0x822   :  { %v12768_v8 = vshrl.u32 %v4633_v16, 5  ;;  %v4644_v15 = vshll.u32 %v15478_v50, %v4635_v1  ;;  %v12773_v63 = vadd.f32 %v12432_v43, %v12621_v48  ;;  %v4639_v40 = vshrl.u32 %v15479_v34, %v4636_v53 }
 0x823   :  { %v4578_v11 = vadd.s32 536870912, %v4577_v31  ;;  %v4642_v27 = vshrl.u32 %v15478_v50, %v4636_v53  ;;  %v4645_v29 = vshrl.u32 %v15480_v2, %v4636_v53  ;;  %v4638_v44 = vshll.u32 %v15510_v22, %v4635_v1 }
 0x824   :  { %v4641_v17 = vshll.u32 %v15479_v34, %v4635_v1  ;;  %v4647_v49 = vshll.u32 %v15480_v2, %v4635_v1  ;;  %v4648_v7 = vshrl.u32 %v15488_v62, %v4636_v53  ;;  %v4289_v10 = vxor.u32 2147483648, %v4288_v35 }
 0x825   :  { %v4393_v58 = vxor.u32 2147483648, %v12764_v45  ;;  %v12783_v43 = vshrl.u32 %v4578_v11, 30  ;;  %v4646_v48 = vor.u32 %v4645_v29, %v4644_v15  ;;  %v4489_v25 = vsub.s32 4294967266, %v12766_v54 }
 0x826   :  { %v4640_v28 = vor.u32 %v4639_v40, %v4638_v44  ;;  %v4643_v13 = vor.u32 %v4642_v27, %v4641_v17  ;;  %v4649_v41 = vor.u32 %v4648_v7, %v4647_v49  ;;  %v15576_v0 = vand.u32 2147483647, %v12417_v38 }
 0x827   :  { %v4580_v36 = vshll.u32 %v12783_v43, 30  ;;  %v4650_v56 = vshll.u32 %v15488_v62, %v4635_v1  ;;  %v4651_v19 = vshrl.u32 %v15505_v9, %v4636_v53  ;;  %v4669_v16 = vshll.u32 %v4629_v14, 8  ;;  %v12795_v5 = vpop.eup %9428 }
 0x828   :  { %vm12788_vm3 = vcmp.le.f32.partialorder %v15576_v0, 0.7853982  ;;  %vm4311_vm5 = vcmp.lt.s32.totalorder %v12430_v12, 0  ;;  %v4485_v4 = vsub.s32 32, %v12766_v54  ;;  %v4637_v37 = vshrl.u32 %v15510_v22, %v4636_v53 }
 0x829   :  { %vm4656_vm8 = vcmp.lt.s32.totalorder %v12768_v8, 4  ;;  %v4728_v33 = vand.u32 2139095040, %v12773_v63  ;;  %v12802_v51 = vsub.s32 %v4577_v31, %v4580_v36  ;;  %v4652_v60 = vor.u32 %v4651_v19, %v4650_v56  ;;  %v12807_v14 = vpop.eup %9430 }
 0x82a   :  { %vm4653_vm10 = vcmp.lt.s32.totalorder %v12768_v8, 1  ;;  %v4658_v1 = vsel %vm4656_vm8, %v4646_v48, 2102212464  ;;  %v4490_v15 = vadd.s32 127, %v4489_v25  ;;  %vm4655_vm13 = vcmp.lt.s32.totalorder %v12768_v8, 3 }
 0x82b   :  { %v4661_v11 = vsel %vm4653_vm10, %v4640_v28, %v4643_v13  ;;  %v4662_v53 = vsel %vm4656_vm8, %v4649_v41, 920167782  ;;  %v15579_v40 = vand.u32 2147483647, %v12430_v12  ;;  %v4583_v27 = vsub.s32 0, %v12802_v51 }
 0x82c   :  { %vm4654_vm9 = vcmp.lt.s32.totalorder %v12768_v8, 2  ;;  %v4663_v29 = vsel %vm4655_vm13, %v4646_v48, %v4662_v53  ;;  %v4665_v44 = vsel %vm4653_vm10, %v4643_v13, %v4646_v48  ;;  %v4657_v17 = vsel %vm4653_vm10, %v4637_v37, %v4640_v28 }
 0x82d   :  { %vm12814_vm6 = vcmp.le.f32.partialorder %v15579_v40, 0.7853982  ;;  %v4659_v49 = vsel %vm4655_vm13, %v4643_v13, %v4658_v1  ;;  %v4664_v7 = vsel %vm4654_vm9, %v4661_v11, %v4663_v29  ;;  %v4666_v25 = vsel %vm4656_vm8, %v4652_v60, 1326507024 }
 0x82e   :  { %v8485_v0 = vmin.u32 %v4583_v27, %v12802_v51  ;;  %v4667_v36 = vsel %vm4655_vm13, %v4649_v41, %v4666_v25  ;;  %v12825_v56 = vmul.u32.u64.low %v4669_v16, %v4664_v7  ;;  %v12826_v19 = vmul.u32.u64.high %v4669_v16, %v4664_v7, %v12825_v56 }
 0x82f   :  { %v15582_v40 = vsel %vm12625_vm11, 0, %v12615_v18  ;;  %v4290_v48 = vsel %vm4207_vm7, %v4289_v10, %v4288_v35  ;;  %v4668_v28 = vsel %vm4654_vm9, %v4665_v44, %v4667_v36  ;;  %v4729_v13 = vshrl.u32 %v4728_v33, 23 }
 0x830   :  { %v12832_v53 = vadd.s32 3, %v15582_v40  ;;  %v4469_v37 = vadd.s32 %v12672_v6, %v12677_v39  ;;  %v4585_v41 = vclz %v8485_v0  ;;  %9432 = vcosq.f32 %v12645_v20 }
 0x831   :  { %v12840_v60 = vmul.u32.u64.low %v4669_v16, %v4668_v28  ;;  %v12841_v1 = vmul.u32.u64.high %v4669_v16, %v4668_v28, %v12840_v60  ;;  %v4294_v18 = vsel %vm12788_vm3, 0, %v12759_v30  ;;  %v4660_v3 = vsel %vm4654_vm9, %v4657_v17, %v4659_v49 }
 0x832   :  { %v8492_v35 = vadd.s32 4294967169, %v4729_v13  ;;  %v4394_v10 = vsel %vm4311_vm5, %v4393_v58, %v12764_v45  ;;  %v4487_v33 = vshrl.u32 %v4469_v37, %v4485_v4  ;;  %v4491_v39 = vshll.u32 %v4490_v15, 23 }
 0x833   :  { %v4679_v6 = vadd.s32 1, %v12826_v19  ;;  %v4293_v11 = vsel %vm12788_vm3, %v12417_v38, %v4290_v48  ;;  %v15432_v27 = vand.u32 2147483647, %v12773_v63  ;;  %v4187_v30 = vsub.s32 4, %v12529_v46 }
 0x834   :  { %v4735_v29 = vadd.s32 1, %v8492_v35  ;;  %v4486_v8 = vshll.u32 %v12727_v23, %v12766_v54  ;;  %v8486_v44 = vadd.s32 4294967294, %v4585_v41  ;;  %v4676_v17 = vmul.u32 %v4669_v16, %v4660_v3 }
 0x835   :  { %vm4678_vm11 = vc.u32 %v12841_v1, %v12825_v56  ;;  %9434 = vsinq.f32 %v12645_v20  ;;  %v4397_v45 = vsel %vm12814_vm6, %v12430_v12, %v4394_v10  ;;  %v12868_v4 = vor.u32 4788187, %v4491_v39 }
 0x836   :  { %v4680_v58 = vsel %vm4678_vm11, %v4679_v6, %v12826_v19  ;;  %vm4736_vm7 = vcmp.gt.s32.totalorder %v4735_v29, 0  ;;  %9436 = vcosq.f32 %v4293_v11  ;;  %v12866_v47 = vor.u32 %v4487_v33, %v4486_v8 }
 0x837   :  { %v4681_v15 = vadd.s32 %v4680_v58, %v4676_v17  ;;  %9438 = vsinq.f32 %v4293_v11  ;;  %v12870_v23 = vadd.s32 3, %v4294_v18  ;;  %v4732_v54 = vand.u32 8388607, %v15432_v27 }
 0x838   :  { %v4737_v20 = vsel %vm4736_vm7, %v4735_v29, 0  ;;  %9440 = vcosq.f32 %v4397_v45  ;;  %vm8487_vm14 = vcmp.lt.s32.totalorder %v8486_v44, 0  ;;  %v4188_v49 = vsel %vm4103_vm15, %v4187_v30, %v12529_v46 }
 0x839   :  { %v4682_v16 = vadd.s32 536870912, %v4681_v15  ;;  %9442 = vsinq.f32 %v4397_v45  ;;  %v12879_v7 = vadd.s32 %v12734_v59, %v12748_v52  ;;  %v4739_v25 = vand.u32 31, %v4737_v20 }
 0x83a   :  { %v12887_v28 = vpop.eup %9432  ;;  %v12889_v13 = vsel %vm8487_vm14, 0, %v8486_v44  ;;  %v4733_v46 = vor.u32 8388608, %v4732_v54  ;;  %v4190_v59 = vsel %vm12713_vm4, 0, %v4188_v49  ;;  %v12894_v52 = vadd.s32 %v12825_v56, %v12841_v1 }
 0x83b   :  { %v12884_v40 = vshrl.u32 %v4682_v16, 30  ;;  %v4740_v37 = vsub.s32 32, %v4739_v25  ;;  %v4742_v60 = vshll.u32 %v15510_v22, %v4739_v25  ;;  %v4395_v18 = vsub.s32 4, %v12640_v21 }
 0x83c   :  { %v4745_v35 = vshll.u32 %v15479_v34, %v4739_v25  ;;  %v4593_v32 = vsub.s32 4294967266, %v12889_v13  ;;  %v4738_v56 = vshrl.u32 %v4737_v20, 5  ;;  %v4748_v1 = vshll.u32 %v15478_v50, %v4739_v25 }
 0x83d   :  { %v4684_v41 = vshll.u32 %v12884_v40, 30  ;;  %v4743_v3 = vshrl.u32 %v15479_v34, %v4740_v37  ;;  %v4746_v10 = vshrl.u32 %v15478_v50, %v4740_v37  ;;  %v4749_v33 = vshrl.u32 %v15480_v2, %v4740_v37 }
 0x83e   :  { %v4589_v11 = vsub.s32 32, %v12889_v13  ;;  %v12910_v8 = vshll.u32 %v4733_v46, 8  ;;  %v4751_v58 = vshll.u32 %v15480_v2, %v4739_v25  ;;  %v4754_v20 = vshll.u32 %v15488_v62, %v4739_v25 }
 0x83f   :  { %v12904_v39 = vsub.s32 %v4681_v15, %v4684_v41  ;;  %v12907_v6 = vpop.eup %9434  ;;  %v4744_v29 = vor.u32 %v4743_v3, %v4742_v60  ;;  %v4747_v30 = vor.u32 %v4746_v10, %v4745_v35  ;;  %v4750_v45 = vor.u32 %v4749_v33, %v4748_v1 }
 0x840   :  { %v12912_v44 = vpop.eup %9436  ;;  %v4752_v15 = vshrl.u32 %v15488_v62, %v4740_v37  ;;  %v4755_v16 = vshrl.u32 %v15505_v9, %v4740_v37  ;;  %v4194_v49 = vadd.s32 3, %v4190_v59  ;;  %v4396_v46 = vsel %vm4311_vm5, %v4395_v18, %v12640_v21 }
 0x841   :  { %v4687_v17 = vsub.s32 0, %v12904_v39  ;;  %v12917_v54 = vpop.eup %9438  ;;  %v4594_v60 = vadd.s32 127, %v4593_v32  ;;  %vm4757_vm15 = vcmp.lt.s32.totalorder %v4738_v56, 1  ;;  %v4741_v33 = vshrl.u32 %v15510_v22, %v4740_v37 }
 0x842   :  { %v12924_v41 = vpop.eup %9440  ;;  %v4753_v35 = vor.u32 %v4752_v15, %v4751_v58  ;;  %v4756_v1 = vor.u32 %v4755_v16, %v4754_v20  ;;  %vm4760_vm4 = vcmp.lt.s32.totalorder %v4738_v56, 4  ;;  %v4765_v25 = vsel %vm4757_vm15, %v4744_v29, %v4747_v30 }
 0x843   :  { %v8489_v3 = vmin.u32 %v4687_v17, %v12904_v39  ;;  %v9443_v10 = vpop.eup %9442  ;;  %vm4759_vm0 = vcmp.lt.s32.totalorder %v4738_v56, 3  ;;  %v4762_v59 = vsel %vm4760_vm4, %v4750_v45, 2102212464  ;;  %vm4758_vm1 = vcmp.lt.s32.totalorder %v4738_v56, 2 }
 0x844   :  { %v4766_v19 = vsel %vm4760_vm4, %v4753_v35, 920167782  ;;  %v4769_v21 = vsel %vm4757_vm15, %v4747_v30, %v4750_v45  ;;  %v4195_v18 = vand.u32 3, %v4194_v49  ;;  %v4761_v32 = vsel %vm4757_vm15, %v4741_v33, %v4744_v29 }
 0x845   :  { %v4689_v27 = vclz %v8489_v3  ;;  %v4767_v36 = vsel %vm4759_vm0, %v4750_v45, %v4766_v19  ;;  %v4770_v58 = vsel %vm4760_vm4, %v4756_v1, 1326507024  ;;  %v4763_v15 = vsel %vm4759_vm0, %v4747_v30, %v4762_v59 }
 0x846   :  { %v4768_v17 = vsel %vm4758_vm1, %v4765_v25, %v4767_v36  ;;  %v4771_v0 = vsel %vm4759_vm0, %v4753_v35, %v4770_v58  ;;  %v4590_v16 = vshll.u32 %v12802_v51, %v12889_v13  ;;  %v4591_v29 = vshrl.u32 %v12879_v7, %v4589_v11 }
 0x847   :  { %v8490_v48 = vadd.s32 4294967294, %v4689_v27  ;;  %v12930_v37 = vmul.u32.u64.low %v12910_v8, %v4768_v17  ;;  %v12931_v20 = vmul.u32.u64.high %v12910_v8, %v4768_v17, %v12930_v37  ;;  %v4772_v19 = vsel %vm4758_vm1, %v4769_v21, %v4771_v0 }
 0x848   :  { %v4398_v27 = vsel %vm12814_vm6, 0, %v4396_v46  ;;  %v12941_v30 = vmul.u32.u64.low %v12910_v8, %v4772_v19  ;;  %v12942_v45 = vmul.u32.u64.high %v12910_v8, %v4772_v19, %v12941_v30  ;;  %vm4193_vm3 = vweird.f32 %v12411_v57 }
 0x849   :  { %vm8491_vm2 = vcmp.lt.s32.totalorder %v8490_v48, 0  ;;  %vm4401_vm5 = vweird.f32 %v12430_v12  ;;  %v4595_v49 = vshll.u32 %v4594_v60, 23  ;;  %v4764_v51 = vsel %vm4758_vm1, %v4761_v32, %v4763_v15 }
 0x84a   :  { %v4692_v36 = vsel %vm8491_vm2, 0, %v8490_v48  ;;  %v4406_v13 = vxor.u32 2147483648, %v9443_v10  ;;  %v4783_v0 = vadd.s32 1, %v12931_v20  ;;  %vm4197_vm8 = vcmp.eq.s32.totalorder %v4195_v18, 0 }
 0x84b   :  { %v4697_v3 = vsub.s32 4294967266, %v4692_v36  ;;  %vm4200_vm10 = vcmp.eq.s32.totalorder %v4195_v18, 2  ;;  %v4402_v31 = vadd.s32 3, %v4398_v27  ;;  %v15583_v48 = vxor.u32 2147483648, %v12807_v14 }
 0x84c   :  { %v15584_v46 = vxor.u32 2147483648, %v12795_v5  ;;  %v4409_v60 = vxor.u32 2147483648, %v12924_v41  ;;  %v4592_v33 = vor.u32 %v4591_v29, %v4590_v16  ;;  %v4780_v56 = vmul.u32 %v12910_v8, %v4764_v51 }
 0x84d   :  { %v4698_v7 = vadd.s32 127, %v4697_v3  ;;  %v4199_v11 = vsel %vm4197_vm8, %v12795_v5, %v15583_v48  ;;  %vm4782_vm13 = vc.u32 %v12942_v45, %v12930_v37  ;;  %v4403_v1 = vand.u32 3, %v4402_v31 }
 0x84e   :  { %v4202_v35 = vsel %vm4200_vm10, %v15584_v46, %v12807_v14  ;;  %v4596_v25 = vor.u32 4788187, %v4595_v49  ;;  %v4693_v59 = vsub.s32 32, %v4692_v36  ;;  %v4784_v21 = vsel %vm4782_vm13, %v4783_v0, %v12931_v20 }
 0x84f   :  { %vm4196_vm6 = vcmp.lt.s32.totalorder %v4195_v18, 2  ;;  %v4785_v32 = vadd.s32 %v4784_v21, %v4780_v56  ;;  %vm4405_vm9 = vcmp.eq.s32.totalorder %v4403_v1, 0  ;;  %vm4408_vm11 = vcmp.eq.s32.totalorder %v4403_v1, 2 }
 0x850   :  { %v4203_v17 = vsel %vm4196_vm6, %v4199_v11, %v4202_v35  ;;  %v4699_v5 = vshll.u32 %v4698_v7, 23  ;;  %vm4404_vm7 = vcmp.lt.s32.totalorder %v4403_v1, 2  ;;  %v4407_v14 = vsel %vm4405_vm9, %v12924_v41, %v4406_v13 }
 0x851   :  { %v4410_v58 = vsel %vm4408_vm11, %v4409_v60, %v9443_v10  ;;  %v4786_v15 = vadd.s32 536870912, %v4785_v32  ;;  %v4091_v16 = vand.u32 3, %v12832_v53  ;;  %v4094_v19 = vxor.u32 2147483648, %v12907_v6 }
 0x852   :  { %v4411_v8 = vsel %vm4404_vm7, %v4407_v14, %v4410_v58  ;;  %v4695_v27 = vshrl.u32 %v12894_v52, %v4693_v59  ;;  %v4204_v18 = vsel %vm4193_vm3, nan, %v4203_v17  ;;  %v4097_v29 = vxor.u32 2147483648, %v12887_v28 }
 0x853   :  { %v4412_v20 = vsel %vm4401_vm5, nan, %v4411_v8  ;;  %v4694_v30 = vshll.u32 %v12904_v39, %v4692_v36  ;;  %v12969_v41 = vshrl.u32 %v4786_v15, 30  ;;  %vm4093_vm14 = vcmp.eq.s32.totalorder %v4091_v16, 0 }
 0x854   :  { %v8885_v10 = vpack.c.bf16 %v4412_v20, %v4204_v18  ;;  %v4700_v49 = vor.u32 4788187, %v4699_v5  ;;  %v4095_v53 = vsel %vm4093_vm14, %v12887_v28, %v4094_v19  ;;  %vm4096_vm15 = vcmp.eq.s32.totalorder %v4091_v16, 2 }
 0x855   :  { %v4299_v52 = vand.u32 3, %v12870_v23  ;;  %v4788_v57 = vshll.u32 %v12969_v41, 30  ;;  %v4098_v12 = vsel %vm4096_vm15, %v4097_v29, %v12907_v6  ;;  %v4302_v3 = vxor.u32 2147483648, %v12917_v54 }
 0x856   :  { %8886 = vmatprep.subr.bf16.mxu1 %v8885_v10  ;;  %v4305_v51 = vxor.u32 2147483648, %v12912_v44  ;;  %v4597_v39 = vand.u32 2147483647, %v4596_v25  ;;  %v4696_v36 = vor.u32 %v4695_v27, %v4694_v30  ;;  %vm4092_vm4 = vcmp.lt.s32.totalorder %v4091_v16, 2 }
 0x857   :  { %vm4301_vm0 = vcmp.eq.s32.totalorder %v4299_v52, 0  ;;  %v4789_v13 = vsub.s32 %v4785_v32, %v4788_v57  ;;  %v4099_v0 = vsel %vm4092_vm4, %v4095_v53, %v4098_v12  ;;  %vm4304_vm1 = vcmp.eq.s32.totalorder %v4299_v52, 2 }
 0x858   :  { %v4303_v28 = vsel %vm4301_vm0, %v12912_v44, %v4302_v3  ;;  %v4599_v31 = vcvt.s32.f32 %v4592_v33  ;;  %v4701_v23 = vand.u32 2147483647, %v4700_v49  ;;  %vm4300_vm2 = vcmp.lt.s32.totalorder %v4299_v52, 2 }
 0x859   :  { %v4306_v7 = vsel %vm4304_vm1, %v4305_v51, %v12917_v54  ;;  %v4791_v48 = vsub.s32 0, %v4789_v13  ;;  %vm4089_vm3 = vweird.f32 %v12409_v24  ;;  %vm4297_vm5 = vweird.f32 %v12417_v38 }
 0x85a   :  { %v4307_v6 = vsel %vm4300_vm2, %v4303_v28, %v4306_v7  ;;  %v15585_v11 = vand.u32 2147483647, %v12868_v4  ;;  %v15586_v46 = vcvt.s32.f32 %v12866_v47  ;;  %v4703_v60 = vcvt.s32.f32 %v4696_v36 }
 0x85b   :  { %v4100_v56 = vsel %vm4089_vm3, nan, %v4099_v0  ;;  %v4308_v44 = vsel %vm4297_vm5, nan, %v4307_v6  ;;  %v4600_v1 = vmul.f32 %v4599_v31, %v4597_v39  ;;  %v8493_v33 = vmin.u32 %v4791_v48, %v4789_v13 }
 0x85c   :  { %v4496_v35 = vmul.f32 %v15586_v46, %v15585_v11  ;;  %v8887_v25 = vpack.c.bf16 %v4308_v44, %v4100_v56  ;;  %v4704_v59 = vmul.f32 %v4703_v60, %v4701_v23  ;;  %vm4415_vm8 = vcmp.lt.s32.totalorder %v12566_v55, 0 }
 0x85d   :  { %v4793_v21 = vclz %v8493_v33  ;;  %v4601_v32 = vxor.u32 2147483648, %v4600_v1  ;;  %vm4519_vm13 = vcmp.lt.s32.totalorder %v12581_v61, 0  ;;  %vm4623_vm6 = vcmp.lt.s32.totalorder %v12631_v42, 0 }
 0x85e   :  { %8888 = vmatpush1.bf16.msra.mxu1 %v8887_v25  ;;  %v4497_v54 = vxor.u32 2147483648, %v4496_v35  ;;  %v4705_v17 = vxor.u32 2147483648, %v4704_v59  ;;  %v4781_v5 = vadd.s32 %v12930_v37, %v12942_v45  ;;  %v15587_v15 = vand.u32 2147483647, %v12566_v55 }
 0x85f   :  { %v8494_v24 = vadd.s32 4294967294, %v4793_v21  ;;  %v4602_v4 = vsel %vm4519_vm13, %v4601_v32, %v4600_v1  ;;  %v15590_v16 = vand.u32 2147483647, %v12581_v61  ;;  %v15593_v30 = vand.u32 2147483647, %v12631_v42 }
 0x860   :  { %v4498_v38 = vsel %vm4415_vm8, %v4497_v54, %v4496_v35  ;;  %vm12996_vm9 = vcmp.le.f32.partialorder %v15587_v15, 0.7853982  ;;  %v4706_v27 = vsel %vm4623_vm6, %v4705_v17, %v4704_v59  ;;  %v4707_v57 = vsub.s32 4, %v12884_v40 }
 0x861   :  { %vm8495_vm10 = vcmp.lt.s32.totalorder %v8494_v24, 0  ;;  %vm13002_vm11 = vcmp.le.f32.partialorder %v15590_v16, 0.7853982  ;;  %v4501_v37 = vsel %vm12996_vm9, %v12566_v55, %v4498_v38  ;;  %vm13016_vm7 = vcmp.le.f32.partialorder %v15593_v30, 0.7853982 }
 0x862   :  { %v4796_v47 = vsel %vm8495_vm10, 0, %v8494_v24  ;;  %v4605_v29 = vsel %vm13002_vm11, %v12581_v61, %v4602_v4  ;;  %v4709_v49 = vsel %vm13016_vm7, %v12631_v42, %v4706_v27  ;;  %9444 = vcosq.f32 %v4501_v37 }
 0x863   :  { %v4797_v14 = vsub.s32 32, %v4796_v47  ;;  %v4801_v58 = vsub.s32 4294967266, %v4796_v47  ;;  %v4798_v45 = vshll.u32 %v4789_v13, %v4796_v47  ;;  %9446 = vcosq.f32 %v4605_v29 }
 0x864   :  { %9448 = vcosq.f32 %v4709_v49  ;;  %v4603_v3 = vsub.s32 4, %v12783_v43  ;;  %v4499_v51 = vsub.s32 4, %v12720_v26  ;;  %v4708_v13 = vsel %vm4623_vm6, %v4707_v57, %v12884_v40 }
 0x865   :  { %v4799_v18 = vshrl.u32 %v4781_v5, %v4797_v14  ;;  %v4802_v20 = vadd.s32 127, %v4801_v58  ;;  %9450 = vsinq.f32 %v4709_v49  ;;  %v4811_v28 = vsub.s32 4, %v12969_v41 }
 0x866   :  { %9452 = vsinq.f32 %v4605_v29  ;;  %v4604_v31 = vsel %vm4519_vm13, %v4603_v3, %v12783_v43  ;;  %v4500_v23 = vsel %vm4415_vm8, %v4499_v51, %v12720_v26  ;;  %v4710_v48 = vsel %vm13016_vm7, 0, %v4708_v13 }
 0x867   :  { %v4800_v53 = vor.u32 %v4799_v18, %v4798_v45  ;;  %v4803_v52 = vshll.u32 %v4802_v20, 23  ;;  %9454 = vsinq.f32 %v4501_v37  ;;  %vm4727_vm14 = vcmp.lt.s32.totalorder %v12773_v63, 0 }
 0x868   :  { %v15596_v6 = vand.u32 2147483647, %v12773_v63  ;;  %v4606_v43 = vsel %vm13002_vm11, 0, %v4604_v31  ;;  %v4812_v46 = vsel %vm4727_vm14, %v4811_v28, %v12969_v41  ;;  %v4502_v26 = vsel %vm12996_vm9, 0, %v4500_v23  ;;  %v8496_v31 = vld [vmem:[%s15382_s2 + $0x80] sm:$0xff]  ;;  %v4842_v23 = vpop.permute.xlu0 %4841 }
 0x869   :  { %v4804_v12 = vor.u32 4788187, %v4803_v52  ;;  %v4807_v36 = vcvt.s32.f32 %v4800_v53  ;;  %v4714_v44 = vadd.s32 3, %v4710_v48  ;;  %v4610_v33 = vadd.s32 3, %v4606_v43 }
 0x86a   :  { %vm13041_vm15 = vcmp.le.f32.partialorder %v15596_v6, 0.7853982  ;;  %v4506_v21 = vadd.s32 3, %v4502_v26  ;;  %vm4713_vm7 = vweird.f32 %v12631_v42  ;;  %v8497_v42 = vld [vmem:[%s15382_s2 + $0x88] sm:$0xff] }
 0x86b   :  { %v4805_v39 = vand.u32 2147483647, %v4804_v12  ;;  %v4814_v25 = vsel %vm13041_vm15, 0, %v4812_v46  ;;  %v4715_v24 = vand.u32 3, %v4714_v44  ;;  %v4611_v17 = vand.u32 3, %v4610_v33  ;;  %v4847_v46 = vpop.permute.xlu1 %4846 }
 0x86c   :  { %v9445_v35 = vpop.eup %9444  ;;  %v4818_v32 = vadd.s32 3, %v4814_v25  ;;  %v4507_v14 = vand.u32 3, %v4506_v21 }
 0x86d   :  { %v4808_v0 = vmul.f32 %v4807_v36, %v4805_v39  ;;  %v9447_v56 = vpop.eup %9446  ;;  %v4513_v15 = vxor.u32 2147483648, %v9445_v35  ;;  %vm4717_vm4 = vcmp.eq.s32.totalorder %v4715_v24, 0  ;;  %vm4720_vm0 = vcmp.eq.s32.totalorder %v4715_v24, 2 }
 0x86e   :  { %v9449_v1 = vpop.eup %9448  ;;  %v4617_v5 = vxor.u32 2147483648, %v9447_v56  ;;  %v4819_v8 = vand.u32 3, %v4818_v32  ;;  %vm4613_vm1 = vcmp.eq.s32.totalorder %v4611_v17, 0  ;;  %vm4616_vm2 = vcmp.eq.s32.totalorder %v4611_v17, 2 }
 0x86f   :  { %v4809_v7 = vxor.u32 2147483648, %v4808_v0  ;;  %v9451_v59 = vpop.eup %9450  ;;  %v4721_v47 = vxor.u32 2147483648, %v9449_v1  ;;  %vm4509_vm3 = vcmp.eq.s32.totalorder %v4507_v14, 0  ;;  %vm4512_vm5 = vcmp.eq.s32.totalorder %v4507_v14, 2 }
 0x870   :  { %v9453_v41 = vpop.eup %9452  ;;  %v4718_v38 = vxor.u32 2147483648, %v9451_v59  ;;  %vm4716_vm8 = vcmp.lt.s32.totalorder %v4715_v24, 2  ;;  %vm4612_vm10 = vcmp.lt.s32.totalorder %v4611_v17, 2  ;;  %vm4824_vm13 = vcmp.eq.s32.totalorder %v4819_v8, 2 }
 0x871   :  { %v4810_v11 = vsel %vm4727_vm14, %v4809_v7, %v4808_v0  ;;  %v9455_v54 = vpop.eup %9454  ;;  %v4614_v4 = vxor.u32 2147483648, %v9453_v41  ;;  %v4722_v19 = vsel %vm4720_vm0, %v4721_v47, %v9451_v59  ;;  %v4618_v45 = vsel %vm4616_vm2, %v4617_v5, %v9453_v41 }
 0x872   :  { %v4813_v60 = vsel %vm13041_vm15, %v12773_v63, %v4810_v11  ;;  %v4510_v58 = vxor.u32 2147483648, %v9455_v54  ;;  %v4719_v16 = vsel %vm4717_vm4, %v9449_v1, %v4718_v38  ;;  %v4514_v30 = vsel %vm4512_vm5, %v4513_v15, %v9455_v54 }
 0x873   :  { %9456 = vcosq.f32 %v4813_v60  ;;  %v4615_v37 = vsel %vm4613_vm1, %v9447_v56, %v4614_v4  ;;  %v4723_v49 = vsel %vm4716_vm8, %v4719_v16, %v4722_v19  ;;  %vm4821_vm6 = vcmp.eq.s32.totalorder %v4819_v8, 0 }
 0x874   :  { %9458 = vsinq.f32 %v4813_v60  ;;  %v4511_v29 = vsel %vm4509_vm3, %v9445_v35, %v4510_v58  ;;  %v4619_v53 = vsel %vm4612_vm10, %v4615_v37, %v4618_v45  ;;  %vm4508_vm9 = vcmp.lt.s32.totalorder %v4507_v14, 2 }
 0x875   :  { %vm4820_vm11 = vcmp.lt.s32.totalorder %v4819_v8, 2  ;;  %v4515_v12 = vsel %vm4508_vm9, %v4511_v29, %v4514_v30  ;;  %vm4609_vm14 = vweird.f32 %v12581_v61  ;;  %vm4817_vm15 = vweird.f32 %v12773_v63  ;;  %v8499_v63 = vld [vmem:[%s15382_s2 + $0x98] sm:$0xff] }
 0x876   :  { %v4724_v51 = vsel %vm4713_vm7, nan, %v4723_v49  ;;  %v4620_v39 = vsel %vm4609_vm14, nan, %v4619_v53  ;;  %vm4505_vm4 = vweird.f32 %v12566_v55  ;;  %v15599_v61 = vmov 0.0   ;;  %v8498_v55 = vld [vmem:[%s15382_s2 + $0x90] sm:$0xff] }
 0x877   :  { %v4516_v0 = vsel %vm4505_vm4, nan, %v4515_v12 }
 0x878   :  { %v8891_v28 = vpack.c.bf16 %v4724_v51, %v4516_v0 }
 0x87d   :  { %v9457_v27 = vpop.eup %9456 }
 0x87e   :  { %v9459_v18 = vpop.eup %9458  ;;  %v4825_v20 = vxor.u32 2147483648, %v9457_v27 }
 0x87f   :  { %v4822_v10 = vxor.u32 2147483648, %v9459_v18 }
 0x880   :  { %v4826_v52 = vsel %vm4824_vm13, %v4825_v20, %v9459_v18 }
 0x881   :  { %v4823_v57 = vsel %vm4821_vm6, %v9457_v27, %v4822_v10 }
 0x882   :  { %v4827_v3 = vsel %vm4820_vm11, %v4823_v57, %v4826_v52 }
 0x883   :  { %v4828_v36 = vsel %vm4817_vm15, nan, %v4827_v3 }
 0x884   :  { %v8889_v13 = vpack.c.bf16 %v4828_v36, %v4620_v39 }
 0x886   :  { %8890 = vmatprep.subr.bf16.mxu1 %v8889_v13 }
 0x887   :  { %8892 = vmatpush1.bf16.msra.mxu1 %v8891_v28 }
 0x88a   :  { %8504 = vmatmul.mubr.msk.f32.vlgmr.msra.gmra.mrb[20].mxu1 %vm1006_vm12, %v8496_v31 }
 0x88b   :  { %4941 = vmatprep.mubr.f32.mxu1 %v15599_v61 }
 0x88e   :  { %8505 = vmatmul.mubr.msk.f32.gmra.mrb[22].mxu1 %vm1006_vm12, %v8497_v42 }
 0x88f   :  { %4947 = vmatprep.mubr.f32.mxu1 %v15599_v61 }
 0x892   :  { %8506 = vmatmul.mubr.msk.f32.gmra.mrb[24].mxu1 %vm1006_vm12, %v8498_v55 }
 0x893   :  { %4953 = vmatprep.mubr.f32.mxu1 %v15599_v61 }
 0x896   :  { %8507 = vmatmul.mubr.msk.f32.gmra.mrb[26].mxu1 %vm1006_vm12, %v8499_v63 }
 0x897   :  { %6861 = vmatprep.mubr.f32.mxu1 %v15599_v61 }
 0x95d   :  { %v4937_v7 = vpop.f32.mrb[20].mxu1 }
 0x95e   :  { %v13079_v48 = vadd.f32 %v4937_v7, %v4842_v23  ;;  %v4939_v6 = vpop.f32.mrb[21].mxu1 }
 0x95f   :  { %v13081_v40 = vadd.f32 %v4939_v6, %v4842_v23 }
 0x960   :  { %v4960_v11 = vand.u32 2147483647, %v13079_v48  ;;  %v4963_v43 = vand.u32 2139095040, %v13079_v48 }
 0x961   :  { %v5064_v35 = vand.u32 2147483647, %v13081_v40  ;;  %v5067_v26 = vand.u32 2139095040, %v13081_v40  ;;  %v4943_v60 = vpop.f32.mrb[22].mxu1 }
 0x962   :  { %v4964_v56 = vshrl.u32 %v4963_v43, 23  ;;  %v13087_v44 = vadd.f32 %v4943_v60, %v4847_v46  ;;  %v4945_v1 = vpop.f32.mrb[23].mxu1  ;;  %v4967_v33 = vand.u32 8388607, %v4960_v11 }
 0x963   :  { %v5068_v25 = vshrl.u32 %v5067_v26, 23  ;;  %v5071_v59 = vand.u32 8388607, %v5064_v35  ;;  %v13100_v27 = vadd.f32 %v4945_v1, %v4847_v46 }
 0x964   :  { %v8508_v21 = vadd.s32 4294967169, %v4964_v56  ;;  %v5171_v54 = vand.u32 2139095040, %v13087_v44  ;;  %v4968_v17 = vor.u32 8388608, %v4967_v33  ;;  %v15436_v29 = vand.u32 2147483647, %v13087_v44 }
 0x965   :  { %v8512_v41 = vadd.s32 4294967169, %v5068_v25  ;;  %v13094_v32 = vpop.f32.mrb[24].mxu1  ;;  %v5072_v38 = vor.u32 8388608, %v5071_v59 }
 0x966   :  { %v4970_v24 = vadd.s32 1, %v8508_v21  ;;  %v5172_v4 = vshrl.u32 %v5171_v54, 23  ;;  %v13096_v5 = vpop.f32.mrb[25].mxu1  ;;  %v13104_v45 = vshll.u32 %v4968_v17, 8 }
 0x967   :  { %v5074_v47 = vadd.s32 1, %v8512_v41  ;;  %v13108_v20 = vshll.u32 %v5072_v38, 8 }
 0x968   :  { %vm4971_vm0 = vcmp.gt.s32.totalorder %v4970_v24, 0  ;;  %v8516_v58 = vadd.s32 4294967169, %v5172_v4 }
 0x969   :  { %v4972_v14 = vsel %vm4971_vm0, %v4970_v24, 0  ;;  %vm5075_vm1 = vcmp.gt.s32.totalorder %v5074_v47, 0  ;;  %v13098_v15 = vpop.f32.mrb[26].mxu1 }
 0x96a   :  { %v4973_v8 = vshrl.u32 %v4972_v14, 5  ;;  %v4974_v16 = vand.u32 31, %v4972_v14  ;;  %v5076_v19 = vsel %vm5075_vm1, %v5074_v47, 0  ;;  %v13102_v37 = vpop.f32.mrb[27].mxu1  ;;  %v13112_v53 = vadd.s32 1, %v8516_v58 }
 0x96b   :  { %v13106_v18 = vshrl.u32 %v5076_v19, 5  ;;  %v5078_v49 = vand.u32 31, %v5076_v19 }
 0x96c   :  { %v4975_v30 = vsub.s32 32, %v4974_v16  ;;  %v4977_v10 = vshll.u32 %v15510_v22, %v4974_v16  ;;  %v4980_v52 = vshll.u32 %v15479_v34, %v4974_v16  ;;  %v4983_v57 = vshll.u32 %v15478_v50, %v4974_v16 }
 0x96d   :  { %v4986_v12 = vshll.u32 %v15480_v2, %v4974_v16  ;;  %v4989_v3 = vshll.u32 %v15488_v62, %v4974_v16  ;;  %vm4992_vm2 = vcmp.lt.s32.totalorder %v4973_v8, 1  ;;  %vm4993_vm3 = vcmp.lt.s32.totalorder %v4973_v8, 2 }
 0x96e   :  { %v4978_v51 = vshrl.u32 %v15479_v34, %v4975_v30  ;;  %v4981_v39 = vshrl.u32 %v15478_v50, %v4975_v30  ;;  %v4984_v36 = vshrl.u32 %v15480_v2, %v4975_v30  ;;  %v4976_v13 = vshrl.u32 %v15510_v22, %v4975_v30 }
 0x96f   :  { %v4987_v0 = vshrl.u32 %v15488_v62, %v4975_v30  ;;  %v4990_v28 = vshrl.u32 %v15505_v9, %v4975_v30  ;;  %v5079_v63 = vsub.s32 32, %v5078_v49  ;;  %vm4994_vm5 = vcmp.lt.s32.totalorder %v4973_v8, 3 }
 0x970   :  { %v4979_v31 = vor.u32 %v4978_v51, %v4977_v10  ;;  %v4982_v42 = vor.u32 %v4981_v39, %v4980_v52  ;;  %v4985_v55 = vor.u32 %v4984_v36, %v4983_v57  ;;  %vm4995_vm8 = vcmp.lt.s32.totalorder %v4973_v8, 4 }
 0x971   :  { %v4988_v23 = vor.u32 %v4987_v0, %v4986_v12  ;;  %v4991_v7 = vor.u32 %v4990_v28, %v4989_v3  ;;  %v5081_v33 = vshll.u32 %v15510_v22, %v5078_v49  ;;  %v5082_v21 = vshrl.u32 %v15479_v34, %v5079_v63 }
 0x972   :  { %v4996_v6 = vsel %vm4992_vm2, %v4976_v13, %v4979_v31  ;;  %v4997_v43 = vsel %vm4995_vm8, %v4985_v55, 2102212464  ;;  %v5000_v46 = vsel %vm4992_vm2, %v4979_v31, %v4982_v42  ;;  %v5004_v26 = vsel %vm4992_vm2, %v4982_v42, %v4985_v55 }
 0x973   :  { %v4998_v60 = vsel %vm4994_vm5, %v4982_v42, %v4997_v43  ;;  %v5001_v56 = vsel %vm4995_vm8, %v4988_v23, 920167782  ;;  %v5005_v1 = vsel %vm4995_vm8, %v4991_v7, 1326507024  ;;  %v5084_v41 = vshll.u32 %v15479_v34, %v5078_v49 }
 0x974   :  { %v5002_v25 = vsel %vm4994_vm5, %v4985_v55, %v5001_v56  ;;  %v5006_v59 = vsel %vm4994_vm5, %v4988_v23, %v5005_v1  ;;  %v4999_v54 = vsel %vm4993_vm3, %v4996_v6, %v4998_v60  ;;  %v5085_v38 = vshrl.u32 %v15478_v50, %v5079_v63 }
 0x975   :  { %v5003_v24 = vsel %vm4993_vm3, %v5000_v46, %v5002_v25  ;;  %v5007_v17 = vsel %vm4993_vm3, %v5004_v26, %v5006_v59  ;;  %v5083_v16 = vor.u32 %v5082_v21, %v5081_v33  ;;  %v5087_v30 = vshll.u32 %v15478_v50, %v5078_v49 }
 0x976   :  { %v13135_v47 = vmul.u32.u64.low %v13104_v45, %v5007_v17  ;;  %v13136_v4 = vmul.u32.u64.high %v13104_v45, %v5007_v17, %v13135_v47  ;;  %v13139_v14 = vmul.u32.u64.low %v13104_v45, %v5003_v24  ;;  %v13140_v58 = vmul.u32.u64.high %v13104_v45, %v5003_v24, %v13139_v14 }
 0x977   :  { %v5086_v19 = vor.u32 %v5085_v38, %v5084_v41  ;;  %v5088_v10 = vshrl.u32 %v15480_v2, %v5079_v63  ;;  %v5080_v8 = vshrl.u32 %v15510_v22, %v5079_v63  ;;  %v5090_v52 = vshll.u32 %v15480_v2, %v5078_v49 }
 0x978   :  { %v5091_v57 = vshrl.u32 %v15488_v62, %v5079_v63  ;;  %v5094_v12 = vshrl.u32 %v15505_v9, %v5079_v63  ;;  %v5015_v3 = vmul.u32 %v13104_v45, %v4999_v54  ;;  %v5093_v39 = vshll.u32 %v15488_v62, %v5078_v49 }
 0x979   :  { %v5089_v51 = vor.u32 %v5088_v10, %v5087_v30  ;;  %vm5096_vm10 = vcmp.lt.s32.totalorder %v13106_v18, 1  ;;  %vm5017_vm13 = vc.u32 %v13136_v4, %v13139_v14  ;;  %v5018_v36 = vadd.s32 1, %v13140_v58 }
 0x97a   :  { %v5092_v13 = vor.u32 %v5091_v57, %v5090_v52  ;;  %vm5097_vm6 = vcmp.lt.s32.totalorder %v13106_v18, 2  ;;  %v5095_v0 = vor.u32 %v5094_v12, %v5093_v39  ;;  %vm5098_vm9 = vcmp.lt.s32.totalorder %v13106_v18, 3 }
 0x97b   :  { %vm5099_vm11 = vcmp.lt.s32.totalorder %v13106_v18, 4  ;;  %v5104_v28 = vsel %vm5096_vm10, %v5083_v16, %v5086_v19  ;;  %v5019_v45 = vsel %vm5017_vm13, %v5018_v36, %v13140_v58  ;;  %v5108_v42 = vsel %vm5096_vm10, %v5086_v19, %v5089_v51 }
 0x97c   :  { %v5101_v31 = vsel %vm5099_vm11, %v5089_v51, 2102212464  ;;  %v5105_v49 = vsel %vm5099_vm11, %v5092_v13, 920167782  ;;  %v5020_v55 = vadd.s32 %v5019_v45, %v5015_v3  ;;  %v5100_v63 = vsel %vm5096_vm10, %v5080_v8, %v5083_v16 }
 0x97d   :  { %v5106_v23 = vsel %vm5098_vm9, %v5089_v51, %v5105_v49  ;;  %v5109_v7 = vsel %vm5099_vm11, %v5095_v0, 1326507024  ;;  %v5102_v6 = vsel %vm5098_vm9, %v5086_v19, %v5101_v31  ;;  %vm5179_vm7 = vcmp.gt.s32.totalorder %v13112_v53, 0 }
 0x97e   :  { %v5107_v43 = vsel %vm5097_vm6, %v5104_v28, %v5106_v23  ;;  %v5110_v46 = vsel %vm5098_vm9, %v5092_v13, %v5109_v7  ;;  %v5021_v26 = vadd.s32 536870912, %v5020_v55  ;;  %v5175_v59 = vand.u32 8388607, %v15436_v29 }
 0x97f   :  { %v5111_v60 = vsel %vm5097_vm6, %v5108_v42, %v5110_v46  ;;  %v13165_v56 = vmul.u32.u64.low %v13108_v20, %v5107_v43  ;;  %v13166_v1 = vmul.u32.u64.high %v13108_v20, %v5107_v43, %v13165_v56  ;;  %v5180_v21 = vsel %vm5179_vm7, %v13112_v53, 0 }
 0x980   :  { %v13170_v33 = vmul.u32.u64.low %v13108_v20, %v5111_v60  ;;  %v13171_v25 = vmul.u32.u64.high %v13108_v20, %v5111_v60, %v13170_v33  ;;  %v13176_v41 = vshrl.u32 %v5021_v26, 30  ;;  %v5103_v54 = vsel %vm5097_vm6, %v5100_v63, %v5102_v6 }
 0x981   :  { %v5182_v24 = vand.u32 31, %v5180_v21  ;;  %v5275_v17 = vand.u32 2139095040, %v13100_v27  ;;  %v5122_v47 = vadd.s32 1, %v13166_v1  ;;  %v5119_v16 = vmul.u32 %v13108_v20, %v5103_v54 }
 0x982   :  { %v5023_v38 = vshll.u32 %v13176_v41, 30  ;;  %vm5121_vm14 = vc.u32 %v13171_v25, %v13165_v56  ;;  %v5176_v19 = vor.u32 8388608, %v5175_v59  ;;  %v5181_v3 = vshrl.u32 %v5180_v21, 5 }
 0x983   :  { %v5183_v58 = vsub.s32 32, %v5182_v24  ;;  %v5123_v30 = vsel %vm5121_vm14, %v5122_v47, %v13166_v1  ;;  %v5276_v18 = vshrl.u32 %v5275_v17, 23  ;;  %v5185_v8 = vshll.u32 %v15510_v22, %v5182_v24 }
 0x984   :  { %v13186_v53 = vsub.s32 %v5020_v55, %v5023_v38  ;;  %v5124_v10 = vadd.s32 %v5123_v30, %v5119_v16  ;;  %v5188_v20 = vshll.u32 %v15479_v34, %v5182_v24  ;;  %v5191_v13 = vshll.u32 %v15478_v50, %v5182_v24 }
 0x985   :  { %v5186_v52 = vshrl.u32 %v15479_v34, %v5183_v58  ;;  %v5189_v57 = vshrl.u32 %v15478_v50, %v5183_v58  ;;  %v5192_v51 = vshrl.u32 %v15480_v2, %v5183_v58  ;;  %v5216_v0 = vshll.u32 %v5176_v19, 8 }
 0x986   :  { %v5026_v12 = vsub.s32 0, %v13186_v53  ;;  %v5125_v39 = vadd.s32 536870912, %v5124_v10  ;;  %v5194_v31 = vshll.u32 %v15480_v2, %v5182_v24  ;;  %v5195_v49 = vshrl.u32 %v15488_v62, %v5183_v58 }
 0x987   :  { %v5187_v36 = vor.u32 %v5186_v52, %v5185_v8  ;;  %v5190_v45 = vor.u32 %v5189_v57, %v5188_v20  ;;  %v5193_v55 = vor.u32 %v5192_v51, %v5191_v13  ;;  %v5197_v63 = vshll.u32 %v15488_v62, %v5182_v24 }
 0x988   :  { %v8509_v28 = vmin.u32 %v5026_v12, %v13186_v53  ;;  %v13199_v42 = vshrl.u32 %v5125_v39, 30  ;;  %v5198_v23 = vshrl.u32 %v15505_v9, %v5183_v58  ;;  %v5196_v6 = vor.u32 %v5195_v49, %v5194_v31 }
 0x989   :  { %vm5200_vm15 = vcmp.lt.s32.totalorder %v5181_v3, 1  ;;  %v8520_v43 = vadd.s32 4294967169, %v5276_v18  ;;  %vm5201_vm4 = vcmp.lt.s32.totalorder %v5181_v3, 2  ;;  %vm5203_vm0 = vcmp.lt.s32.totalorder %v5181_v3, 4 }
 0x98a   :  { %v5028_v7 = vclz %v8509_v28  ;;  %v5127_v46 = vshll.u32 %v13199_v42, 30  ;;  %v5199_v26 = vor.u32 %v5198_v23, %v5197_v63  ;;  %vm5202_vm1 = vcmp.lt.s32.totalorder %v5181_v3, 3 }
 0x98b   :  { %v5208_v1 = vsel %vm5200_vm15, %v5187_v36, %v5190_v45  ;;  %v5209_v33 = vsel %vm5203_vm0, %v5196_v6, 920167782  ;;  %v5205_v21 = vsel %vm5203_vm0, %v5193_v55, 2102212464  ;;  %v5212_v24 = vsel %vm5200_vm15, %v5190_v45, %v5193_v55 }
 0x98c   :  { %v8510_v60 = vadd.s32 4294967294, %v5028_v7  ;;  %v13205_v59 = vsub.s32 %v5124_v10, %v5127_v46  ;;  %v5210_v54 = vsel %vm5202_vm1, %v5193_v55, %v5209_v33  ;;  %v5184_v17 = vshrl.u32 %v15510_v22, %v5183_v58  ;;  %v4852_v33 = vpop.permute.xlu0 %4851 }
 0x98d   :  { %v5211_v38 = vsel %vm5201_vm4, %v5208_v1, %v5210_v54  ;;  %v5213_v47 = vsel %vm5203_vm0, %v5199_v26, 1326507024  ;;  %v5282_v18 = vadd.s32 1, %v8520_v43  ;;  %v5206_v52 = vsel %vm5202_vm1, %v5190_v45, %v5205_v21 }
 0x98e   :  { %vm8511_vm2 = vcmp.lt.s32.totalorder %v8510_v60, 0  ;;  %v5130_v19 = vsub.s32 0, %v13205_v59  ;;  %v5214_v30 = vsel %vm5202_vm1, %v5196_v6, %v5213_v47  ;;  %v5204_v10 = vsel %vm5200_vm15, %v5184_v17, %v5187_v36 }
 0x98f   :  { %v5031_v16 = vsel %vm8511_vm2, 0, %v8510_v60  ;;  %v5215_v57 = vsel %vm5201_vm4, %v5212_v24, %v5214_v30  ;;  %vm5283_vm3 = vcmp.gt.s32.totalorder %v5282_v18, 0  ;;  %v15435_v28 = vand.u32 2147483647, %v13100_v27 }
 0x990   :  { %v5036_v8 = vsub.s32 4294967266, %v5031_v16  ;;  %v8513_v12 = vmin.u32 %v5130_v19, %v13205_v59  ;;  %v13217_v20 = vmul.u32.u64.low %v5216_v0, %v5215_v57  ;;  %v13218_v58 = vmul.u32.u64.high %v5216_v0, %v5215_v57, %v13217_v20 }
 0x991   :  { %v13220_v51 = vmul.u32.u64.low %v5216_v0, %v5211_v38  ;;  %v13221_v39 = vmul.u32.u64.high %v5216_v0, %v5211_v38, %v13220_v51  ;;  %v5284_v31 = vsel %vm5283_vm3, %v5282_v18, 0  ;;  %v5032_v49 = vsub.s32 32, %v5031_v16 }
 0x992   :  { %v5132_v13 = vclz %v8513_v12  ;;  %v5037_v36 = vadd.s32 127, %v5036_v8  ;;  %v5207_v45 = vsel %vm5201_vm4, %v5204_v10, %v5206_v52  ;;  %v5286_v55 = vand.u32 31, %v5284_v31 }
 0x993   :  { %vm5225_vm5 = vc.u32 %v13218_v58, %v13220_v51  ;;  %v5016_v23 = vadd.s32 %v13139_v14, %v13136_v4  ;;  %v5226_v7 = vadd.s32 1, %v13221_v39  ;;  %v5223_v6 = vmul.u32 %v5216_v0, %v5207_v45 }
 0x994   :  { %v8514_v63 = vadd.s32 4294967294, %v5132_v13  ;;  %v5279_v43 = vand.u32 8388607, %v15435_v28  ;;  %v5038_v26 = vshll.u32 %v5037_v36, 23  ;;  %v5287_v60 = vsub.s32 32, %v5286_v55 }
 0x995   :  { %v5034_v46 = vshrl.u32 %v5016_v23, %v5032_v49  ;;  %v5227_v3 = vsel %vm5225_vm5, %v5226_v7, %v13221_v39  ;;  %v5033_v21 = vshll.u32 %v13186_v53, %v5031_v16  ;;  %v13236_v4 = vadd.f32 %v13094_v32, %v4852_v33 }
 0x996   :  { %vm8515_vm8 = vcmp.lt.s32.totalorder %v8514_v63, 0  ;;  %v5228_v1 = vadd.s32 %v5227_v3, %v5223_v6  ;;  %v5280_v17 = vor.u32 8388608, %v5279_v43  ;;  %v5039_v0 = vor.u32 4788187, %v5038_v26 }
 0x997   :  { %v5135_v54 = vsel %vm8515_vm8, 0, %v8514_v63  ;;  %v5035_v14 = vor.u32 %v5034_v46, %v5033_v21  ;;  %v5290_v38 = vshrl.u32 %v15479_v34, %v5287_v60  ;;  %v5293_v47 = vshrl.u32 %v15478_v50, %v5287_v60 }
 0x998   :  { %v5229_v24 = vadd.s32 536870912, %v5228_v1  ;;  %v5140_v19 = vsub.s32 4294967266, %v5135_v54  ;;  %v5296_v18 = vshrl.u32 %v15480_v2, %v5287_v60  ;;  %v5299_v8 = vshrl.u32 %v15488_v62, %v5287_v60 }
 0x999   :  { %v5289_v53 = vshll.u32 %v15510_v22, %v5286_v55  ;;  %v5292_v16 = vshll.u32 %v15479_v34, %v5286_v55  ;;  %v5298_v32 = vshll.u32 %v15480_v2, %v5286_v55  ;;  %v5302_v10 = vshrl.u32 %v15505_v9, %v5287_v60 }
 0x99a   :  { %v13240_v30 = vshrl.u32 %v5229_v24, 30  ;;  %v5285_v57 = vshrl.u32 %v5284_v31, 5  ;;  %v5295_v12 = vshll.u32 %v15478_v50, %v5286_v55  ;;  %v13251_v20 = vadd.f32 %v13096_v5, %v4852_v33 }
 0x99b   :  { %v5291_v39 = vor.u32 %v5290_v38, %v5289_v53  ;;  %v5294_v13 = vor.u32 %v5293_v47, %v5292_v16  ;;  %v5300_v49 = vor.u32 %v5299_v8, %v5298_v32  ;;  %v5301_v36 = vshll.u32 %v15488_v62, %v5286_v55 }
 0x99c   :  { %v5231_v52 = vshll.u32 %v13240_v30, 30  ;;  %v5120_v45 = vadd.s32 %v13165_v56, %v13171_v25  ;;  %v5141_v63 = vadd.s32 127, %v5140_v19  ;;  %v5297_v7 = vor.u32 %v5296_v18, %v5295_v12 }
 0x99d   :  { %v5040_v6 = vand.u32 2147483647, %v5039_v0  ;;  %v5042_v43 = vcvt.s32.f32 %v5035_v14  ;;  %v5303_v31 = vor.u32 %v5302_v10, %v5301_v36  ;;  %v5320_v46 = vshll.u32 %v5280_v17, 8 }
 0x99e   :  { %v13256_v23 = vsub.s32 %v5228_v1, %v5231_v52  ;;  %v5136_v26 = vsub.s32 32, %v5135_v54  ;;  %vm5304_vm10 = vcmp.lt.s32.totalorder %v5285_v57, 1  ;;  %vm5307_vm13 = vcmp.lt.s32.totalorder %v5285_v57, 4 }
 0x99f   :  { %v5288_v3 = vshrl.u32 %v15510_v22, %v5287_v60  ;;  %vm5306_vm6 = vcmp.lt.s32.totalorder %v5285_v57, 3  ;;  %v5312_v55 = vsel %vm5304_vm10, %v5291_v39, %v5294_v13  ;;  %v5313_v33 = vsel %vm5307_vm13, %v5300_v49, 920167782 }
 0x9a0   :  { %v5234_v5 = vsub.s32 0, %v13256_v23  ;;  %v5142_v56 = vshll.u32 %v5141_v63, 23  ;;  %vm5305_vm9 = vcmp.lt.s32.totalorder %v5285_v57, 2  ;;  %v5309_v25 = vsel %vm5307_vm13, %v5297_v7, 2102212464 }
 0x9a1   :  { %v5314_v1 = vsel %vm5306_vm6, %v5297_v7, %v5313_v33  ;;  %v5316_v17 = vsel %vm5304_vm10, %v5294_v13, %v5297_v7  ;;  %v5317_v14 = vsel %vm5307_vm13, %v5303_v31, 1326507024  ;;  %v5137_v0 = vshll.u32 %v13205_v59, %v5135_v54 }
 0x9a2   :  { %v8517_v21 = vmin.u32 %v5234_v5, %v13256_v23  ;;  %v5315_v24 = vsel %vm5305_vm9, %v5312_v55, %v5314_v1  ;;  %v5138_v38 = vshrl.u32 %v5120_v45, %v5136_v26  ;;  %v5308_v60 = vsel %vm5304_vm10, %v5288_v3, %v5291_v39 }
 0x9a3   :  { %v5318_v47 = vsel %vm5306_vm6, %v5300_v49, %v5317_v14  ;;  %v5310_v19 = vsel %vm5306_vm6, %v5294_v13, %v5309_v25  ;;  %v13267_v8 = vmul.u32.u64.low %v5320_v46, %v5315_v24  ;;  %v13268_v53 = vmul.u32.u64.high %v5320_v46, %v5315_v24, %v13267_v8 }
 0x9a4   :  { %v5319_v18 = vsel %vm5305_vm9, %v5316_v17, %v5318_v47  ;;  %v5043_v16 = vmul.f32 %v5042_v43, %v5040_v6  ;;  %v5143_v32 = vor.u32 4788187, %v5142_v56  ;;  %v5236_v12 = vclz %v8517_v21  ;;  %v13291_v21 = vpop.permute.xlu1 %4856 }
 0x9a5   :  { %v13271_v10 = vmul.u32.u64.low %v5320_v46, %v5319_v18  ;;  %v13272_v52 = vmul.u32.u64.high %v5320_v46, %v5319_v18, %v13271_v10  ;;  %v5379_v36 = vand.u32 2139095040, %v13236_v4  ;;  %v5139_v59 = vor.u32 %v5138_v38, %v5137_v0 }
 0x9a6   :  { %v5311_v54 = vsel %vm5305_vm9, %v5308_v60, %v5310_v19  ;;  %v5483_v39 = vand.u32 2139095040, %v13251_v20  ;;  %v5330_v13 = vadd.s32 1, %v13268_v53  ;;  %v5044_v45 = vxor.u32 2147483648, %v5043_v16 }
 0x9a7   :  { %v5380_v49 = vshrl.u32 %v5379_v36, 23  ;;  %v5046_v63 = vsub.s32 4, %v13176_v41  ;;  %v5144_v7 = vand.u32 2147483647, %v5143_v32  ;;  %v15433_v6 = vand.u32 2147483647, %v13236_v4 }
 0x9a8   :  { %v8518_v43 = vadd.s32 4294967294, %v5236_v12  ;;  %v5327_v31 = vmul.u32 %v5320_v46, %v5311_v54  ;;  %vm5329_vm11 = vc.u32 %v13272_v52, %v13267_v8  ;;  %v5146_v5 = vcvt.s32.f32 %v5139_v59 }
 0x9a9   :  { %v8524_v26 = vadd.s32 4294967169, %v5380_v49  ;;  %v5331_v57 = vsel %vm5329_vm11, %v5330_v13, %v13268_v53  ;;  %v5484_v3 = vshrl.u32 %v5483_v39, 23  ;;  %vm4962_vm7 = vcmp.lt.s32.totalorder %v13079_v48, 0 }
 0x9aa   :  { %v5332_v55 = vadd.s32 %v5331_v57, %v5327_v31  ;;  %v5045_v56 = vsel %vm4962_vm7, %v5044_v45, %v5043_v16  ;;  %v13285_v25 = vsel %vm4962_vm7, %v5046_v63, %v13176_v41  ;;  %v13287_v1 = vmul.f32 %v5146_v5, %v5144_v7 }
 0x9ab   :  { %v5386_v33 = vadd.s32 1, %v8524_v26  ;;  %v5383_v46 = vand.u32 8388607, %v15433_v6  ;;  %vm8519_vm14 = vcmp.lt.s32.totalorder %v8518_v43, 0  ;;  %v8528_v17 = vadd.s32 4294967169, %v5484_v3 }
 0x9ac   :  { %v5333_v24 = vadd.s32 536870912, %v5332_v55  ;;  %vm13295_vm4 = vcmp.le.f32.partialorder %v4960_v11, 0.7853982  ;;  %v13301_v41 = vadd.f32 %v13098_v15, %v13291_v21  ;;  %v13308_v60 = vadd.s32 %v13220_v51, %v13218_v58 }
 0x9ad   :  { %vm5387_vm15 = vcmp.gt.s32.totalorder %v5386_v33, 0  ;;  %v13315_v11 = vsel %vm13295_vm4, %v13079_v48, %v5045_v56  ;;  %v5148_v18 = vxor.u32 2147483648, %v13287_v1  ;;  %v13318_v15 = vsel %vm8519_vm14, 0, %v8518_v43 }
 0x9ae   :  { %v5388_v0 = vsel %vm5387_vm15, %v5386_v33, 0  ;;  %v13310_v47 = vshrl.u32 %v5333_v24, 30  ;;  %v5384_v32 = vor.u32 8388608, %v5383_v46  ;;  %v5490_v58 = vadd.s32 1, %v8528_v17 }
 0x9af   :  { %v5390_v19 = vand.u32 31, %v5388_v0  ;;  %v5389_v51 = vshrl.u32 %v5388_v0, 5  ;;  %v15434_v57 = vand.u32 2147483647, %v13251_v20  ;;  %vm5066_vm0 = vcmp.lt.s32.totalorder %v13081_v40, 0 }
 0x9b0   :  { %v5335_v16 = vshll.u32 %v13310_v47, 30  ;;  %v5244_v3 = vsub.s32 4294967266, %v13318_v15  ;;  %v5424_v24 = vshll.u32 %v5384_v32, 8  ;;  %vm5491_vm2 = vcmp.gt.s32.totalorder %v5490_v58, 0 }
 0x9b1   :  { %v5391_v10 = vsub.s32 32, %v5390_v19  ;;  %v5393_v12 = vshll.u32 %v15510_v22, %v5390_v19  ;;  %v5396_v36 = vshll.u32 %v15479_v34, %v5390_v19  ;;  %v5399_v59 = vshll.u32 %v15478_v50, %v5390_v19 }
 0x9b2   :  { %v13325_v54 = vsub.s32 %v5332_v55, %v5335_v16  ;;  %v5402_v49 = vshll.u32 %v15480_v2, %v5390_v19  ;;  %v5405_v7 = vshll.u32 %v15488_v62, %v5390_v19  ;;  %vm5408_vm1 = vcmp.lt.s32.totalorder %v5389_v51, 1 }
 0x9b3   :  { %v5394_v39 = vshrl.u32 %v15479_v34, %v5391_v10  ;;  %v5397_v13 = vshrl.u32 %v15478_v50, %v5391_v10  ;;  %v5400_v45 = vshrl.u32 %v15480_v2, %v5391_v10  ;;  %v5403_v63 = vshrl.u32 %v15488_v62, %v5391_v10 }
 0x9b4   :  { %v5406_v43 = vshrl.u32 %v15505_v9, %v5391_v10  ;;  %v5338_v31 = vsub.s32 0, %v13325_v54  ;;  %v5392_v17 = vshrl.u32 %v15510_v22, %v5391_v10  ;;  %vm5409_vm3 = vcmp.lt.s32.totalorder %v5389_v51, 2 }
 0x9b5   :  { %v5395_v26 = vor.u32 %v5394_v39, %v5393_v12  ;;  %v5398_v5 = vor.u32 %v5397_v13, %v5396_v36  ;;  %v5401_v55 = vor.u32 %v5400_v45, %v5399_v59  ;;  %v5404_v33 = vor.u32 %v5403_v63, %v5402_v49 }
 0x9b6   :  { %v5407_v56 = vor.u32 %v5406_v43, %v5405_v7  ;;  %v8521_v46 = vmin.u32 %v5338_v31, %v13325_v54  ;;  %vm5411_vm5 = vcmp.lt.s32.totalorder %v5389_v51, 4  ;;  %vm5410_vm8 = vcmp.lt.s32.totalorder %v5389_v51, 3 }
 0x9b7   :  { %v5416_v0 = vsel %vm5408_vm1, %v5395_v26, %v5398_v5  ;;  %v5413_v16 = vsel %vm5411_vm5, %v5401_v55, 2102212464  ;;  %v5417_v12 = vsel %vm5411_vm5, %v5404_v33, 920167782  ;;  %v5412_v36 = vsel %vm5408_vm1, %v5392_v17, %v5395_v26 }
 0x9b8   :  { %v5340_v19 = vclz %v8521_v46  ;;  %v5418_v39 = vsel %vm5410_vm8, %v5401_v55, %v5417_v12  ;;  %v5420_v13 = vsel %vm5408_vm1, %v5398_v5, %v5401_v55  ;;  %v5421_v59 = vsel %vm5411_vm5, %v5407_v56, 1326507024 }
 0x9b9   :  { %v5414_v45 = vsel %vm5410_vm8, %v5398_v5, %v5413_v16  ;;  %v5419_v63 = vsel %vm5409_vm3, %v5416_v0, %v5418_v39  ;;  %v5422_v7 = vsel %vm5410_vm8, %v5404_v33, %v5421_v59  ;;  %v5245_v32 = vadd.s32 127, %v5244_v3 }
 0x9ba   :  { %v8522_v49 = vadd.s32 4294967294, %v5340_v19  ;;  %v5423_v43 = vsel %vm5409_vm3, %v5420_v13, %v5422_v7  ;;  %v13342_v10 = vmul.u32.u64.low %v5424_v24, %v5419_v63  ;;  %v13343_v31 = vmul.u32.u64.high %v5424_v24, %v5419_v63, %v13342_v10 }
 0x9bb   :  { %v13346_v46 = vmul.u32.u64.low %v5424_v24, %v5423_v43  ;;  %v13347_v6 = vmul.u32.u64.high %v5424_v24, %v5423_v43, %v13346_v46  ;;  %v5492_v26 = vsel %vm5491_vm2, %v5490_v58, 0  ;;  %v5415_v5 = vsel %vm5409_vm3, %v5412_v36, %v5414_v45 }
 0x9bc   :  { %vm8523_vm10 = vcmp.lt.s32.totalorder %v8522_v49, 0  ;;  %v5487_v33 = vand.u32 8388607, %v15434_v57  ;;  %v5494_v3 = vand.u32 31, %v5492_v26  ;;  %v13358_v56 = vsel %vm5066_vm0, %v5148_v18, %v13287_v1 }
 0x9bd   :  { %v13350_v55 = vsel %vm8523_vm10, 0, %v8522_v49  ;;  %v5240_v17 = vsub.s32 32, %v13318_v15  ;;  %v5587_v19 = vand.u32 2139095040, %v13301_v41  ;;  %v5434_v16 = vadd.s32 1, %v13343_v31 }
 0x9be   :  { %v5348_v51 = vsub.s32 4294967266, %v13350_v55  ;;  %v5495_v12 = vsub.s32 32, %v5494_v3  ;;  %v5246_v36 = vshll.u32 %v5245_v32, 23  ;;  %v5328_v39 = vadd.s32 %v13267_v8, %v13272_v52 }
 0x9bf   :  { %v5431_v1 = vmul.u32 %v5424_v24, %v5415_v5  ;;  %vm5433_vm13 = vc.u32 %v13347_v6, %v13342_v10  ;;  %v5488_v13 = vor.u32 8388608, %v5487_v33  ;;  %v5344_v45 = vsub.s32 32, %v13350_v55 }
 0x9c0   :  { %v5435_v18 = vsel %vm5433_vm13, %v5434_v16, %v13343_v31  ;;  %v5498_v59 = vshrl.u32 %v15479_v34, %v5495_v12  ;;  %v5501_v49 = vshrl.u32 %v15478_v50, %v5495_v12  ;;  %v5493_v7 = vshrl.u32 %v5492_v26, 5 }
 0x9c1   :  { %v5436_v63 = vadd.s32 %v5435_v18, %v5431_v1  ;;  %v5588_v43 = vshrl.u32 %v5587_v19, 23  ;;  %v5349_v32 = vadd.s32 127, %v5348_v51  ;;  %v5497_v46 = vshll.u32 %v15510_v22, %v5494_v3 }
 0x9c2   :  { %v5500_v8 = vshll.u32 %v15479_v34, %v5494_v3  ;;  %v5504_v52 = vshrl.u32 %v15480_v2, %v5495_v12  ;;  %v5503_v31 = vshll.u32 %v15478_v50, %v5494_v3  ;;  %v5506_v5 = vshll.u32 %v15480_v2, %v5494_v3 }
 0x9c3   :  { %v5437_v24 = vadd.s32 536870912, %v5436_v63  ;;  %v5507_v33 = vshrl.u32 %v15488_v62, %v5495_v12  ;;  %vm13383_vm6 = vcmp.le.f32.partialorder %v5064_v35, 0.7853982  ;;  %v5499_v26 = vor.u32 %v5498_v59, %v5497_v46 }
 0x9c4   :  { %v5502_v19 = vor.u32 %v5501_v49, %v5500_v8  ;;  %v5509_v51 = vshll.u32 %v15488_v62, %v5494_v3  ;;  %v5510_v1 = vshrl.u32 %v15505_v9, %v5495_v12  ;;  %v5242_v18 = vshrl.u32 %v13308_v60, %v5240_v17 }
 0x9c5   :  { %v13390_v57 = vshrl.u32 %v5437_v24, 30  ;;  %v5505_v38 = vor.u32 %v5504_v52, %v5503_v31  ;;  %v5508_v28 = vor.u32 %v5507_v33, %v5506_v5  ;;  %v5247_v29 = vor.u32 4788187, %v5246_v36 }
 0x9c6   :  { %v5511_v53 = vor.u32 %v5510_v1, %v5509_v51  ;;  %v5528_v0 = vshll.u32 %v5488_v13, 8  ;;  %v8532_v58 = vadd.s32 4294967169, %v5588_v43  ;;  %v5350_v35 = vshll.u32 %v5349_v32, 23 }
 0x9c7   :  { %v5439_v61 = vshll.u32 %v13390_v57, 30  ;;  %vm5512_vm9 = vcmp.lt.s32.totalorder %v5493_v7, 1  ;;  %vm5515_vm11 = vcmp.lt.s32.totalorder %v5493_v7, 4  ;;  %vm5170_vm7 = vcmp.lt.s32.totalorder %v13087_v44, 0 }
 0x9c8   :  { %v5345_v3 = vshll.u32 %v13325_v54, %v13350_v55  ;;  %v5346_v59 = vshrl.u32 %v5328_v39, %v5344_v45  ;;  %v5520_v60 = vsel %vm5512_vm9, %v5499_v26, %v5502_v19  ;;  %v5521_v17 = vsel %vm5515_vm11, %v5508_v28, 920167782 }
 0x9c9   :  { %v13397_v49 = vsub.s32 %v5436_v63, %v5439_v61  ;;  %v5496_v36 = vshrl.u32 %v15510_v22, %v5495_v12  ;;  %vm5514_vm14 = vcmp.lt.s32.totalorder %v5493_v7, 3  ;;  %v5517_v13 = vsel %vm5515_vm11, %v5505_v38, 2102212464 }
 0x9ca   :  { %vm5513_vm15 = vcmp.lt.s32.totalorder %v5493_v7, 2  ;;  %v5522_v43 = vsel %vm5514_vm14, %v5505_v38, %v5521_v17  ;;  %v5524_v32 = vsel %vm5512_vm9, %v5502_v19, %v5505_v38  ;;  %v5525_v46 = vsel %vm5515_vm11, %v5511_v53, 1326507024 }
 0x9cb   :  { %v5351_v8 = vor.u32 4788187, %v5350_v35  ;;  %v5442_v52 = vsub.s32 0, %v13397_v49  ;;  %v5516_v54 = vsel %vm5512_vm9, %v5496_v36, %v5499_v26  ;;  %v5523_v55 = vsel %vm5513_vm15, %v5520_v60, %v5522_v43 }
 0x9cc   :  { %v5518_v39 = vsel %vm5514_vm14, %v5502_v19, %v5517_v13  ;;  %v5526_v45 = vsel %vm5514_vm14, %v5508_v28, %v5525_v46  ;;  %v13404_v61 = vmul.u32.u64.low %v5528_v0, %v5523_v55  ;;  %v13405_v63 = vmul.u32.u64.high %v5528_v0, %v5523_v55, %v13404_v61 }
 0x9cd   :  { %v5152_v12 = vsel %vm13383_vm6, %v13081_v40, %v13358_v56  ;;  %v8525_v38 = vmin.u32 %v5442_v52, %v13397_v49  ;;  %v5527_v53 = vsel %vm5513_vm15, %v5524_v32, %v5526_v45  ;;  %v5594_v24 = vadd.s32 1, %v8532_v58 }
 0x9ce   :  { %v15604_v31 = vshll.u32 %v13256_v23, %v13318_v15  ;;  %v5347_v33 = vor.u32 %v5346_v59, %v5345_v3  ;;  %v13417_v28 = vmul.u32.u64.low %v5528_v0, %v5527_v53  ;;  %v13418_v26 = vmul.u32.u64.high %v5528_v0, %v5527_v53, %v13417_v28 }
 0x9cf   :  { %v5248_v19 = vand.u32 2147483647, %v5247_v29  ;;  %v5444_v51 = vclz %v8525_v38  ;;  %v5519_v1 = vsel %vm5513_vm15, %v5516_v54, %v5518_v39  ;;  %vm5595_vm1 = vcmp.gt.s32.totalorder %v5594_v24, 0 }
 0x9d0   :  { %v5243_v5 = vor.u32 %v5242_v18, %v15604_v31  ;;  %v5352_v35 = vand.u32 2147483647, %v5351_v8  ;;  %v5538_v56 = vadd.s32 1, %v13405_v63  ;;  %v15605_v60 = vand.u32 2147483647, %v13301_v41 }
 0x9d1   :  { %v5596_v58 = vsel %vm5595_vm1, %v5594_v24, 0  ;;  %9460 = vcosq.f32 %v5152_v12  ;;  %v15606_v23 = vsub.s32 4, %v13240_v30  ;;  %v8526_v29 = vadd.s32 4294967294, %v5444_v51 }
 0x9d2   :  { %v5591_v17 = vand.u32 8388607, %v15605_v60  ;;  %v5598_v18 = vand.u32 31, %v5596_v58  ;;  %v5250_v7 = vcvt.s32.f32 %v5243_v5  ;;  %v5354_v3 = vcvt.s32.f32 %v5347_v33 }
 0x9d3   :  { %v13429_v15 = vsel %vm5170_vm7, %v15606_v23, %v13240_v30  ;;  %v5535_v59 = vmul.u32 %v5528_v0, %v5519_v1  ;;  %vm5537_vm2 = vc.u32 %v13418_v26, %v13404_v61  ;;  %9462 = vsinq.f32 %v5152_v12 }
 0x9d4   :  { %vm8527_vm3 = vcmp.lt.s32.totalorder %v8526_v29, 0  ;;  %v5539_v36 = vsel %vm5537_vm2, %v5538_v56, %v13405_v63  ;;  %v5599_v13 = vsub.s32 32, %v5598_v18  ;;  %v5251_v43 = vmul.f32 %v5250_v7, %v5248_v19 }
 0x9d5   :  { %v13434_v32 = vmul.f32 %v5354_v3, %v5352_v35  ;;  %v5540_v46 = vadd.s32 %v5539_v36, %v5535_v59  ;;  %v5592_v8 = vor.u32 8388608, %v5591_v17  ;;  %v13436_v30 = vsel %vm8527_vm3, 0, %v8526_v29 }
 0x9d6   :  { %v13438_v52 = vshrl.u32 %v5596_v58, 5  ;;  %v5607_v54 = vshll.u32 %v15478_v50, %v5598_v18  ;;  %v13443_v0 = vadd.f32 %v13102_v37, %v13291_v21  ;;  %v5602_v39 = vshrl.u32 %v15479_v34, %v5599_v13 }
 0x9d7   :  { %v5541_v55 = vadd.s32 536870912, %v5540_v46  ;;  %v5605_v45 = vshrl.u32 %v15478_v50, %v5599_v13  ;;  %v5608_v63 = vshrl.u32 %v15480_v2, %v5599_v13  ;;  %v5601_v12 = vshll.u32 %v15510_v22, %v5598_v18 }
 0x9d8   :  { %v5604_v38 = vshll.u32 %v15479_v34, %v5598_v18  ;;  %v5610_v53 = vshll.u32 %v15480_v2, %v5598_v18  ;;  %v5611_v24 = vshrl.u32 %v15488_v62, %v5599_v13  ;;  %v5252_v31 = vxor.u32 2147483648, %v5251_v43 }
 0x9d9   :  { %v5356_v5 = vxor.u32 2147483648, %v13434_v32  ;;  %v13453_v37 = vshrl.u32 %v5541_v55, 30  ;;  %v5609_v21 = vor.u32 %v5608_v63, %v5607_v54  ;;  %v5452_v33 = vsub.s32 4294967266, %v13436_v30 }
 0x9da   :  { %v5603_v28 = vor.u32 %v5602_v39, %v5601_v12  ;;  %v5606_v19 = vor.u32 %v5605_v45, %v5604_v38  ;;  %v5612_v51 = vor.u32 %v5611_v24, %v5610_v53  ;;  %v15607_v1 = vand.u32 2147483647, %v13087_v44 }
 0x9db   :  { %v5543_v56 = vshll.u32 %v13453_v37, 30  ;;  %v5613_v60 = vshll.u32 %v15488_v62, %v5598_v18  ;;  %v5614_v17 = vshrl.u32 %v15505_v9, %v5599_v13  ;;  %v5632_v58 = vshll.u32 %v5592_v8, 8  ;;  %v13465_v23 = vpop.eup %9460 }
 0x9dc   :  { %vm13458_vm5 = vcmp.le.f32.partialorder %v15607_v1, 0.7853982  ;;  %vm5274_vm8 = vcmp.lt.s32.totalorder %v13100_v27, 0  ;;  %v5448_v29 = vsub.s32 32, %v13436_v30  ;;  %v5600_v7 = vshrl.u32 %v15510_v22, %v5599_v13 }
 0x9dd   :  { %vm5619_vm10 = vcmp.lt.s32.totalorder %v13438_v52, 4  ;;  %v5691_v3 = vand.u32 2139095040, %v13443_v0  ;;  %v13472_v59 = vsub.s32 %v5540_v46, %v5543_v56  ;;  %v5615_v36 = vor.u32 %v5614_v17, %v5613_v60  ;;  %v13477_v8 = vpop.eup %9462 }
 0x9de   :  { %vm5616_vm13 = vcmp.lt.s32.totalorder %v13438_v52, 1  ;;  %v5621_v18 = vsel %vm5619_vm10, %v5609_v21, 2102212464  ;;  %v5453_v54 = vadd.s32 127, %v5452_v33  ;;  %vm5618_vm9 = vcmp.lt.s32.totalorder %v13438_v52, 3 }
 0x9df   :  { %v5624_v55 = vsel %vm5616_vm13, %v5603_v28, %v5606_v19  ;;  %v5625_v13 = vsel %vm5619_vm10, %v5612_v51, 920167782  ;;  %v15610_v39 = vand.u32 2147483647, %v13100_v27  ;;  %v5546_v45 = vsub.s32 0, %v13472_v59 }
 0x9e0   :  { %vm5617_vm14 = vcmp.lt.s32.totalorder %v13438_v52, 2  ;;  %v5626_v63 = vsel %vm5618_vm9, %v5609_v21, %v5625_v13  ;;  %v5628_v12 = vsel %vm5616_vm13, %v5606_v19, %v5609_v21  ;;  %v5620_v38 = vsel %vm5616_vm13, %v5600_v7, %v5603_v28 }
 0x9e1   :  { %vm13484_vm11 = vcmp.le.f32.partialorder %v15610_v39, 0.7853982  ;;  %v5622_v53 = vsel %vm5618_vm9, %v5606_v19, %v5621_v18  ;;  %v5627_v24 = vsel %vm5617_vm14, %v5624_v55, %v5626_v63  ;;  %v5629_v33 = vsel %vm5619_vm10, %v5615_v36, 1326507024 }
 0x9e2   :  { %v8529_v1 = vmin.u32 %v5546_v45, %v13472_v59  ;;  %v5630_v56 = vsel %vm5618_vm9, %v5612_v51, %v5629_v33  ;;  %v13495_v60 = vmul.u32.u64.low %v5632_v58, %v5627_v24  ;;  %v13496_v17 = vmul.u32.u64.high %v5632_v58, %v5627_v24, %v13495_v60 }
 0x9e3   :  { %v15613_v39 = vsel %vm13295_vm4, 0, %v13285_v25  ;;  %v5253_v21 = vsel %vm5170_vm7, %v5252_v31, %v5251_v43  ;;  %v5631_v28 = vsel %vm5617_vm14, %v5628_v12, %v5630_v56  ;;  %v5692_v19 = vshrl.u32 %v5691_v3, 23 }
 0x9e4   :  { %v13502_v13 = vadd.s32 3, %v15613_v39  ;;  %v5432_v7 = vadd.s32 %v13342_v10, %v13347_v6  ;;  %v5548_v51 = vclz %v8529_v1  ;;  %9464 = vcosq.f32 %v13315_v11 }
 0x9e5   :  { %v13510_v36 = vmul.u32.u64.low %v5632_v58, %v5631_v28  ;;  %v13511_v18 = vmul.u32.u64.high %v5632_v58, %v5631_v28, %v13510_v36  ;;  %v5257_v25 = vsel %vm13458_vm5, 0, %v13429_v15  ;;  %v5623_v14 = vsel %vm5617_vm14, %v5620_v38, %v5622_v53 }
 0x9e6   :  { %v8536_v43 = vadd.s32 4294967169, %v5692_v19  ;;  %v5357_v31 = vsel %vm5274_vm8, %v5356_v5, %v13434_v32  ;;  %v5450_v3 = vshrl.u32 %v5432_v7, %v5448_v29  ;;  %v5454_v6 = vshll.u32 %v5453_v54, 23 }
 0x9e7   :  { %v5642_v10 = vadd.s32 1, %v13496_v17  ;;  %v5256_v55 = vsel %vm13458_vm5, %v13087_v44, %v5253_v21  ;;  %v15438_v45 = vand.u32 2147483647, %v13443_v0  ;;  %v5150_v15 = vsub.s32 4, %v13199_v42 }
 0x9e8   :  { %v5698_v63 = vadd.s32 1, %v8536_v43  ;;  %v5449_v52 = vshll.u32 %v13397_v49, %v13436_v30  ;;  %v8530_v12 = vadd.s32 4294967294, %v5548_v51  ;;  %v5639_v38 = vmul.u32 %v5632_v58, %v5623_v14 }
 0x9e9   :  { %vm5641_vm4 = vc.u32 %v13511_v18, %v13495_v60  ;;  %9466 = vsinq.f32 %v13315_v11  ;;  %v5360_v32 = vsel %vm13484_vm11, %v13100_v27, %v5357_v31  ;;  %v13538_v29 = vor.u32 4788187, %v5454_v6 }
 0x9ea   :  { %v5643_v5 = vsel %vm5641_vm4, %v5642_v10, %v13496_v17  ;;  %vm5699_vm7 = vcmp.gt.s32.totalorder %v5698_v63, 0  ;;  %9468 = vcosq.f32 %v5256_v55  ;;  %v13536_v35 = vor.u32 %v5450_v3, %v5449_v52 }
 0x9eb   :  { %v5644_v54 = vadd.s32 %v5643_v5, %v5639_v38  ;;  %9470 = vsinq.f32 %v5256_v55  ;;  %v13540_v49 = vadd.s32 3, %v5257_v25  ;;  %v5695_v30 = vand.u32 8388607, %v15438_v45 }
 0x9ec   :  { %v5700_v11 = vsel %vm5699_vm7, %v5698_v63, 0  ;;  %9472 = vcosq.f32 %v5360_v32  ;;  %vm8531_vm15 = vcmp.lt.s32.totalorder %v8530_v12, 0  ;;  %v5151_v53 = vsel %vm5066_vm0, %v5150_v15, %v13199_v42 }
 0x9ed   :  { %v5645_v58 = vadd.s32 536870912, %v5644_v54  ;;  %9474 = vsinq.f32 %v5360_v32  ;;  %v13549_v24 = vadd.s32 %v13404_v61, %v13418_v26  ;;  %v5702_v33 = vand.u32 31, %v5700_v11 }
 0x9ee   :  { %v13557_v28 = vpop.eup %9464  ;;  %v13559_v19 = vsel %vm8531_vm15, 0, %v8530_v12  ;;  %v5696_v42 = vor.u32 8388608, %v5695_v30  ;;  %v5153_v61 = vsel %vm13383_vm6, 0, %v5151_v53  ;;  %v13564_v26 = vadd.s32 %v13495_v60, %v13511_v18 }
 0x9ef   :  { %v13554_v39 = vshrl.u32 %v5645_v58, 30  ;;  %v5703_v7 = vsub.s32 32, %v5702_v33  ;;  %v5705_v36 = vshll.u32 %v15510_v22, %v5702_v33  ;;  %v5358_v25 = vsub.s32 4, %v13310_v47 }
 0x9f0   :  { %v5708_v43 = vshll.u32 %v15479_v34, %v5702_v33  ;;  %v5556_v16 = vsub.s32 4294967266, %v13559_v19  ;;  %v5701_v60 = vshrl.u32 %v5700_v11, 5  ;;  %v5711_v18 = vshll.u32 %v15478_v50, %v5702_v33 }
 0x9f1   :  { %v5647_v51 = vshll.u32 %v13554_v39, 30  ;;  %v5706_v14 = vshrl.u32 %v15479_v34, %v5703_v7  ;;  %v5709_v31 = vshrl.u32 %v15478_v50, %v5703_v7  ;;  %v5712_v3 = vshrl.u32 %v15480_v2, %v5703_v7 }
 0x9f2   :  { %v5552_v55 = vsub.s32 32, %v13559_v19  ;;  %v13580_v52 = vshll.u32 %v5696_v42, 8  ;;  %v5714_v5 = vshll.u32 %v15480_v2, %v5702_v33  ;;  %v5717_v11 = vshll.u32 %v15488_v62, %v5702_v33 }
 0x9f3   :  { %v13574_v6 = vsub.s32 %v5644_v54, %v5647_v51  ;;  %v13577_v10 = vpop.eup %9466  ;;  %v5707_v63 = vor.u32 %v5706_v14, %v5705_v36  ;;  %v5710_v15 = vor.u32 %v5709_v31, %v5708_v43  ;;  %v5713_v32 = vor.u32 %v5712_v3, %v5711_v18 }
 0x9f4   :  { %v13582_v12 = vpop.eup %9468  ;;  %v5715_v54 = vshrl.u32 %v15488_v62, %v5703_v7  ;;  %v5718_v58 = vshrl.u32 %v15505_v9, %v5703_v7  ;;  %v5157_v53 = vadd.s32 3, %v5153_v61  ;;  %v5359_v42 = vsel %vm5274_vm8, %v5358_v25, %v13310_v47 }
 0x9f5   :  { %v5650_v38 = vsub.s32 0, %v13574_v6  ;;  %v13587_v30 = vpop.eup %9470  ;;  %v5557_v36 = vadd.s32 127, %v5556_v16  ;;  %vm5720_vm0 = vcmp.lt.s32.totalorder %v5701_v60, 1  ;;  %v5704_v3 = vshrl.u32 %v15510_v22, %v5703_v7 }
 0x9f6   :  { %v13594_v51 = vpop.eup %9472  ;;  %v5716_v43 = vor.u32 %v5715_v54, %v5714_v5  ;;  %v5719_v18 = vor.u32 %v5718_v58, %v5717_v11  ;;  %vm5723_vm6 = vcmp.lt.s32.totalorder %v5701_v60, 4  ;;  %v5728_v33 = vsel %vm5720_vm0, %v5707_v63, %v5710_v15 }
 0x9f7   :  { %v8533_v14 = vmin.u32 %v5650_v38, %v13574_v6  ;;  %v9475_v31 = vpop.eup %9474  ;;  %vm5722_vm1 = vcmp.lt.s32.totalorder %v5701_v60, 3  ;;  %v5725_v61 = vsel %vm5723_vm6, %v5713_v32, 2102212464  ;;  %vm5721_vm2 = vcmp.lt.s32.totalorder %v5701_v60, 2 }
 0x9f8   :  { %v5729_v17 = vsel %vm5723_vm6, %v5716_v43, 920167782  ;;  %v5732_v47 = vsel %vm5720_vm0, %v5710_v15, %v5713_v32  ;;  %v5158_v25 = vand.u32 3, %v5157_v53  ;;  %v5724_v16 = vsel %vm5720_vm0, %v5704_v3, %v5707_v63 }
 0x9f9   :  { %v5652_v45 = vclz %v8533_v14  ;;  %v5730_v56 = vsel %vm5722_vm1, %v5713_v32, %v5729_v17  ;;  %v5733_v5 = vsel %vm5723_vm6, %v5719_v18, 1326507024  ;;  %v5726_v54 = vsel %vm5722_vm1, %v5710_v15, %v5725_v61 }
 0x9fa   :  { %v5731_v38 = vsel %vm5721_vm2, %v5728_v33, %v5730_v56  ;;  %v5734_v1 = vsel %vm5722_vm1, %v5716_v43, %v5733_v5  ;;  %v5553_v58 = vshll.u32 %v13472_v59, %v13559_v19  ;;  %v5554_v63 = vshrl.u32 %v13549_v24, %v5552_v55 }
 0x9fb   :  { %v8534_v21 = vadd.s32 4294967294, %v5652_v45  ;;  %v13600_v7 = vmul.u32.u64.low %v13580_v52, %v5731_v38  ;;  %v13601_v11 = vmul.u32.u64.high %v13580_v52, %v5731_v38, %v13600_v7  ;;  %v5735_v17 = vsel %vm5721_vm2, %v5732_v47, %v5734_v1 }
 0x9fc   :  { %v5361_v45 = vsel %vm13484_vm11, 0, %v5359_v42  ;;  %v13611_v15 = vmul.u32.u64.low %v13580_v52, %v5735_v17  ;;  %v13612_v32 = vmul.u32.u64.high %v13580_v52, %v5735_v17, %v13611_v15  ;;  %vm5156_vm5 = vweird.f32 %v13081_v40 }
 0x9fd   :  { %vm8535_vm3 = vcmp.lt.s32.totalorder %v8534_v21, 0  ;;  %vm5364_vm8 = vweird.f32 %v13100_v27  ;;  %v5558_v53 = vshll.u32 %v5557_v36, 23  ;;  %v5727_v59 = vsel %vm5721_vm2, %v5724_v16, %v5726_v54 }
 0x9fe   :  { %v5655_v56 = vsel %vm8535_vm3, 0, %v8534_v21  ;;  %v5369_v19 = vxor.u32 2147483648, %v9475_v31  ;;  %v5746_v1 = vadd.s32 1, %v13601_v11  ;;  %vm5160_vm10 = vcmp.eq.s32.totalorder %v5158_v25, 0 }
 0x9ff   :  { %v5660_v14 = vsub.s32 4294967266, %v5655_v56  ;;  %vm5163_vm13 = vcmp.eq.s32.totalorder %v5158_v25, 2  ;;  %v5365_v46 = vadd.s32 3, %v5361_v45  ;;  %v15614_v21 = vxor.u32 2147483648, %v13477_v8 }
 0xa00   :  { %v15615_v42 = vxor.u32 2147483648, %v13465_v23  ;;  %v5372_v36 = vxor.u32 2147483648, %v13594_v51  ;;  %v5555_v3 = vor.u32 %v5554_v63, %v5553_v58  ;;  %v5743_v60 = vmul.u32 %v13580_v52, %v5727_v59 }
 0xa01   :  { %v5661_v24 = vadd.s32 127, %v5660_v14  ;;  %v5162_v55 = vsel %vm5160_vm10, %v13465_v23, %v15614_v21  ;;  %vm5745_vm9 = vc.u32 %v13612_v32, %v13600_v7  ;;  %v5366_v18 = vand.u32 3, %v5365_v46 }
 0xa02   :  { %v5165_v43 = vsel %vm5163_vm13, %v15615_v42, %v13477_v8  ;;  %v5559_v33 = vor.u32 4788187, %v5558_v53  ;;  %v5656_v61 = vsub.s32 32, %v5655_v56  ;;  %v5747_v47 = vsel %vm5745_vm9, %v5746_v1, %v13601_v11 }
 0xa03   :  { %vm5159_vm11 = vcmp.lt.s32.totalorder %v5158_v25, 2  ;;  %v5748_v16 = vadd.s32 %v5747_v47, %v5743_v60  ;;  %vm5368_vm14 = vcmp.eq.s32.totalorder %v5366_v18, 0  ;;  %vm5371_vm4 = vcmp.eq.s32.totalorder %v5366_v18, 2 }
 0xa04   :  { %v5166_v38 = vsel %vm5159_vm11, %v5162_v55, %v5165_v43  ;;  %v5662_v23 = vshll.u32 %v5661_v24, 23  ;;  %vm5367_vm7 = vcmp.lt.s32.totalorder %v5366_v18, 2  ;;  %v5370_v8 = vsel %vm5368_vm14, %v13594_v51, %v5369_v19 }
 0xa05   :  { %v5373_v5 = vsel %vm5371_vm4, %v5372_v36, %v9475_v31  ;;  %v5749_v54 = vadd.s32 536870912, %v5748_v16  ;;  %v5054_v58 = vand.u32 3, %v13502_v13  ;;  %v5057_v17 = vxor.u32 2147483648, %v13577_v10 }
 0xa06   :  { %v5374_v52 = vsel %vm5367_vm7, %v5370_v8, %v5373_v5  ;;  %v5658_v45 = vshrl.u32 %v13564_v26, %v5656_v61  ;;  %v5167_v25 = vsel %vm5156_vm5, nan, %v5166_v38  ;;  %v5060_v63 = vxor.u32 2147483648, %v13557_v28 }
 0xa07   :  { %v5375_v11 = vsel %vm5364_vm8, nan, %v5374_v52  ;;  %v5657_v15 = vshll.u32 %v13574_v6, %v5655_v56  ;;  %v13639_v51 = vshrl.u32 %v5749_v54, 30  ;;  %vm5056_vm15 = vcmp.eq.s32.totalorder %v5054_v58, 0 }
 0xa08   :  { %v8893_v31 = vpack.c.bf16 %v5375_v11, %v5167_v25  ;;  %v5663_v53 = vor.u32 4788187, %v5662_v23  ;;  %v5058_v13 = vsel %vm5056_vm15, %v13557_v28, %v5057_v17  ;;  %vm5059_vm0 = vcmp.eq.s32.totalorder %v5054_v58, 2 }
 0xa09   :  { %v5262_v26 = vand.u32 3, %v13540_v49  ;;  %v5751_v40 = vshll.u32 %v13639_v51, 30  ;;  %v5061_v27 = vsel %vm5059_vm0, %v5060_v63, %v13577_v10  ;;  %v5265_v14 = vxor.u32 2147483648, %v13587_v30 }
 0xa0a   :  { %8894 = vmatprep.subr.bf16.mxu0 %v8893_v31  ;;  %v5268_v59 = vxor.u32 2147483648, %v13582_v12  ;;  %v5560_v6 = vand.u32 2147483647, %v5559_v33  ;;  %v5659_v56 = vor.u32 %v5658_v45, %v5657_v15  ;;  %vm5055_vm6 = vcmp.lt.s32.totalorder %v5054_v58, 2 }
 0xa0b   :  { %vm5264_vm1 = vcmp.eq.s32.totalorder %v5262_v26, 0  ;;  %v5752_v19 = vsub.s32 %v5748_v16, %v5751_v40  ;;  %v5062_v1 = vsel %vm5055_vm6, %v5058_v13, %v5061_v27  ;;  %vm5267_vm2 = vcmp.eq.s32.totalorder %v5262_v26, 2 }
 0xa0c   :  { %v5266_v28 = vsel %vm5264_vm1, %v13582_v12, %v5265_v14  ;;  %v5562_v46 = vcvt.s32.f32 %v5555_v3  ;;  %v5664_v49 = vand.u32 2147483647, %v5663_v53  ;;  %vm5263_vm3 = vcmp.lt.s32.totalorder %v5262_v26, 2 }
 0xa0d   :  { %v5269_v24 = vsel %vm5267_vm2, %v5268_v59, %v13587_v30  ;;  %v5754_v21 = vsub.s32 0, %v5752_v19  ;;  %vm5052_vm5 = vweird.f32 %v13079_v48  ;;  %vm5260_vm8 = vweird.f32 %v13087_v44 }
 0xa0e   :  { %v5270_v10 = vsel %vm5263_vm3, %v5266_v28, %v5269_v24  ;;  %v15616_v55 = vand.u32 2147483647, %v13538_v29  ;;  %v15617_v42 = vcvt.s32.f32 %v13536_v35  ;;  %v5666_v36 = vcvt.s32.f32 %v5659_v56 }
 0xa0f   :  { %v5063_v60 = vsel %vm5052_vm5, nan, %v5062_v1  ;;  %v5271_v12 = vsel %vm5260_vm8, nan, %v5270_v10  ;;  %v5563_v18 = vmul.f32 %v5562_v46, %v5560_v6  ;;  %v8537_v3 = vmin.u32 %v5754_v21, %v5752_v19 }
 0xa10   :  { %v5459_v43 = vmul.f32 %v15617_v42, %v15616_v55  ;;  %v8895_v33 = vpack.c.bf16 %v5271_v12, %v5063_v60  ;;  %v5667_v61 = vmul.f32 %v5666_v36, %v5664_v49  ;;  %vm5378_vm10 = vcmp.lt.s32.totalorder %v13236_v4, 0 }
 0xa11   :  { %v5756_v47 = vclz %v8537_v3  ;;  %v5564_v16 = vxor.u32 2147483648, %v5563_v18  ;;  %vm5482_vm9 = vcmp.lt.s32.totalorder %v13251_v20, 0  ;;  %vm5586_vm11 = vcmp.lt.s32.totalorder %v13301_v41, 0 }
 0xa12   :  { %8896 = vmatpush1.bf16.msra.mxu0 %v8895_v33  ;;  %v5460_v30 = vxor.u32 2147483648, %v5459_v43  ;;  %v5668_v38 = vxor.u32 2147483648, %v5667_v61  ;;  %v5744_v23 = vadd.s32 %v13600_v7, %v13612_v32  ;;  %v15618_v54 = vand.u32 2147483647, %v13236_v4 }
 0xa13   :  { %v8538_v48 = vadd.s32 4294967294, %v5756_v47  ;;  %v5565_v29 = vsel %vm5482_vm9, %v5564_v16, %v5563_v18  ;;  %v15621_v58 = vand.u32 2147483647, %v13251_v20  ;;  %v15624_v15 = vand.u32 2147483647, %v13301_v41 }
 0xa14   :  { %v5461_v44 = vsel %vm5378_vm10, %v5460_v30, %v5459_v43  ;;  %vm13666_vm14 = vcmp.le.f32.partialorder %v15618_v54, 0.7853982  ;;  %v5669_v45 = vsel %vm5586_vm11, %v5668_v38, %v5667_v61  ;;  %v5670_v40 = vsub.s32 4, %v13554_v39 }
 0xa15   :  { %vm8539_vm13 = vcmp.lt.s32.totalorder %v8538_v48, 0  ;;  %vm13672_vm4 = vcmp.le.f32.partialorder %v15621_v58, 0.7853982  ;;  %v5464_v7 = vsel %vm13666_vm14, %v13236_v4, %v5461_v44  ;;  %vm13686_vm7 = vcmp.le.f32.partialorder %v15624_v15, 0.7853982 }
 0xa16   :  { %v5759_v35 = vsel %vm8539_vm13, 0, %v8538_v48  ;;  %v5568_v63 = vsel %vm13672_vm4, %v13251_v20, %v5565_v29  ;;  %v5672_v53 = vsel %vm13686_vm7, %v13301_v41, %v5669_v45  ;;  %9476 = vcosq.f32 %v5464_v7 }
 0xa17   :  { %v5760_v8 = vsub.s32 32, %v5759_v35  ;;  %v5764_v5 = vsub.s32 4294967266, %v5759_v35  ;;  %v5761_v32 = vshll.u32 %v5752_v19, %v5759_v35  ;;  %9478 = vcosq.f32 %v5568_v63 }
 0xa18   :  { %9480 = vcosq.f32 %v5672_v53  ;;  %v5566_v14 = vsub.s32 4, %v13453_v37  ;;  %v5462_v59 = vsub.s32 4, %v13390_v57  ;;  %v5671_v19 = vsel %vm5586_vm11, %v5670_v40, %v13554_v39 }
 0xa19   :  { %v5762_v25 = vshrl.u32 %v5744_v23, %v5760_v8  ;;  %v5765_v11 = vadd.s32 127, %v5764_v5  ;;  %9482 = vsinq.f32 %v5672_v53  ;;  %v5774_v28 = vsub.s32 4, %v13639_v51 }
 0xa1a   :  { %9484 = vsinq.f32 %v5568_v63  ;;  %v5567_v46 = vsel %vm5482_vm9, %v5566_v14, %v13453_v37  ;;  %v5463_v49 = vsel %vm5378_vm10, %v5462_v59, %v13390_v57  ;;  %v5673_v21 = vsel %vm13686_vm7, 0, %v5671_v19 }
 0xa1b   :  { %v5763_v13 = vor.u32 %v5762_v25, %v5761_v32  ;;  %v5766_v26 = vshll.u32 %v5765_v11, 23  ;;  %9486 = vsinq.f32 %v5464_v7  ;;  %vm5690_vm15 = vcmp.lt.s32.totalorder %v13443_v0, 0 }
 0xa1c   :  { %v15627_v10 = vand.u32 2147483647, %v13443_v0  ;;  %v5569_v37 = vsel %vm13672_vm4, 0, %v5567_v46  ;;  %v5775_v42 = vsel %vm5690_vm15, %v5774_v28, %v13639_v51  ;;  %v5465_v57 = vsel %vm13666_vm14, 0, %v5463_v49  ;;  %v8540_v46 = vld [vmem:[%s15382_s2 + $0xa0] sm:$0xff]  ;;  %v5805_v49 = vpop.permute.xlu0 %5804 }
 0xa1d   :  { %v5767_v27 = vor.u32 4788187, %v5766_v26  ;;  %v5770_v56 = vcvt.s32.f32 %v5763_v13  ;;  %v5677_v12 = vadd.s32 3, %v5673_v21  ;;  %v5573_v3 = vadd.s32 3, %v5569_v37 }
 0xa1e   :  { %vm13711_vm0 = vcmp.le.f32.partialorder %v15627_v10, 0.7853982  ;;  %v5469_v47 = vadd.s32 3, %v5465_v57  ;;  %vm5676_vm7 = vweird.f32 %v13301_v41  ;;  %v8541_v41 = vld [vmem:[%s15382_s2 + $0xa8] sm:$0xff] }
 0xa1f   :  { %v5768_v6 = vand.u32 2147483647, %v5767_v27  ;;  %v5777_v33 = vsel %vm13711_vm0, 0, %v5775_v42  ;;  %v5678_v48 = vand.u32 3, %v5677_v12  ;;  %v5574_v38 = vand.u32 3, %v5573_v3  ;;  %v5810_v42 = vpop.permute.xlu1 %5809 }
 0xa20   :  { %v9477_v43 = vpop.eup %9476  ;;  %v5781_v16 = vadd.s32 3, %v5777_v33  ;;  %v5470_v8 = vand.u32 3, %v5469_v47 }
 0xa21   :  { %v5771_v1 = vmul.f32 %v5770_v56, %v5768_v6  ;;  %v9479_v60 = vpop.eup %9478  ;;  %v5476_v54 = vxor.u32 2147483648, %v9477_v43  ;;  %vm5680_vm6 = vcmp.eq.s32.totalorder %v5678_v48, 0  ;;  %vm5683_vm1 = vcmp.eq.s32.totalorder %v5678_v48, 2 }
 0xa22   :  { %v9481_v18 = vpop.eup %9480  ;;  %v5580_v23 = vxor.u32 2147483648, %v9479_v60  ;;  %v5782_v52 = vand.u32 3, %v5781_v16  ;;  %vm5576_vm2 = vcmp.eq.s32.totalorder %v5574_v38, 0  ;;  %vm5579_vm3 = vcmp.eq.s32.totalorder %v5574_v38, 2 }
 0xa23   :  { %v5772_v24 = vxor.u32 2147483648, %v5771_v1  ;;  %v9483_v61 = vpop.eup %9482  ;;  %v5684_v35 = vxor.u32 2147483648, %v9481_v18  ;;  %vm5472_vm5 = vcmp.eq.s32.totalorder %v5470_v8, 0  ;;  %vm5475_vm8 = vcmp.eq.s32.totalorder %v5470_v8, 2 }
 0xa24   :  { %v9485_v51 = vpop.eup %9484  ;;  %v5681_v44 = vxor.u32 2147483648, %v9483_v61  ;;  %vm5679_vm10 = vcmp.lt.s32.totalorder %v5678_v48, 2  ;;  %vm5575_vm13 = vcmp.lt.s32.totalorder %v5574_v38, 2  ;;  %vm5787_vm9 = vcmp.eq.s32.totalorder %v5782_v52, 2 }
 0xa25   :  { %v5773_v55 = vsel %vm5690_vm15, %v5772_v24, %v5771_v1  ;;  %v9487_v30 = vpop.eup %9486  ;;  %v5577_v29 = vxor.u32 2147483648, %v9485_v51  ;;  %v5685_v17 = vsel %vm5683_vm1, %v5684_v35, %v9483_v61  ;;  %v5581_v32 = vsel %vm5579_vm3, %v5580_v23, %v9485_v51 }
 0xa26   :  { %v5776_v36 = vsel %vm13711_vm0, %v13443_v0, %v5773_v55  ;;  %v5473_v5 = vxor.u32 2147483648, %v9487_v30  ;;  %v5682_v58 = vsel %vm5680_vm6, %v9481_v18, %v5681_v44  ;;  %v5477_v15 = vsel %vm5475_vm8, %v5476_v54, %v9487_v30 }
 0xa27   :  { %9488 = vcosq.f32 %v5776_v36  ;;  %v5578_v7 = vsel %vm5576_vm2, %v9479_v60, %v5577_v29  ;;  %v5686_v53 = vsel %vm5679_vm10, %v5682_v58, %v5685_v17  ;;  %vm5784_vm11 = vcmp.eq.s32.totalorder %v5782_v52, 0 }
 0xa28   :  { %9490 = vsinq.f32 %v5776_v36  ;;  %v5474_v63 = vsel %vm5472_vm5, %v9477_v43, %v5473_v5  ;;  %v5582_v13 = vsel %vm5575_vm13, %v5578_v7, %v5581_v32  ;;  %vm5471_vm14 = vcmp.lt.s32.totalorder %v5470_v8, 2 }
 0xa29   :  { %vm5783_vm4 = vcmp.lt.s32.totalorder %v5782_v52, 2  ;;  %v5478_v27 = vsel %vm5471_vm14, %v5474_v63, %v5477_v15  ;;  %vm5572_vm15 = vweird.f32 %v13251_v20  ;;  %vm5780_vm0 = vweird.f32 %v13443_v0  ;;  %v8543_v0 = vld [vmem:[%s15382_s2 + $0xb8] sm:$0xff] }
 0xa2a   :  { %v5687_v59 = vsel %vm5676_vm7, nan, %v5686_v53  ;;  %v5583_v6 = vsel %vm5572_vm15, nan, %v5582_v13  ;;  %vm5468_vm6 = vweird.f32 %v13236_v4  ;;  %v15630_v20 = vmov 0.0   ;;  %v8542_v4 = vld [vmem:[%s15382_s2 + $0xb0] sm:$0xff] }
 0xa2b   :  { %v5479_v1 = vsel %vm5468_vm6, nan, %v5478_v27 }
 0xa2c   :  { %v8899_v28 = vpack.c.bf16 %v5687_v59, %v5479_v1 }
 0xa31   :  { %v9489_v45 = vpop.eup %9488 }
 0xa32   :  { %v9491_v25 = vpop.eup %9490  ;;  %v5788_v11 = vxor.u32 2147483648, %v9489_v45 }
 0xa33   :  { %v5785_v31 = vxor.u32 2147483648, %v9491_v25 }
 0xa34   :  { %v5789_v26 = vsel %vm5787_vm9, %v5788_v11, %v9491_v25 }
 0xa35   :  { %v5786_v40 = vsel %vm5784_vm11, %v9489_v45, %v5785_v31 }
 0xa36   :  { %v5790_v14 = vsel %vm5783_vm4, %v5786_v40, %v5789_v26 }
 0xa37   :  { %v5791_v56 = vsel %vm5780_vm0, nan, %v5790_v14 }
 0xa38   :  { %v8897_v19 = vpack.c.bf16 %v5791_v56, %v5583_v6 }
 0xa3a   :  { %8898 = vmatprep.subr.bf16.mxu0 %v8897_v19 }
 0xa3b   :  { %8900 = vmatpush1.bf16.msra.mxu0 %v8899_v28 }
 0xa3e   :  { %8548 = vmatmul.mubr.msk.f32.vlgmr.msra.gmra.mrb[20].mxu0 %vm1006_vm12, %v8540_v46 }
 0xa3f   :  { %5904 = vmatprep.mubr.f32.mxu0 %v15630_v20 }
 0xa42   :  { %8549 = vmatmul.mubr.msk.f32.gmra.mrb[22].mxu0 %vm1006_vm12, %v8541_v41 }
 0xa43   :  { %5910 = vmatprep.mubr.f32.mxu0 %v15630_v20 }
 0xa46   :  { %8550 = vmatmul.mubr.msk.f32.gmra.mrb[24].mxu0 %vm1006_vm12, %v8542_v4 }
 0xa47   :  { %5916 = vmatprep.mubr.f32.mxu0 %v15630_v20 }
 0xa4a   :  { %8551 = vmatmul.mubr.msk.f32.gmra.mrb[26].mxu0 %vm1006_vm12, %v8543_v0 }
 0xa4b   :  { %7790 = vmatprep.mubr.f32.mxu0 %v15630_v20 }
 0xb11   :  { %v5900_v24 = vpop.f32.mrb[20].mxu0 }
 0xb12   :  { %v13749_v21 = vadd.f32 %v5900_v24, %v5805_v49  ;;  %v5902_v10 = vpop.f32.mrb[21].mxu0 }
 0xb13   :  { %v13751_v39 = vadd.f32 %v5902_v10, %v5805_v49 }
 0xb14   :  { %v5923_v55 = vand.u32 2147483647, %v13749_v21  ;;  %v5926_v37 = vand.u32 2139095040, %v13749_v21 }
 0xb15   :  { %v6027_v43 = vand.u32 2147483647, %v13751_v39  ;;  %v6030_v57 = vand.u32 2139095040, %v13751_v39  ;;  %v5906_v36 = vpop.f32.mrb[22].mxu0 }
 0xb16   :  { %v5927_v60 = vshrl.u32 %v5926_v37, 23  ;;  %v13757_v12 = vadd.f32 %v5906_v36, %v5810_v42  ;;  %v5908_v18 = vpop.f32.mrb[23].mxu0  ;;  %v5930_v3 = vand.u32 8388607, %v5923_v55 }
 0xb17   :  { %v6031_v33 = vshrl.u32 %v6030_v57, 23  ;;  %v6034_v61 = vand.u32 8388607, %v6027_v43  ;;  %v13770_v45 = vadd.f32 %v5908_v18, %v5810_v42 }
 0xb18   :  { %v8552_v47 = vadd.s32 4294967169, %v5927_v60  ;;  %v6134_v30 = vand.u32 2139095040, %v13757_v12  ;;  %v5931_v38 = vor.u32 8388608, %v5930_v3  ;;  %v15442_v63 = vand.u32 2147483647, %v13757_v12 }
 0xb19   :  { %v8556_v51 = vadd.s32 4294967169, %v6031_v33  ;;  %v13764_v16 = vpop.f32.mrb[24].mxu0  ;;  %v6035_v44 = vor.u32 8388608, %v6034_v61 }
 0xb1a   :  { %v5933_v48 = vadd.s32 1, %v8552_v47  ;;  %v6135_v29 = vshrl.u32 %v6134_v30, 23  ;;  %v13766_v23 = vpop.f32.mrb[25].mxu0  ;;  %v13774_v32 = vshll.u32 %v5931_v38, 8 }
 0xb1b   :  { %v6037_v35 = vadd.s32 1, %v8556_v51  ;;  %v13778_v11 = vshll.u32 %v6035_v44, 8 }
 0xb1c   :  { %vm5934_vm1 = vcmp.gt.s32.totalorder %v5933_v48, 0  ;;  %v8560_v5 = vadd.s32 4294967169, %v6135_v29 }
 0xb1d   :  { %v5935_v8 = vsel %vm5934_vm1, %v5933_v48, 0  ;;  %vm6038_vm2 = vcmp.gt.s32.totalorder %v6037_v35, 0  ;;  %v13768_v54 = vpop.f32.mrb[26].mxu0 }
 0xb1e   :  { %v5936_v52 = vshrl.u32 %v5935_v8, 5  ;;  %v5937_v58 = vand.u32 31, %v5935_v8  ;;  %v6039_v17 = vsel %vm6038_vm2, %v6037_v35, 0  ;;  %v13772_v7 = vpop.f32.mrb[27].mxu0  ;;  %v13782_v13 = vadd.s32 1, %v8560_v5 }
 0xb1f   :  { %v13776_v25 = vshrl.u32 %v6039_v17, 5  ;;  %v6041_v53 = vand.u32 31, %v6039_v17 }
 0xb20   :  { %v5938_v15 = vsub.s32 32, %v5937_v58  ;;  %v5940_v31 = vshll.u32 %v15510_v22, %v5937_v58  ;;  %v5943_v26 = vshll.u32 %v15479_v34, %v5937_v58  ;;  %v5946_v40 = vshll.u32 %v15478_v50, %v5937_v58 }
 0xb21   :  { %v5949_v27 = vshll.u32 %v15480_v2, %v5937_v58  ;;  %v5952_v14 = vshll.u32 %v15488_v62, %v5937_v58  ;;  %vm5955_vm3 = vcmp.lt.s32.totalorder %v5936_v52, 1  ;;  %vm5956_vm5 = vcmp.lt.s32.totalorder %v5936_v52, 2 }
 0xb22   :  { %v5941_v59 = vshrl.u32 %v15479_v34, %v5938_v15  ;;  %v5944_v6 = vshrl.u32 %v15478_v50, %v5938_v15  ;;  %v5947_v56 = vshrl.u32 %v15480_v2, %v5938_v15  ;;  %v5939_v19 = vshrl.u32 %v15510_v22, %v5938_v15 }
 0xb23   :  { %v5950_v1 = vshrl.u32 %v15488_v62, %v5938_v15  ;;  %v5953_v28 = vshrl.u32 %v15505_v9, %v5938_v15  ;;  %v6042_v0 = vsub.s32 32, %v6041_v53  ;;  %vm5957_vm8 = vcmp.lt.s32.totalorder %v5936_v52, 3 }
 0xb24   :  { %v5942_v46 = vor.u32 %v5941_v59, %v5940_v31  ;;  %v5945_v41 = vor.u32 %v5944_v6, %v5943_v26  ;;  %v5948_v4 = vor.u32 %v5947_v56, %v5946_v40  ;;  %vm5958_vm10 = vcmp.lt.s32.totalorder %v5936_v52, 4 }
 0xb25   :  { %v5951_v49 = vor.u32 %v5950_v1, %v5949_v27  ;;  %v5954_v24 = vor.u32 %v5953_v28, %v5952_v14  ;;  %v6044_v3 = vshll.u32 %v15510_v22, %v6041_v53  ;;  %v6045_v47 = vshrl.u32 %v15479_v34, %v6042_v0 }
 0xb26   :  { %v5959_v10 = vsel %vm5955_vm3, %v5939_v19, %v5942_v46  ;;  %v5960_v37 = vsel %vm5958_vm10, %v5948_v4, 2102212464  ;;  %v5963_v42 = vsel %vm5955_vm3, %v5942_v46, %v5945_v41  ;;  %v5967_v57 = vsel %vm5955_vm3, %v5945_v41, %v5948_v4 }
 0xb27   :  { %v5961_v36 = vsel %vm5957_vm8, %v5945_v41, %v5960_v37  ;;  %v5964_v60 = vsel %vm5958_vm10, %v5951_v49, 920167782  ;;  %v5968_v18 = vsel %vm5958_vm10, %v5954_v24, 1326507024  ;;  %v6047_v51 = vshll.u32 %v15479_v34, %v6041_v53 }
 0xb28   :  { %v5965_v33 = vsel %vm5957_vm8, %v5948_v4, %v5964_v60  ;;  %v5969_v61 = vsel %vm5957_vm8, %v5951_v49, %v5968_v18  ;;  %v5962_v30 = vsel %vm5956_vm5, %v5959_v10, %v5961_v36  ;;  %v6048_v44 = vshrl.u32 %v15478_v50, %v6042_v0 }
 0xb29   :  { %v5966_v48 = vsel %vm5956_vm5, %v5963_v42, %v5965_v33  ;;  %v5970_v38 = vsel %vm5956_vm5, %v5967_v57, %v5969_v61  ;;  %v6046_v58 = vor.u32 %v6045_v47, %v6044_v3  ;;  %v6050_v15 = vshll.u32 %v15478_v50, %v6041_v53 }
 0xb2a   :  { %v13805_v35 = vmul.u32.u64.low %v13774_v32, %v5970_v38  ;;  %v13806_v29 = vmul.u32.u64.high %v13774_v32, %v5970_v38, %v13805_v35  ;;  %v13809_v8 = vmul.u32.u64.low %v13774_v32, %v5966_v48  ;;  %v13810_v5 = vmul.u32.u64.high %v13774_v32, %v5966_v48, %v13809_v8 }
 0xb2b   :  { %v6049_v17 = vor.u32 %v6048_v44, %v6047_v51  ;;  %v6051_v31 = vshrl.u32 %v15480_v2, %v6042_v0  ;;  %v6043_v52 = vshrl.u32 %v15510_v22, %v6042_v0  ;;  %v6053_v26 = vshll.u32 %v15480_v2, %v6041_v53 }
 0xb2c   :  { %v6054_v40 = vshrl.u32 %v15488_v62, %v6042_v0  ;;  %v6057_v27 = vshrl.u32 %v15505_v9, %v6042_v0  ;;  %v5978_v14 = vmul.u32 %v13774_v32, %v5962_v30  ;;  %v6056_v6 = vshll.u32 %v15488_v62, %v6041_v53 }
 0xb2d   :  { %v6052_v59 = vor.u32 %v6051_v31, %v6050_v15  ;;  %vm6059_vm13 = vcmp.lt.s32.totalorder %v13776_v25, 1  ;;  %vm5980_vm9 = vc.u32 %v13806_v29, %v13809_v8  ;;  %v5981_v56 = vadd.s32 1, %v13810_v5 }
 0xb2e   :  { %v6055_v19 = vor.u32 %v6054_v40, %v6053_v26  ;;  %vm6060_vm11 = vcmp.lt.s32.totalorder %v13776_v25, 2  ;;  %v6058_v1 = vor.u32 %v6057_v27, %v6056_v6  ;;  %vm6061_vm14 = vcmp.lt.s32.totalorder %v13776_v25, 3 }
 0xb2f   :  { %vm6062_vm4 = vcmp.lt.s32.totalorder %v13776_v25, 4  ;;  %v6067_v28 = vsel %vm6059_vm13, %v6046_v58, %v6049_v17  ;;  %v5982_v32 = vsel %vm5980_vm9, %v5981_v56, %v13810_v5  ;;  %v6071_v41 = vsel %vm6059_vm13, %v6049_v17, %v6052_v59 }
 0xb30   :  { %v6064_v46 = vsel %vm6062_vm4, %v6052_v59, 2102212464  ;;  %v6068_v53 = vsel %vm6062_vm4, %v6055_v19, 920167782  ;;  %v5983_v4 = vadd.s32 %v5982_v32, %v5978_v14  ;;  %v6063_v0 = vsel %vm6059_vm13, %v6043_v52, %v6046_v58 }
 0xb31   :  { %v6069_v49 = vsel %vm6061_vm14, %v6052_v59, %v6068_v53  ;;  %v6072_v24 = vsel %vm6062_vm4, %v6058_v1, 1326507024  ;;  %v6065_v10 = vsel %vm6061_vm14, %v6049_v17, %v6064_v46  ;;  %vm6142_vm7 = vcmp.gt.s32.totalorder %v13782_v13, 0 }
 0xb32   :  { %v6070_v37 = vsel %vm6060_vm11, %v6067_v28, %v6069_v49  ;;  %v6073_v42 = vsel %vm6061_vm14, %v6055_v19, %v6072_v24  ;;  %v5984_v57 = vadd.s32 536870912, %v5983_v4  ;;  %v6138_v61 = vand.u32 8388607, %v15442_v63 }
 0xb33   :  { %v6074_v36 = vsel %vm6060_vm11, %v6071_v41, %v6073_v42  ;;  %v13835_v60 = vmul.u32.u64.low %v13778_v11, %v6070_v37  ;;  %v13836_v18 = vmul.u32.u64.high %v13778_v11, %v6070_v37, %v13835_v60  ;;  %v6143_v47 = vsel %vm6142_vm7, %v13782_v13, 0 }
 0xb34   :  { %v13840_v3 = vmul.u32.u64.low %v13778_v11, %v6074_v36  ;;  %v13841_v33 = vmul.u32.u64.high %v13778_v11, %v6074_v36, %v13840_v3  ;;  %v13846_v51 = vshrl.u32 %v5984_v57, 30  ;;  %v6066_v30 = vsel %vm6060_vm11, %v6063_v0, %v6065_v10 }
 0xb35   :  { %v6145_v48 = vand.u32 31, %v6143_v47  ;;  %v6238_v38 = vand.u32 2139095040, %v13770_v45  ;;  %v6085_v35 = vadd.s32 1, %v13836_v18  ;;  %v6082_v58 = vmul.u32 %v13778_v11, %v6066_v30 }
 0xb36   :  { %v5986_v44 = vshll.u32 %v13846_v51, 30  ;;  %vm6084_vm15 = vc.u32 %v13841_v33, %v13835_v60  ;;  %v6139_v17 = vor.u32 8388608, %v6138_v61  ;;  %v6144_v14 = vshrl.u32 %v6143_v47, 5 }
 0xb37   :  { %v6146_v5 = vsub.s32 32, %v6145_v48  ;;  %v6086_v15 = vsel %vm6084_vm15, %v6085_v35, %v13836_v18  ;;  %v6239_v25 = vshrl.u32 %v6238_v38, 23  ;;  %v6148_v52 = vshll.u32 %v15510_v22, %v6145_v48 }
 0xb38   :  { %v13856_v13 = vsub.s32 %v5983_v4, %v5986_v44  ;;  %v6087_v31 = vadd.s32 %v6086_v15, %v6082_v58  ;;  %v6151_v11 = vshll.u32 %v15479_v34, %v6145_v48  ;;  %v6154_v19 = vshll.u32 %v15478_v50, %v6145_v48 }
 0xb39   :  { %v6149_v26 = vshrl.u32 %v15479_v34, %v6146_v5  ;;  %v6152_v40 = vshrl.u32 %v15478_v50, %v6146_v5  ;;  %v6155_v59 = vshrl.u32 %v15480_v2, %v6146_v5  ;;  %v6179_v1 = vshll.u32 %v6139_v17, 8 }
 0xb3a   :  { %v5989_v27 = vsub.s32 0, %v13856_v13  ;;  %v6088_v6 = vadd.s32 536870912, %v6087_v31  ;;  %v6157_v46 = vshll.u32 %v15480_v2, %v6145_v48  ;;  %v6158_v53 = vshrl.u32 %v15488_v62, %v6146_v5 }
 0xb3b   :  { %v6150_v56 = vor.u32 %v6149_v26, %v6148_v52  ;;  %v6153_v32 = vor.u32 %v6152_v40, %v6151_v11  ;;  %v6156_v4 = vor.u32 %v6155_v59, %v6154_v19  ;;  %v6160_v0 = vshll.u32 %v15488_v62, %v6145_v48 }
 0xb3c   :  { %v8553_v28 = vmin.u32 %v5989_v27, %v13856_v13  ;;  %v13869_v41 = vshrl.u32 %v6088_v6, 30  ;;  %v6161_v49 = vshrl.u32 %v15505_v9, %v6146_v5  ;;  %v6159_v10 = vor.u32 %v6158_v53, %v6157_v46 }
 0xb3d   :  { %vm6163_vm0 = vcmp.lt.s32.totalorder %v6144_v14, 1  ;;  %v8564_v37 = vadd.s32 4294967169, %v6239_v25  ;;  %vm6164_vm6 = vcmp.lt.s32.totalorder %v6144_v14, 2  ;;  %vm6166_vm1 = vcmp.lt.s32.totalorder %v6144_v14, 4 }
 0xb3e   :  { %v5991_v24 = vclz %v8553_v28  ;;  %v6090_v42 = vshll.u32 %v13869_v41, 30  ;;  %v6162_v57 = vor.u32 %v6161_v49, %v6160_v0  ;;  %vm6165_vm2 = vcmp.lt.s32.totalorder %v6144_v14, 3 }
 0xb3f   :  { %v6171_v18 = vsel %vm6163_vm0, %v6150_v56, %v6153_v32  ;;  %v6172_v3 = vsel %vm6166_vm1, %v6159_v10, 920167782  ;;  %v6168_v47 = vsel %vm6166_vm1, %v6156_v4, 2102212464  ;;  %v6175_v48 = vsel %vm6163_vm0, %v6153_v32, %v6156_v4 }
 0xb40   :  { %v8554_v36 = vadd.s32 4294967294, %v5991_v24  ;;  %v13875_v61 = vsub.s32 %v6087_v31, %v6090_v42  ;;  %v6173_v30 = vsel %vm6165_vm2, %v6156_v4, %v6172_v3  ;;  %v6147_v38 = vshrl.u32 %v15510_v22, %v6146_v5  ;;  %v5815_v3 = vpop.permute.xlu0 %5814 }
 0xb41   :  { %v6174_v44 = vsel %vm6164_vm6, %v6171_v18, %v6173_v30  ;;  %v6176_v35 = vsel %vm6166_vm1, %v6162_v57, 1326507024  ;;  %v6245_v25 = vadd.s32 1, %v8564_v37  ;;  %v6169_v26 = vsel %vm6165_vm2, %v6153_v32, %v6168_v47 }
 0xb42   :  { %vm8555_vm3 = vcmp.lt.s32.totalorder %v8554_v36, 0  ;;  %v6093_v17 = vsub.s32 0, %v13875_v61  ;;  %v6177_v15 = vsel %vm6165_vm2, %v6159_v10, %v6176_v35  ;;  %v6167_v31 = vsel %vm6163_vm0, %v6147_v38, %v6150_v56 }
 0xb43   :  { %v5994_v58 = vsel %vm8555_vm3, 0, %v8554_v36  ;;  %v6178_v40 = vsel %vm6164_vm6, %v6175_v48, %v6177_v15  ;;  %vm6246_vm5 = vcmp.gt.s32.totalorder %v6245_v25, 0  ;;  %v15441_v28 = vand.u32 2147483647, %v13770_v45 }
 0xb44   :  { %v5999_v52 = vsub.s32 4294967266, %v5994_v58  ;;  %v8557_v27 = vmin.u32 %v6093_v17, %v13875_v61  ;;  %v13887_v11 = vmul.u32.u64.low %v6179_v1, %v6178_v40  ;;  %v13888_v5 = vmul.u32.u64.high %v6179_v1, %v6178_v40, %v13887_v11 }
 0xb45   :  { %v13890_v59 = vmul.u32.u64.low %v6179_v1, %v6174_v44  ;;  %v13891_v6 = vmul.u32.u64.high %v6179_v1, %v6174_v44, %v13890_v59  ;;  %v6247_v46 = vsel %vm6246_vm5, %v6245_v25, 0  ;;  %v5995_v53 = vsub.s32 32, %v5994_v58 }
 0xb46   :  { %v6095_v19 = vclz %v8557_v27  ;;  %v6000_v56 = vadd.s32 127, %v5999_v52  ;;  %v6170_v32 = vsel %vm6164_vm6, %v6167_v31, %v6169_v26  ;;  %v6249_v4 = vand.u32 31, %v6247_v46 }
 0xb47   :  { %vm6188_vm8 = vc.u32 %v13888_v5, %v13890_v59  ;;  %v5979_v49 = vadd.s32 %v13809_v8, %v13806_v29  ;;  %v6189_v24 = vadd.s32 1, %v13891_v6  ;;  %v6186_v10 = vmul.u32 %v6179_v1, %v6170_v32 }
 0xb48   :  { %v8558_v0 = vadd.s32 4294967294, %v6095_v19  ;;  %v6242_v37 = vand.u32 8388607, %v15441_v28  ;;  %v6001_v57 = vshll.u32 %v6000_v56, 23  ;;  %v6250_v36 = vsub.s32 32, %v6249_v4 }
 0xb49   :  { %v5997_v42 = vshrl.u32 %v5979_v49, %v5995_v53  ;;  %v6190_v14 = vsel %vm6188_vm8, %v6189_v24, %v13891_v6  ;;  %v5996_v47 = vshll.u32 %v13856_v13, %v5994_v58  ;;  %v13906_v29 = vadd.f32 %v13764_v16, %v5815_v3 }
 0xb4a   :  { %vm8559_vm10 = vcmp.lt.s32.totalorder %v8558_v0, 0  ;;  %v6191_v18 = vadd.s32 %v6190_v14, %v6186_v10  ;;  %v6243_v38 = vor.u32 8388608, %v6242_v37  ;;  %v6002_v1 = vor.u32 4788187, %v6001_v57 }
 0xb4b   :  { %v6098_v30 = vsel %vm8559_vm10, 0, %v8558_v0  ;;  %v5998_v8 = vor.u32 %v5997_v42, %v5996_v47  ;;  %v6253_v44 = vshrl.u32 %v15479_v34, %v6250_v36  ;;  %v6256_v35 = vshrl.u32 %v15478_v50, %v6250_v36 }
 0xb4c   :  { %v6192_v48 = vadd.s32 536870912, %v6191_v18  ;;  %v6103_v17 = vsub.s32 4294967266, %v6098_v30  ;;  %v6259_v25 = vshrl.u32 %v15480_v2, %v6250_v36  ;;  %v6262_v52 = vshrl.u32 %v15488_v62, %v6250_v36 }
 0xb4d   :  { %v6252_v13 = vshll.u32 %v15510_v22, %v6249_v4  ;;  %v6255_v58 = vshll.u32 %v15479_v34, %v6249_v4  ;;  %v6261_v16 = vshll.u32 %v15480_v2, %v6249_v4  ;;  %v6265_v31 = vshrl.u32 %v15505_v9, %v6250_v36 }
 0xb4e   :  { %v13910_v15 = vshrl.u32 %v6192_v48, 30  ;;  %v6248_v40 = vshrl.u32 %v6247_v46, 5  ;;  %v6258_v27 = vshll.u32 %v15478_v50, %v6249_v4  ;;  %v13921_v11 = vadd.f32 %v13766_v23, %v5815_v3 }
 0xb4f   :  { %v6254_v6 = vor.u32 %v6253_v44, %v6252_v13  ;;  %v6257_v19 = vor.u32 %v6256_v35, %v6255_v58  ;;  %v6263_v53 = vor.u32 %v6262_v52, %v6261_v16  ;;  %v6264_v56 = vshll.u32 %v15488_v62, %v6249_v4 }
 0xb50   :  { %v6194_v26 = vshll.u32 %v13910_v15, 30  ;;  %v6083_v32 = vadd.s32 %v13835_v60, %v13841_v33  ;;  %v6104_v0 = vadd.s32 127, %v6103_v17  ;;  %v6260_v24 = vor.u32 %v6259_v25, %v6258_v27 }
 0xb51   :  { %v6003_v10 = vand.u32 2147483647, %v6002_v1  ;;  %v6005_v37 = vcvt.s32.f32 %v5998_v8  ;;  %v6266_v46 = vor.u32 %v6265_v31, %v6264_v56  ;;  %v6283_v42 = vshll.u32 %v6243_v38, 8 }
 0xb52   :  { %v13926_v49 = vsub.s32 %v6191_v18, %v6194_v26  ;;  %v6099_v57 = vsub.s32 32, %v6098_v30  ;;  %vm6267_vm13 = vcmp.lt.s32.totalorder %v6248_v40, 1  ;;  %vm6270_vm9 = vcmp.lt.s32.totalorder %v6248_v40, 4 }
 0xb53   :  { %v6251_v14 = vshrl.u32 %v15510_v22, %v6250_v36  ;;  %vm6269_vm11 = vcmp.lt.s32.totalorder %v6248_v40, 3  ;;  %v6275_v4 = vsel %vm6267_vm13, %v6254_v6, %v6257_v19  ;;  %v6276_v3 = vsel %vm6270_vm9, %v6263_v53, 920167782 }
 0xb54   :  { %v6197_v23 = vsub.s32 0, %v13926_v49  ;;  %v6105_v60 = vshll.u32 %v6104_v0, 23  ;;  %vm6268_vm14 = vcmp.lt.s32.totalorder %v6248_v40, 2  ;;  %v6272_v33 = vsel %vm6270_vm9, %v6260_v24, 2102212464 }
 0xb55   :  { %v6277_v18 = vsel %vm6269_vm11, %v6260_v24, %v6276_v3  ;;  %v6279_v38 = vsel %vm6267_vm13, %v6257_v19, %v6260_v24  ;;  %v6280_v8 = vsel %vm6270_vm9, %v6266_v46, 1326507024  ;;  %v6100_v1 = vshll.u32 %v13875_v61, %v6098_v30 }
 0xb56   :  { %v8561_v47 = vmin.u32 %v6197_v23, %v13926_v49  ;;  %v6278_v48 = vsel %vm6268_vm14, %v6275_v4, %v6277_v18  ;;  %v6101_v44 = vshrl.u32 %v6083_v32, %v6099_v57  ;;  %v6271_v36 = vsel %vm6267_vm13, %v6251_v14, %v6254_v6 }
 0xb57   :  { %v6281_v35 = vsel %vm6269_vm11, %v6263_v53, %v6280_v8  ;;  %v6273_v17 = vsel %vm6269_vm11, %v6257_v19, %v6272_v33  ;;  %v13937_v52 = vmul.u32.u64.low %v6283_v42, %v6278_v48  ;;  %v13938_v13 = vmul.u32.u64.high %v6283_v42, %v6278_v48, %v13937_v52 }
 0xb58   :  { %v6282_v25 = vsel %vm6268_vm14, %v6279_v38, %v6281_v35  ;;  %v6006_v58 = vmul.f32 %v6005_v37, %v6003_v10  ;;  %v6106_v16 = vor.u32 4788187, %v6105_v60  ;;  %v6199_v27 = vclz %v8561_v47  ;;  %v13961_v47 = vpop.permute.xlu1 %5819 }
 0xb59   :  { %v13941_v31 = vmul.u32.u64.low %v6283_v42, %v6282_v25  ;;  %v13942_v26 = vmul.u32.u64.high %v6283_v42, %v6282_v25, %v13941_v31  ;;  %v6342_v56 = vand.u32 2139095040, %v13906_v29  ;;  %v6102_v61 = vor.u32 %v6101_v44, %v6100_v1 }
 0xb5a   :  { %v6274_v30 = vsel %vm6268_vm14, %v6271_v36, %v6273_v17  ;;  %v6446_v6 = vand.u32 2139095040, %v13921_v11  ;;  %v6293_v19 = vadd.s32 1, %v13938_v13  ;;  %v6007_v32 = vxor.u32 2147483648, %v6006_v58 }
 0xb5b   :  { %v6343_v53 = vshrl.u32 %v6342_v56, 23  ;;  %v6009_v0 = vsub.s32 4, %v13846_v51  ;;  %v6107_v24 = vand.u32 2147483647, %v6106_v16  ;;  %v15439_v10 = vand.u32 2147483647, %v13906_v29 }
 0xb5c   :  { %v8562_v37 = vadd.s32 4294967294, %v6199_v27  ;;  %v6290_v46 = vmul.u32 %v6283_v42, %v6274_v30  ;;  %vm6292_vm4 = vc.u32 %v13942_v26, %v13937_v52  ;;  %v6109_v23 = vcvt.s32.f32 %v6102_v61 }
 0xb5d   :  { %v8568_v57 = vadd.s32 4294967169, %v6343_v53  ;;  %v6294_v40 = vsel %vm6292_vm4, %v6293_v19, %v13938_v13  ;;  %v6447_v14 = vshrl.u32 %v6446_v6, 23  ;;  %vm5925_vm7 = vcmp.lt.s32.totalorder %v13749_v21, 0 }
 0xb5e   :  { %v6295_v4 = vadd.s32 %v6294_v40, %v6290_v46  ;;  %v6008_v60 = vsel %vm5925_vm7, %v6007_v32, %v6006_v58  ;;  %v13955_v33 = vsel %vm5925_vm7, %v6009_v0, %v13846_v51  ;;  %v13957_v18 = vmul.f32 %v6109_v23, %v6107_v24 }
 0xb5f   :  { %v6349_v3 = vadd.s32 1, %v8568_v57  ;;  %v6346_v42 = vand.u32 8388607, %v15439_v10  ;;  %vm8563_vm15 = vcmp.lt.s32.totalorder %v8562_v37, 0  ;;  %v8572_v38 = vadd.s32 4294967169, %v6447_v14 }
 0xb60   :  { %v6296_v48 = vadd.s32 536870912, %v6295_v4  ;;  %vm13965_vm6 = vcmp.le.f32.partialorder %v5923_v55, 0.7853982  ;;  %v13971_v51 = vadd.f32 %v13768_v54, %v13961_v47  ;;  %v13978_v36 = vadd.s32 %v13890_v59, %v13888_v5 }
 0xb61   :  { %vm6350_vm0 = vcmp.gt.s32.totalorder %v6349_v3, 0  ;;  %v13985_v55 = vsel %vm13965_vm6, %v13749_v21, %v6008_v60  ;;  %v6111_v25 = vxor.u32 2147483648, %v13957_v18  ;;  %v13988_v54 = vsel %vm8563_vm15, 0, %v8562_v37 }
 0xb62   :  { %v6351_v1 = vsel %vm6350_vm0, %v6349_v3, 0  ;;  %v13980_v35 = vshrl.u32 %v6296_v48, 30  ;;  %v6347_v16 = vor.u32 8388608, %v6346_v42  ;;  %v6453_v5 = vadd.s32 1, %v8572_v38 }
 0xb63   :  { %v6353_v17 = vand.u32 31, %v6351_v1  ;;  %v6352_v59 = vshrl.u32 %v6351_v1, 5  ;;  %v15440_v40 = vand.u32 2147483647, %v13921_v11  ;;  %vm6029_vm1 = vcmp.lt.s32.totalorder %v13751_v39, 0 }
 0xb64   :  { %v6298_v58 = vshll.u32 %v13980_v35, 30  ;;  %v6207_v14 = vsub.s32 4294967266, %v13988_v54  ;;  %v6387_v48 = vshll.u32 %v6347_v16, 8  ;;  %vm6454_vm3 = vcmp.gt.s32.totalorder %v6453_v5, 0 }
 0xb65   :  { %v6354_v31 = vsub.s32 32, %v6353_v17  ;;  %v6356_v27 = vshll.u32 %v15510_v22, %v6353_v17  ;;  %v6359_v56 = vshll.u32 %v15479_v34, %v6353_v17  ;;  %v6362_v61 = vshll.u32 %v15478_v50, %v6353_v17 }
 0xb66   :  { %v13995_v30 = vsub.s32 %v6295_v4, %v6298_v58  ;;  %v6365_v53 = vshll.u32 %v15480_v2, %v6353_v17  ;;  %v6368_v24 = vshll.u32 %v15488_v62, %v6353_v17  ;;  %vm6371_vm2 = vcmp.lt.s32.totalorder %v6352_v59, 1 }
 0xb67   :  { %v6357_v6 = vshrl.u32 %v15479_v34, %v6354_v31  ;;  %v6360_v19 = vshrl.u32 %v15478_v50, %v6354_v31  ;;  %v6363_v32 = vshrl.u32 %v15480_v2, %v6354_v31  ;;  %v6366_v0 = vshrl.u32 %v15488_v62, %v6354_v31 }
 0xb68   :  { %v6369_v37 = vshrl.u32 %v15505_v9, %v6354_v31  ;;  %v6301_v46 = vsub.s32 0, %v13995_v30  ;;  %v6355_v38 = vshrl.u32 %v15510_v22, %v6354_v31  ;;  %vm6372_vm5 = vcmp.lt.s32.totalorder %v6352_v59, 2 }
 0xb69   :  { %v6358_v57 = vor.u32 %v6357_v6, %v6356_v27  ;;  %v6361_v23 = vor.u32 %v6360_v19, %v6359_v56  ;;  %v6364_v4 = vor.u32 %v6363_v32, %v6362_v61  ;;  %v6367_v3 = vor.u32 %v6366_v0, %v6365_v53 }
 0xb6a   :  { %v6370_v60 = vor.u32 %v6369_v37, %v6368_v24  ;;  %v8565_v42 = vmin.u32 %v6301_v46, %v13995_v30  ;;  %vm6374_vm8 = vcmp.lt.s32.totalorder %v6352_v59, 4  ;;  %vm6373_vm10 = vcmp.lt.s32.totalorder %v6352_v59, 3 }
 0xb6b   :  { %v6379_v1 = vsel %vm6371_vm2, %v6358_v57, %v6361_v23  ;;  %v6376_v58 = vsel %vm6374_vm8, %v6364_v4, 2102212464  ;;  %v6380_v27 = vsel %vm6374_vm8, %v6367_v3, 920167782  ;;  %v6375_v56 = vsel %vm6371_vm2, %v6355_v38, %v6358_v57 }
 0xb6c   :  { %v6303_v17 = vclz %v8565_v42  ;;  %v6381_v6 = vsel %vm6373_vm10, %v6364_v4, %v6380_v27  ;;  %v6383_v19 = vsel %vm6371_vm2, %v6361_v23, %v6364_v4  ;;  %v6384_v61 = vsel %vm6374_vm8, %v6370_v60, 1326507024 }
 0xb6d   :  { %v6377_v32 = vsel %vm6373_vm10, %v6361_v23, %v6376_v58  ;;  %v6382_v0 = vsel %vm6372_vm5, %v6379_v1, %v6381_v6  ;;  %v6385_v24 = vsel %vm6373_vm10, %v6367_v3, %v6384_v61  ;;  %v6208_v16 = vadd.s32 127, %v6207_v14 }
 0xb6e   :  { %v8566_v53 = vadd.s32 4294967294, %v6303_v17  ;;  %v6386_v37 = vsel %vm6372_vm5, %v6383_v19, %v6385_v24  ;;  %v14012_v31 = vmul.u32.u64.low %v6387_v48, %v6382_v0  ;;  %v14013_v46 = vmul.u32.u64.high %v6387_v48, %v6382_v0, %v14012_v31 }
 0xb6f   :  { %v14016_v42 = vmul.u32.u64.low %v6387_v48, %v6386_v37  ;;  %v14017_v10 = vmul.u32.u64.high %v6387_v48, %v6386_v37, %v14016_v42  ;;  %v6455_v57 = vsel %vm6454_vm3, %v6453_v5, 0  ;;  %v6378_v23 = vsel %vm6372_vm5, %v6375_v56, %v6377_v32 }
 0xb70   :  { %vm8567_vm13 = vcmp.lt.s32.totalorder %v8566_v53, 0  ;;  %v6450_v3 = vand.u32 8388607, %v15440_v40  ;;  %v6457_v14 = vand.u32 31, %v6455_v57  ;;  %v14028_v60 = vsel %vm6029_vm1, %v6111_v25, %v13957_v18 }
 0xb71   :  { %v14020_v4 = vsel %vm8567_vm13, 0, %v8566_v53  ;;  %v6203_v38 = vsub.s32 32, %v13988_v54  ;;  %v6550_v17 = vand.u32 2139095040, %v13971_v51  ;;  %v6397_v58 = vadd.s32 1, %v14013_v46 }
 0xb72   :  { %v6311_v59 = vsub.s32 4294967266, %v14020_v4  ;;  %v6458_v27 = vsub.s32 32, %v6457_v14  ;;  %v6209_v56 = vshll.u32 %v6208_v16, 23  ;;  %v6291_v6 = vadd.s32 %v13937_v52, %v13942_v26 }
 0xb73   :  { %v6394_v18 = vmul.u32 %v6387_v48, %v6378_v23  ;;  %vm6396_vm9 = vc.u32 %v14017_v10, %v14012_v31  ;;  %v6451_v19 = vor.u32 8388608, %v6450_v3  ;;  %v6307_v32 = vsub.s32 32, %v14020_v4 }
 0xb74   :  { %v6398_v25 = vsel %vm6396_vm9, %v6397_v58, %v14013_v46  ;;  %v6461_v61 = vshrl.u32 %v15479_v34, %v6458_v27  ;;  %v6464_v53 = vshrl.u32 %v15478_v50, %v6458_v27  ;;  %v6456_v24 = vshrl.u32 %v6455_v57, 5 }
 0xb75   :  { %v6399_v0 = vadd.s32 %v6398_v25, %v6394_v18  ;;  %v6551_v37 = vshrl.u32 %v6550_v17, 23  ;;  %v6312_v16 = vadd.s32 127, %v6311_v59  ;;  %v6460_v42 = vshll.u32 %v15510_v22, %v6457_v14 }
 0xb76   :  { %v6463_v52 = vshll.u32 %v15479_v34, %v6457_v14  ;;  %v6467_v26 = vshrl.u32 %v15480_v2, %v6458_v27  ;;  %v6466_v46 = vshll.u32 %v15478_v50, %v6457_v14  ;;  %v6469_v23 = vshll.u32 %v15480_v2, %v6457_v14 }
 0xb77   :  { %v6400_v48 = vadd.s32 536870912, %v6399_v0  ;;  %v6470_v3 = vshrl.u32 %v15488_v62, %v6458_v27  ;;  %vm14053_vm11 = vcmp.le.f32.partialorder %v6027_v43, 0.7853982  ;;  %v6462_v57 = vor.u32 %v6461_v61, %v6460_v42 }
 0xb78   :  { %v6465_v17 = vor.u32 %v6464_v53, %v6463_v52  ;;  %v6472_v59 = vshll.u32 %v15488_v62, %v6457_v14  ;;  %v6473_v18 = vshrl.u32 %v15505_v9, %v6458_v27  ;;  %v6205_v25 = vshrl.u32 %v13978_v36, %v6203_v38 }
 0xb79   :  { %v14060_v40 = vshrl.u32 %v6400_v48, 30  ;;  %v6468_v44 = vor.u32 %v6467_v26, %v6466_v46  ;;  %v6471_v28 = vor.u32 %v6470_v3, %v6469_v23  ;;  %v6210_v63 = vor.u32 4788187, %v6209_v56 }
 0xb7a   :  { %v6474_v13 = vor.u32 %v6473_v18, %v6472_v59  ;;  %v6491_v1 = vshll.u32 %v6451_v19, 8  ;;  %v8576_v5 = vadd.s32 4294967169, %v6551_v37  ;;  %v6313_v43 = vshll.u32 %v6312_v16, 23 }
 0xb7b   :  { %v6402_v20 = vshll.u32 %v14060_v40, 30  ;;  %vm6475_vm14 = vcmp.lt.s32.totalorder %v6456_v24, 1  ;;  %vm6478_vm4 = vcmp.lt.s32.totalorder %v6456_v24, 4  ;;  %vm6133_vm7 = vcmp.lt.s32.totalorder %v13757_v12, 0 }
 0xb7c   :  { %v6308_v14 = vshll.u32 %v13995_v30, %v14020_v4  ;;  %v6309_v61 = vshrl.u32 %v6291_v6, %v6307_v32  ;;  %v6483_v36 = vsel %vm6475_vm14, %v6462_v57, %v6465_v17  ;;  %v6484_v38 = vsel %vm6478_vm4, %v6471_v28, 920167782 }
 0xb7d   :  { %v14067_v53 = vsub.s32 %v6399_v0, %v6402_v20  ;;  %v6459_v56 = vshrl.u32 %v15510_v22, %v6458_v27  ;;  %vm6477_vm15 = vcmp.lt.s32.totalorder %v6456_v24, 3  ;;  %v6480_v19 = vsel %vm6478_vm4, %v6468_v44, 2102212464 }
 0xb7e   :  { %vm6476_vm0 = vcmp.lt.s32.totalorder %v6456_v24, 2  ;;  %v6485_v37 = vsel %vm6477_vm15, %v6468_v44, %v6484_v38  ;;  %v6487_v16 = vsel %vm6475_vm14, %v6465_v17, %v6468_v44  ;;  %v6488_v42 = vsel %vm6478_vm4, %v6474_v13, 1326507024 }
 0xb7f   :  { %v6314_v52 = vor.u32 4788187, %v6313_v43  ;;  %v6405_v26 = vsub.s32 0, %v14067_v53  ;;  %v6479_v30 = vsel %vm6475_vm14, %v6459_v56, %v6462_v57  ;;  %v6486_v4 = vsel %vm6476_vm0, %v6483_v36, %v6485_v37 }
 0xb80   :  { %v6481_v6 = vsel %vm6477_vm15, %v6465_v17, %v6480_v19  ;;  %v6489_v32 = vsel %vm6477_vm15, %v6471_v28, %v6488_v42  ;;  %v14074_v20 = vmul.u32.u64.low %v6491_v1, %v6486_v4  ;;  %v14075_v0 = vmul.u32.u64.high %v6491_v1, %v6486_v4, %v14074_v20 }
 0xb81   :  { %v6115_v27 = vsel %vm14053_vm11, %v13751_v39, %v14028_v60  ;;  %v8569_v44 = vmin.u32 %v6405_v26, %v14067_v53  ;;  %v6490_v13 = vsel %vm6476_vm0, %v6487_v16, %v6489_v32  ;;  %v6557_v48 = vadd.s32 1, %v8576_v5 }
 0xb82   :  { %v15635_v46 = vshll.u32 %v13926_v49, %v13988_v54  ;;  %v6310_v3 = vor.u32 %v6309_v61, %v6308_v14  ;;  %v14087_v28 = vmul.u32.u64.low %v6491_v1, %v6490_v13  ;;  %v14088_v57 = vmul.u32.u64.high %v6491_v1, %v6490_v13, %v14087_v28 }
 0xb83   :  { %v6211_v17 = vand.u32 2147483647, %v6210_v63  ;;  %v6407_v59 = vclz %v8569_v44  ;;  %v6482_v18 = vsel %vm6476_vm0, %v6479_v30, %v6481_v6  ;;  %vm6558_vm2 = vcmp.gt.s32.totalorder %v6557_v48, 0 }
 0xb84   :  { %v6206_v23 = vor.u32 %v6205_v25, %v15635_v46  ;;  %v6315_v43 = vand.u32 2147483647, %v6314_v52  ;;  %v6501_v60 = vadd.s32 1, %v14075_v0  ;;  %v15636_v36 = vand.u32 2147483647, %v13971_v51 }
 0xb85   :  { %v6559_v5 = vsel %vm6558_vm2, %v6557_v48, 0  ;;  %9492 = vcosq.f32 %v6115_v27  ;;  %v15637_v49 = vsub.s32 4, %v13910_v15  ;;  %v8570_v63 = vadd.s32 4294967294, %v6407_v59 }
 0xb86   :  { %v6554_v38 = vand.u32 8388607, %v15636_v36  ;;  %v6561_v25 = vand.u32 31, %v6559_v5  ;;  %v6213_v24 = vcvt.s32.f32 %v6206_v23  ;;  %v6317_v14 = vcvt.s32.f32 %v6310_v3 }
 0xb87   :  { %v14099_v54 = vsel %vm6133_vm7, %v15637_v49, %v13910_v15  ;;  %v6498_v61 = vmul.u32 %v6491_v1, %v6482_v18  ;;  %vm6500_vm3 = vc.u32 %v14088_v57, %v14074_v20  ;;  %9494 = vsinq.f32 %v6115_v27 }
 0xb88   :  { %vm8571_vm5 = vcmp.lt.s32.totalorder %v8570_v63, 0  ;;  %v6502_v56 = vsel %vm6500_vm3, %v6501_v60, %v14075_v0  ;;  %v6562_v19 = vsub.s32 32, %v6561_v25  ;;  %v6214_v37 = vmul.f32 %v6213_v24, %v6211_v17 }
 0xb89   :  { %v14104_v16 = vmul.f32 %v6317_v14, %v6315_v43  ;;  %v6503_v42 = vadd.s32 %v6502_v56, %v6498_v61  ;;  %v6555_v52 = vor.u32 8388608, %v6554_v38  ;;  %v14106_v15 = vsel %vm8571_vm5, 0, %v8570_v63 }
 0xb8a   :  { %v14108_v26 = vshrl.u32 %v6559_v5, 5  ;;  %v6570_v30 = vshll.u32 %v15478_v50, %v6561_v25  ;;  %v14113_v1 = vadd.f32 %v13772_v7, %v13961_v47  ;;  %v6565_v6 = vshrl.u32 %v15479_v34, %v6562_v19 }
 0xb8b   :  { %v6504_v4 = vadd.s32 536870912, %v6503_v42  ;;  %v6568_v32 = vshrl.u32 %v15478_v50, %v6562_v19  ;;  %v6571_v0 = vshrl.u32 %v15480_v2, %v6562_v19  ;;  %v6564_v27 = vshll.u32 %v15510_v22, %v6561_v25 }
 0xb8c   :  { %v6567_v44 = vshll.u32 %v15479_v34, %v6561_v25  ;;  %v6573_v13 = vshll.u32 %v15480_v2, %v6561_v25  ;;  %v6574_v48 = vshrl.u32 %v15488_v62, %v6562_v19  ;;  %v6215_v46 = vxor.u32 2147483648, %v6214_v37 }
 0xb8d   :  { %v6319_v23 = vxor.u32 2147483648, %v14104_v16  ;;  %v14123_v7 = vshrl.u32 %v6504_v4, 30  ;;  %v6572_v47 = vor.u32 %v6571_v0, %v6570_v30  ;;  %v6415_v3 = vsub.s32 4294967266, %v14106_v15 }
 0xb8e   :  { %v6566_v28 = vor.u32 %v6565_v6, %v6564_v27  ;;  %v6569_v17 = vor.u32 %v6568_v32, %v6567_v44  ;;  %v6575_v59 = vor.u32 %v6574_v48, %v6573_v13  ;;  %v15638_v18 = vand.u32 2147483647, %v13757_v12 }
 0xb8f   :  { %v6506_v60 = vshll.u32 %v14123_v7, 30  ;;  %v6576_v36 = vshll.u32 %v15488_v62, %v6561_v25  ;;  %v6577_v38 = vshrl.u32 %v15505_v9, %v6562_v19  ;;  %v6595_v5 = vshll.u32 %v6555_v52, 8  ;;  %v14135_v49 = vpop.eup %9492 }
 0xb90   :  { %vm14128_vm8 = vcmp.le.f32.partialorder %v15638_v18, 0.7853982  ;;  %vm6237_vm10 = vcmp.lt.s32.totalorder %v13770_v45, 0  ;;  %v6411_v63 = vsub.s32 32, %v14106_v15  ;;  %v6563_v24 = vshrl.u32 %v15510_v22, %v6562_v19 }
 0xb91   :  { %vm6582_vm13 = vcmp.lt.s32.totalorder %v14108_v26, 4  ;;  %v6654_v14 = vand.u32 2139095040, %v14113_v1  ;;  %v14142_v61 = vsub.s32 %v6503_v42, %v6506_v60  ;;  %v6578_v56 = vor.u32 %v6577_v38, %v6576_v36  ;;  %v14147_v52 = vpop.eup %9494 }
 0xb92   :  { %vm6579_vm9 = vcmp.lt.s32.totalorder %v14108_v26, 1  ;;  %v6584_v25 = vsel %vm6582_vm13, %v6572_v47, 2102212464  ;;  %v6416_v30 = vadd.s32 127, %v6415_v3  ;;  %vm6581_vm14 = vcmp.lt.s32.totalorder %v14108_v26, 3 }
 0xb93   :  { %v6587_v4 = vsel %vm6579_vm9, %v6566_v28, %v6569_v17  ;;  %v6588_v19 = vsel %vm6582_vm13, %v6575_v59, 920167782  ;;  %v15641_v6 = vand.u32 2147483647, %v13770_v45  ;;  %v6509_v32 = vsub.s32 0, %v14142_v61 }
 0xb94   :  { %vm6580_vm15 = vcmp.lt.s32.totalorder %v14108_v26, 2  ;;  %v6589_v0 = vsel %vm6581_vm14, %v6572_v47, %v6588_v19  ;;  %v6591_v27 = vsel %vm6579_vm9, %v6569_v17, %v6572_v47  ;;  %v6583_v44 = vsel %vm6579_vm9, %v6563_v24, %v6566_v28 }
 0xb95   :  { %vm14154_vm4 = vcmp.le.f32.partialorder %v15641_v6, 0.7853982  ;;  %v6585_v13 = vsel %vm6581_vm14, %v6569_v17, %v6584_v25  ;;  %v6590_v48 = vsel %vm6580_vm15, %v6587_v4, %v6589_v0  ;;  %v6592_v3 = vsel %vm6582_vm13, %v6578_v56, 1326507024 }
 0xb96   :  { %v8573_v18 = vmin.u32 %v6509_v32, %v14142_v61  ;;  %v6593_v60 = vsel %vm6581_vm14, %v6575_v59, %v6592_v3  ;;  %v14165_v36 = vmul.u32.u64.low %v6595_v5, %v6590_v48  ;;  %v14166_v38 = vmul.u32.u64.high %v6595_v5, %v6590_v48, %v14165_v36 }
 0xb97   :  { %v15644_v6 = vsel %vm13965_vm6, 0, %v13955_v33  ;;  %v6216_v47 = vsel %vm6133_vm7, %v6215_v46, %v6214_v37  ;;  %v6594_v28 = vsel %vm6580_vm15, %v6591_v27, %v6593_v60  ;;  %v6655_v17 = vshrl.u32 %v6654_v14, 23 }
 0xb98   :  { %v14172_v19 = vadd.s32 3, %v15644_v6  ;;  %v6395_v24 = vadd.s32 %v14012_v31, %v14017_v10  ;;  %v6511_v59 = vclz %v8573_v18  ;;  %9496 = vcosq.f32 %v13985_v55 }
 0xb99   :  { %v14180_v56 = vmul.u32.u64.low %v6595_v5, %v6594_v28  ;;  %v14181_v25 = vmul.u32.u64.high %v6595_v5, %v6594_v28, %v14180_v56  ;;  %v6220_v33 = vsel %vm14128_vm8, 0, %v14099_v54  ;;  %v6586_v8 = vsel %vm6580_vm15, %v6583_v44, %v6585_v13 }
 0xb9a   :  { %v8580_v37 = vadd.s32 4294967169, %v6655_v17  ;;  %v6320_v46 = vsel %vm6237_vm10, %v6319_v23, %v14104_v16  ;;  %v6413_v14 = vshrl.u32 %v6395_v24, %v6411_v63  ;;  %v6417_v10 = vshll.u32 %v6416_v30, 23 }
 0xb9b   :  { %v6605_v31 = vadd.s32 1, %v14166_v38  ;;  %v6219_v4 = vsel %vm14128_vm8, %v13757_v12, %v6216_v47  ;;  %v15444_v32 = vand.u32 2147483647, %v14113_v1  ;;  %v6113_v54 = vsub.s32 4, %v13869_v41 }
 0xb9c   :  { %v6661_v0 = vadd.s32 1, %v8580_v37  ;;  %v6412_v26 = vshll.u32 %v14067_v53, %v14106_v15  ;;  %v8574_v27 = vadd.s32 4294967294, %v6511_v59  ;;  %v6602_v44 = vmul.u32 %v6595_v5, %v6586_v8 }
 0xb9d   :  { %vm6604_vm6 = vc.u32 %v14181_v25, %v14165_v36  ;;  %9498 = vsinq.f32 %v13985_v55  ;;  %v6323_v16 = vsel %vm14154_vm4, %v13770_v45, %v6320_v46  ;;  %v14208_v63 = vor.u32 4788187, %v6417_v10 }
 0xb9e   :  { %v6606_v23 = vsel %vm6604_vm6, %v6605_v31, %v14166_v38  ;;  %vm6662_vm7 = vcmp.gt.s32.totalorder %v6661_v0, 0  ;;  %9500 = vcosq.f32 %v6219_v4  ;;  %v14206_v43 = vor.u32 %v6413_v14, %v6412_v26 }
 0xb9f   :  { %v6607_v30 = vadd.s32 %v6606_v23, %v6602_v44  ;;  %9502 = vsinq.f32 %v6219_v4  ;;  %v14210_v53 = vadd.s32 3, %v6220_v33  ;;  %v6658_v15 = vand.u32 8388607, %v15444_v32 }
 0xba0   :  { %v6663_v55 = vsel %vm6662_vm7, %v6661_v0, 0  ;;  %9504 = vcosq.f32 %v6323_v16  ;;  %vm8575_vm0 = vcmp.lt.s32.totalorder %v8574_v27, 0  ;;  %v6114_v13 = vsel %vm6029_vm1, %v6113_v54, %v13869_v41 }
 0xba1   :  { %v6608_v5 = vadd.s32 536870912, %v6607_v30  ;;  %9506 = vsinq.f32 %v6323_v16  ;;  %v14219_v48 = vadd.s32 %v14074_v20, %v14088_v57  ;;  %v6665_v3 = vand.u32 31, %v6663_v55 }
 0xba2   :  { %v14227_v28 = vpop.eup %9496  ;;  %v14229_v17 = vsel %vm8575_vm0, 0, %v8574_v27  ;;  %v6659_v41 = vor.u32 8388608, %v6658_v15  ;;  %v6116_v20 = vsel %vm14053_vm11, 0, %v6114_v13  ;;  %v14234_v57 = vadd.s32 %v14165_v36, %v14181_v25 }
 0xba3   :  { %v14224_v6 = vshrl.u32 %v6608_v5, 30  ;;  %v6666_v24 = vsub.s32 32, %v6665_v3  ;;  %v6668_v56 = vshll.u32 %v15510_v22, %v6665_v3  ;;  %v6321_v33 = vsub.s32 4, %v13980_v35 }
 0xba4   :  { %v6671_v37 = vshll.u32 %v15479_v34, %v6665_v3  ;;  %v6519_v58 = vsub.s32 4294967266, %v14229_v17  ;;  %v6664_v36 = vshrl.u32 %v6663_v55, 5  ;;  %v6674_v25 = vshll.u32 %v15478_v50, %v6665_v3 }
 0xba5   :  { %v6610_v59 = vshll.u32 %v14224_v6, 30  ;;  %v6669_v8 = vshrl.u32 %v15479_v34, %v6666_v24  ;;  %v6672_v46 = vshrl.u32 %v15478_v50, %v6666_v24  ;;  %v6675_v14 = vshrl.u32 %v15480_v2, %v6666_v24 }
 0xba6   :  { %v6515_v4 = vsub.s32 32, %v14229_v17  ;;  %v14250_v26 = vshll.u32 %v6659_v41, 8  ;;  %v6677_v23 = vshll.u32 %v15480_v2, %v6665_v3  ;;  %v6680_v55 = vshll.u32 %v15488_v62, %v6665_v3 }
 0xba7   :  { %v14244_v10 = vsub.s32 %v6607_v30, %v6610_v59  ;;  %v14247_v31 = vpop.eup %9498  ;;  %v6670_v0 = vor.u32 %v6669_v8, %v6668_v56  ;;  %v6673_v54 = vor.u32 %v6672_v46, %v6671_v37  ;;  %v6676_v16 = vor.u32 %v6675_v14, %v6674_v25 }
 0xba8   :  { %v14252_v27 = vpop.eup %9500  ;;  %v6678_v30 = vshrl.u32 %v15488_v62, %v6666_v24  ;;  %v6681_v5 = vshrl.u32 %v15505_v9, %v6666_v24  ;;  %v6120_v13 = vadd.s32 3, %v6116_v20  ;;  %v6322_v41 = vsel %vm6237_vm10, %v6321_v33, %v13980_v35 }
 0xba9   :  { %v6613_v44 = vsub.s32 0, %v14244_v10  ;;  %v14257_v15 = vpop.eup %9502  ;;  %v6520_v56 = vadd.s32 127, %v6519_v58  ;;  %vm6683_vm1 = vcmp.lt.s32.totalorder %v6664_v36, 1  ;;  %v6667_v14 = vshrl.u32 %v15510_v22, %v6666_v24 }
 0xbaa   :  { %v14264_v59 = vpop.eup %9504  ;;  %v6679_v37 = vor.u32 %v6678_v30, %v6677_v23  ;;  %v6682_v25 = vor.u32 %v6681_v5, %v6680_v55  ;;  %vm6686_vm11 = vcmp.lt.s32.totalorder %v6664_v36, 4  ;;  %v6691_v3 = vsel %vm6683_vm1, %v6670_v0, %v6673_v54 }
 0xbab   :  { %v8577_v8 = vmin.u32 %v6613_v44, %v14244_v10  ;;  %v9507_v46 = vpop.eup %9506  ;;  %vm6685_vm2 = vcmp.lt.s32.totalorder %v6664_v36, 3  ;;  %v6688_v20 = vsel %vm6686_vm11, %v6676_v16, 2102212464  ;;  %vm6684_vm3 = vcmp.lt.s32.totalorder %v6664_v36, 2 }
 0xbac   :  { %v6692_v38 = vsel %vm6686_vm11, %v6679_v37, 920167782  ;;  %v6695_v35 = vsel %vm6683_vm1, %v6673_v54, %v6676_v16  ;;  %v6121_v33 = vand.u32 3, %v6120_v13  ;;  %v6687_v58 = vsel %vm6683_vm1, %v6667_v14, %v6670_v0 }
 0xbad   :  { %v6615_v32 = vclz %v8577_v8  ;;  %v6693_v60 = vsel %vm6685_vm2, %v6676_v16, %v6692_v38  ;;  %v6696_v23 = vsel %vm6686_vm11, %v6682_v25, 1326507024  ;;  %v6689_v30 = vsel %vm6685_vm2, %v6673_v54, %v6688_v20 }
 0xbae   :  { %v6694_v44 = vsel %vm6684_vm3, %v6691_v3, %v6693_v60  ;;  %v6697_v18 = vsel %vm6685_vm2, %v6679_v37, %v6696_v23  ;;  %v6516_v5 = vshll.u32 %v14142_v61, %v14229_v17  ;;  %v6517_v0 = vshrl.u32 %v14219_v48, %v6515_v4 }
 0xbaf   :  { %v8578_v47 = vadd.s32 4294967294, %v6615_v32  ;;  %v14270_v24 = vmul.u32.u64.low %v14250_v26, %v6694_v44  ;;  %v14271_v55 = vmul.u32.u64.high %v14250_v26, %v6694_v44, %v14270_v24  ;;  %v6698_v38 = vsel %vm6684_vm3, %v6695_v35, %v6697_v18 }
 0xbb0   :  { %v6324_v32 = vsel %vm14154_vm4, 0, %v6322_v41  ;;  %v14281_v54 = vmul.u32.u64.low %v14250_v26, %v6698_v38  ;;  %v14282_v16 = vmul.u32.u64.high %v14250_v26, %v6698_v38, %v14281_v54  ;;  %vm6119_vm8 = vweird.f32 %v13751_v39 }
 0xbb1   :  { %vm8579_vm5 = vcmp.lt.s32.totalorder %v8578_v47, 0  ;;  %vm6327_vm10 = vweird.f32 %v13770_v45  ;;  %v6521_v13 = vshll.u32 %v6520_v56, 23  ;;  %v6690_v61 = vsel %vm6684_vm3, %v6687_v58, %v6689_v30 }
 0xbb2   :  { %v6618_v60 = vsel %vm8579_vm5, 0, %v8578_v47  ;;  %v6332_v17 = vxor.u32 2147483648, %v9507_v46  ;;  %v6709_v18 = vadd.s32 1, %v14271_v55  ;;  %vm6123_vm13 = vcmp.eq.s32.totalorder %v6121_v33, 0 }
 0xbb3   :  { %v6623_v8 = vsub.s32 4294967266, %v6618_v60  ;;  %vm6126_vm9 = vcmp.eq.s32.totalorder %v6121_v33, 2  ;;  %v6328_v42 = vadd.s32 3, %v6324_v32  ;;  %v15645_v47 = vxor.u32 2147483648, %v14147_v52 }
 0xbb4   :  { %v15646_v41 = vxor.u32 2147483648, %v14135_v49  ;;  %v6335_v56 = vxor.u32 2147483648, %v14264_v59  ;;  %v6518_v14 = vor.u32 %v6517_v0, %v6516_v5  ;;  %v6706_v36 = vmul.u32 %v14250_v26, %v6690_v61 }
 0xbb5   :  { %v6624_v48 = vadd.s32 127, %v6623_v8  ;;  %v6125_v4 = vsel %vm6123_vm13, %v14135_v49, %v15645_v47  ;;  %vm6708_vm14 = vc.u32 %v14282_v16, %v14270_v24  ;;  %v6329_v25 = vand.u32 3, %v6328_v42 }
 0xbb6   :  { %v6128_v37 = vsel %vm6126_vm9, %v15646_v41, %v14147_v52  ;;  %v6522_v3 = vor.u32 4788187, %v6521_v13  ;;  %v6619_v20 = vsub.s32 32, %v6618_v60  ;;  %v6710_v35 = vsel %vm6708_vm14, %v6709_v18, %v14271_v55 }
 0xbb7   :  { %vm6122_vm4 = vcmp.lt.s32.totalorder %v6121_v33, 2  ;;  %v6711_v58 = vadd.s32 %v6710_v35, %v6706_v36  ;;  %vm6331_vm15 = vcmp.eq.s32.totalorder %v6329_v25, 0  ;;  %vm6334_vm6 = vcmp.eq.s32.totalorder %v6329_v25, 2 }
 0xbb8   :  { %v6129_v44 = vsel %vm6122_vm4, %v6125_v4, %v6128_v37  ;;  %v6625_v49 = vshll.u32 %v6624_v48, 23  ;;  %vm6330_vm7 = vcmp.lt.s32.totalorder %v6329_v25, 2  ;;  %v6333_v52 = vsel %vm6331_vm15, %v14264_v59, %v6332_v17 }
 0xbb9   :  { %v6336_v23 = vsel %vm6334_vm6, %v6335_v56, %v9507_v46  ;;  %v6712_v30 = vadd.s32 536870912, %v6711_v58  ;;  %v6017_v5 = vand.u32 3, %v14172_v19  ;;  %v6020_v38 = vxor.u32 2147483648, %v14247_v31 }
 0xbba   :  { %v6337_v26 = vsel %vm6330_vm7, %v6333_v52, %v6336_v23  ;;  %v6621_v32 = vshrl.u32 %v14234_v57, %v6619_v20  ;;  %v6130_v33 = vsel %vm6119_vm8, nan, %v6129_v44  ;;  %v6023_v0 = vxor.u32 2147483648, %v14227_v28 }
 0xbbb   :  { %v6338_v55 = vsel %vm6327_vm10, nan, %v6337_v26  ;;  %v6620_v54 = vshll.u32 %v14244_v10, %v6618_v60  ;;  %v14309_v59 = vshrl.u32 %v6712_v30, 30  ;;  %vm6019_vm0 = vcmp.eq.s32.totalorder %v6017_v5, 0 }
 0xbbc   :  { %v8901_v46 = vpack.c.bf16 %v6338_v55, %v6130_v33  ;;  %v6626_v13 = vor.u32 4788187, %v6625_v49  ;;  %v6021_v19 = vsel %vm6019_vm0, %v14227_v28, %v6020_v38  ;;  %vm6022_vm1 = vcmp.eq.s32.totalorder %v6017_v5, 2 }
 0xbbd   :  { %v6225_v57 = vand.u32 3, %v14210_v53  ;;  %v6714_v39 = vshll.u32 %v14309_v59, 30  ;;  %v6024_v45 = vsel %vm6022_vm1, %v6023_v0, %v14247_v31  ;;  %v6228_v8 = vxor.u32 2147483648, %v14257_v15 }
 0xbbe   :  { %8902 = vmatprep.subr.bf16.mxu1 %v8901_v46  ;;  %v6231_v61 = vxor.u32 2147483648, %v14252_v27  ;;  %v6523_v10 = vand.u32 2147483647, %v6522_v3  ;;  %v6622_v60 = vor.u32 %v6621_v32, %v6620_v54  ;;  %vm6018_vm11 = vcmp.lt.s32.totalorder %v6017_v5, 2 }
 0xbbf   :  { %vm6227_vm2 = vcmp.eq.s32.totalorder %v6225_v57, 0  ;;  %v6715_v17 = vsub.s32 %v6711_v58, %v6714_v39  ;;  %v6025_v18 = vsel %vm6018_vm11, %v6021_v19, %v6024_v45  ;;  %vm6230_vm3 = vcmp.eq.s32.totalorder %v6225_v57, 2 }
 0xbc0   :  { %v6229_v28 = vsel %vm6227_vm2, %v14252_v27, %v6228_v8  ;;  %v6525_v42 = vcvt.s32.f32 %v6518_v14  ;;  %v6627_v53 = vand.u32 2147483647, %v6626_v13  ;;  %vm6226_vm5 = vcmp.lt.s32.totalorder %v6225_v57, 2 }
 0xbc1   :  { %v6232_v48 = vsel %vm6230_vm3, %v6231_v61, %v14257_v15  ;;  %v6717_v47 = vsub.s32 0, %v6715_v17  ;;  %vm6015_vm8 = vweird.f32 %v13749_v21  ;;  %vm6223_vm10 = vweird.f32 %v13757_v12 }
 0xbc2   :  { %v6233_v31 = vsel %vm6226_vm5, %v6229_v28, %v6232_v48  ;;  %v15647_v4 = vand.u32 2147483647, %v14208_v63  ;;  %v15648_v41 = vcvt.s32.f32 %v14206_v43  ;;  %v6629_v56 = vcvt.s32.f32 %v6622_v60 }
 0xbc3   :  { %v6026_v36 = vsel %vm6015_vm8, nan, %v6025_v18  ;;  %v6234_v27 = vsel %vm6223_vm10, nan, %v6233_v31  ;;  %v6526_v25 = vmul.f32 %v6525_v42, %v6523_v10  ;;  %v8581_v14 = vmin.u32 %v6717_v47, %v6715_v17 }
 0xbc4   :  { %v6422_v37 = vmul.f32 %v15648_v41, %v15647_v4  ;;  %v8903_v3 = vpack.c.bf16 %v6234_v27, %v6026_v36  ;;  %v6630_v20 = vmul.f32 %v6629_v56, %v6627_v53  ;;  %vm6341_vm13 = vcmp.lt.s32.totalorder %v13906_v29, 0 }
 0xbc5   :  { %v6719_v35 = vclz %v8581_v14  ;;  %v6527_v58 = vxor.u32 2147483648, %v6526_v25  ;;  %vm6445_vm14 = vcmp.lt.s32.totalorder %v13921_v11, 0  ;;  %vm6549_vm4 = vcmp.lt.s32.totalorder %v13971_v51, 0 }
 0xbc6   :  { %8904 = vmatpush1.bf16.msra.mxu1 %v8903_v3  ;;  %v6423_v15 = vxor.u32 2147483648, %v6422_v37  ;;  %v6631_v44 = vxor.u32 2147483648, %v6630_v20  ;;  %v6707_v49 = vadd.s32 %v14270_v24, %v14282_v16  ;;  %v15649_v30 = vand.u32 2147483647, %v13906_v29 }
 0xbc7   :  { %v8582_v21 = vadd.s32 4294967294, %v6719_v35  ;;  %v6528_v63 = vsel %vm6445_vm14, %v6527_v58, %v6526_v25  ;;  %v15652_v5 = vand.u32 2147483647, %v13921_v11  ;;  %v15655_v54 = vand.u32 2147483647, %v13971_v51 }
 0xbc8   :  { %v6424_v12 = vsel %vm6341_vm13, %v6423_v15, %v6422_v37  ;;  %vm14336_vm15 = vcmp.le.f32.partialorder %v15649_v30, 0.7853982  ;;  %v6632_v32 = vsel %vm6549_vm4, %v6631_v44, %v6630_v20  ;;  %v6633_v39 = vsub.s32 4, %v14224_v6 }
 0xbc9   :  { %vm8583_vm9 = vcmp.lt.s32.totalorder %v8582_v21, 0  ;;  %vm14342_vm6 = vcmp.le.f32.partialorder %v15652_v5, 0.7853982  ;;  %v6427_v24 = vsel %vm14336_vm15, %v13906_v29, %v6424_v12  ;;  %vm14356_vm7 = vcmp.le.f32.partialorder %v15655_v54, 0.7853982 }
 0xbca   :  { %v6722_v43 = vsel %vm8583_vm9, 0, %v8582_v21  ;;  %v6531_v0 = vsel %vm14342_vm6, %v13921_v11, %v6528_v63  ;;  %v6635_v13 = vsel %vm14356_vm7, %v13971_v51, %v6632_v32  ;;  %9508 = vcosq.f32 %v6427_v24 }
 0xbcb   :  { %v6723_v52 = vsub.s32 32, %v6722_v43  ;;  %v6727_v23 = vsub.s32 4294967266, %v6722_v43  ;;  %v6724_v16 = vshll.u32 %v6715_v17, %v6722_v43  ;;  %9510 = vcosq.f32 %v6531_v0 }
 0xbcc   :  { %9512 = vcosq.f32 %v6635_v13  ;;  %v6529_v8 = vsub.s32 4, %v14123_v7  ;;  %v6425_v61 = vsub.s32 4, %v14060_v40  ;;  %v6634_v17 = vsel %vm6549_vm4, %v6633_v39, %v14224_v6 }
 0xbcd   :  { %v6725_v33 = vshrl.u32 %v6707_v49, %v6723_v52  ;;  %v6728_v55 = vadd.s32 127, %v6727_v23  ;;  %9514 = vsinq.f32 %v6635_v13  ;;  %v6737_v28 = vsub.s32 4, %v14309_v59 }
 0xbce   :  { %9516 = vsinq.f32 %v6531_v0  ;;  %v6530_v42 = vsel %vm6445_vm14, %v6529_v8, %v14123_v7  ;;  %v6426_v53 = vsel %vm6341_vm13, %v6425_v61, %v14060_v40  ;;  %v6636_v47 = vsel %vm14356_vm7, 0, %v6634_v17 }
 0xbcf   :  { %v6726_v19 = vor.u32 %v6725_v33, %v6724_v16  ;;  %v6729_v57 = vshll.u32 %v6728_v55, 23  ;;  %9518 = vsinq.f32 %v6427_v24  ;;  %vm6653_vm0 = vcmp.lt.s32.totalorder %v14113_v1, 0 }
 0xbd0   :  { %v15658_v31 = vand.u32 2147483647, %v14113_v1  ;;  %v6532_v7 = vsel %vm14342_vm6, 0, %v6530_v42  ;;  %v6738_v41 = vsel %vm6653_vm0, %v6737_v28, %v14309_v59  ;;  %v6428_v40 = vsel %vm14336_vm15, 0, %v6426_v53  ;;  %v8584_v42 = vld [vmem:[%s15382_s2 + $0xc0] sm:$0xff]  ;;  %v6768_v53 = vpop.permute.xlu0 %6767 }
 0xbd1   :  { %v6730_v45 = vor.u32 4788187, %v6729_v57  ;;  %v6733_v60 = vcvt.s32.f32 %v6726_v19  ;;  %v6640_v27 = vadd.s32 3, %v6636_v47  ;;  %v6536_v14 = vadd.s32 3, %v6532_v7 }
 0xbd2   :  { %vm14381_vm1 = vcmp.le.f32.partialorder %v15658_v31, 0.7853982  ;;  %v6432_v35 = vadd.s32 3, %v6428_v40  ;;  %vm6639_vm7 = vweird.f32 %v13971_v51  ;;  %v8585_v51 = vld [vmem:[%s15382_s2 + $0xc8] sm:$0xff] }
 0xbd3   :  { %v6731_v10 = vand.u32 2147483647, %v6730_v45  ;;  %v6740_v3 = vsel %vm14381_vm1, 0, %v6738_v41  ;;  %v6641_v21 = vand.u32 3, %v6640_v27  ;;  %v6537_v44 = vand.u32 3, %v6536_v14  ;;  %v6773_v41 = vpop.permute.xlu1 %6772 }
 0xbd4   :  { %v9509_v37 = vpop.eup %9508  ;;  %v6744_v58 = vadd.s32 3, %v6740_v3  ;;  %v6433_v52 = vand.u32 3, %v6432_v35 }
 0xbd5   :  { %v6734_v18 = vmul.f32 %v6733_v60, %v6731_v10  ;;  %v9511_v36 = vpop.eup %9510  ;;  %v6439_v30 = vxor.u32 2147483648, %v9509_v37  ;;  %vm6643_vm11 = vcmp.eq.s32.totalorder %v6641_v21, 0  ;;  %vm6646_vm2 = vcmp.eq.s32.totalorder %v6641_v21, 2 }
 0xbd6   :  { %v9513_v25 = vpop.eup %9512  ;;  %v6543_v49 = vxor.u32 2147483648, %v9511_v36  ;;  %v6745_v26 = vand.u32 3, %v6744_v58  ;;  %vm6539_vm3 = vcmp.eq.s32.totalorder %v6537_v44, 0  ;;  %vm6542_vm5 = vcmp.eq.s32.totalorder %v6537_v44, 2 }
 0xbd7   :  { %v6735_v48 = vxor.u32 2147483648, %v6734_v18  ;;  %v9515_v20 = vpop.eup %9514  ;;  %v6647_v43 = vxor.u32 2147483648, %v9513_v25  ;;  %vm6435_vm8 = vcmp.eq.s32.totalorder %v6433_v52, 0  ;;  %vm6438_vm10 = vcmp.eq.s32.totalorder %v6433_v52, 2 }
 0xbd8   :  { %v9517_v59 = vpop.eup %9516  ;;  %v6644_v12 = vxor.u32 2147483648, %v9515_v20  ;;  %vm6642_vm13 = vcmp.lt.s32.totalorder %v6641_v21, 2  ;;  %vm6538_vm9 = vcmp.lt.s32.totalorder %v6537_v44, 2  ;;  %vm6750_vm14 = vcmp.eq.s32.totalorder %v6745_v26, 2 }
 0xbd9   :  { %v6736_v4 = vsel %vm6653_vm0, %v6735_v48, %v6734_v18  ;;  %v9519_v15 = vpop.eup %9518  ;;  %v6540_v63 = vxor.u32 2147483648, %v9517_v59  ;;  %v6648_v38 = vsel %vm6646_vm2, %v6647_v43, %v9515_v20  ;;  %v6544_v16 = vsel %vm6542_vm5, %v6543_v49, %v9517_v59 }
 0xbda   :  { %v6739_v56 = vsel %vm14381_vm1, %v14113_v1, %v6736_v4  ;;  %v6436_v23 = vxor.u32 2147483648, %v9519_v15  ;;  %v6645_v5 = vsel %vm6643_vm11, %v9513_v25, %v6644_v12  ;;  %v6440_v54 = vsel %vm6438_vm10, %v6439_v30, %v9519_v15 }
 0xbdb   :  { %9520 = vcosq.f32 %v6739_v56  ;;  %v6541_v24 = vsel %vm6539_vm3, %v9511_v36, %v6540_v63  ;;  %v6649_v13 = vsel %vm6642_vm13, %v6645_v5, %v6648_v38  ;;  %vm6747_vm4 = vcmp.eq.s32.totalorder %v6745_v26, 0 }
 0xbdc   :  { %9522 = vsinq.f32 %v6739_v56  ;;  %v6437_v0 = vsel %vm6435_vm8, %v9509_v37, %v6436_v23  ;;  %v6545_v19 = vsel %vm6538_vm9, %v6541_v24, %v6544_v16  ;;  %vm6434_vm15 = vcmp.lt.s32.totalorder %v6433_v52, 2 }
 0xbdd   :  { %vm6746_vm6 = vcmp.lt.s32.totalorder %v6745_v26, 2  ;;  %v6441_v45 = vsel %vm6434_vm15, %v6437_v0, %v6440_v54  ;;  %vm6535_vm0 = vweird.f32 %v13921_v11  ;;  %vm6743_vm1 = vweird.f32 %v14113_v1  ;;  %v8587_v1 = vld [vmem:[%s15382_s2 + $0xd8] sm:$0xff] }
 0xbde   :  { %v6650_v61 = vsel %vm6639_vm7, nan, %v6649_v13  ;;  %v6546_v10 = vsel %vm6535_vm0, nan, %v6545_v19  ;;  %vm6431_vm11 = vweird.f32 %v13906_v29  ;;  %v15661_v11 = vmov 0.0   ;;  %v8586_v29 = vld [vmem:[%s15382_s2 + $0xd0] sm:$0xff] }
 0xbdf   :  { %v6442_v18 = vsel %vm6431_vm11, nan, %v6441_v45 }
 0xbe0   :  { %v8907_v28 = vpack.c.bf16 %v6650_v61, %v6442_v18 }
 0xbe5   :  { %v9521_v32 = vpop.eup %9520 }
 0xbe6   :  { %v9523_v33 = vpop.eup %9522  ;;  %v6751_v55 = vxor.u32 2147483648, %v9521_v32 }
 0xbe7   :  { %v6748_v46 = vxor.u32 2147483648, %v9523_v33 }
 0xbe8   :  { %v6752_v57 = vsel %vm6750_vm14, %v6751_v55, %v9523_v33 }
 0xbe9   :  { %v6749_v39 = vsel %vm6747_vm4, %v9521_v32, %v6748_v46 }
 0xbea   :  { %v6753_v8 = vsel %vm6746_vm6, %v6749_v39, %v6752_v57 }
 0xbeb   :  { %v6754_v60 = vsel %vm6743_vm1, nan, %v6753_v8 }
 0xbec   :  { %v8905_v17 = vpack.c.bf16 %v6754_v60, %v6546_v10 }
 0xbee   :  { %8906 = vmatprep.subr.bf16.mxu1 %v8905_v17 }
 0xbef   :  { %8908 = vmatpush1.bf16.msra.mxu1 %v8907_v28 }
 0xbf2   :  { %8592 = vmatmul.mubr.msk.f32.vlgmr.msra.gmra.mrb[28].mxu1 %vm1006_vm12, %v8584_v42 }
 0xbf3   :  { %6867 = vmatprep.mubr.f32.mxu1 %v15661_v11 }
 0xbf6   :  { %8593 = vmatmul.mubr.msk.f32.gmra.mrb[30].mxu1 %vm1006_vm12, %v8585_v51 }
 0xbf7   :  { %6873 = vmatprep.mubr.f32.mxu1 %v15661_v11 }
 0xbfa   :  { %8594 = vmatmul.mubr.msk.f32.gmra.mrb[32].mxu1 %vm1006_vm12, %v8586_v29 }
 0xbfb   :  { %6879 = vmatprep.mubr.f32.mxu1 %v15661_v11 }
 0xbfe   :  { %8595 = vmatmul.mubr.msk.f32.gmra.mrb[34].mxu1 %vm1006_vm12, %v8587_v1 }
 0xcc5   :  { %v6863_v48 = vpop.f32.mrb[28].mxu1 }
 0xcc6   :  { %v14418_v47 = vadd.f32 %v6863_v48, %v6768_v53  ;;  %v6865_v31 = vpop.f32.mrb[29].mxu1 }
 0xcc7   :  { %v14420_v6 = vadd.f32 %v6865_v31, %v6768_v53 }
 0xcc8   :  { %v6886_v4 = vand.u32 2147483647, %v14418_v47  ;;  %v6889_v7 = vand.u32 2139095040, %v14418_v47 }
 0xcc9   :  { %v6990_v37 = vand.u32 2147483647, %v14420_v6  ;;  %v6993_v40 = vand.u32 2139095040, %v14420_v6  ;;  %v6869_v56 = vpop.f32.mrb[30].mxu1 }
 0xcca   :  { %v6890_v36 = vshrl.u32 %v6889_v7, 23  ;;  %v14426_v27 = vadd.f32 %v6869_v56, %v6773_v41  ;;  %v6871_v25 = vpop.f32.mrb[31].mxu1  ;;  %v6893_v14 = vand.u32 8388607, %v6886_v4 }
 0xccb   :  { %v6994_v3 = vshrl.u32 %v6993_v40, 23  ;;  %v6997_v20 = vand.u32 8388607, %v6990_v37  ;;  %v14439_v32 = vadd.f32 %v6871_v25, %v6773_v41 }
 0xccc   :  { %v8596_v35 = vadd.s32 4294967169, %v6890_v36  ;;  %v7097_v15 = vand.u32 2139095040, %v14426_v27  ;;  %v6894_v44 = vor.u32 8388608, %v6893_v14  ;;  %v15448_v0 = vand.u32 2147483647, %v14426_v27 }
 0xccd   :  { %v8600_v59 = vadd.s32 4294967169, %v6994_v3  ;;  %v14433_v58 = vpop.f32.mrb[32].mxu1  ;;  %v6998_v12 = vor.u32 8388608, %v6997_v20 }
 0xcce   :  { %v6896_v21 = vadd.s32 1, %v8596_v35  ;;  %v7098_v63 = vshrl.u32 %v7097_v15, 23  ;;  %v14435_v49 = vpop.f32.mrb[33].mxu1  ;;  %v14443_v16 = vshll.u32 %v6894_v44, 8 }
 0xccf   :  { %v7000_v43 = vadd.s32 1, %v8600_v59  ;;  %v14447_v55 = vshll.u32 %v6998_v12, 8 }
 0xcd0   :  { %vm6897_vm2 = vcmp.gt.s32.totalorder %v6896_v21, 0  ;;  %v8604_v23 = vadd.s32 4294967169, %v7098_v63 }
 0xcd1   :  { %v6898_v52 = vsel %vm6897_vm2, %v6896_v21, 0  ;;  %vm7001_vm3 = vcmp.gt.s32.totalorder %v7000_v43, 0  ;;  %v14437_v30 = vpop.f32.mrb[34].mxu1 }
 0xcd2   :  { %v6899_v26 = vshrl.u32 %v6898_v52, 5  ;;  %v6900_v5 = vand.u32 31, %v6898_v52  ;;  %v7002_v38 = vsel %vm7001_vm3, %v7000_v43, 0  ;;  %v14441_v24 = vpop.f32.mrb[35].mxu1  ;;  %v14451_v19 = vadd.s32 1, %v8604_v23 }
 0xcd3   :  { %v14445_v33 = vshrl.u32 %v7002_v38, 5  ;;  %v7004_v13 = vand.u32 31, %v7002_v38 }
 0xcd4   :  { %v6901_v54 = vsub.s32 32, %v6900_v5  ;;  %v6903_v46 = vshll.u32 %v15510_v22, %v6900_v5  ;;  %v6906_v57 = vshll.u32 %v15479_v34, %v6900_v5  ;;  %v6909_v39 = vshll.u32 %v15478_v50, %v6900_v5 }
 0xcd5   :  { %v6912_v45 = vshll.u32 %v15480_v2, %v6900_v5  ;;  %v6915_v8 = vshll.u32 %v15488_v62, %v6900_v5  ;;  %vm6918_vm5 = vcmp.lt.s32.totalorder %v6899_v26, 1  ;;  %vm6919_vm8 = vcmp.lt.s32.totalorder %v6899_v26, 2 }
 0xcd6   :  { %v6904_v61 = vshrl.u32 %v15479_v34, %v6901_v54  ;;  %v6907_v10 = vshrl.u32 %v15478_v50, %v6901_v54  ;;  %v6910_v60 = vshrl.u32 %v15480_v2, %v6901_v54  ;;  %v6902_v17 = vshrl.u32 %v15510_v22, %v6901_v54 }
 0xcd7   :  { %v6913_v18 = vshrl.u32 %v15488_v62, %v6901_v54  ;;  %v6916_v28 = vshrl.u32 %v15505_v9, %v6901_v54  ;;  %v7005_v1 = vsub.s32 32, %v7004_v13  ;;  %vm6920_vm10 = vcmp.lt.s32.totalorder %v6899_v26, 3 }
 0xcd8   :  { %v6905_v42 = vor.u32 %v6904_v61, %v6903_v46  ;;  %v6908_v51 = vor.u32 %v6907_v10, %v6906_v57  ;;  %v6911_v29 = vor.u32 %v6910_v60, %v6909_v39  ;;  %vm6921_vm13 = vcmp.lt.s32.totalorder %v6899_v26, 4 }
 0xcd9   :  { %v6914_v53 = vor.u32 %v6913_v18, %v6912_v45  ;;  %v6917_v48 = vor.u32 %v6916_v28, %v6915_v8  ;;  %v7007_v14 = vshll.u32 %v15510_v22, %v7004_v13  ;;  %v7008_v35 = vshrl.u32 %v15479_v34, %v7005_v1 }
 0xcda   :  { %v6922_v31 = vsel %vm6918_vm5, %v6902_v17, %v6905_v42  ;;  %v6923_v7 = vsel %vm6921_vm13, %v6911_v29, 2102212464  ;;  %v6926_v41 = vsel %vm6918_vm5, %v6905_v42, %v6908_v51  ;;  %v6930_v40 = vsel %vm6918_vm5, %v6908_v51, %v6911_v29 }
 0xcdb   :  { %v6924_v56 = vsel %vm6920_vm10, %v6908_v51, %v6923_v7  ;;  %v6927_v36 = vsel %vm6921_vm13, %v6914_v53, 920167782  ;;  %v6931_v25 = vsel %vm6921_vm13, %v6917_v48, 1326507024  ;;  %v7010_v59 = vshll.u32 %v15479_v34, %v7004_v13 }
 0xcdc   :  { %v6928_v3 = vsel %vm6920_vm10, %v6911_v29, %v6927_v36  ;;  %v6932_v20 = vsel %vm6920_vm10, %v6914_v53, %v6931_v25  ;;  %v6925_v15 = vsel %vm6919_vm8, %v6922_v31, %v6924_v56  ;;  %v7011_v12 = vshrl.u32 %v15478_v50, %v7005_v1 }
 0xcdd   :  { %v6929_v21 = vsel %vm6919_vm8, %v6926_v41, %v6928_v3  ;;  %v6933_v44 = vsel %vm6919_vm8, %v6930_v40, %v6932_v20  ;;  %v7009_v5 = vor.u32 %v7008_v35, %v7007_v14  ;;  %v7013_v54 = vshll.u32 %v15478_v50, %v7004_v13 }
 0xcde   :  { %v14474_v43 = vmul.u32.u64.low %v14443_v16, %v6933_v44  ;;  %v14475_v63 = vmul.u32.u64.high %v14443_v16, %v6933_v44, %v14474_v43  ;;  %v14478_v52 = vmul.u32.u64.low %v14443_v16, %v6929_v21  ;;  %v14479_v23 = vmul.u32.u64.high %v14443_v16, %v6929_v21, %v14478_v52 }
 0xcdf   :  { %v7012_v38 = vor.u32 %v7011_v12, %v7010_v59  ;;  %v7014_v46 = vshrl.u32 %v15480_v2, %v7005_v1  ;;  %v7006_v26 = vshrl.u32 %v15510_v22, %v7005_v1  ;;  %v7016_v57 = vshll.u32 %v15480_v2, %v7004_v13 }
 0xce0   :  { %v7017_v39 = vshrl.u32 %v15488_v62, %v7005_v1  ;;  %v7020_v45 = vshrl.u32 %v15505_v9, %v7005_v1  ;;  %v6941_v8 = vmul.u32 %v14443_v16, %v6925_v15  ;;  %v7019_v10 = vshll.u32 %v15488_v62, %v7004_v13 }
 0xce1   :  { %v7015_v61 = vor.u32 %v7014_v46, %v7013_v54  ;;  %vm7022_vm9 = vcmp.lt.s32.totalorder %v14445_v33, 1  ;;  %vm6943_vm14 = vc.u32 %v14475_v63, %v14478_v52  ;;  %v6944_v60 = vadd.s32 1, %v14479_v23 }
 0xce2   :  { %v7018_v17 = vor.u32 %v7017_v39, %v7016_v57  ;;  %vm7023_vm4 = vcmp.lt.s32.totalorder %v14445_v33, 2  ;;  %v7021_v18 = vor.u32 %v7020_v45, %v7019_v10  ;;  %vm7024_vm15 = vcmp.lt.s32.totalorder %v14445_v33, 3 }
 0xce3   :  { %vm7025_vm6 = vcmp.lt.s32.totalorder %v14445_v33, 4  ;;  %v7030_v28 = vsel %vm7022_vm9, %v7009_v5, %v7012_v38  ;;  %v6945_v16 = vsel %vm6943_vm14, %v6944_v60, %v14479_v23  ;;  %v7034_v51 = vsel %vm7022_vm9, %v7012_v38, %v7015_v61 }
 0xce4   :  { %v7027_v42 = vsel %vm7025_vm6, %v7015_v61, 2102212464  ;;  %v7031_v13 = vsel %vm7025_vm6, %v7018_v17, 920167782  ;;  %v6946_v29 = vadd.s32 %v6945_v16, %v6941_v8  ;;  %v7026_v1 = vsel %vm7022_vm9, %v7006_v26, %v7009_v5 }
 0xce5   :  { %v7032_v53 = vsel %vm7024_vm15, %v7015_v61, %v7031_v13  ;;  %v7035_v48 = vsel %vm7025_vm6, %v7021_v18, 1326507024  ;;  %v7028_v31 = vsel %vm7024_vm15, %v7012_v38, %v7027_v42  ;;  %vm7105_vm7 = vcmp.gt.s32.totalorder %v14451_v19, 0 }
 0xce6   :  { %v7033_v7 = vsel %vm7023_vm4, %v7030_v28, %v7032_v53  ;;  %v7036_v41 = vsel %vm7024_vm15, %v7018_v17, %v7035_v48  ;;  %v6947_v40 = vadd.s32 536870912, %v6946_v29  ;;  %v7101_v20 = vand.u32 8388607, %v15448_v0 }
 0xce7   :  { %v7037_v56 = vsel %vm7023_vm4, %v7034_v51, %v7036_v41  ;;  %v14504_v36 = vmul.u32.u64.low %v14447_v55, %v7033_v7  ;;  %v14505_v25 = vmul.u32.u64.high %v14447_v55, %v7033_v7, %v14504_v36  ;;  %v7106_v35 = vsel %vm7105_vm7, %v14451_v19, 0 }
 0xce8   :  { %v14509_v14 = vmul.u32.u64.low %v14447_v55, %v7037_v56  ;;  %v14510_v3 = vmul.u32.u64.high %v14447_v55, %v7037_v56, %v14509_v14  ;;  %v14515_v59 = vshrl.u32 %v6947_v40, 30  ;;  %v7029_v15 = vsel %vm7023_vm4, %v7026_v1, %v7028_v31 }
 0xce9   :  { %v7108_v21 = vand.u32 31, %v7106_v35  ;;  %v7201_v44 = vand.u32 2139095040, %v14439_v32  ;;  %v7048_v43 = vadd.s32 1, %v14505_v25  ;;  %v7045_v5 = vmul.u32 %v14447_v55, %v7029_v15 }
 0xcea   :  { %v6949_v12 = vshll.u32 %v14515_v59, 30  ;;  %vm7047_vm0 = vc.u32 %v14510_v3, %v14504_v36  ;;  %v7102_v38 = vor.u32 8388608, %v7101_v20  ;;  %v7107_v8 = vshrl.u32 %v7106_v35, 5 }
 0xceb   :  { %v7109_v23 = vsub.s32 32, %v7108_v21  ;;  %v7049_v54 = vsel %vm7047_vm0, %v7048_v43, %v14505_v25  ;;  %v7202_v33 = vshrl.u32 %v7201_v44, 23  ;;  %v7111_v26 = vshll.u32 %v15510_v22, %v7108_v21 }
 0xcec   :  { %v14525_v19 = vsub.s32 %v6946_v29, %v6949_v12  ;;  %v7050_v46 = vadd.s32 %v7049_v54, %v7045_v5  ;;  %v7114_v55 = vshll.u32 %v15479_v34, %v7108_v21  ;;  %v7117_v17 = vshll.u32 %v15478_v50, %v7108_v21 }
 0xced   :  { %v7112_v57 = vshrl.u32 %v15479_v34, %v7109_v23  ;;  %v7115_v39 = vshrl.u32 %v15478_v50, %v7109_v23  ;;  %v7118_v61 = vshrl.u32 %v15480_v2, %v7109_v23  ;;  %v7142_v18 = vshll.u32 %v7102_v38, 8 }
 0xcee   :  { %v6952_v45 = vsub.s32 0, %v14525_v19  ;;  %v7051_v10 = vadd.s32 536870912, %v7050_v46  ;;  %v7120_v42 = vshll.u32 %v15480_v2, %v7108_v21  ;;  %v7121_v13 = vshrl.u32 %v15488_v62, %v7109_v23 }
 0xcef   :  { %v7113_v60 = vor.u32 %v7112_v57, %v7111_v26  ;;  %v7116_v16 = vor.u32 %v7115_v39, %v7114_v55  ;;  %v7119_v29 = vor.u32 %v7118_v61, %v7117_v17  ;;  %v7123_v1 = vshll.u32 %v15488_v62, %v7108_v21 }
 0xcf0   :  { %v8597_v28 = vmin.u32 %v6952_v45, %v14525_v19  ;;  %v14538_v51 = vshrl.u32 %v7051_v10, 30  ;;  %v7124_v53 = vshrl.u32 %v15505_v9, %v7109_v23  ;;  %v7122_v31 = vor.u32 %v7121_v13, %v7120_v42 }
 0xcf1   :  { %vm7126_vm1 = vcmp.lt.s32.totalorder %v7107_v8, 1  ;;  %v8608_v7 = vadd.s32 4294967169, %v7202_v33  ;;  %vm7127_vm11 = vcmp.lt.s32.totalorder %v7107_v8, 2  ;;  %vm7129_vm2 = vcmp.lt.s32.totalorder %v7107_v8, 4 }
 0xcf2   :  { %v6954_v48 = vclz %v8597_v28  ;;  %v7053_v41 = vshll.u32 %v14538_v51, 30  ;;  %v7125_v40 = vor.u32 %v7124_v53, %v7123_v1  ;;  %vm7128_vm3 = vcmp.lt.s32.totalorder %v7107_v8, 3 }
 0xcf3   :  { %v7134_v25 = vsel %vm7126_vm1, %v7113_v60, %v7116_v16  ;;  %v7135_v14 = vsel %vm7129_vm2, %v7122_v31, 920167782  ;;  %v7131_v35 = vsel %vm7129_vm2, %v7119_v29, 2102212464  ;;  %v7138_v21 = vsel %vm7126_vm1, %v7116_v16, %v7119_v29 }
 0xcf4   :  { %v8598_v56 = vadd.s32 4294967294, %v6954_v48  ;;  %v14544_v20 = vsub.s32 %v7050_v46, %v7053_v41  ;;  %v7136_v15 = vsel %vm7128_vm3, %v7119_v29, %v7135_v14  ;;  %v7110_v44 = vshrl.u32 %v15510_v22, %v7109_v23  ;;  %v6778_v14 = vpop.permute.xlu0 %6777 }
 0xcf5   :  { %v7137_v12 = vsel %vm7127_vm11, %v7134_v25, %v7136_v15  ;;  %v7139_v43 = vsel %vm7129_vm2, %v7125_v40, 1326507024  ;;  %v7208_v33 = vadd.s32 1, %v8608_v7  ;;  %v7132_v57 = vsel %vm7128_vm3, %v7116_v16, %v7131_v35 }
 0xcf6   :  { %vm8599_vm5 = vcmp.lt.s32.totalorder %v8598_v56, 0  ;;  %v7056_v38 = vsub.s32 0, %v14544_v20  ;;  %v7140_v54 = vsel %vm7128_vm3, %v7122_v31, %v7139_v43  ;;  %v7130_v46 = vsel %vm7126_vm1, %v7110_v44, %v7113_v60 }
 0xcf7   :  { %v6957_v5 = vsel %vm8599_vm5, 0, %v8598_v56  ;;  %v7141_v39 = vsel %vm7127_vm11, %v7138_v21, %v7140_v54  ;;  %vm7209_vm8 = vcmp.gt.s32.totalorder %v7208_v33, 0  ;;  %v15447_v28 = vand.u32 2147483647, %v14439_v32 }
 0xcf8   :  { %v6962_v26 = vsub.s32 4294967266, %v6957_v5  ;;  %v8601_v45 = vmin.u32 %v7056_v38, %v14544_v20  ;;  %v14556_v55 = vmul.u32.u64.low %v7142_v18, %v7141_v39  ;;  %v14557_v23 = vmul.u32.u64.high %v7142_v18, %v7141_v39, %v14556_v55 }
 0xcf9   :  { %v14559_v61 = vmul.u32.u64.low %v7142_v18, %v7137_v12  ;;  %v14560_v10 = vmul.u32.u64.high %v7142_v18, %v7137_v12, %v14559_v61  ;;  %v7210_v42 = vsel %vm7209_vm8, %v7208_v33, 0  ;;  %v6958_v13 = vsub.s32 32, %v6957_v5 }
 0xcfa   :  { %v7058_v17 = vclz %v8601_v45  ;;  %v6963_v60 = vadd.s32 127, %v6962_v26  ;;  %v7133_v16 = vsel %vm7127_vm11, %v7130_v46, %v7132_v57  ;;  %v7212_v29 = vand.u32 31, %v7210_v42 }
 0xcfb   :  { %vm7151_vm10 = vc.u32 %v14557_v23, %v14559_v61  ;;  %v6942_v53 = vadd.s32 %v14478_v52, %v14475_v63  ;;  %v7152_v48 = vadd.s32 1, %v14560_v10  ;;  %v7149_v31 = vmul.u32 %v7142_v18, %v7133_v16 }
 0xcfc   :  { %v8602_v1 = vadd.s32 4294967294, %v7058_v17  ;;  %v7205_v7 = vand.u32 8388607, %v15447_v28  ;;  %v6964_v40 = vshll.u32 %v6963_v60, 23  ;;  %v7213_v56 = vsub.s32 32, %v7212_v29 }
 0xcfd   :  { %v6960_v41 = vshrl.u32 %v6942_v53, %v6958_v13  ;;  %v7153_v8 = vsel %vm7151_vm10, %v7152_v48, %v14560_v10  ;;  %v6959_v35 = vshll.u32 %v14525_v19, %v6957_v5  ;;  %v14575_v63 = vadd.f32 %v14433_v58, %v6778_v14 }
 0xcfe   :  { %vm8603_vm13 = vcmp.lt.s32.totalorder %v8602_v1, 0  ;;  %v7154_v25 = vadd.s32 %v7153_v8, %v7149_v31  ;;  %v7206_v44 = vor.u32 8388608, %v7205_v7  ;;  %v6965_v18 = vor.u32 4788187, %v6964_v40 }
 0xcff   :  { %v7061_v15 = vsel %vm8603_vm13, 0, %v8602_v1  ;;  %v6961_v52 = vor.u32 %v6960_v41, %v6959_v35  ;;  %v7216_v12 = vshrl.u32 %v15479_v34, %v7213_v56  ;;  %v7219_v43 = vshrl.u32 %v15478_v50, %v7213_v56 }
 0xd00   :  { %v7155_v21 = vadd.s32 536870912, %v7154_v25  ;;  %v7066_v38 = vsub.s32 4294967266, %v7061_v15  ;;  %v7222_v33 = vshrl.u32 %v15480_v2, %v7213_v56  ;;  %v7225_v26 = vshrl.u32 %v15488_v62, %v7213_v56 }
 0xd01   :  { %v7215_v19 = vshll.u32 %v15510_v22, %v7212_v29  ;;  %v7218_v5 = vshll.u32 %v15479_v34, %v7212_v29  ;;  %v7224_v58 = vshll.u32 %v15480_v2, %v7212_v29  ;;  %v7228_v46 = vshrl.u32 %v15505_v9, %v7213_v56 }
 0xd02   :  { %v14579_v54 = vshrl.u32 %v7155_v21, 30  ;;  %v7211_v39 = vshrl.u32 %v7210_v42, 5  ;;  %v7221_v45 = vshll.u32 %v15478_v50, %v7212_v29  ;;  %v14590_v55 = vadd.f32 %v14435_v49, %v6778_v14 }
 0xd03   :  { %v7217_v10 = vor.u32 %v7216_v12, %v7215_v19  ;;  %v7220_v17 = vor.u32 %v7219_v43, %v7218_v5  ;;  %v7226_v13 = vor.u32 %v7225_v26, %v7224_v58  ;;  %v7227_v60 = vshll.u32 %v15488_v62, %v7212_v29 }
 0xd04   :  { %v7157_v57 = vshll.u32 %v14579_v54, 30  ;;  %v7046_v16 = vadd.s32 %v14504_v36, %v14510_v3  ;;  %v7067_v1 = vadd.s32 127, %v7066_v38  ;;  %v7223_v48 = vor.u32 %v7222_v33, %v7221_v45 }
 0xd05   :  { %v6966_v31 = vand.u32 2147483647, %v6965_v18  ;;  %v6968_v7 = vcvt.s32.f32 %v6961_v52  ;;  %v7229_v42 = vor.u32 %v7228_v46, %v7227_v60  ;;  %v7246_v41 = vshll.u32 %v7206_v44, 8 }
 0xd06   :  { %v14595_v53 = vsub.s32 %v7154_v25, %v7157_v57  ;;  %v7062_v40 = vsub.s32 32, %v7061_v15  ;;  %vm7230_vm9 = vcmp.lt.s32.totalorder %v7211_v39, 1  ;;  %vm7233_vm14 = vcmp.lt.s32.totalorder %v7211_v39, 4 }
 0xd07   :  { %v7214_v8 = vshrl.u32 %v15510_v22, %v7213_v56  ;;  %vm7232_vm4 = vcmp.lt.s32.totalorder %v7211_v39, 3  ;;  %v7238_v29 = vsel %vm7230_vm9, %v7217_v10, %v7220_v17  ;;  %v7239_v14 = vsel %vm7233_vm14, %v7226_v13, 920167782 }
 0xd08   :  { %v7160_v49 = vsub.s32 0, %v14595_v53  ;;  %v7068_v36 = vshll.u32 %v7067_v1, 23  ;;  %vm7231_vm15 = vcmp.lt.s32.totalorder %v7211_v39, 2  ;;  %v7235_v3 = vsel %vm7233_vm14, %v7223_v48, 2102212464 }
 0xd09   :  { %v7240_v25 = vsel %vm7232_vm4, %v7223_v48, %v7239_v14  ;;  %v7242_v44 = vsel %vm7230_vm9, %v7220_v17, %v7223_v48  ;;  %v7243_v52 = vsel %vm7233_vm14, %v7229_v42, 1326507024  ;;  %v7063_v18 = vshll.u32 %v14544_v20, %v7061_v15 }
 0xd0a   :  { %v8605_v35 = vmin.u32 %v7160_v49, %v14595_v53  ;;  %v7241_v21 = vsel %vm7231_vm15, %v7238_v29, %v7240_v25  ;;  %v7064_v12 = vshrl.u32 %v7046_v16, %v7062_v40  ;;  %v7234_v56 = vsel %vm7230_vm9, %v7214_v8, %v7217_v10 }
 0xd0b   :  { %v7244_v43 = vsel %vm7232_vm4, %v7226_v13, %v7243_v52  ;;  %v7236_v38 = vsel %vm7232_vm4, %v7220_v17, %v7235_v3  ;;  %v14606_v26 = vmul.u32.u64.low %v7246_v41, %v7241_v21  ;;  %v14607_v19 = vmul.u32.u64.high %v7246_v41, %v7241_v21, %v14606_v26 }
 0xd0c   :  { %v7245_v33 = vsel %vm7231_vm15, %v7242_v44, %v7244_v43  ;;  %v6969_v5 = vmul.f32 %v6968_v7, %v6966_v31  ;;  %v7069_v58 = vor.u32 4788187, %v7068_v36  ;;  %v7162_v45 = vclz %v8605_v35  ;;  %v14630_v35 = vpop.permute.xlu1 %6782 }
 0xd0d   :  { %v14610_v46 = vmul.u32.u64.low %v7246_v41, %v7245_v33  ;;  %v14611_v57 = vmul.u32.u64.high %v7246_v41, %v7245_v33, %v14610_v46  ;;  %v7305_v60 = vand.u32 2139095040, %v14575_v63  ;;  %v7065_v20 = vor.u32 %v7064_v12, %v7063_v18 }
 0xd0e   :  { %v7237_v15 = vsel %vm7231_vm15, %v7234_v56, %v7236_v38  ;;  %v7409_v10 = vand.u32 2139095040, %v14590_v55  ;;  %v7256_v17 = vadd.s32 1, %v14607_v19  ;;  %v6970_v16 = vxor.u32 2147483648, %v6969_v5 }
 0xd0f   :  { %v7306_v13 = vshrl.u32 %v7305_v60, 23  ;;  %v6972_v1 = vsub.s32 4, %v14515_v59  ;;  %v7070_v48 = vand.u32 2147483647, %v7069_v58  ;;  %v15445_v31 = vand.u32 2147483647, %v14575_v63 }
 0xd10   :  { %v8606_v7 = vadd.s32 4294967294, %v7162_v45  ;;  %v7253_v42 = vmul.u32 %v7246_v41, %v7237_v15  ;;  %vm7255_vm6 = vc.u32 %v14611_v57, %v14606_v26  ;;  %v7072_v49 = vcvt.s32.f32 %v7065_v20 }
 0xd11   :  { %v8612_v40 = vadd.s32 4294967169, %v7306_v13  ;;  %v7257_v39 = vsel %vm7255_vm6, %v7256_v17, %v14607_v19  ;;  %v7410_v8 = vshrl.u32 %v7409_v10, 23  ;;  %vm6888_vm7 = vcmp.lt.s32.totalorder %v14418_v47, 0 }
 0xd12   :  { %v7258_v29 = vadd.s32 %v7257_v39, %v7253_v42  ;;  %v6971_v36 = vsel %vm6888_vm7, %v6970_v16, %v6969_v5  ;;  %v14624_v3 = vsel %vm6888_vm7, %v6972_v1, %v14515_v59  ;;  %v14626_v25 = vmul.f32 %v7072_v49, %v7070_v48 }
 0xd13   :  { %v7312_v14 = vadd.s32 1, %v8612_v40  ;;  %v7309_v41 = vand.u32 8388607, %v15445_v31  ;;  %vm8607_vm0 = vcmp.lt.s32.totalorder %v8606_v7, 0  ;;  %v8616_v44 = vadd.s32 4294967169, %v7410_v8 }
 0xd14   :  { %v7259_v21 = vadd.s32 536870912, %v7258_v29  ;;  %vm14634_vm11 = vcmp.le.f32.partialorder %v6886_v4, 0.7853982  ;;  %v14640_v59 = vadd.f32 %v14437_v30, %v14630_v35  ;;  %v14647_v56 = vadd.s32 %v14559_v61, %v14557_v23 }
 0xd15   :  { %vm7313_vm1 = vcmp.gt.s32.totalorder %v7312_v14, 0  ;;  %v14654_v4 = vsel %vm14634_vm11, %v14418_v47, %v6971_v36  ;;  %v7074_v33 = vxor.u32 2147483648, %v14626_v25  ;;  %v14657_v30 = vsel %vm8607_vm0, 0, %v8606_v7 }
 0xd16   :  { %v7314_v18 = vsel %vm7313_vm1, %v7312_v14, 0  ;;  %v14649_v43 = vshrl.u32 %v7259_v21, 30  ;;  %v7310_v58 = vor.u32 8388608, %v7309_v41  ;;  %v7416_v23 = vadd.s32 1, %v8616_v44 }
 0xd17   :  { %v7316_v38 = vand.u32 31, %v7314_v18  ;;  %v7315_v61 = vshrl.u32 %v7314_v18, 5  ;;  %v15446_v39 = vand.u32 2147483647, %v14590_v55  ;;  %vm6992_vm2 = vcmp.lt.s32.totalorder %v14420_v6, 0 }
 0xd18   :  { %v7261_v5 = vshll.u32 %v14649_v43, 30  ;;  %v7170_v8 = vsub.s32 4294967266, %v14657_v30  ;;  %v7350_v21 = vshll.u32 %v7310_v58, 8  ;;  %vm7417_vm5 = vcmp.gt.s32.totalorder %v7416_v23, 0 }
 0xd19   :  { %v7317_v46 = vsub.s32 32, %v7316_v38  ;;  %v7319_v45 = vshll.u32 %v15510_v22, %v7316_v38  ;;  %v7322_v60 = vshll.u32 %v15479_v34, %v7316_v38  ;;  %v7325_v20 = vshll.u32 %v15478_v50, %v7316_v38 }
 0xd1a   :  { %v14664_v15 = vsub.s32 %v7258_v29, %v7261_v5  ;;  %v7328_v13 = vshll.u32 %v15480_v2, %v7316_v38  ;;  %v7331_v48 = vshll.u32 %v15488_v62, %v7316_v38  ;;  %vm7334_vm3 = vcmp.lt.s32.totalorder %v7315_v61, 1 }
 0xd1b   :  { %v7320_v10 = vshrl.u32 %v15479_v34, %v7317_v46  ;;  %v7323_v17 = vshrl.u32 %v15478_v50, %v7317_v46  ;;  %v7326_v16 = vshrl.u32 %v15480_v2, %v7317_v46  ;;  %v7329_v1 = vshrl.u32 %v15488_v62, %v7317_v46 }
 0xd1c   :  { %v7332_v7 = vshrl.u32 %v15505_v9, %v7317_v46  ;;  %v7264_v42 = vsub.s32 0, %v14664_v15  ;;  %v7318_v44 = vshrl.u32 %v15510_v22, %v7317_v46  ;;  %vm7335_vm8 = vcmp.lt.s32.totalorder %v7315_v61, 2 }
 0xd1d   :  { %v7321_v40 = vor.u32 %v7320_v10, %v7319_v45  ;;  %v7324_v49 = vor.u32 %v7323_v17, %v7322_v60  ;;  %v7327_v29 = vor.u32 %v7326_v16, %v7325_v20  ;;  %v7330_v14 = vor.u32 %v7329_v1, %v7328_v13 }
 0xd1e   :  { %v7333_v36 = vor.u32 %v7332_v7, %v7331_v48  ;;  %v8609_v41 = vmin.u32 %v7264_v42, %v14664_v15  ;;  %vm7337_vm10 = vcmp.lt.s32.totalorder %v7315_v61, 4  ;;  %vm7336_vm13 = vcmp.lt.s32.totalorder %v7315_v61, 3 }
 0xd1f   :  { %v7342_v18 = vsel %vm7334_vm3, %v7321_v40, %v7324_v49  ;;  %v7339_v5 = vsel %vm7337_vm10, %v7327_v29, 2102212464  ;;  %v7343_v45 = vsel %vm7337_vm10, %v7330_v14, 920167782  ;;  %v7338_v60 = vsel %vm7334_vm3, %v7318_v44, %v7321_v40 }
 0xd20   :  { %v7266_v38 = vclz %v8609_v41  ;;  %v7344_v10 = vsel %vm7336_vm13, %v7327_v29, %v7343_v45  ;;  %v7346_v17 = vsel %vm7334_vm3, %v7324_v49, %v7327_v29  ;;  %v7347_v20 = vsel %vm7337_vm10, %v7333_v36, 1326507024 }
 0xd21   :  { %v7340_v16 = vsel %vm7336_vm13, %v7324_v49, %v7339_v5  ;;  %v7345_v1 = vsel %vm7335_vm8, %v7342_v18, %v7344_v10  ;;  %v7348_v48 = vsel %vm7336_vm13, %v7330_v14, %v7347_v20  ;;  %v7171_v58 = vadd.s32 127, %v7170_v8 }
 0xd22   :  { %v8610_v13 = vadd.s32 4294967294, %v7266_v38  ;;  %v7349_v7 = vsel %vm7335_vm8, %v7346_v17, %v7348_v48  ;;  %v14681_v46 = vmul.u32.u64.low %v7350_v21, %v7345_v1  ;;  %v14682_v42 = vmul.u32.u64.high %v7350_v21, %v7345_v1, %v14681_v46 }
 0xd23   :  { %v14685_v41 = vmul.u32.u64.low %v7350_v21, %v7349_v7  ;;  %v14686_v31 = vmul.u32.u64.high %v7350_v21, %v7349_v7, %v14685_v41  ;;  %v7418_v40 = vsel %vm7417_vm5, %v7416_v23, 0  ;;  %v7341_v49 = vsel %vm7335_vm8, %v7338_v60, %v7340_v16 }
 0xd24   :  { %vm8611_vm9 = vcmp.lt.s32.totalorder %v8610_v13, 0  ;;  %v7413_v14 = vand.u32 8388607, %v15446_v39  ;;  %v7420_v8 = vand.u32 31, %v7418_v40  ;;  %v14697_v36 = vsel %vm6992_vm2, %v7074_v33, %v14626_v25 }
 0xd25   :  { %v14689_v29 = vsel %vm8611_vm9, 0, %v8610_v13  ;;  %v7166_v44 = vsub.s32 32, %v14657_v30  ;;  %v7513_v38 = vand.u32 2139095040, %v14640_v59  ;;  %v7360_v5 = vadd.s32 1, %v14682_v42 }
 0xd26   :  { %v7274_v61 = vsub.s32 4294967266, %v14689_v29  ;;  %v7421_v45 = vsub.s32 32, %v7420_v8  ;;  %v7172_v60 = vshll.u32 %v7171_v58, 23  ;;  %v7254_v10 = vadd.s32 %v14606_v26, %v14611_v57 }
 0xd27   :  { %v7357_v25 = vmul.u32 %v7350_v21, %v7341_v49  ;;  %vm7359_vm14 = vc.u32 %v14686_v31, %v14681_v46  ;;  %v7414_v17 = vor.u32 8388608, %v7413_v14  ;;  %v7270_v16 = vsub.s32 32, %v14689_v29 }
 0xd28   :  { %v7361_v33 = vsel %vm7359_vm14, %v7360_v5, %v14682_v42  ;;  %v7424_v20 = vshrl.u32 %v15479_v34, %v7421_v45  ;;  %v7427_v13 = vshrl.u32 %v15478_v50, %v7421_v45  ;;  %v7419_v48 = vshrl.u32 %v7418_v40, 5 }
 0xd29   :  { %v7362_v1 = vadd.s32 %v7361_v33, %v7357_v25  ;;  %v7514_v7 = vshrl.u32 %v7513_v38, 23  ;;  %v7275_v58 = vadd.s32 127, %v7274_v61  ;;  %v7423_v41 = vshll.u32 %v15510_v22, %v7420_v8 }
 0xd2a   :  { %v7426_v26 = vshll.u32 %v15479_v34, %v7420_v8  ;;  %v7430_v57 = vshrl.u32 %v15480_v2, %v7421_v45  ;;  %v7429_v42 = vshll.u32 %v15478_v50, %v7420_v8  ;;  %v7432_v49 = vshll.u32 %v15480_v2, %v7420_v8 }
 0xd2b   :  { %v7363_v21 = vadd.s32 536870912, %v7362_v1  ;;  %v7433_v14 = vshrl.u32 %v15488_v62, %v7421_v45  ;;  %vm14722_vm4 = vcmp.le.f32.partialorder %v6990_v37, 0.7853982  ;;  %v7425_v40 = vor.u32 %v7424_v20, %v7423_v41 }
 0xd2c   :  { %v7428_v38 = vor.u32 %v7427_v13, %v7426_v26  ;;  %v7435_v61 = vshll.u32 %v15488_v62, %v7420_v8  ;;  %v7436_v25 = vshrl.u32 %v15505_v9, %v7421_v45  ;;  %v7168_v33 = vshrl.u32 %v14647_v56, %v7166_v44 }
 0xd2d   :  { %v14729_v39 = vshrl.u32 %v7363_v21, 30  ;;  %v7431_v12 = vor.u32 %v7430_v57, %v7429_v42  ;;  %v7434_v28 = vor.u32 %v7433_v14, %v7432_v49  ;;  %v7173_v0 = vor.u32 4788187, %v7172_v60 }
 0xd2e   :  { %v7437_v19 = vor.u32 %v7436_v25, %v7435_v61  ;;  %v7454_v18 = vshll.u32 %v7414_v17, 8  ;;  %v8620_v23 = vadd.s32 4294967169, %v7514_v7  ;;  %v7276_v37 = vshll.u32 %v7275_v58, 23 }
 0xd2f   :  { %v7365_v11 = vshll.u32 %v14729_v39, 30  ;;  %vm7438_vm15 = vcmp.lt.s32.totalorder %v7419_v48, 1  ;;  %vm7441_vm6 = vcmp.lt.s32.totalorder %v7419_v48, 4  ;;  %vm7096_vm7 = vcmp.lt.s32.totalorder %v14426_v27, 0 }
 0xd30   :  { %v7271_v8 = vshll.u32 %v14664_v15, %v14689_v29  ;;  %v7272_v20 = vshrl.u32 %v7254_v10, %v7270_v16  ;;  %v7446_v56 = vsel %vm7438_vm15, %v7425_v40, %v7428_v38  ;;  %v7447_v44 = vsel %vm7441_vm6, %v7434_v28, 920167782 }
 0xd31   :  { %v14736_v13 = vsub.s32 %v7362_v1, %v7365_v11  ;;  %v7422_v60 = vshrl.u32 %v15510_v22, %v7421_v45  ;;  %vm7440_vm0 = vcmp.lt.s32.totalorder %v7419_v48, 3  ;;  %v7443_v17 = vsel %vm7441_vm6, %v7431_v12, 2102212464 }
 0xd32   :  { %vm7439_vm1 = vcmp.lt.s32.totalorder %v7419_v48, 2  ;;  %v7448_v7 = vsel %vm7440_vm0, %v7431_v12, %v7447_v44  ;;  %v7450_v58 = vsel %vm7438_vm15, %v7428_v38, %v7431_v12  ;;  %v7451_v41 = vsel %vm7441_vm6, %v7437_v19, 1326507024 }
 0xd33   :  { %v7277_v26 = vor.u32 4788187, %v7276_v37  ;;  %v7368_v57 = vsub.s32 0, %v14736_v13  ;;  %v7442_v15 = vsel %vm7438_vm15, %v7422_v60, %v7425_v40  ;;  %v7449_v29 = vsel %vm7439_vm1, %v7446_v56, %v7448_v7 }
 0xd34   :  { %v7444_v10 = vsel %vm7440_vm0, %v7428_v38, %v7443_v17  ;;  %v7452_v16 = vsel %vm7440_vm0, %v7434_v28, %v7451_v41  ;;  %v14743_v11 = vmul.u32.u64.low %v7454_v18, %v7449_v29  ;;  %v14744_v1 = vmul.u32.u64.high %v7454_v18, %v7449_v29, %v14743_v11 }
 0xd35   :  { %v7078_v45 = vsel %vm14722_vm4, %v14420_v6, %v14697_v36  ;;  %v8613_v12 = vmin.u32 %v7368_v57, %v14736_v13  ;;  %v7453_v19 = vsel %vm7439_vm1, %v7450_v58, %v7452_v16  ;;  %v7520_v21 = vadd.s32 1, %v8620_v23 }
 0xd36   :  { %v15666_v42 = vshll.u32 %v14595_v53, %v14657_v30  ;;  %v7273_v14 = vor.u32 %v7272_v20, %v7271_v8  ;;  %v14756_v28 = vmul.u32.u64.low %v7454_v18, %v7453_v19  ;;  %v14757_v40 = vmul.u32.u64.high %v7454_v18, %v7453_v19, %v14756_v28 }
 0xd37   :  { %v7174_v38 = vand.u32 2147483647, %v7173_v0  ;;  %v7370_v61 = vclz %v8613_v12  ;;  %v7445_v25 = vsel %vm7439_vm1, %v7442_v15, %v7444_v10  ;;  %vm7521_vm3 = vcmp.gt.s32.totalorder %v7520_v21, 0 }
 0xd38   :  { %v7169_v49 = vor.u32 %v7168_v33, %v15666_v42  ;;  %v7278_v37 = vand.u32 2147483647, %v7277_v26  ;;  %v7464_v36 = vadd.s32 1, %v14744_v1  ;;  %v15667_v56 = vand.u32 2147483647, %v14640_v59 }
 0xd39   :  { %v7522_v23 = vsel %vm7521_vm3, %v7520_v21, 0  ;;  %9524 = vcosq.f32 %v7078_v45  ;;  %v15668_v53 = vsub.s32 4, %v14579_v54  ;;  %v8614_v0 = vadd.s32 4294967294, %v7370_v61 }
 0xd3a   :  { %v7517_v44 = vand.u32 8388607, %v15667_v56  ;;  %v7524_v33 = vand.u32 31, %v7522_v23  ;;  %v7176_v48 = vcvt.s32.f32 %v7169_v49  ;;  %v7280_v8 = vcvt.s32.f32 %v7273_v14 }
 0xd3b   :  { %v14768_v30 = vsel %vm7096_vm7, %v15668_v53, %v14579_v54  ;;  %v7461_v20 = vmul.u32 %v7454_v18, %v7445_v25  ;;  %vm7463_vm5 = vc.u32 %v14757_v40, %v14743_v11  ;;  %9526 = vsinq.f32 %v7078_v45 }
 0xd3c   :  { %vm8615_vm8 = vcmp.lt.s32.totalorder %v8614_v0, 0  ;;  %v7465_v60 = vsel %vm7463_vm5, %v7464_v36, %v14744_v1  ;;  %v7525_v17 = vsub.s32 32, %v7524_v33  ;;  %v7177_v7 = vmul.f32 %v7176_v48, %v7174_v38 }
 0xd3d   :  { %v14773_v58 = vmul.f32 %v7280_v8, %v7278_v37  ;;  %v7466_v41 = vadd.s32 %v7465_v60, %v7461_v20  ;;  %v7518_v26 = vor.u32 8388608, %v7517_v44  ;;  %v14775_v54 = vsel %vm8615_vm8, 0, %v8614_v0 }
 0xd3e   :  { %v14777_v57 = vshrl.u32 %v7522_v23, 5  ;;  %v7533_v15 = vshll.u32 %v15478_v50, %v7524_v33  ;;  %v14782_v18 = vadd.f32 %v14441_v24, %v14630_v35  ;;  %v7528_v10 = vshrl.u32 %v15479_v34, %v7525_v17 }
 0xd3f   :  { %v7467_v29 = vadd.s32 536870912, %v7466_v41  ;;  %v7531_v16 = vshrl.u32 %v15478_v50, %v7525_v17  ;;  %v7534_v1 = vshrl.u32 %v15480_v2, %v7525_v17  ;;  %v7527_v45 = vshll.u32 %v15510_v22, %v7524_v33 }
 0xd40   :  { %v7530_v12 = vshll.u32 %v15479_v34, %v7524_v33  ;;  %v7536_v19 = vshll.u32 %v15480_v2, %v7524_v33  ;;  %v7537_v21 = vshrl.u32 %v15488_v62, %v7525_v17  ;;  %v7178_v42 = vxor.u32 2147483648, %v7177_v7 }
 0xd41   :  { %v7282_v49 = vxor.u32 2147483648, %v14773_v58  ;;  %v14792_v24 = vshrl.u32 %v7467_v29, 30  ;;  %v7535_v35 = vor.u32 %v7534_v1, %v7533_v15  ;;  %v7378_v14 = vsub.s32 4294967266, %v14775_v54 }
 0xd42   :  { %v7529_v28 = vor.u32 %v7528_v10, %v7527_v45  ;;  %v7532_v38 = vor.u32 %v7531_v16, %v7530_v12  ;;  %v7538_v61 = vor.u32 %v7537_v21, %v7536_v19  ;;  %v15669_v25 = vand.u32 2147483647, %v14426_v27 }
 0xd43   :  { %v7469_v36 = vshll.u32 %v14792_v24, 30  ;;  %v7539_v56 = vshll.u32 %v15488_v62, %v7524_v33  ;;  %v7540_v44 = vshrl.u32 %v15505_v9, %v7525_v17  ;;  %v7558_v23 = vshll.u32 %v7518_v26, 8  ;;  %v14804_v53 = vpop.eup %9524 }
 0xd44   :  { %vm14797_vm10 = vcmp.le.f32.partialorder %v15669_v25, 0.7853982  ;;  %vm7200_vm13 = vcmp.lt.s32.totalorder %v14439_v32, 0  ;;  %v7374_v0 = vsub.s32 32, %v14775_v54  ;;  %v7526_v48 = vshrl.u32 %v15510_v22, %v7525_v17 }
 0xd45   :  { %vm7545_vm9 = vcmp.lt.s32.totalorder %v14777_v57, 4  ;;  %v7617_v8 = vand.u32 2139095040, %v14782_v18  ;;  %v14811_v20 = vsub.s32 %v7466_v41, %v7469_v36  ;;  %v7541_v60 = vor.u32 %v7540_v44, %v7539_v56  ;;  %v14816_v26 = vpop.eup %9526 }
 0xd46   :  { %vm7542_vm14 = vcmp.lt.s32.totalorder %v14777_v57, 1  ;;  %v7547_v33 = vsel %vm7545_vm9, %v7535_v35, 2102212464  ;;  %v7379_v15 = vadd.s32 127, %v7378_v14  ;;  %vm7544_vm15 = vcmp.lt.s32.totalorder %v14777_v57, 3 }
 0xd47   :  { %v7550_v29 = vsel %vm7542_vm14, %v7529_v28, %v7532_v38  ;;  %v7551_v17 = vsel %vm7545_vm9, %v7538_v61, 920167782  ;;  %v15672_v10 = vand.u32 2147483647, %v14439_v32  ;;  %v7472_v16 = vsub.s32 0, %v14811_v20 }
 0xd48   :  { %vm7543_vm0 = vcmp.lt.s32.totalorder %v14777_v57, 2  ;;  %v7552_v1 = vsel %vm7544_vm15, %v7535_v35, %v7551_v17  ;;  %v7554_v45 = vsel %vm7542_vm14, %v7532_v38, %v7535_v35  ;;  %v7546_v12 = vsel %vm7542_vm14, %v7526_v48, %v7529_v28 }
 0xd49   :  { %vm14823_vm6 = vcmp.le.f32.partialorder %v15672_v10, 0.7853982  ;;  %v7548_v19 = vsel %vm7544_vm15, %v7532_v38, %v7547_v33  ;;  %v7553_v21 = vsel %vm7543_vm0, %v7550_v29, %v7552_v1  ;;  %v7555_v14 = vsel %vm7545_vm9, %v7541_v60, 1326507024 }
 0xd4a   :  { %v8617_v25 = vmin.u32 %v7472_v16, %v14811_v20  ;;  %v7556_v36 = vsel %vm7544_vm15, %v7538_v61, %v7555_v14  ;;  %v14834_v56 = vmul.u32.u64.low %v7558_v23, %v7553_v21  ;;  %v14835_v44 = vmul.u32.u64.high %v7558_v23, %v7553_v21, %v14834_v56 }
 0xd4b   :  { %v15675_v10 = vsel %vm14634_vm11, 0, %v14624_v3  ;;  %v7179_v35 = vsel %vm7096_vm7, %v7178_v42, %v7177_v7  ;;  %v7557_v28 = vsel %vm7543_vm0, %v7554_v45, %v7556_v36  ;;  %v7618_v38 = vshrl.u32 %v7617_v8, 23 }
 0xd4c   :  { %v14841_v17 = vadd.s32 3, %v15675_v10  ;;  %v7358_v48 = vadd.s32 %v14681_v46, %v14686_v31  ;;  %v7474_v61 = vclz %v8617_v25  ;;  %9528 = vcosq.f32 %v14654_v4 }
 0xd4d   :  { %v14849_v60 = vmul.u32.u64.low %v7558_v23, %v7557_v28  ;;  %v14850_v33 = vmul.u32.u64.high %v7558_v23, %v7557_v28, %v14849_v60  ;;  %v7183_v3 = vsel %vm14797_vm10, 0, %v14768_v30  ;;  %v7549_v52 = vsel %vm7543_vm0, %v7546_v12, %v7548_v19 }
 0xd4e   :  { %v8624_v7 = vadd.s32 4294967169, %v7618_v38  ;;  %v7283_v42 = vsel %vm7200_vm13, %v7282_v49, %v14773_v58  ;;  %v7376_v8 = vshrl.u32 %v7358_v48, %v7374_v0  ;;  %v7380_v31 = vshll.u32 %v7379_v15, 23 }
 0xd4f   :  { %v7568_v46 = vadd.s32 1, %v14835_v44  ;;  %v7182_v29 = vsel %vm14797_vm10, %v14426_v27, %v7179_v35  ;;  %v7614_v16 = vand.u32 2147483647, %v14782_v18  ;;  %v7076_v30 = vsub.s32 4, %v14538_v51 }
 0xd50   :  { %v7624_v1 = vadd.s32 1, %v8624_v7  ;;  %v7375_v57 = vshll.u32 %v14736_v13, %v14775_v54  ;;  %v8618_v45 = vadd.s32 4294967294, %v7474_v61  ;;  %v7565_v12 = vmul.u32 %v7558_v23, %v7549_v52 }
 0xd51   :  { %vm7567_vm11 = vc.u32 %v14850_v33, %v14834_v56  ;;  %9530 = vsinq.f32 %v14654_v4  ;;  %v7286_v58 = vsel %vm14823_vm6, %v14439_v32, %v7283_v42  ;;  %v14877_v0 = vor.u32 4788187, %v7380_v31 }
 0xd52   :  { %v7569_v49 = vsel %vm7567_vm11, %v7568_v46, %v14835_v44  ;;  %vm7625_vm7 = vcmp.gt.s32.totalorder %v7624_v1, 0  ;;  %9532 = vcosq.f32 %v7182_v29  ;;  %v14875_v37 = vor.u32 %v7376_v8, %v7375_v57 }
 0xd53   :  { %v7570_v15 = vadd.s32 %v7569_v49, %v7565_v12  ;;  %9534 = vsinq.f32 %v7182_v29  ;;  %v14879_v13 = vadd.s32 3, %v7183_v3  ;;  %v7621_v54 = vand.u32 8388607, %v7614_v16 }
 0xd54   :  { %v7626_v4 = vsel %vm7625_vm7, %v7624_v1, 0  ;;  %9536 = vcosq.f32 %v7286_v58  ;;  %vm8619_vm1 = vcmp.lt.s32.totalorder %v8618_v45, 0  ;;  %v7077_v19 = vsel %vm6992_vm2, %v7076_v30, %v14538_v51 }
 0xd55   :  { %v7571_v23 = vadd.s32 536870912, %v7570_v15  ;;  %9538 = vsinq.f32 %v7286_v58  ;;  %v14888_v21 = vadd.s32 %v14743_v11, %v14757_v40  ;;  %v7628_v14 = vand.u32 31, %v7626_v4 }
 0xd56   :  { %v7087_v25 = vxor.u32 2147483648, %v14816_v26  ;;  %v7382_v36 = vand.u32 2147483647, %v14877_v0  ;;  %v7384_v44 = vcvt.s32.f32 %v14875_v37  ;;  %v7090_v35 = vxor.u32 2147483648, %v14804_v53  ;;  %v14896_v28 = vpop.eup %9528  ;;  %v7814_v0 = vld [vmem:[%s15383_s5 + $0x40] sm:$0xff] }
 0xd57   :  { %v14893_v10 = vshrl.u32 %v7571_v23, 30  ;;  %v14898_v38 = vsel %vm8619_vm1, 0, %v8618_v45  ;;  %v7622_v51 = vor.u32 8388608, %v7621_v54  ;;  %v7629_v48 = vsub.s32 32, %v7628_v14 }
 0xd58   :  { %v7079_v11 = vsel %vm14722_vm4, 0, %v7077_v19  ;;  %v14903_v40 = vadd.s32 %v14834_v56, %v14850_v33  ;;  %v7631_v60 = vshll.u32 %v15510_v22, %v7628_v14  ;;  %v7284_v3 = vsub.s32 4, %v14649_v43 }
 0xd59   :  { %v7573_v61 = vshll.u32 %v14893_v10, 30  ;;  %v7632_v52 = vshrl.u32 %v15479_v34, %v7629_v48  ;;  %v7634_v7 = vshll.u32 %v15479_v34, %v7628_v14  ;;  %v7635_v42 = vshrl.u32 %v15478_v50, %v7629_v48 }
 0xd5a   :  { %v7638_v8 = vshrl.u32 %v15480_v2, %v7629_v48  ;;  %v7482_v5 = vsub.s32 4294967266, %v14898_v38  ;;  %v7627_v56 = vshrl.u32 %v7626_v4, 5  ;;  %v7637_v33 = vshll.u32 %v15478_v50, %v7628_v14 }
 0xd5b   :  { %v14913_v31 = vsub.s32 %v7570_v15, %v7573_v61  ;;  %v14916_v46 = vpop.eup %9530  ;;  %v7478_v29 = vsub.s32 32, %v14898_v38  ;;  %v7633_v1 = vor.u32 %v7632_v52, %v7631_v60  ;;  %v7636_v30 = vor.u32 %v7635_v42, %v7634_v7 }
 0xd5c   :  { %v14919_v57 = vshll.u32 %v7622_v51, 8  ;;  %v14921_v34 = vpop.eup %9532  ;;  %v7639_v12 = vor.u32 %v7638_v8, %v7637_v33  ;;  %v7640_v58 = vshll.u32 %v15480_v2, %v7628_v14  ;;  %v7641_v49 = vshrl.u32 %v15488_v62, %v7629_v48 }
 0xd5d   :  { %v7576_v45 = vsub.s32 0, %v14913_v31  ;;  %v14926_v15 = vpop.eup %9534  ;;  %v7643_v50 = vshll.u32 %v15488_v62, %v7628_v14  ;;  %v7644_v54 = vshrl.u32 %v15505_v9, %v7629_v48  ;;  %v7083_v4 = vadd.s32 3, %v7079_v11 }
 0xd5e   :  { %v7285_v23 = vsel %vm7200_vm13, %v7284_v3, %v14649_v43  ;;  %v14933_v19 = vpop.eup %9536  ;;  %v7483_v51 = vadd.s32 127, %v7482_v5  ;;  %v7642_v60 = vor.u32 %v7641_v49, %v7640_v58  ;;  %vm7646_vm2 = vcmp.lt.s32.totalorder %v7627_v56, 1 }
 0xd5f   :  { %v8621_v61 = vmin.u32 %v7576_v45, %v14913_v31  ;;  %v9539_v2 = vpop.eup %9538  ;;  %v7630_v52 = vshrl.u32 %v15510_v22, %v7629_v48  ;;  %v7645_v7 = vor.u32 %v7644_v54, %v7643_v50  ;;  %vm7649_vm4 = vcmp.lt.s32.totalorder %v7627_v56, 4 }
 0xd60   :  { %v7654_v62 = vsel %vm7646_vm2, %v7633_v1, %v7636_v30  ;;  %vm7648_vm3 = vcmp.lt.s32.totalorder %v7627_v56, 3  ;;  %v7651_v9 = vsel %vm7649_vm4, %v7639_v12, 2102212464  ;;  %v7655_v11 = vsel %vm7649_vm4, %v7642_v60, 920167782 }
 0xd61   :  { %v7578_v14 = vclz %v8621_v61  ;;  %vm7647_vm5 = vcmp.lt.s32.totalorder %v7627_v56, 2  ;;  %v7656_v42 = vsel %vm7648_vm3, %v7639_v12, %v7655_v11  ;;  %v7658_v43 = vsel %vm7646_vm2, %v7636_v30, %v7639_v12 }
 0xd62   :  { %v7084_v3 = vand.u32 3, %v7083_v4  ;;  %v7650_v5 = vsel %vm7646_vm2, %v7630_v52, %v7633_v1  ;;  %v7657_v33 = vsel %vm7647_vm5, %v7654_v62, %v7656_v42  ;;  %v7659_v45 = vsel %vm7649_vm4, %v7645_v7, 1326507024 }
 0xd63   :  { %v8622_v8 = vadd.s32 4294967294, %v7578_v14  ;;  %v7652_v58 = vsel %vm7648_vm3, %v7636_v30, %v7651_v9  ;;  %v7660_v49 = vsel %vm7648_vm3, %v7642_v60, %v7659_v45  ;;  %v7479_v50 = vshll.u32 %v14811_v20, %v14898_v38 }
 0xd64   :  { %v14939_v22 = vmul.u32.u64.low %v14919_v57, %v7657_v33  ;;  %v14940_v48 = vmul.u32.u64.high %v14919_v57, %v7657_v33, %v14939_v22  ;;  %v7661_v54 = vsel %vm7647_vm5, %v7658_v43, %v7660_v49  ;;  %v7287_v12 = vsel %vm14823_vm6, 0, %v7285_v23 }
 0xd65   :  { %vm8623_vm8 = vcmp.lt.s32.totalorder %v8622_v8, 0  ;;  %v7480_v1 = vshrl.u32 %v14888_v21, %v7478_v29  ;;  %v14950_v30 = vmul.u32.u64.low %v14919_v57, %v7661_v54  ;;  %v14951_v61 = vmul.u32.u64.high %v14919_v57, %v7661_v54, %v14950_v30 }
 0xd66   :  { %v7581_v4 = vsel %vm8623_vm8, 0, %v8622_v8  ;;  %vm7082_vm10 = vweird.f32 %v14420_v6  ;;  %vm7290_vm13 = vweird.f32 %v14439_v32  ;;  %v7484_v60 = vshll.u32 %v7483_v51, 23 }
 0xd67   :  { %v7586_v52 = vsub.s32 4294967266, %v7581_v4  ;;  %v7653_v20 = vsel %vm7647_vm5, %v7650_v5, %v7652_v58  ;;  %v7295_v38 = vxor.u32 2147483648, %v9539_v2  ;;  %v7672_v7 = vadd.s32 1, %v14940_v48 }
 0xd68   :  { %vm7086_vm9 = vcmp.eq.s32.totalorder %v7084_v3, 0  ;;  %vm7089_vm14 = vcmp.eq.s32.totalorder %v7084_v3, 2  ;;  %v7291_v41 = vadd.s32 3, %v7287_v12  ;;  %v7298_v51 = vxor.u32 2147483648, %v14933_v19 }
 0xd69   :  { %v7587_v21 = vadd.s32 127, %v7586_v52  ;;  %v7088_v29 = vsel %vm7086_vm9, %v14804_v53, %v7087_v25  ;;  %v7091_v23 = vsel %vm7089_vm14, %v7090_v35, %v14816_v26  ;;  %v7481_v62 = vor.u32 %v7480_v1, %v7479_v50 }
 0xd6a   :  { %v7669_v56 = vmul.u32 %v14919_v57, %v7653_v20  ;;  %vm7671_vm15 = vc.u32 %v14951_v61, %v14939_v22  ;;  %v7292_v14 = vand.u32 3, %v7291_v41  ;;  %v7485_v9 = vor.u32 4788187, %v7484_v60 }
 0xd6b   :  { %v7582_v11 = vsub.s32 32, %v7581_v4  ;;  %v7673_v42 = vsel %vm7671_vm15, %v7672_v7, %v14940_v48  ;;  %vm7085_vm6 = vcmp.lt.s32.totalorder %v7084_v3, 2  ;;  %v7588_v53 = vshll.u32 %v7587_v21, 23 }
 0xd6c   :  { %v7674_v43 = vadd.s32 %v7673_v42, %v7669_v56  ;;  %v7092_v25 = vsel %vm7085_vm6, %v7088_v29, %v7091_v23  ;;  %vm7294_vm0 = vcmp.eq.s32.totalorder %v7292_v14, 0  ;;  %vm7297_vm11 = vcmp.eq.s32.totalorder %v7292_v14, 2 }
 0xd6d   :  { %vm7293_vm7 = vcmp.lt.s32.totalorder %v7292_v14, 2  ;;  %v7296_v26 = vsel %vm7294_vm0, %v14933_v19, %v7295_v38  ;;  %v7299_v35 = vsel %vm7297_vm11, %v7298_v51, %v9539_v2  ;;  %v6980_v5 = vand.u32 3, %v14841_v17 }
 0xd6e   :  { %v7675_v8 = vadd.s32 536870912, %v7674_v43  ;;  %v7300_v57 = vsel %vm7293_vm7, %v7296_v26, %v7299_v35  ;;  %v6983_v33 = vxor.u32 2147483648, %v14916_v46  ;;  %v7584_v45 = vshrl.u32 %v14903_v40, %v7582_v11  ;;  %v7822_v26 = vld [vmem:[%s15383_s5 + $0x80] sm:$0xff]  ;;  %v7823_v35 = vld [vmem:[%s15383_s5 + $0x88] sm:$0xff] }
 0xd6f   :  { %v7093_v3 = vsel %vm7082_vm10, nan, %v7092_v25  ;;  %v7301_v58 = vsel %vm7290_vm13, nan, %v7300_v57  ;;  %v6986_v49 = vxor.u32 2147483648, %v14896_v28  ;;  %v7583_v48 = vshll.u32 %v14913_v31, %v7581_v4 }
 0xd70   :  { %v14978_v19 = vshrl.u32 %v7675_v8, 30  ;;  %v8909_v2 = vpack.c.bf16 %v7301_v58, %v7093_v3  ;;  %vm6982_vm1 = vcmp.eq.s32.totalorder %v6980_v5, 0  ;;  %v7589_v50 = vor.u32 4788187, %v7588_v53  ;;  %v7825_v3 = vld [vmem:[%s15383_s5 + $0x98] sm:$0xff] }
 0xd71   :  { %v6984_v17 = vsel %vm6982_vm1, %v14896_v28, %v6983_v33  ;;  %vm6985_vm2 = vcmp.eq.s32.totalorder %v6980_v5, 2  ;;  %v7188_v40 = vand.u32 3, %v14879_v13  ;;  %v7191_v54 = vxor.u32 2147483648, %v14926_v15  ;;  %v7807_v33 = vld [vmem:[%s15383_s5 + $0x8] sm:$0xff] }
 0xd72   :  { %v7677_v6 = vshll.u32 %v14978_v19, 30  ;;  %8910 = vmatprep.subr.bf16.mxu0 %v8909_v2  ;;  %v6987_v32 = vsel %vm6985_vm2, %v6986_v49, %v14916_v46  ;;  %v7194_v12 = vxor.u32 2147483648, %v14921_v34  ;;  %v7486_v31 = vand.u32 2147483647, %v7485_v9 }
 0xd73   :  { %v7585_v1 = vor.u32 %v7584_v45, %v7583_v48  ;;  %vm6981_vm4 = vcmp.lt.s32.totalorder %v6980_v5, 2  ;;  %vm7190_vm3 = vcmp.eq.s32.totalorder %v7188_v40, 0  ;;  %vm7193_vm5 = vcmp.eq.s32.totalorder %v7188_v40, 2  ;;  %v7824_v45 = vld [vmem:[%s15383_s5 + $0x90] sm:$0xff] }
 0xd74   :  { %v7678_v4 = vsub.s32 %v7674_v43, %v7677_v6  ;;  %v6988_v30 = vsel %vm6981_vm4, %v6984_v17, %v6987_v32  ;;  %v7192_v28 = vsel %vm7190_vm3, %v14921_v34, %v7191_v54  ;;  %v7488_v60 = vcvt.s32.f32 %v7481_v62 }
 0xd75   :  { %v7590_v13 = vand.u32 2147483647, %v7589_v50  ;;  %vm7189_vm8 = vcmp.lt.s32.totalorder %v7188_v40, 2  ;;  %v7195_v52 = vsel %vm7193_vm5, %v7194_v12, %v14926_v15  ;;  %vm6978_vm10 = vweird.f32 %v14418_v47  ;;  %v15053_v40 = vld [vmem:[%s15384_s4] sm:$0x7] }
 0xd76   :  { %v7680_v20 = vsub.s32 0, %v7678_v4  ;;  %vm7186_vm13 = vweird.f32 %v14426_v27  ;;  %v7196_v46 = vsel %vm7189_vm8, %v7192_v28, %v7195_v52  ;;  %v7385_v38 = vmul.f32 %v7384_v44, %v7382_v36  ;;  %v7826_v28 = vld [vmem:[%s15383_s5 + $0xa0] sm:$0xff] }
 0xd77   :  { %v7592_v7 = vcvt.s32.f32 %v7585_v1  ;;  %v6989_v41 = vsel %vm6978_vm10, nan, %v6988_v30  ;;  %v7197_v34 = vsel %vm7186_vm13, nan, %v7196_v46  ;;  %v7489_v21 = vmul.f32 %v7488_v60, %v7486_v31  ;;  %v7808_v31 = vld [vmem:[%s15383_s5 + $0x10] sm:$0xff]  ;;  %v7809_v1 = vld [vmem:[%s15383_s5 + $0x18] sm:$0xff]  ;;  %v7827_v60 = vld [vmem:[%s15383_s5 + $0xa8] sm:$0xff] }
 0xd78   :  { %v8625_v29 = vmin.u32 %v7680_v20, %v7678_v4  ;;  %v8911_v23 = vpack.c.bf16 %v7197_v34, %v6989_v41  ;;  %v7386_v15 = vxor.u32 2147483648, %v7385_v38  ;;  %v15676_v27 = vand.u32 2147483647, %v14575_v63  ;;  %v7810_v41 = vld [vmem:[%s15383_s5 + $0x20] sm:$0xff]  ;;  %v7811_v34 = vld [vmem:[%s15383_s5 + $0x28] sm:$0xff] }
 0xd79   :  { %v7593_v51 = vmul.f32 %v7592_v7, %v7590_v13  ;;  %v7490_v56 = vxor.u32 2147483648, %v7489_v21  ;;  %vm7304_vm14 = vcmp.lt.s32.totalorder %v14575_v63, 0  ;;  %vm7408_vm6 = vcmp.lt.s32.totalorder %v14590_v55, 0 }
 0xd7a   :  { %v7682_v62 = vclz %v8625_v29  ;;  %8912 = vmatpush1.bf16.msra.mxu0 %v8911_v23  ;;  %vm14996_vm9 = vcmp.le.f32.partialorder %v15676_v27, 0.7853982  ;;  %v7387_v37 = vsel %vm7304_vm14, %v7386_v15, %v7385_v38  ;;  %vm7512_vm0 = vcmp.lt.s32.totalorder %v14640_v59, 0 }
 0xd7b   :  { %v7594_v14 = vxor.u32 2147483648, %v7593_v51  ;;  %v7491_v44 = vsel %vm7408_vm6, %v7490_v56, %v7489_v21  ;;  %v7670_v9 = vadd.s32 %v14939_v22, %v14951_v61  ;;  %v15679_v43 = vand.u32 2147483647, %v14590_v55  ;;  %v7806_v22 = vld [vmem:[%s15383_s5] sm:$0xff] }
 0xd7c   :  { %v8626_v47 = vadd.s32 4294967294, %v7682_v62  ;;  %v7390_v61 = vsel %vm14996_vm9, %v14575_v63, %v7387_v37  ;;  %v15682_v49 = vand.u32 2147483647, %v14640_v59  ;;  %v9578_v6 = vmov 32   ;;  %v7829_v62 = vld [vmem:[%s15383_s5 + $0xb8] sm:$0xff] }
 0xd7d   :  { %vm15011_vm11 = vcmp.le.f32.partialorder %v15679_v43, 0.7853982  ;;  %v7595_v53 = vsel %vm7512_vm0, %v7594_v14, %v7593_v51  ;;  %9540 = vcosq.f32 %v7390_v61  ;;  %9297 = vset.pattern.permute.xlu0 %v9578_v6  ;;  %v8917_v32 = vpack.c.bf16 %v7823_v35, %v7822_v26  ;;  %v7828_v51 = vld [vmem:[%s15383_s5 + $0xb0] sm:$0xff]  ;;  %v7831_v43 = vld [vmem:[%s15383_s5 + $0xc8] sm:$0xff] }
 0xd7e   :  { %vm8627_vm15 = vcmp.lt.s32.totalorder %v8626_v47, 0  ;;  %v7494_v58 = vsel %vm15011_vm11, %v14590_v55, %v7491_v44  ;;  %vm15043_vm7 = vcmp.le.f32.partialorder %v15682_v49, 0.7853982  ;;  %v8919_v54 = vpack.c.bf16 %v7807_v33, %v7806_v22  ;;  %7721 = vperm.xlu0 %9297, %v15053_v40  }
 0xd7f   :  { %v7685_v36 = vsel %vm8627_vm15, 0, %v8626_v47  ;;  %v7598_v2 = vsel %vm15043_vm7, %v14640_v59, %v7595_v53  ;;  %v8921_v12 = vpack.c.bf16 %v7825_v3, %v7824_v45  ;;  %9542 = vcosq.f32 %v7494_v58  ;;  %8918 = vmatprep.subr.bf16.mxu1 %v8917_v32  ;;  %v7832_v3 = vld [vmem:[%s15383_s5 + $0xd0] sm:$0xff] }
 0xd80   :  { %v7686_v11 = vsub.s32 32, %v7685_v36  ;;  %v7690_v42 = vsub.s32 4294967266, %v7685_v36  ;;  %v7687_v8 = vshll.u32 %v7678_v4, %v7685_v36  ;;  %v7596_v4 = vsub.s32 4, %v14893_v10  ;;  %8920 = vmatpush3.bf16.msra.mxu1 %v8919_v54  ;;  %v7812_v36 = vld [vmem:[%s15383_s5 + $0x30] sm:$0xff] }
 0xd81   :  { %v7388_v13 = vsub.s32 4, %v14729_v39  ;;  %9544 = vcosq.f32 %v7598_v2  ;;  %v7492_v52 = vsub.s32 4, %v14792_v24  ;;  %v8923_v38 = vpack.c.bf16 %v7809_v1, %v7808_v31  ;;  %8922 = vmatprep.subr.bf16.mxu1 %v8921_v12  ;;  %v7816_v31 = vld [vmem:[%s15383_s5 + $0x50] sm:$0xff]  ;;  %v7817_v1 = vld [vmem:[%s15383_s5 + $0x58] sm:$0xff] }
 0xd82   :  { %v7688_v57 = vshrl.u32 %v7670_v9, %v7686_v11  ;;  %v7691_v5 = vadd.s32 127, %v7690_v42  ;;  %9546 = vsinq.f32 %v7598_v2  ;;  %v8925_v7 = vpack.c.bf16 %v7827_v60, %v7826_v28  ;;  %v7830_v42 = vld [vmem:[%s15383_s5 + $0xc0] sm:$0xff] }
 0xd83   :  { %9548 = vsinq.f32 %v7494_v58  ;;  %v7597_v21 = vsel %vm7512_vm0, %v7596_v4, %v14893_v10  ;;  %v7700_v23 = vsub.s32 4, %v14978_v19  ;;  %v15685_v15 = vmov 0   ;;  %v7833_v58 = vld [vmem:[%s15383_s5 + $0xd8] sm:$0xff] }
 0xd84   :  { %v7689_v50 = vor.u32 %v7688_v57, %v7687_v8  ;;  %v7692_v17 = vshll.u32 %v7691_v5, 23  ;;  %9550 = vsinq.f32 %v7390_v61  ;;  %9298 = vset.pattern.permute.xlu0 %v15685_v15  ;;  %v7493_v56 = vsel %vm7408_vm6, %v7492_v52, %v14792_v24  ;;  %8924 = vmatpush3.bf16.msra.mxu1 %v8923_v38  ;;  %v7813_v24 = vld [vmem:[%s15383_s5 + $0x38] sm:$0xff]  ;;  %v7815_v5 = vld [vmem:[%s15383_s5 + $0x48] sm:$0xff] }
 0xd85   :  { %v7389_v10 = vsel %vm7304_vm14, %v7388_v13, %v14729_v39  ;;  %v8927_v14 = vpack.c.bf16 %v7811_v34, %v7810_v41  ;;  %v7599_v27 = vsel %vm15043_vm7, 0, %v7597_v21  ;;  %vm7616_vm1 = vcmp.lt.s32.totalorder %v14782_v18, 0  ;;  %8926 = vmatprep.subr.bf16.mxu1 %v8925_v7 }
 0xd86   :  { %v7693_v30 = vor.u32 4788187, %v7692_v17  ;;  %v7696_v46 = vcvt.s32.f32 %v7689_v50  ;;  %v8929_v37 = vpack.c.bf16 %v7829_v62, %v7828_v51  ;;  %vm15105_vm2 = vcmp.le.f32.partialorder %v7614_v16, 0.7853982 }
 0xd87   :  { %v7495_v9 = vsel %vm15011_vm11, 0, %v7493_v56  ;;  %v7701_v11 = vsel %vm7616_vm1, %v7700_v23, %v14978_v19  ;;  %v9541_v53 = vpop.eup %9540  ;;  %v7391_v16 = vsel %vm14996_vm9, 0, %v7389_v10  ;;  %v7603_v35 = vadd.s32 3, %v7599_v27 }
 0xd88   :  { %v7694_v20 = vand.u32 2147483647, %v7693_v30  ;;  %8928 = vmatpush3.bf16.msra.mxu1 %v8927_v14  ;;  %v8931_v19 = vpack.c.bf16 %v7813_v24, %v7812_v36  ;;  %v7499_v61 = vadd.s32 3, %v7495_v9  ;;  %v7703_v8 = vsel %vm15105_vm2, 0, %v7701_v11  ;;  %v7819_v11 = vld [vmem:[%s15383_s5 + $0x68] sm:$0xff] }
 0xd89   :  { %v9543_v25 = vpop.eup %9542  ;;  %8930 = vmatprep.subr.bf16.mxu1 %v8929_v37  ;;  %v8933_v57 = vpack.c.bf16 %v7831_v43, %v7830_v42  ;;  %v7395_v45 = vadd.s32 3, %v7391_v16  ;;  %v7707_v2 = vadd.s32 3, %v7703_v8  ;;  %v7604_v50 = vand.u32 3, %v7603_v35  ;;  %v7837_v42 = vld [vmem:[%s15383_s5 + $0xf8] sm:$0xff]  ;;  %v8629_v35 = vld [vmem:[%s15385_s6 + $0x80] sm:$0xff]  ;;  %v8631_v8 = vld [vmem:[%s15385_s6 + $0x90] sm:$0xff] }
 0xd8a   :  { %v7697_v29 = vmul.f32 %v7696_v46, %v7694_v20  ;;  %v8935_v17 = vpack.c.bf16 %v7815_v5, %v7814_v0  ;;  %v7500_v6 = vand.u32 3, %v7499_v61  ;;  %v8937_v12 = vpack.c.bf16 %v7833_v58, %v7832_v3  ;;  %v8633_v5 = vld [vmem:[%s15385_s6 + $0xa0] sm:$0xff]  ;;  %v8635_v3 = vld [vmem:[%s15385_s6 + $0xb0] sm:$0xff]  ;;  %v8636_v58 = vld [vmem:[%s15385_s6 + $0xb8] sm:$0xff] }
 0xd8b   :  { %v9545_v22 = vpop.eup %9544  ;;  %v7506_v30 = vxor.u32 2147483648, %v9543_v25  ;;  %v7396_v28 = vand.u32 3, %v7395_v45  ;;  %v7402_v13 = vxor.u32 2147483648, %v9541_v53  ;;  %v7708_v52 = vand.u32 3, %v7707_v2  ;;  %v8638_v2 = vld [vmem:[%s15385_s6 + $0xc8] sm:$0xff] }
 0xd8c   :  { %v7698_v47 = vxor.u32 2147483648, %v7697_v29  ;;  %v9547_v33 = vpop.eup %9546  ;;  %8932 = vmatpush3.bf16.msra.mxu1 %v8931_v19  ;;  %v7610_v54 = vxor.u32 2147483648, %v9545_v22  ;;  %vm7606_vm4 = vcmp.eq.s32.totalorder %v7604_v50, 0  ;;  %vm7609_vm3 = vcmp.eq.s32.totalorder %v7604_v50, 2  ;;  %v8630_v19 = vld [vmem:[%s15385_s6 + $0x88] sm:$0xff] }
 0xd8d   :  { %v9549_v49 = vpop.eup %9548  ;;  %v7607_v32 = vxor.u32 2147483648, %v9547_v33  ;;  %8934 = vmatprep.subr.bf16.mxu1 %v8933_v57  ;;  %v8939_v20 = vpack.c.bf16 %v7817_v1, %v7816_v31  ;;  %vm7502_vm5 = vcmp.eq.s32.totalorder %v7500_v6, 0  ;;  %vm7505_vm8 = vcmp.eq.s32.totalorder %v7500_v6, 2  ;;  %v8632_v57 = vld [vmem:[%s15385_s6 + $0x98] sm:$0xff] }
 0xd8e   :  { %v7699_v44 = vsel %vm7616_vm1, %v7698_v47, %v7697_v29  ;;  %v9551_v48 = vpop.eup %9550  ;;  %v7503_v4 = vxor.u32 2147483648, %v9549_v49  ;;  %v7611_v38 = vsel %vm7609_vm3, %v7610_v54, %v9547_v33  ;;  %v7507_v34 = vsel %vm7505_vm8, %v7506_v30, %v9549_v49  ;;  %v8634_v33 = vld [vmem:[%s15385_s6 + $0xa8] sm:$0xff]  ;;  %v8641_v54 = vld [vmem:[%s15385_s6 + $0xe0] sm:$0xff] }
 0xd8f   :  { %v7702_v26 = vsel %vm15105_vm2, %v14782_v18, %v7699_v44  ;;  %v7399_v60 = vxor.u32 2147483648, %v9551_v48  ;;  %v7608_v46 = vsel %vm7606_vm4, %v9545_v22, %v7607_v32  ;;  %vm7398_vm10 = vcmp.eq.s32.totalorder %v7396_v28, 0 }
 0xd90   :  { %9552 = vcosq.f32 %v7702_v26  ;;  %8936 = vmatpush3.bf16.msra.mxu1 %v8935_v17  ;;  %v7504_v41 = vsel %vm7502_vm5, %v9543_v25, %v7503_v4  ;;  %vm7401_vm13 = vcmp.eq.s32.totalorder %v7396_v28, 2  ;;  %vm7605_vm9 = vcmp.lt.s32.totalorder %v7604_v50, 2  ;;  %v7821_v25 = vld [vmem:[%s15383_s5 + $0x78] sm:$0xff]  ;;  %v8639_v17 = vld [vmem:[%s15385_s6 + $0xd0] sm:$0xff] }
 0xd91   :  { %9554 = vsinq.f32 %v7702_v26  ;;  %8938 = vmatprep.subr.bf16.mxu1 %v8937_v12  ;;  %v7400_v23 = vsel %vm7398_vm10, %v9541_v53, %v7399_v60  ;;  %v7403_v51 = vsel %vm7401_vm13, %v7402_v13, %v9551_v48  ;;  %vm7501_vm14 = vcmp.lt.s32.totalorder %v7500_v6, 2  ;;  %v7820_v26 = vld [vmem:[%s15383_s5 + $0x70] sm:$0xff]  ;;  %v8637_v48 = vld [vmem:[%s15385_s6 + $0xc0] sm:$0xff]  ;;  %v8640_v6 = vld [vmem:[%s15385_s6 + $0xd8] sm:$0xff] }
 0xd92   :  { %vm7713_vm15 = vcmp.eq.s32.totalorder %v7708_v52, 2  ;;  %v7612_v15 = vsel %vm7605_vm9, %v7608_v46, %v7611_v38  ;;  %v7508_v56 = vsel %vm7501_vm14, %v7504_v41, %v7507_v34  ;;  %vm7710_vm6 = vcmp.eq.s32.totalorder %v7708_v52, 0  ;;  %v8642_v12 = vld [vmem:[%s15385_s6 + $0xe8] sm:$0xff]  ;;  %v7911_v34 = vld [vmem:[%s15385_s6 + $0x10] sm:$0xff] }
 0xd93   :  { %vm7397_vm0 = vcmp.lt.s32.totalorder %v7396_v28, 2  ;;  %vm7709_vm11 = vcmp.lt.s32.totalorder %v7708_v52, 2  ;;  %vm7602_vm7 = vweird.f32 %v14640_v59  ;;  %vm7498_vm1 = vweird.f32 %v14590_v55  ;;  %v7834_v55 = vld [vmem:[%s15383_s5 + $0xe0] sm:$0xff]  ;;  %v7835_v59 = vld [vmem:[%s15383_s5 + $0xe8] sm:$0xff] }
 0xd94   :  { %8940 = vmatpush3.bf16.msra.mxu1 %v8939_v20  ;;  %v7404_v14 = vsel %vm7397_vm0, %v7400_v23, %v7403_v51  ;;  %vm7706_vm2 = vweird.f32 %v14782_v18  ;;  %v7613_v37 = vsel %vm7602_vm7, nan, %v7612_v15  ;;  %v7509_v36 = vsel %vm7498_vm1, nan, %v7508_v56  ;;  %v7909_v52 = vld [vmem:[%s15385_s6] sm:$0xff]  ;;  %v7910_v20 = vld [vmem:[%s15385_s6 + $0x8] sm:$0xff]  ;;  %v7915_v56 = vld [vmem:[%s15385_s6 + $0x30] sm:$0xff] }
 0xd95   :  { %vm7394_vm4 = vweird.f32 %v14575_v63  ;;  %v7818_v63 = vld [vmem:[%s15383_s5 + $0x60] sm:$0xff]  ;;  %v8941_v18 = vpack.c.bf16 %v7835_v59, %v7834_v55  ;;  %v9579_v43 = vmov 0.0|0.0   ;;  %v8947_v22 = vpack.c.bf16 %v7821_v25, %v7820_v26  ;;  %v7923_v59 = vld [vmem:[%s15385_s6 + $0x70] sm:$0xff]  ;;  %v8646_v25 = vld [vmem:[%s15385_s6 + $0x108] sm:$0xff] }
 0xd96   :  { %v7405_v44 = vsel %vm7394_vm4, nan, %v7404_v14  ;;  %v8943_v53 = vpack.c.bf16 %v7819_v11, %v7818_v63  ;;  %v8974_v61 = vpack.c.bf16 %v8630_v19, %v8629_v35  ;;  %v8977_v0 = vpack.c.bf16 %v8632_v57, %v8631_v8  ;;  %v7913_v51 = vld [vmem:[%s15385_s6 + $0x20] sm:$0xff]  ;;  %v7924_v63 = vld [vmem:[%s15385_s6 + $0x78] sm:$0xff]  ;;  %v8647_v8 = vld [vmem:[%s15385_s6 + $0x110] sm:$0xff] }
 0xd97   :  { %v8915_v9 = vpack.c.bf16 %v7613_v37, %v7405_v44  ;;  %8942 = vmatprep.subr.bf16.mxu1 %v8941_v18  ;;  %v8980_v45 = vpack.c.bf16 %v8634_v33, %v8633_v5  ;;  %v8983_v49 = vpack.c.bf16 %v8636_v58, %v8635_v3  ;;  %v8986_v50 = vpack.c.bf16 %v8638_v2, %v8637_v48  ;;  %v7917_v14 = vld [vmem:[%s15385_s6 + $0x40] sm:$0xff]  ;;  %v8643_v18 = vld [vmem:[%s15385_s6 + $0xf0] sm:$0xff]  ;;  %v8648_v57 = vld [vmem:[%s15385_s6 + $0x118] sm:$0xff] }
 0xd98   :  { %8944 = vmatpush3.bf16.msra.mxu1 %v8943_v53  ;;  %v8989_v32 = vpack.c.bf16 %v8640_v6, %v8639_v17  ;;  %v8992_v31 = vpack.c.bf16 %v8642_v12, %v8641_v54  ;;  %v8950_v41 = vpack.c.bf16 %v7910_v20, %v7909_v52  ;;  %v7921_v44 = vld [vmem:[%s15385_s6 + $0x60] sm:$0xff]  ;;  %v8971_v11 = vpack.c.bf16 %v7924_v63, %v7923_v59  ;;  %v8650_v33 = vld [vmem:[%s15385_s6 + $0x128] sm:$0xff]  ;;  %v8651_v3 = vld [vmem:[%s15385_s6 + $0x130] sm:$0xff] }
 0xd99   :  { %v8645_v26 = vld [vmem:[%s15385_s6 + $0x100] sm:$0xff]  ;;  %v8652_v58 = vld [vmem:[%s15385_s6 + $0x138] sm:$0xff]  ;;  %v8654_v2 = vld [vmem:[%s15385_s6 + $0x148] sm:$0xff]  ;;  %vm8179_vm3 = vcmask 253952  }
 0xd9a   :  { %v9553_v7 = vpop.eup %9552  ;;  %v8649_v5 = vld [vmem:[%s15385_s6 + $0x120] sm:$0xff]  ;;  %v8655_v17 = vld [vmem:[%s15385_s6 + $0x150] sm:$0xff]  ;;  %v8656_v6 = vld [vmem:[%s15385_s6 + $0x158] sm:$0xff] }
 0xd9b   :  { %v9555_v21 = vpop.eup %9554  ;;  %v7714_v29 = vxor.u32 2147483648, %v9553_v7  ;;  %v8653_v48 = vld [vmem:[%s15385_s6 + $0x140] sm:$0xff]  ;;  %v8658_v12 = vld [vmem:[%s15385_s6 + $0x168] sm:$0xff] }
 0xd9c   :  { %v7711_v62 = vxor.u32 2147483648, %v9555_v21  ;;  %v8657_v54 = vld [vmem:[%s15385_s6 + $0x160] sm:$0xff] }
 0xd9d   :  { %v7715_v10 = vsel %vm7713_vm15, %v7714_v29, %v9555_v21  ;;  %v7912_v21 = vld [vmem:[%s15385_s6 + $0x18] sm:$0xff] }
 0xd9e   :  { %v7712_v47 = vsel %vm7710_vm6, %v9553_v7, %v7711_v62  ;;  %v8953_v23 = vpack.c.bf16 %v7912_v21, %v7911_v34  ;;  %v7914_v62 = vld [vmem:[%s15385_s6 + $0x28] sm:$0xff] }
 0xd9f   :  { %v7716_v27 = vsel %vm7709_vm11, %v7712_v47, %v7715_v10  ;;  %v8956_v15 = vpack.c.bf16 %v7914_v62, %v7913_v51  ;;  %v7916_v10 = vld [vmem:[%s15385_s6 + $0x38] sm:$0xff] }
 0xda0   :  { %v7717_v24 = vsel %vm7706_vm2, nan, %v7716_v27  ;;  %v8959_v47 = vpack.c.bf16 %v7916_v10, %v7915_v56  ;;  %v7918_v27 = vld [vmem:[%s15385_s6 + $0x48] sm:$0xff] }
 0xda1   :  { %v8913_v39 = vpack.c.bf16 %v7717_v24, %v7509_v36  ;;  %v8962_v37 = vpack.c.bf16 %v7918_v27, %v7917_v14  ;;  %v7919_v36 = vld [vmem:[%s15385_s6 + $0x50] sm:$0xff]  ;;  %v7920_v24 = vld [vmem:[%s15385_s6 + $0x58] sm:$0xff] }
 0xda3   :  { %8914 = vmatprep.subr.bf16.mxu0 %v8913_v39  ;;  %v8965_v39 = vpack.c.bf16 %v7920_v24, %v7919_v36 }
 0xda4   :  { %8916 = vmatpush1.bf16.msra.mxu0 %v8915_v9  ;;  %v7922_v9 = vld [vmem:[%s15385_s6 + $0x68] sm:$0xff] }
 0xda5   :  { %8973 = vmatprep.subr.bf16.mxu0 %v9579_v43  ;;  %v8968_v55 = vpack.c.bf16 %v7922_v9, %v7921_v44 }
 0xda7   :  { %8628 = vmatmul.mubr.msk.f32.vlgmr.msra.gmra.mrb[28].mxu0 %vm1006_vm12, %v15053_v40  ;;  %v7836_v40 = vld [vmem:[%s15383_s5 + $0xf0] sm:$0xff]  ;;  %vm9580_vm12 = vmmov 0  }
 0xda8   :  { %v8945_v16 = vpack.c.bf16 %v7837_v42, %v7836_v40  ;;  %8975 = vmatpush3.bf16.msra.mxu0 %v8974_v61  ;;  %v8644_v40 = vld [vmem:[%s15385_s6 + $0xf8] sm:$0xff]  ;;  %v15688_v42 = vmov 0.0  }
 0xda9   :  { %8976 = vmatprep.subr.bf16.mxu0 %v9579_v43  ;;  %8815 = vmatprep.mubr.msk.f32.mxu0 %vm9580_vm12, %v15688_v42  ;;  %v8995_v53 = vpack.c.bf16 %v8644_v40, %v8643_v18 }
 0xdaa   :  { %8946 = vmatprep.subr.bf16.mxu1 %v8945_v16 }
 0xdab   :  { %8948 = vmatpush3.bf16.msra.mxu1 %v8947_v22  ;;  %v8998_v22 = vpack.c.bf16 %v8646_v25, %v8645_v26 }
 0xdac   :  { %8949 = vmatprep.subr.bf16.mxu1 %v9579_v43  ;;  %8978 = vmatpush3.bf16.msra.mxu0 %v8977_v0  ;;  %v9001_v0 = vpack.c.bf16 %v8648_v57, %v8647_v8 }
 0xdad   :  { %8979 = vmatprep.subr.bf16.mxu0 %v9579_v43 }
 0xdb0   :  { %8981 = vmatpush3.bf16.msra.mxu0 %v8980_v45  ;;  %v9004_v45 = vpack.c.bf16 %v8650_v33, %v8649_v5 }
 0xdb1   :  { %8982 = vmatprep.subr.bf16.mxu0 %v9579_v43 }
 0xdb4   :  { %8984 = vmatpush3.bf16.msra.mxu0 %v8983_v49  ;;  %v9007_v49 = vpack.c.bf16 %v8652_v58, %v8651_v3 }
 0xdb5   :  { %8985 = vmatprep.subr.bf16.mxu0 %v9579_v43 }
 0xdb8   :  { %8987 = vmatpush3.bf16.msra.mxu0 %v8986_v50  ;;  %v9010_v50 = vpack.c.bf16 %v8654_v2, %v8653_v48 }
 0xdb9   :  { %8988 = vmatprep.subr.bf16.mxu0 %v9579_v43 }
 0xdbc   :  { %8990 = vmatpush3.bf16.msra.mxu0 %v8989_v32  ;;  %v9013_v32 = vpack.c.bf16 %v8656_v6, %v8655_v17 }
 0xdbd   :  { %8991 = vmatprep.subr.bf16.mxu0 %v9579_v43 }
 0xdc0   :  { %8993 = vmatpush3.bf16.msra.mxu0 %v8992_v31  ;;  %v9016_v31 = vpack.c.bf16 %v8658_v12, %v8657_v54 }
 0xdc1   :  { %8994 = vmatprep.subr.bf16.mxu0 %v9579_v43 }
 0xdc4   :  { %8996 = vmatpush3.bf16.msra.mxu0 %v8995_v53 }
 0xdc5   :  { %8997 = vmatprep.subr.bf16.mxu0 %v9579_v43 }
 0xdfd   :  { %v7722_v1 = vpop.permute.xlu0 %7721 }
 0xe7a   :  { %v7792_v4 = vpop.f32.mrb[28].mxu0 }
 0xe7b   :  { %v7793_v30 = vadd.f32 %v7792_v4, %v7722_v1  ;;  %v7794_v28 = vpop.f32.mrb[29].mxu0  ;;  %v8660_v4 = vld [vmem:[%s15385_s6 + $0x178] sm:$0xff] }
 0xe7c   :  { %v7795_v60 = vadd.f32 %v7794_v28, %v7722_v1  ;;  %v8659_v1 = vld [vmem:[%s15385_s6 + $0x170] sm:$0xff] }
 0xe7d   :  { %v7797_v13 = vmax.f32 %v7793_v30, 0.0  ;;  %v9019_v30 = vpack.c.bf16 %v8660_v4, %v8659_v1 }
 0xe7e   :  { %v7798_v46 = vmax.f32 %v7795_v60, 0.0  ;;  %v8177_v60 = vld [vmem:[%s15387_s8] sm:$0x1]  ;;  %s9581_s8 = smov 96  }
 0xe7f   :  { %v7799_v38 = vmin.f32 %v7797_v13, 1.0  ;;  %v8178_v13 = vmul.f32 %v8177_v60, %v8177_v60 }
 0xe80   :  { %v7800_v7 = vmin.f32 %v7798_v46, 1.0 }
 0xe81   :  { %v8180_v52 = vsel %vm8179_vm3, %v8178_v13, 0.0 }
 0xe82   :  { %v7803_v29 = vcombine.low %v7799_v38, %v7800_v7  ;;  %7902 = vmatprep.mubr.f32.mxu1 %v7800_v7  ;;  %8181 = vadd.xlane.f32.xlu0 %v8180_v52  ;;  %v7908_v7 = vld [vmem:[%s15388_s7] sm:$0x1] }
 0xe83   :  { %7903 = vmatmul.mubr.f32.vlgmr.msra.gmra.mrb[36].mxu1 %v7799_v38  ;;  %v8213_v38 = vlaneseq }
 0xe84   :  { %7805 = vst [vmem:[%s15386_s9] sm:$0x77] %v7803_v29  ;;  %8951 = vmatpush3.bf16.msra.mxu1 %v8950_v41  ;;  %8780 = vmatprep.mubr.msk.f32.mxu1 %vm9580_vm12, %v15688_v42 }
 0xe85   :  { %8952 = vmatprep.subr.bf16.mxu1 %v9579_v43  ;;  %vm8282_vm0 = vcmp.lt.s32.totalorder %v8213_v38, 256 }
 0xe88   :  { %8954 = vmatpush3.bf16.msra.mxu1 %v8953_v23 }
 0xe89   :  { %8955 = vmatprep.subr.bf16.mxu1 %v9579_v43 }
 0xe8c   :  { %8957 = vmatpush3.bf16.msra.mxu1 %v8956_v15 }
 0xe8d   :  { %8958 = vmatprep.subr.bf16.mxu1 %v9579_v43 }
 0xe90   :  { %8960 = vmatpush3.bf16.msra.mxu1 %v8959_v47 }
 0xe91   :  { %8961 = vmatprep.subr.bf16.mxu1 %v9579_v43 }
 0xe94   :  { %8963 = vmatpush3.bf16.msra.mxu1 %v8962_v37 }
 0xe95   :  { %8964 = vmatprep.subr.bf16.mxu1 %v9579_v43 }
 0xe98   :  { %8966 = vmatpush3.bf16.msra.mxu1 %v8965_v39 }
 0xe99   :  { %8967 = vmatprep.subr.bf16.mxu1 %v9579_v43 }
 0xe9c   :  { %8969 = vmatpush3.bf16.msra.mxu1 %v8968_v55 }
 0xe9d   :  { %8970 = vmatprep.subr.bf16.mxu1 %v9579_v43 }
 0xea0   :  { %8972 = vmatpush3.bf16.msra.mxu1 %v8971_v11 }
 0xf0f   :  { %v8182_v11 = vpop.xlane.xlu0 %8181 }
 0xf10   :  { %9556 = vrsqrt.f32 %v8182_v11  ;;  %vm8185_vm5 = vcmp.eq.f32.partialorder %v8182_v11, inf  ;;  %v8188_v25 = vand.u32 2147483648, %v8182_v11  ;;  %vm8187_vm10 = vcmp.eq.f32.partialorder %v8182_v11, 0.0 }
 0xf56   :  { %v8694_v16 = vpop.f32.mrb[36].mxu1 }
 0xf57   :  { %v8695_v35 = vpop.f32.mrb[37].mxu1 }
 0xf58   :  { %v8696_v19 = vadd.f32 %v8695_v35, %v8694_v16 }
 0xf5a   :  { %v8014_v61 = vrot.slane %v8696_v19, 1  ;;  %8781 = vmatmul.mubr.f32.vlgmr.msra.gmra.mrb[38].mxu1 %v8696_v19  ;;  %v8104_v28 = vrot.slane %v8696_v19, 2 }
 0xf5c   :  { %8816 = vmatmul.mubr.f32.vlgmr.msra.gmra.mrb[30].mxu0 %v8014_v61 }
 0xf5d   :  { %8999 = vmatpush3.bf16.msra.mxu0 %v8998_v22  ;;  %8850 = vmatprep.mubr.msk.f32.mxu0 %vm9580_vm12, %v15688_v42  ;;  %v9557_v42 = vpop.eup %9556 }
 0xf5e   :  { %9000 = vmatprep.subr.bf16.mxu0 %v9579_v43  ;;  %v8184_v16 = vmul.f32 %v9557_v42, %v8182_v11 }
 0xf60   :  { %v8186_v35 = vsel %vm8185_vm5, %v8182_v11, %v8184_v16 }
 0xf61   :  { %9002 = vmatpush3.bf16.msra.mxu0 %v9001_v0  ;;  %v8189_v8 = vsel %vm8187_vm10, %v8188_v25, %v8186_v35 }
 0xf62   :  { %9003 = vmatprep.subr.bf16.mxu0 %v9579_v43 }
 0xf65   :  { %9005 = vmatpush3.bf16.msra.mxu0 %v9004_v45 }
 0xf66   :  { %9006 = vmatprep.subr.bf16.mxu0 %v9579_v43 }
 0xf69   :  { %9008 = vmatpush3.bf16.msra.mxu0 %v9007_v49 }
 0xf6a   :  { %9009 = vmatprep.subr.bf16.mxu0 %v9579_v43 }
 0xf6d   :  { %9011 = vmatpush3.bf16.msra.mxu0 %v9010_v50 }
 0xf6e   :  { %9012 = vmatprep.subr.bf16.mxu0 %v9579_v43 }
 0xf71   :  { %9014 = vmatpush3.bf16.msra.mxu0 %v9013_v32 }
 0xf72   :  { %9015 = vmatprep.subr.bf16.mxu0 %v9579_v43 }
 0xf75   :  { %9017 = vmatpush3.bf16.msra.mxu0 %v9016_v31 }
 0xf76   :  { %9018 = vmatprep.subr.bf16.mxu0 %v9579_v43  ;;  %v15358_v43 = vshrl.u32 %v8213_v38, 7 }
 0xf78   :  { %v8215_v23 = vsub.s32 0, %v15358_v43 }
 0xf79   :  { %9020 = vmatpush3.bf16.msra.mxu0 %v9019_v30 }
 0xf7c   :  { %8851 = vmatmul.mubr.f32.vlgmr.msra.gmra.mrb[30].mxu0 %v8104_v28 }
0x102d   :  { %v7991_v20 = vpop.f32.mrb[38].mxu1 }
0x102e   :  { %v8782_v46 = vpop.f32.mrb[39].mxu1  ;;  %v7995_v41 = vadd.f32 %v7991_v20, %v7908_v7 }
0x104f   :  { %v8172_v34 = vpop.f32.mrb[30].mxu0 }
0x1050   :  { %v9024_v21 = vadd.f32 %v8172_v34, %v7995_v41  ;;  %v8852_v29 = vpop.f32.mrb[31].mxu0 }
0x1052   :  { %8231 = vrot.lane.b32.xlu1 %v9024_v21, %s9581_s8  ;;  %v8191_v51 = vmul.f32 %v9024_v21, %v9024_v21  ;;  %v8202_v56 = vmul.f32 %v9024_v21, %v8177_v60  ;;  %v15365_v47 = vmul.f32 0.0, %v9024_v21 }
0x1054   :  { %v8216_v62 = vrot.slane %v8191_v51, %v8215_v23  ;;  %v8192_v15 = vsel %vm8179_vm3, %v8191_v51, 0.0  ;;  %v8203_v10 = vsel %vm8179_vm3, %v8202_v56, 0.0  ;;  %v8211_v14 = vadd.f32 %v9024_v21, %v15365_v47 }
0x1056   :  { %8217 = vrot.lane.b32.xlu1 %v8216_v62, %s9581_s8 }
0x107a   :  { %8193 = vadd.xlane.f32.xlu1 %v8192_v15 }
0x107e   :  { %8204 = vadd.xlane.f32.xlu1 %v8203_v10 }
0x10c4   :  { %v8232_v27 = vpop.permute.xlu1 %8231 }
0x10c5   :  { %v8243_v37 = vadd.f32 %v8232_v27, %v8211_v14  ;;  %v8234_v59 = vmul.f32 %v8232_v27, %v8177_v60 }
0x10c7   :  { %v8244_v36 = vmul.f32 0.5, %v8243_v37  ;;  %v8235_v18 = vsel %vm8179_vm3, %v8234_v59, 0.0 }
0x10c8   :  { %v8218_v24 = vpop.permute.xlu1 %8217 }
0x10c9   :  { %v8220_v39 = vsel %vm8179_vm3, %v8218_v24, 0.0  ;;  %v8257_v44 = vmul.f32 %v8244_v36, %v8177_v60  ;;  %v8246_v9 = vmul.f32 %v8244_v36, %v8244_v36 }
0x10ca   :  { %8221 = vadd.xlane.f32.xlu0 %v8220_v39 }
0x10cb   :  { %v8258_v55 = vsel %vm8179_vm3, %v8257_v44, 0.0  ;;  %v8247_v63 = vsel %vm8179_vm3, %v8246_v9, 0.0 }
0x10cc   :  { %8259 = vadd.xlane.f32.xlu1 %v8258_v55 }
0x10ce   :  { %8248 = vadd.xlane.f32.xlu0 %v8247_v63 }
0x10d2   :  { %8236 = vadd.xlane.f32.xlu0 %v8235_v18 }
0x1107   :  { %v8194_v40 = vpop.xlane.xlu1 %8193 }
0x1108   :  { %9558 = vrsqrt.f32 %v8194_v40  ;;  %vm8197_vm8 = vcmp.eq.f32.partialorder %v8194_v40, inf  ;;  %v8200_v61 = vand.u32 2147483648, %v8194_v40  ;;  %vm8199_vm13 = vcmp.eq.f32.partialorder %v8194_v40, 0.0 }
0x110b   :  { %v8205_v30 = vpop.xlane.xlu1 %8204 }
0x1112   :  { %v9559_v53 = vpop.eup %9558 }
0x1113   :  { %v8196_v26 = vmul.f32 %v9559_v53, %v8194_v40 }
0x1115   :  { %v8198_v19 = vsel %vm8197_vm8, %v8194_v40, %v8196_v26 }
0x1116   :  { %v8201_v57 = vsel %vm8199_vm13, %v8200_v61, %v8198_v19 }
0x1117   :  { %v8206_v5 = vmul.f32 %v8201_v57, %v8189_v8 }
0x1119   :  { %v8207_v33 = vmax.f32 %v8206_v5, 1e-08 }
0x1157   :  { %v8222_v22 = vpop.xlane.xlu0 %8221 }
0x1158   :  { %9560 = vrsqrt.f32 %v8222_v22  ;;  %vm8225_vm9 = vcmp.eq.f32.partialorder %v8222_v22, inf  ;;  %v8228_v58 = vand.u32 2147483648, %v8222_v22  ;;  %vm8227_vm14 = vcmp.eq.f32.partialorder %v8222_v22, 0.0 }
0x1159   :  { %v8260_v41 = vpop.xlane.xlu1 %8259 }
0x115b   :  { %v8249_v0 = vpop.xlane.xlu0 %8248 }
0x115c   :  { %9562 = vrsqrt.f32 %v8249_v0  ;;  %vm8252_vm15 = vcmp.eq.f32.partialorder %v8249_v0, inf  ;;  %v8255_v6 = vand.u32 2147483648, %v8249_v0  ;;  %vm8254_vm6 = vcmp.eq.f32.partialorder %v8249_v0, 0.0 }
0x115d   :  { %9564 = vrcp.f32 %v8207_v33 }
0x115f   :  { %v8237_v13 = vpop.xlane.xlu0 %8236 }
0x1162   :  { %v9561_v45 = vpop.eup %9560 }
0x1163   :  { %v8224_v3 = vmul.f32 %v9561_v45, %v8222_v22 }
0x1165   :  { %v8226_v49 = vsel %vm8225_vm9, %v8222_v22, %v8224_v3 }
0x1166   :  { %v9563_v48 = vpop.eup %9562  ;;  %v8229_v2 = vsel %vm8227_vm14, %v8228_v58, %v8226_v49 }
0x1167   :  { %v8251_v50 = vmul.f32 %v9563_v48, %v8249_v0  ;;  %v8238_v17 = vmul.f32 %v8229_v2, %v8189_v8  ;;  %v9565_v4 = vpop.eup %9564 }
0x1168   :  { %v8209_v28 = vmul.f32 %v9565_v4, %v8205_v30 }
0x1169   :  { %v8253_v32 = vsel %vm8252_vm15, %v8249_v0, %v8251_v50  ;;  %v8239_v54 = vmax.f32 %v8238_v17, 1e-08 }
0x116a   :  { %v8256_v12 = vsel %vm8254_vm6, %v8255_v6, %v8253_v32  ;;  %v8210_v52 = vadd.f32 %v8209_v28, %v15365_v47 }
0x116b   :  { %v8261_v31 = vmul.f32 %v8256_v12, %v8189_v8  ;;  %9566 = vrcp.f32 %v8239_v54 }
0x116d   :  { %v8262_v1 = vmax.f32 %v8261_v31, 1e-08 }
0x116f   :  { %9568 = vrcp.f32 %v8262_v1 }
0x1175   :  { %v9567_v60 = vpop.eup %9566 }
0x1176   :  { %v8241_v20 = vmul.f32 %v9567_v60, %v8237_v13 }
0x1178   :  { %v8242_v46 = vadd.f32 %v8241_v20, %v8210_v52 }
0x1179   :  { %v9569_v7 = vpop.eup %9568 }
0x117a   :  { %v8266_v34 = vmul.f32 0.5, %v8242_v46  ;;  %v8264_v21 = vmul.f32 %v9569_v7, %v8260_v41 }
0x117c   :  { %v8267_v29 = vmul.f32 -100.0, %v8266_v34  ;;  %v8265_v51 = vmul.f32 -100.0, %v8264_v21 }
0x117e   :  { %v8269_v62 = vmul.f32 0.7, %v8267_v29  ;;  %v8268_v15 = vmul.f32 0.3, %v8265_v51 }
0x1180   :  { %v8270_v56 = vadd.f32 %v8269_v62, %v8268_v15 }
0x1182   :  { %8273 = vperm.xlu0 %9298, %v8270_v56  }
0x1201   :  { %v8274_v10 = vpop.permute.xlu0 %8273 }
0x1202   :  { %v8278_v14 = vrot.slane %v8274_v10, %v8215_v23 }
0x1204   :  { %8661 = vst.msk [vmem:[%s15386_s9 + $0x3] ss:$4 sm:$0x3] %vm8282_vm0, %v8278_v14 }

</bundles_post_ra>
